<compile_context>
chip_gen: v7x
topology: tpu7x:2x2x1
jax: 0.10.0
libtpu: 0.0.40
codegen_flags: <defaults>
</compile_context>

<pallas_src>
import jax
import jax.numpy as jnp
from jax import lax
from jax.experimental import pallas as pl
from jax.experimental.pallas import tpu as pltpu


def unet_fused_kernel(x_ref, w1_ref, b1_ref, w2_ref, b2_ref, o_ref,
                      xpad_ref, midpad_ref):
    """Fused UNetModule forward for a block of Nb images.

    x_ref     : (Nb, Cin, H, W)     f32   NCHW input block (cast in-kernel)
    w1_ref    : (9, Cout, Cin)      bf16  layer-1 weights, tap-major (dy*3+dx)
    b1_ref    : (Cout, 1)           f32
    w2_ref    : (9, Cout, Cout)     bf16  layer-2 weights
    b2_ref    : (Cout, 1)           f32
    o_ref     : (Nb, Cout, H*W)     f32   lane-dense output block
    xpad_ref  : VMEM (Cin,  H+2, W+2) bf16  zero-halo scratch (layer-1 input)
    midpad_ref: VMEM (Cout, H+2, W+2) bf16  zero-halo scratch (layer-1 output)
    """
    Nb, Cin, H, W = x_ref.shape
    Cout = o_ref.shape[1]
    HW = H * W

    def zero_halo(ref):
        c, hp, wp = ref.shape
        ref[:, 0:1, :] = jnp.zeros((c, 1, wp), ref.dtype)
        ref[:, hp - 1:hp, :] = jnp.zeros((c, 1, wp), ref.dtype)
        ref[:, :, 0:1] = jnp.zeros((c, hp, 1), ref.dtype)
        ref[:, :, wp - 1:wp] = jnp.zeros((c, hp, 1), ref.dtype)

    def conv3x3_relu(pad_ref, w_ref, b_ref, cin):
        # Lane-dense accumulator: (Cout, H*W) f32 -> 2 dense vregs at Cout=8.
        acc = jnp.zeros((Cout, HW), jnp.float32)
        for dy in range(3):
            for dx in range(3):
                # Read each tap window straight from the padded bf16 ref
                # (never holds the whole padded image in vregs); flatten
                # spatial onto the lane axis and feed the MXU in bf16.
                patch = pad_ref[:, dy:dy + H, dx:dx + W].reshape(cin, HW)
                acc = acc + jnp.dot(w_ref[dy * 3 + dx], patch,
                                    preferred_element_type=jnp.float32)
        acc = acc + b_ref[...]            # (Cout, 1) broadcasts along lanes
        return jnp.maximum(acc, 0.0)      # ReLU, (Cout, HW) f32, lane-dense

    # Halo-only zeroing each step; interiors are fully overwritten below.
    zero_halo(xpad_ref)
    zero_halo(midpad_ref)

    for i in range(Nb):                   # static unroll; scratches are reused
        # ---- layer 1: in-VMEM padding, single f32->bf16 cast at the write ----
        xpad_ref[:, 1:H + 1, 1:W + 1] = x_ref[i].astype(jnp.bfloat16)
        h1 = conv3x3_relu(xpad_ref, w1_ref, b1_ref, Cin)

        # ---- layer 2: intermediate never leaves VMEM; one cast at the write ----
        midpad_ref[:, 1:H + 1, 1:W + 1] = (
            h1.astype(jnp.bfloat16).reshape(Cout, H, W))
        h2 = conv3x3_relu(midpad_ref, w2_ref, b2_ref, Cout)

        o_ref[i] = h2                     # lane-dense (Cout, 256) f32 store


def unet_module_forward(x_nchw, params, images_per_step=1):
    """UNetModule.forward: l1 (conv3x3+ReLU) then l2 (conv3x3+ReLU), fused.

    x_nchw: (N, Cin, H, W) float32 -- PyTorch layout, consumed directly.
    Returns (N, Cout, H, W) float32.
    """
    N, Cin, H, W = x_nchw.shape
    Cout = params["b1"].shape[0]
    Nb = images_per_step
    assert N % Nb == 0, "images_per_step must divide the batch"

    # Tap-major weights: (Cout, Cin, 3, 3) -> (9, Cout, Cin); tap = dy*3 + dx
    # becomes an aligned leading-dim index and each tap is a (Cout, Cin) LHS.
    w1 = jnp.transpose(params["w1"], (2, 3, 0, 1)).reshape(9, Cout, Cin)
    w2 = jnp.transpose(params["w2"], (2, 3, 0, 1)).reshape(9, Cout, Cout)
    w1 = w1.astype(jnp.bfloat16)
    w2 = w2.astype(jnp.bfloat16)
    b1 = params["b1"].reshape(Cout, 1).astype(jnp.float32)
    b2 = params["b2"].reshape(Cout, 1).astype(jnp.float32)

    out_flat = pl.pallas_call(
        unet_fused_kernel,
        out_shape=jax.ShapeDtypeStruct((N, Cout, H * W), jnp.float32),
        grid_spec=pltpu.PrefetchScalarGridSpec(
            num_scalar_prefetch=0,
            grid=(N // Nb,),
            in_specs=[
                pl.BlockSpec((Nb, Cin, H, W), lambda n: (n, 0, 0, 0)),
                pl.BlockSpec((9, Cout, Cin), lambda n: (0, 0, 0)),
                pl.BlockSpec((Cout, 1), lambda n: (0, 0)),
                pl.BlockSpec((9, Cout, Cout), lambda n: (0, 0, 0)),
                pl.BlockSpec((Cout, 1), lambda n: (0, 0)),
            ],
            out_specs=pl.BlockSpec((Nb, Cout, H * W), lambda n: (n, 0, 0)),
            scratch_shapes=[
                pltpu.VMEM((Cin, H + 2, W + 2), jnp.bfloat16),
                pltpu.VMEM((Cout, H + 2, W + 2), jnp.bfloat16),
            ],
        ),
        compiler_params=pltpu.CompilerParams(
            dimension_semantics=("parallel",),
            # Conservative cap that fits every generation; raise (with bigger
            # spatial/batch blocks) on v6e's 128 MiB, keep <=48 MiB on v7x.
            vmem_limit_bytes=32 * 1024 * 1024,
        ),
    )(x_nchw, w1, b1, w2, b2)

    # (N, Cout, H*W) -> (N, Cout, H, W): pure reshape, no transpose / copy.
    return out_flat.reshape(N, Cout, H, W)


def init_params(key, c_in, c_out):
    """Deterministic synthetic parameters in PyTorch layout (Cout, Cin, 3, 3)."""
    k1, k2, k3, k4 = jax.random.split(key, 4)
    return {
        "w1": jax.random.normal(k1, (c_out, c_in, 3, 3), jnp.float32) * 0.1,
        "b1": jax.random.normal(k3, (c_out,), jnp.float32) * 0.1,
        "w2": jax.random.normal(k2, (c_out, c_out, 3, 3), jnp.float32) * 0.1,
        "b2": jax.random.normal(k4, (c_out,), jnp.float32) * 0.1,
    }


def _reference_forward(x_nchw, params, match_kernel_precision=False):
    """Pure-JAX reference (lax.conv).

    match_kernel_precision=True rounds conv inputs/weights to bf16 (as the
    kernel's MXU path and bf16 intermediate scratch do) so the comparison
    tolerance can stay tight.
    """
    def maybe_bf16(a):
        if match_kernel_precision:
            return a.astype(jnp.bfloat16).astype(jnp.float32)
        return a

    def conv(x, w_oihw, b):
        y = lax.conv_general_dilated(
            maybe_bf16(x), maybe_bf16(w_oihw), window_strides=(1, 1),
            padding=((1, 1), (1, 1)),
            dimension_numbers=("NCHW", "OIHW", "NCHW"),
            precision=lax.Precision.HIGHEST)
        return jax.nn.relu(y + b[None, :, None, None])

    x = conv(x_nchw, params["w1"], params["b1"])
    x = conv(x, params["w2"], params["b2"])
    return x


if __name__ == "__main__":
    key = jax.random.PRNGKey(0)
    k_x, k_p = jax.random.split(key)

    N, C_IN, C_OUT, H, W = 2, 4, 8, 16, 16
    x = jax.random.normal(k_x, (N, C_IN, H, W), jnp.float32)
    params = init_params(k_p, C_IN, C_OUT)

    out = jax.block_until_ready(unet_module_forward(x, params))
    assert out.shape == (N, C_OUT, H, W)

    # Tight check vs. a reference matching the kernel's bf16 MXU / bf16
    # intermediate rounding, plus a loose sanity check vs. pure-f32.
    ref_matched = _reference_forward(x, params, match_kernel_precision=True)
    ref_f32 = _reference_forward(x, params, match_kernel_precision=False)
    assert jnp.allclose(out, ref_matched, atol=1e-2, rtol=1e-2), \
        "mismatch vs precision-matched reference"
    assert jnp.allclose(out, ref_f32, atol=1e-1, rtol=1e-1), \
        "mismatch vs f32 reference"

    print("KERNEL_OK")
</pallas_src>

<mosaic_0001>
module attributes {stable_mosaic.version = 11 : i64} {
  func.func @unet_fused_kernel(%arg0: i32, %arg1: memref<1x4x16x16xf32, #tpu.memory_space<vmem>>, %arg2: memref<9x8x4xbf16, #tpu.memory_space<vmem>>, %arg3: memref<8x1xf32, #tpu.memory_space<vmem>>, %arg4: memref<9x8x8xbf16, #tpu.memory_space<vmem>>, %arg5: memref<8x1xf32, #tpu.memory_space<vmem>>, %arg6: memref<1x8x256xf32, #tpu.memory_space<vmem>>, %arg7: memref<4x18x18xbf16, #tpu.memory_space<vmem>>, %arg8: memref<8x18x18xbf16, #tpu.memory_space<vmem>>) attributes {dimension_semantics = [#tpu.dimension_semantics<parallel>], iteration_bounds = array<i64: 2>, scalar_prefetch = 0 : i64, scratch_operands = 2 : i64, tpu.core_type = #tpu.core_type<tc>, window_params = [{transform_indices = @transform_0, window_bounds = array<i64: 1, 4, 16, 16>}, {pipeline_mode = #tpu.pipeline_mode<synchronous>, transform_indices = @transform_1, window_bounds = array<i64: 9, 8, 4>}, {pipeline_mode = #tpu.pipeline_mode<synchronous>, transform_indices = @transform_2, window_bounds = array<i64: 8, 1>}, {pipeline_mode = #tpu.pipeline_mode<synchronous>, transform_indices = @transform_3, window_bounds = array<i64: 9, 8, 8>}, {pipeline_mode = #tpu.pipeline_mode<synchronous>, transform_indices = @transform_4, window_bounds = array<i64: 8, 1>}, {transform_indices = @transform_5, window_bounds = array<i64: 1, 8, 256>}]} {
    %cst = arith.constant 0.000000e+00 : bf16
    %0 = vector.broadcast %cst : bf16 to vector<4x1x18xbf16>
    %c0 = arith.constant 0 : index
    %c0_0 = arith.constant 0 : index
    %c0_1 = arith.constant 0 : index
    %1 = vector.load %arg7[%c0, %c0_0, %c0_1] : memref<4x18x18xbf16, #tpu.memory_space<vmem>>, vector<4x1x18xbf16>
    tpu.vector_store %arg7[%c0, %c0_0, %c0_1], %0 {strides = array<i32>} : memref<4x18x18xbf16, #tpu.memory_space<vmem>>, vector<4x1x18xbf16>,
    %cst_2 = arith.constant 0.000000e+00 : bf16
    %2 = vector.broadcast %cst_2 : bf16 to vector<4x1x18xbf16>
    %c0_3 = arith.constant 0 : index
    %c17 = arith.constant 17 : index
    %c0_4 = arith.constant 0 : index
    %3 = vector.load %arg7[%c0_3, %c17, %c0_4] : memref<4x18x18xbf16, #tpu.memory_space<vmem>>, vector<4x1x18xbf16>
    tpu.vector_store %arg7[%c0_3, %c17, %c0_4], %2 {strides = array<i32>} : memref<4x18x18xbf16, #tpu.memory_space<vmem>>, vector<4x1x18xbf16>,
    %cst_5 = arith.constant 0.000000e+00 : bf16
    %4 = vector.broadcast %cst_5 : bf16 to vector<4x18x1xbf16>
    %c0_6 = arith.constant 0 : index
    %c0_7 = arith.constant 0 : index
    %c0_8 = arith.constant 0 : index
    %5 = vector.load %arg7[%c0_6, %c0_7, %c0_8] : memref<4x18x18xbf16, #tpu.memory_space<vmem>>, vector<4x18x1xbf16>
    tpu.vector_store %arg7[%c0_6, %c0_7, %c0_8], %4 {strides = array<i32>} : memref<4x18x18xbf16, #tpu.memory_space<vmem>>, vector<4x18x1xbf16>,
    %cst_9 = arith.constant 0.000000e+00 : bf16
    %6 = vector.broadcast %cst_9 : bf16 to vector<4x18x1xbf16>
    %c0_10 = arith.constant 0 : index
    %c0_11 = arith.constant 0 : index
    %c17_12 = arith.constant 17 : index
    %7 = vector.load %arg7[%c0_10, %c0_11, %c17_12] : memref<4x18x18xbf16, #tpu.memory_space<vmem>>, vector<4x18x1xbf16>
    tpu.vector_store %arg7[%c0_10, %c0_11, %c17_12], %6 {strides = array<i32>} : memref<4x18x18xbf16, #tpu.memory_space<vmem>>, vector<4x18x1xbf16>,
    %cst_13 = arith.constant 0.000000e+00 : bf16
    %8 = vector.broadcast %cst_13 : bf16 to vector<8x1x18xbf16>
    %c0_14 = arith.constant 0 : index
    %c0_15 = arith.constant 0 : index
    %c0_16 = arith.constant 0 : index
    %9 = vector.load %arg8[%c0_14, %c0_15, %c0_16] : memref<8x18x18xbf16, #tpu.memory_space<vmem>>, vector<8x1x18xbf16>
    tpu.vector_store %arg8[%c0_14, %c0_15, %c0_16], %8 {strides = array<i32>} : memref<8x18x18xbf16, #tpu.memory_space<vmem>>, vector<8x1x18xbf16>,
    %cst_17 = arith.constant 0.000000e+00 : bf16
    %10 = vector.broadcast %cst_17 : bf16 to vector<8x1x18xbf16>
    %c0_18 = arith.constant 0 : index
    %c17_19 = arith.constant 17 : index
    %c0_20 = arith.constant 0 : index
    %11 = vector.load %arg8[%c0_18, %c17_19, %c0_20] : memref<8x18x18xbf16, #tpu.memory_space<vmem>>, vector<8x1x18xbf16>
    tpu.vector_store %arg8[%c0_18, %c17_19, %c0_20], %10 {strides = array<i32>} : memref<8x18x18xbf16, #tpu.memory_space<vmem>>, vector<8x1x18xbf16>,
    %cst_21 = arith.constant 0.000000e+00 : bf16
    %12 = vector.broadcast %cst_21 : bf16 to vector<8x18x1xbf16>
    %c0_22 = arith.constant 0 : index
    %c0_23 = arith.constant 0 : index
    %c0_24 = arith.constant 0 : index
    %13 = vector.load %arg8[%c0_22, %c0_23, %c0_24] : memref<8x18x18xbf16, #tpu.memory_space<vmem>>, vector<8x18x1xbf16>
    tpu.vector_store %arg8[%c0_22, %c0_23, %c0_24], %12 {strides = array<i32>} : memref<8x18x18xbf16, #tpu.memory_space<vmem>>, vector<8x18x1xbf16>,
    %cst_25 = arith.constant 0.000000e+00 : bf16
    %14 = vector.broadcast %cst_25 : bf16 to vector<8x18x1xbf16>
    %c0_26 = arith.constant 0 : index
    %c0_27 = arith.constant 0 : index
    %c17_28 = arith.constant 17 : index
    %15 = vector.load %arg8[%c0_26, %c0_27, %c17_28] : memref<8x18x18xbf16, #tpu.memory_space<vmem>>, vector<8x18x1xbf16>
    tpu.vector_store %arg8[%c0_26, %c0_27, %c17_28], %14 {strides = array<i32>} : memref<8x18x18xbf16, #tpu.memory_space<vmem>>, vector<8x18x1xbf16>,
    %c0_29 = arith.constant 0 : index
    %c0_30 = arith.constant 0 : index
    %c0_31 = arith.constant 0 : index
    %c0_32 = arith.constant 0 : index
    %16 = vector.load %arg1[%c0_29, %c0_30, %c0_31, %c0_32] : memref<1x4x16x16xf32, #tpu.memory_space<vmem>>, vector<1x4x16x16xf32>
    %17 = vector.shape_cast %16 : vector<1x4x16x16xf32> to vector<4x16x16xf32>
    %18 = arith.truncf %17 : vector<4x16x16xf32> to vector<4x16x16xbf16>
    %c0_33 = arith.constant 0 : index
    %c1 = arith.constant 1 : index
    %c1_34 = arith.constant 1 : index
    %19 = vector.load %arg7[%c0_33, %c1, %c1_34] : memref<4x18x18xbf16, #tpu.memory_space<vmem>>, vector<4x16x16xbf16>
    tpu.vector_store %arg7[%c0_33, %c1, %c1_34], %18 {strides = array<i32>} : memref<4x18x18xbf16, #tpu.memory_space<vmem>>, vector<4x16x16xbf16>,
    %cst_35 = arith.constant 0.000000e+00 : f32
    %20 = vector.broadcast %cst_35 : f32 to vector<8x256xf32>
    %c0_36 = arith.constant 0 : index
    %c0_37 = arith.constant 0 : index
    %c0_38 = arith.constant 0 : index
    %21 = vector.load %arg7[%c0_36, %c0_37, %c0_38] : memref<4x18x18xbf16, #tpu.memory_space<vmem>>, vector<4x16x16xbf16>
    %22 = vector.shape_cast %21 : vector<4x16x16xbf16> to vector<4x256xbf16>
    %c0_39 = arith.constant 0 : index
    %c0_40 = arith.constant 0 : index
    %c0_41 = arith.constant 0 : index
    %23 = vector.load %arg2[%c0_39, %c0_40, %c0_41] : memref<9x8x4xbf16, #tpu.memory_space<vmem>>, vector<1x8x4xbf16>
    %24 = vector.shape_cast %23 : vector<1x8x4xbf16> to vector<8x4xbf16>
    %cst_42 = arith.constant dense<0.000000e+00> : vector<8x256xf32>
    %25 = tpu.matmul %24, %22, %cst_42 {dimension_numbers = #tpu.dot_dimension_numbers<[1], [0], [0], [1], [0, 0, 1, 1], [], []>} : vector<8x4xbf16>, vector<4x256xbf16>, vector<8x256xf32> -> vector<8x256xf32>
    %26 = arith.addf %20, %25 : vector<8x256xf32>
    %c0_43 = arith.constant 0 : index
    %c0_44 = arith.constant 0 : index
    %c1_45 = arith.constant 1 : index
    %27 = vector.load %arg7[%c0_43, %c0_44, %c1_45] : memref<4x18x18xbf16, #tpu.memory_space<vmem>>, vector<4x16x16xbf16>
    %28 = vector.shape_cast %27 : vector<4x16x16xbf16> to vector<4x256xbf16>
    %c1_46 = arith.constant 1 : index
    %c0_47 = arith.constant 0 : index
    %c0_48 = arith.constant 0 : index
    %29 = vector.load %arg2[%c1_46, %c0_47, %c0_48] : memref<9x8x4xbf16, #tpu.memory_space<vmem>>, vector<1x8x4xbf16>
    %30 = vector.shape_cast %29 : vector<1x8x4xbf16> to vector<8x4xbf16>
    %cst_49 = arith.constant dense<0.000000e+00> : vector<8x256xf32>
    %31 = tpu.matmul %30, %28, %cst_49 {dimension_numbers = #tpu.dot_dimension_numbers<[1], [0], [0], [1], [0, 0, 1, 1], [], []>} : vector<8x4xbf16>, vector<4x256xbf16>, vector<8x256xf32> -> vector<8x256xf32>
    %32 = arith.addf %26, %31 : vector<8x256xf32>
    %c0_50 = arith.constant 0 : index
    %c0_51 = arith.constant 0 : index
    %c2 = arith.constant 2 : index
    %33 = vector.load %arg7[%c0_50, %c0_51, %c2] : memref<4x18x18xbf16, #tpu.memory_space<vmem>>, vector<4x16x16xbf16>
    %34 = vector.shape_cast %33 : vector<4x16x16xbf16> to vector<4x256xbf16>
    %c2_52 = arith.constant 2 : index
    %c0_53 = arith.constant 0 : index
    %c0_54 = arith.constant 0 : index
    %35 = vector.load %arg2[%c2_52, %c0_53, %c0_54] : memref<9x8x4xbf16, #tpu.memory_space<vmem>>, vector<1x8x4xbf16>
    %36 = vector.shape_cast %35 : vector<1x8x4xbf16> to vector<8x4xbf16>
    %cst_55 = arith.constant dense<0.000000e+00> : vector<8x256xf32>
    %37 = tpu.matmul %36, %34, %cst_55 {dimension_numbers = #tpu.dot_dimension_numbers<[1], [0], [0], [1], [0, 0, 1, 1], [], []>} : vector<8x4xbf16>, vector<4x256xbf16>, vector<8x256xf32> -> vector<8x256xf32>
    %38 = arith.addf %32, %37 : vector<8x256xf32>
    %c0_56 = arith.constant 0 : index
    %c1_57 = arith.constant 1 : index
    %c0_58 = arith.constant 0 : index
    %39 = vector.load %arg7[%c0_56, %c1_57, %c0_58] : memref<4x18x18xbf16, #tpu.memory_space<vmem>>, vector<4x16x16xbf16>
    %40 = vector.shape_cast %39 : vector<4x16x16xbf16> to vector<4x256xbf16>
    %c3 = arith.constant 3 : index
    %c0_59 = arith.constant 0 : index
    %c0_60 = arith.constant 0 : index
    %41 = vector.load %arg2[%c3, %c0_59, %c0_60] : memref<9x8x4xbf16, #tpu.memory_space<vmem>>, vector<1x8x4xbf16>
    %42 = vector.shape_cast %41 : vector<1x8x4xbf16> to vector<8x4xbf16>
    %cst_61 = arith.constant dense<0.000000e+00> : vector<8x256xf32>
    %43 = tpu.matmul %42, %40, %cst_61 {dimension_numbers = #tpu.dot_dimension_numbers<[1], [0], [0], [1], [0, 0, 1, 1], [], []>} : vector<8x4xbf16>, vector<4x256xbf16>, vector<8x256xf32> -> vector<8x256xf32>
    %44 = arith.addf %38, %43 : vector<8x256xf32>
    %c0_62 = arith.constant 0 : index
    %c1_63 = arith.constant 1 : index
    %c1_64 = arith.constant 1 : index
    %45 = vector.load %arg7[%c0_62, %c1_63, %c1_64] : memref<4x18x18xbf16, #tpu.memory_space<vmem>>, vector<4x16x16xbf16>
    %46 = vector.shape_cast %45 : vector<4x16x16xbf16> to vector<4x256xbf16>
    %c4 = arith.constant 4 : index
    %c0_65 = arith.constant 0 : index
    %c0_66 = arith.constant 0 : index
    %47 = vector.load %arg2[%c4, %c0_65, %c0_66] : memref<9x8x4xbf16, #tpu.memory_space<vmem>>, vector<1x8x4xbf16>
    %48 = vector.shape_cast %47 : vector<1x8x4xbf16> to vector<8x4xbf16>
    %cst_67 = arith.constant dense<0.000000e+00> : vector<8x256xf32>
    %49 = tpu.matmul %48, %46, %cst_67 {dimension_numbers = #tpu.dot_dimension_numbers<[1], [0], [0], [1], [0, 0, 1, 1], [], []>} : vector<8x4xbf16>, vector<4x256xbf16>, vector<8x256xf32> -> vector<8x256xf32>
    %50 = arith.addf %44, %49 : vector<8x256xf32>
    %c0_68 = arith.constant 0 : index
    %c1_69 = arith.constant 1 : index
    %c2_70 = arith.constant 2 : index
    %51 = vector.load %arg7[%c0_68, %c1_69, %c2_70] : memref<4x18x18xbf16, #tpu.memory_space<vmem>>, vector<4x16x16xbf16>
    %52 = vector.shape_cast %51 : vector<4x16x16xbf16> to vector<4x256xbf16>
    %c5 = arith.constant 5 : index
    %c0_71 = arith.constant 0 : index
    %c0_72 = arith.constant 0 : index
    %53 = vector.load %arg2[%c5, %c0_71, %c0_72] : memref<9x8x4xbf16, #tpu.memory_space<vmem>>, vector<1x8x4xbf16>
    %54 = vector.shape_cast %53 : vector<1x8x4xbf16> to vector<8x4xbf16>
    %cst_73 = arith.constant dense<0.000000e+00> : vector<8x256xf32>
    %55 = tpu.matmul %54, %52, %cst_73 {dimension_numbers = #tpu.dot_dimension_numbers<[1], [0], [0], [1], [0, 0, 1, 1], [], []>} : vector<8x4xbf16>, vector<4x256xbf16>, vector<8x256xf32> -> vector<8x256xf32>
    %56 = arith.addf %50, %55 : vector<8x256xf32>
    %c0_74 = arith.constant 0 : index
    %c2_75 = arith.constant 2 : index
    %c0_76 = arith.constant 0 : index
    %57 = vector.load %arg7[%c0_74, %c2_75, %c0_76] : memref<4x18x18xbf16, #tpu.memory_space<vmem>>, vector<4x16x16xbf16>
    %58 = vector.shape_cast %57 : vector<4x16x16xbf16> to vector<4x256xbf16>
    %c6 = arith.constant 6 : index
    %c0_77 = arith.constant 0 : index
    %c0_78 = arith.constant 0 : index
    %59 = vector.load %arg2[%c6, %c0_77, %c0_78] : memref<9x8x4xbf16, #tpu.memory_space<vmem>>, vector<1x8x4xbf16>
    %60 = vector.shape_cast %59 : vector<1x8x4xbf16> to vector<8x4xbf16>
    %cst_79 = arith.constant dense<0.000000e+00> : vector<8x256xf32>
    %61 = tpu.matmul %60, %58, %cst_79 {dimension_numbers = #tpu.dot_dimension_numbers<[1], [0], [0], [1], [0, 0, 1, 1], [], []>} : vector<8x4xbf16>, vector<4x256xbf16>, vector<8x256xf32> -> vector<8x256xf32>
    %62 = arith.addf %56, %61 : vector<8x256xf32>
    %c0_80 = arith.constant 0 : index
    %c2_81 = arith.constant 2 : index
    %c1_82 = arith.constant 1 : index
    %63 = vector.load %arg7[%c0_80, %c2_81, %c1_82] : memref<4x18x18xbf16, #tpu.memory_space<vmem>>, vector<4x16x16xbf16>
    %64 = vector.shape_cast %63 : vector<4x16x16xbf16> to vector<4x256xbf16>
    %c7 = arith.constant 7 : index
    %c0_83 = arith.constant 0 : index
    %c0_84 = arith.constant 0 : index
    %65 = vector.load %arg2[%c7, %c0_83, %c0_84] : memref<9x8x4xbf16, #tpu.memory_space<vmem>>, vector<1x8x4xbf16>
    %66 = vector.shape_cast %65 : vector<1x8x4xbf16> to vector<8x4xbf16>
    %cst_85 = arith.constant dense<0.000000e+00> : vector<8x256xf32>
    %67 = tpu.matmul %66, %64, %cst_85 {dimension_numbers = #tpu.dot_dimension_numbers<[1], [0], [0], [1], [0, 0, 1, 1], [], []>} : vector<8x4xbf16>, vector<4x256xbf16>, vector<8x256xf32> -> vector<8x256xf32>
    %68 = arith.addf %62, %67 : vector<8x256xf32>
    %c0_86 = arith.constant 0 : index
    %c2_87 = arith.constant 2 : index
    %c2_88 = arith.constant 2 : index
    %69 = vector.load %arg7[%c0_86, %c2_87, %c2_88] : memref<4x18x18xbf16, #tpu.memory_space<vmem>>, vector<4x16x16xbf16>
    %70 = vector.shape_cast %69 : vector<4x16x16xbf16> to vector<4x256xbf16>
    %c8 = arith.constant 8 : index
    %c0_89 = arith.constant 0 : index
    %c0_90 = arith.constant 0 : index
    %71 = vector.load %arg2[%c8, %c0_89, %c0_90] : memref<9x8x4xbf16, #tpu.memory_space<vmem>>, vector<1x8x4xbf16>
    %72 = vector.shape_cast %71 : vector<1x8x4xbf16> to vector<8x4xbf16>
    %cst_91 = arith.constant dense<0.000000e+00> : vector<8x256xf32>
    %73 = tpu.matmul %72, %70, %cst_91 {dimension_numbers = #tpu.dot_dimension_numbers<[1], [0], [0], [1], [0, 0, 1, 1], [], []>} : vector<8x4xbf16>, vector<4x256xbf16>, vector<8x256xf32> -> vector<8x256xf32>
    %74 = arith.addf %68, %73 : vector<8x256xf32>
    %c0_92 = arith.constant 0 : index
    %c0_93 = arith.constant 0 : index
    %75 = vector.load %arg3[%c0_92, %c0_93] : memref<8x1xf32, #tpu.memory_space<vmem>>, vector<8x1xf32>
    %76 = vector.broadcast %75 : vector<8x1xf32> to vector<8x256xf32>
    %77 = arith.addf %74, %76 : vector<8x256xf32>
    %cst_94 = arith.constant 0.000000e+00 : f32
    %78 = vector.broadcast %cst_94 : f32 to vector<8x256xf32>
    %79 = arith.maximumf %77, %78 : vector<8x256xf32>
    %80 = arith.truncf %79 : vector<8x256xf32> to vector<8x256xbf16>
    %81 = vector.shape_cast %80 : vector<8x256xbf16> to vector<8x16x16xbf16>
    %c0_95 = arith.constant 0 : index
    %c1_96 = arith.constant 1 : index
    %c1_97 = arith.constant 1 : index
    %82 = vector.load %arg8[%c0_95, %c1_96, %c1_97] : memref<8x18x18xbf16, #tpu.memory_space<vmem>>, vector<8x16x16xbf16>
    tpu.vector_store %arg8[%c0_95, %c1_96, %c1_97], %81 {strides = array<i32>} : memref<8x18x18xbf16, #tpu.memory_space<vmem>>, vector<8x16x16xbf16>,
    %cst_98 = arith.constant 0.000000e+00 : f32
    %83 = vector.broadcast %cst_98 : f32 to vector<8x256xf32>
    %c0_99 = arith.constant 0 : index
    %c0_100 = arith.constant 0 : index
    %c0_101 = arith.constant 0 : index
    %84 = vector.load %arg8[%c0_99, %c0_100, %c0_101] : memref<8x18x18xbf16, #tpu.memory_space<vmem>>, vector<8x16x16xbf16>
    %85 = vector.shape_cast %84 : vector<8x16x16xbf16> to vector<8x256xbf16>
    %c0_102 = arith.constant 0 : index
    %c0_103 = arith.constant 0 : index
    %c0_104 = arith.constant 0 : index
    %86 = vector.load %arg4[%c0_102, %c0_103, %c0_104] : memref<9x8x8xbf16, #tpu.memory_space<vmem>>, vector<1x8x8xbf16>
    %87 = vector.shape_cast %86 : vector<1x8x8xbf16> to vector<8x8xbf16>
    %cst_105 = arith.constant dense<0.000000e+00> : vector<8x256xf32>
    %88 = tpu.matmul %87, %85, %cst_105 {dimension_numbers = #tpu.dot_dimension_numbers<[1], [0], [0], [1], [0, 0, 1, 1], [], []>} : vector<8x8xbf16>, vector<8x256xbf16>, vector<8x256xf32> -> vector<8x256xf32>
    %89 = arith.addf %83, %88 : vector<8x256xf32>
    %c0_106 = arith.constant 0 : index
    %c0_107 = arith.constant 0 : index
    %c1_108 = arith.constant 1 : index
    %90 = vector.load %arg8[%c0_106, %c0_107, %c1_108] : memref<8x18x18xbf16, #tpu.memory_space<vmem>>, vector<8x16x16xbf16>
    %91 = vector.shape_cast %90 : vector<8x16x16xbf16> to vector<8x256xbf16>
    %c1_109 = arith.constant 1 : index
    %c0_110 = arith.constant 0 : index
    %c0_111 = arith.constant 0 : index
    %92 = vector.load %arg4[%c1_109, %c0_110, %c0_111] : memref<9x8x8xbf16, #tpu.memory_space<vmem>>, vector<1x8x8xbf16>
    %93 = vector.shape_cast %92 : vector<1x8x8xbf16> to vector<8x8xbf16>
    %cst_112 = arith.constant dense<0.000000e+00> : vector<8x256xf32>
    %94 = tpu.matmul %93, %91, %cst_112 {dimension_numbers = #tpu.dot_dimension_numbers<[1], [0], [0], [1], [0, 0, 1, 1], [], []>} : vector<8x8xbf16>, vector<8x256xbf16>, vector<8x256xf32> -> vector<8x256xf32>
    %95 = arith.addf %89, %94 : vector<8x256xf32>
    %c0_113 = arith.constant 0 : index
    %c0_114 = arith.constant 0 : index
    %c2_115 = arith.constant 2 : index
    %96 = vector.load %arg8[%c0_113, %c0_114, %c2_115] : memref<8x18x18xbf16, #tpu.memory_space<vmem>>, vector<8x16x16xbf16>
    %97 = vector.shape_cast %96 : vector<8x16x16xbf16> to vector<8x256xbf16>
    %c2_116 = arith.constant 2 : index
    %c0_117 = arith.constant 0 : index
    %c0_118 = arith.constant 0 : index
    %98 = vector.load %arg4[%c2_116, %c0_117, %c0_118] : memref<9x8x8xbf16, #tpu.memory_space<vmem>>, vector<1x8x8xbf16>
    %99 = vector.shape_cast %98 : vector<1x8x8xbf16> to vector<8x8xbf16>
    %cst_119 = arith.constant dense<0.000000e+00> : vector<8x256xf32>
    %100 = tpu.matmul %99, %97, %cst_119 {dimension_numbers = #tpu.dot_dimension_numbers<[1], [0], [0], [1], [0, 0, 1, 1], [], []>} : vector<8x8xbf16>, vector<8x256xbf16>, vector<8x256xf32> -> vector<8x256xf32>
    %101 = arith.addf %95, %100 : vector<8x256xf32>
    %c0_120 = arith.constant 0 : index
    %c1_121 = arith.constant 1 : index
    %c0_122 = arith.constant 0 : index
    %102 = vector.load %arg8[%c0_120, %c1_121, %c0_122] : memref<8x18x18xbf16, #tpu.memory_space<vmem>>, vector<8x16x16xbf16>
    %103 = vector.shape_cast %102 : vector<8x16x16xbf16> to vector<8x256xbf16>
    %c3_123 = arith.constant 3 : index
    %c0_124 = arith.constant 0 : index
    %c0_125 = arith.constant 0 : index
    %104 = vector.load %arg4[%c3_123, %c0_124, %c0_125] : memref<9x8x8xbf16, #tpu.memory_space<vmem>>, vector<1x8x8xbf16>
    %105 = vector.shape_cast %104 : vector<1x8x8xbf16> to vector<8x8xbf16>
    %cst_126 = arith.constant dense<0.000000e+00> : vector<8x256xf32>
    %106 = tpu.matmul %105, %103, %cst_126 {dimension_numbers = #tpu.dot_dimension_numbers<[1], [0], [0], [1], [0, 0, 1, 1], [], []>} : vector<8x8xbf16>, vector<8x256xbf16>, vector<8x256xf32> -> vector<8x256xf32>
    %107 = arith.addf %101, %106 : vector<8x256xf32>
    %c0_127 = arith.constant 0 : index
    %c1_128 = arith.constant 1 : index
    %c1_129 = arith.constant 1 : index
    %108 = vector.load %arg8[%c0_127, %c1_128, %c1_129] : memref<8x18x18xbf16, #tpu.memory_space<vmem>>, vector<8x16x16xbf16>
    %109 = vector.shape_cast %108 : vector<8x16x16xbf16> to vector<8x256xbf16>
    %c4_130 = arith.constant 4 : index
    %c0_131 = arith.constant 0 : index
    %c0_132 = arith.constant 0 : index
    %110 = vector.load %arg4[%c4_130, %c0_131, %c0_132] : memref<9x8x8xbf16, #tpu.memory_space<vmem>>, vector<1x8x8xbf16>
    %111 = vector.shape_cast %110 : vector<1x8x8xbf16> to vector<8x8xbf16>
    %cst_133 = arith.constant dense<0.000000e+00> : vector<8x256xf32>
    %112 = tpu.matmul %111, %109, %cst_133 {dimension_numbers = #tpu.dot_dimension_numbers<[1], [0], [0], [1], [0, 0, 1, 1], [], []>} : vector<8x8xbf16>, vector<8x256xbf16>, vector<8x256xf32> -> vector<8x256xf32>
    %113 = arith.addf %107, %112 : vector<8x256xf32>
    %c0_134 = arith.constant 0 : index
    %c1_135 = arith.constant 1 : index
    %c2_136 = arith.constant 2 : index
    %114 = vector.load %arg8[%c0_134, %c1_135, %c2_136] : memref<8x18x18xbf16, #tpu.memory_space<vmem>>, vector<8x16x16xbf16>
    %115 = vector.shape_cast %114 : vector<8x16x16xbf16> to vector<8x256xbf16>
    %c5_137 = arith.constant 5 : index
    %c0_138 = arith.constant 0 : index
    %c0_139 = arith.constant 0 : index
    %116 = vector.load %arg4[%c5_137, %c0_138, %c0_139] : memref<9x8x8xbf16, #tpu.memory_space<vmem>>, vector<1x8x8xbf16>
    %117 = vector.shape_cast %116 : vector<1x8x8xbf16> to vector<8x8xbf16>
    %cst_140 = arith.constant dense<0.000000e+00> : vector<8x256xf32>
    %118 = tpu.matmul %117, %115, %cst_140 {dimension_numbers = #tpu.dot_dimension_numbers<[1], [0], [0], [1], [0, 0, 1, 1], [], []>} : vector<8x8xbf16>, vector<8x256xbf16>, vector<8x256xf32> -> vector<8x256xf32>
    %119 = arith.addf %113, %118 : vector<8x256xf32>
    %c0_141 = arith.constant 0 : index
    %c2_142 = arith.constant 2 : index
    %c0_143 = arith.constant 0 : index
    %120 = vector.load %arg8[%c0_141, %c2_142, %c0_143] : memref<8x18x18xbf16, #tpu.memory_space<vmem>>, vector<8x16x16xbf16>
    %121 = vector.shape_cast %120 : vector<8x16x16xbf16> to vector<8x256xbf16>
    %c6_144 = arith.constant 6 : index
    %c0_145 = arith.constant 0 : index
    %c0_146 = arith.constant 0 : index
    %122 = vector.load %arg4[%c6_144, %c0_145, %c0_146] : memref<9x8x8xbf16, #tpu.memory_space<vmem>>, vector<1x8x8xbf16>
    %123 = vector.shape_cast %122 : vector<1x8x8xbf16> to vector<8x8xbf16>
    %cst_147 = arith.constant dense<0.000000e+00> : vector<8x256xf32>
    %124 = tpu.matmul %123, %121, %cst_147 {dimension_numbers = #tpu.dot_dimension_numbers<[1], [0], [0], [1], [0, 0, 1, 1], [], []>} : vector<8x8xbf16>, vector<8x256xbf16>, vector<8x256xf32> -> vector<8x256xf32>
    %125 = arith.addf %119, %124 : vector<8x256xf32>
    %c0_148 = arith.constant 0 : index
    %c2_149 = arith.constant 2 : index
    %c1_150 = arith.constant 1 : index
    %126 = vector.load %arg8[%c0_148, %c2_149, %c1_150] : memref<8x18x18xbf16, #tpu.memory_space<vmem>>, vector<8x16x16xbf16>
    %127 = vector.shape_cast %126 : vector<8x16x16xbf16> to vector<8x256xbf16>
    %c7_151 = arith.constant 7 : index
    %c0_152 = arith.constant 0 : index
    %c0_153 = arith.constant 0 : index
    %128 = vector.load %arg4[%c7_151, %c0_152, %c0_153] : memref<9x8x8xbf16, #tpu.memory_space<vmem>>, vector<1x8x8xbf16>
    %129 = vector.shape_cast %128 : vector<1x8x8xbf16> to vector<8x8xbf16>
    %cst_154 = arith.constant dense<0.000000e+00> : vector<8x256xf32>
    %130 = tpu.matmul %129, %127, %cst_154 {dimension_numbers = #tpu.dot_dimension_numbers<[1], [0], [0], [1], [0, 0, 1, 1], [], []>} : vector<8x8xbf16>, vector<8x256xbf16>, vector<8x256xf32> -> vector<8x256xf32>
    %131 = arith.addf %125, %130 : vector<8x256xf32>
    %c0_155 = arith.constant 0 : index
    %c2_156 = arith.constant 2 : index
    %c2_157 = arith.constant 2 : index
    %132 = vector.load %arg8[%c0_155, %c2_156, %c2_157] : memref<8x18x18xbf16, #tpu.memory_space<vmem>>, vector<8x16x16xbf16>
    %133 = vector.shape_cast %132 : vector<8x16x16xbf16> to vector<8x256xbf16>
    %c8_158 = arith.constant 8 : index
    %c0_159 = arith.constant 0 : index
    %c0_160 = arith.constant 0 : index
    %134 = vector.load %arg4[%c8_158, %c0_159, %c0_160] : memref<9x8x8xbf16, #tpu.memory_space<vmem>>, vector<1x8x8xbf16>
    %135 = vector.shape_cast %134 : vector<1x8x8xbf16> to vector<8x8xbf16>
    %cst_161 = arith.constant dense<0.000000e+00> : vector<8x256xf32>
    %136 = tpu.matmul %135, %133, %cst_161 {dimension_numbers = #tpu.dot_dimension_numbers<[1], [0], [0], [1], [0, 0, 1, 1], [], []>} : vector<8x8xbf16>, vector<8x256xbf16>, vector<8x256xf32> -> vector<8x256xf32>
    %137 = arith.addf %131, %136 : vector<8x256xf32>
    %c0_162 = arith.constant 0 : index
    %c0_163 = arith.constant 0 : index
    %138 = vector.load %arg5[%c0_162, %c0_163] : memref<8x1xf32, #tpu.memory_space<vmem>>, vector<8x1xf32>
    %139 = vector.broadcast %138 : vector<8x1xf32> to vector<8x256xf32>
    %140 = arith.addf %137, %139 : vector<8x256xf32>
    %cst_164 = arith.constant 0.000000e+00 : f32
    %141 = vector.broadcast %cst_164 : f32 to vector<8x256xf32>
    %142 = arith.maximumf %140, %141 : vector<8x256xf32>
    %c0_165 = arith.constant 0 : index
    %c0_166 = arith.constant 0 : index
    %c0_167 = arith.constant 0 : index
    %143 = vector.load %arg6[%c0_165, %c0_166, %c0_167] : memref<1x8x256xf32, #tpu.memory_space<vmem>>, vector<1x8x256xf32>
    %144 = vector.shape_cast %143 : vector<1x8x256xf32> to vector<8x256xf32>
    %145 = vector.shape_cast %142 : vector<8x256xf32> to vector<1x8x256xf32>
    tpu.vector_store %arg6[%c0_165, %c0_166, %c0_167], %145 {strides = array<i32>} : memref<1x8x256xf32, #tpu.memory_space<vmem>>, vector<1x8x256xf32>,
    return
  }
  func.func @transform_0(%arg0: i32) -> (i32, i32, i32, i32) {
    %c0_i32 = arith.constant 0 : i32
    %c0_i32_0 = arith.constant 0 : i32
    %c0_i32_1 = arith.constant 0 : i32
    %c0_i32_2 = arith.constant 0 : i32
    return %arg0, %c0_i32, %c0_i32_0, %c0_i32_1 : i32, i32, i32, i32
  }
  func.func @transform_1(%arg0: i32) -> (i32, i32, i32) {
    %c0_i32 = arith.constant 0 : i32
    %c0_i32_0 = arith.constant 0 : i32
    %c0_i32_1 = arith.constant 0 : i32
    %c0_i32_2 = arith.constant 0 : i32
    return %c0_i32, %c0_i32_0, %c0_i32_1 : i32, i32, i32
  }
  func.func @transform_2(%arg0: i32) -> (i32, i32) {
    %c0_i32 = arith.constant 0 : i32
    %c0_i32_0 = arith.constant 0 : i32
    %c0_i32_1 = arith.constant 0 : i32
    return %c0_i32, %c0_i32_0 : i32, i32
  }
  func.func @transform_3(%arg0: i32) -> (i32, i32, i32) {
    %c0_i32 = arith.constant 0 : i32
    %c0_i32_0 = arith.constant 0 : i32
    %c0_i32_1 = arith.constant 0 : i32
    %c0_i32_2 = arith.constant 0 : i32
    return %c0_i32, %c0_i32_0, %c0_i32_1 : i32, i32, i32
  }
  func.func @transform_4(%arg0: i32) -> (i32, i32) {
    %c0_i32 = arith.constant 0 : i32
    %c0_i32_0 = arith.constant 0 : i32
    %c0_i32_1 = arith.constant 0 : i32
    return %c0_i32, %c0_i32_0 : i32, i32
  }
  func.func @transform_5(%arg0: i32) -> (i32, i32, i32) {
    %c0_i32 = arith.constant 0 : i32
    %c0_i32_0 = arith.constant 0 : i32
    %c0_i32_1 = arith.constant 0 : i32
    return %arg0, %c0_i32, %c0_i32_0 : i32, i32, i32
  }
}

</mosaic_0001>

<bundles_post_ra>
// kernel: tpu_custom_call.1
= control target key start
LH: loop header
LB: loop body
LE: loop exit
PB: predicated region body
PF: predicated region fallthrough
CT: control target
= control target key end

     0   :  { %10 = vsyncpa [#allocation5], 0  ;;  %s14439_s0 = inlined_call_operand.vmem [shape: f32[2,4,16,16], index: 0, kind: input, shape index: {}]   ;;  %s14440_s1 = inlined_call_operand.vmem [shape: bf16[9,8,4], index: 1, kind: input, shape index: {}]   ;;  %s14441_s2 = inlined_call_operand.vmem [shape: f32[8,1], index: 2, kind: input, shape index: {}]   ;;  %s14442_s3 = inlined_call_operand.vmem [shape: bf16[9,8,8], index: 3, kind: input, shape index: {}]   ;;  %s14443_s4 = inlined_call_operand.vmem [shape: f32[8,1], index: 4, kind: input, shape index: {}]   ;;  %s14444_s5 = inlined_call_operand.hbm [shape: f32[2,8,256], index: 5, kind: output, shape index: {}]  }
   0x1   :  { %12 = vsyncpa [#allocation5 + $0x1], 0  ;;  %s9434_s18 = smov 0   ;;  %s9436_s19 = smov 0  }
   0x2   :  { %s9438_s20 = smov 0   ;;  %s9440_s21 = smov 0  }
   0x3 LB: > { %s9455_s22 = sadd.s32 4294967295, %s9388_s21   ;;  %s8811_s23 = sadd.s32 4294967294, %s9388_s21   ;;  %s9388_s21 = sphi %s9440_s21, %s15058_s21   ;;  %s9384_s20 = sphi %s9438_s20, %s15057_s20   ;;  %s9380_s19 = sphi %s9436_s19, %s15056_s19   ;;  %s9376_s18 = sphi %s9434_s18, %s15055_s18  }
   0x4   : > { %s9459_s24 = sadd.s32 1, %s9388_s21   ;;  %s135_s25 = sadd.s32 1, %s9384_s20 }
   0x5   : > { %s132_s26 = ssub.s32 %s9388_s21, %s9459_s24  ;;  %p145_p0 = scmp.ne.s32.totalorder %s9384_s20, %s9380_s19 }
   0x6   : > { %p133_p1 = scmp.eq.s32.totalorder %s132_s26, 0  ;;  %p146_p2 = scmp.eq.s32.totalorder %s9455_s22, 1 }
   0x7   : > { %p151_p3 = scmp.ne.s32.totalorder %s9380_s19, %s9376_s18  ;;  %p152_p4 = scmp.eq.s32.totalorder %s8811_s23, 1 }
   0x8   : > { %s9470_s27 = scalar_select %p133_p1, %s9384_s20, %s135_s25  }
   0x9   : > { %p9472_p5 = por %p146_p2, %p145_p0  ;;  %p9476_p6 = por %p152_p4, %p151_p3 }
   0xa   : > { %p8814_p7 = scmp.ge.s32.totalorder %s9388_s21, 1  ;;  %p190_p8 = scmp.lt.s32.totalorder %s9388_s21, 3 }
   0xc   : > { %p191_p9 = pnand %p8814_p7, %p190_p8 }
   0xe   : > { %194 = sbr.rel (%p191_p9) target bundleno = 1966 (0x7ae), region = 40 }
  0x15   : > { %p218_p10 = scmp.lt.s32.totalorder %s9455_s22, 1  ;;  %vm224_vm0 = vcmask 139264   ;;  %vm225_vm1 = vsmask.f32 256  ;;  %v14541_v0 = vmov 0  ;;  %vm14476_vm4 = vcmask 3072  }
  0x16   : > { %vm9484_vm2 = vmand %vm224_vm0, %vm225_vm1  ;;  %v233_v1 = vld [vmem:[#allocation2 + $0x18] sm:$0x1]  ;;  %vm239_vm3 = vsmask.f32 7938  ;;  %v14544_v3 = vmov 0  ;;  %vm14475_vm6 = vcmask 142472  }
  0x17   : > { %v14542_v0 = vsel %vm9484_vm2, 4294967295, %v14541_v0  ;;  %s9489_s30 = scalar_select %p218_p10, %s9455_s22, 1  ;;  %v234_v2 = vsel %vm9484_vm2, 0, %v233_v1  ;;  %vm9494_vm5 = vmand %vm224_vm0, %vm239_vm3  ;;  %v14445_v4 = vmov 0   ;;  %v227_v5 = vld [vmem:[#allocation2] sm:$0x1] }
  0x18   : > { %14543 = vst [vmem:[#allocation7_spill] sm:$0xff] %v14542_v0  ;;  %235 = vst [vmem:[#allocation2 + $0x18] sm:$0x1] %v234_v2  ;;  %v14545_v3 = vsel %vm9494_vm5, 4294967295, %v14544_v3  ;;  %v236_v6 = vld [vmem:[#allocation2 + $0x24] sm:$0x1]  ;;  %1199 = vmatprep.mubr.bf16.mxu1 %v14445_v4  ;;  %1151 = vmatprep.mubr.bf16.mxu0 %v14445_v4 }
  0x19   : > { %14546 = vst [vmem:[#allocation8_spill] sm:$0xff] %v14545_v3  ;;  %255 = vst.msk [vmem:[#allocation2 + $0x4] sm:$0xf] %vm14476_vm4, %v14445_v4  ;;  %s9187_s6 = sshll.u32 %s9489_s30, 6  ;;  %v228_v7 = vsel %vm9484_vm2, 0, %v227_v5  ;;  %v237_v8 = vsel %vm9484_vm2, 0, %v236_v6  ;;  %9321 = vset.pattern.permute.xlu0 %v14445_v4 }
  0x1a   : > { %259 = vst.msk [vmem:[#allocation2 + $0x10] sm:$0xf] %vm14476_vm4, %v14445_v4  ;;  %262 = vst.msk [vmem:[#allocation2 + $0x1c] sm:$0xf] %vm14476_vm4, %v14445_v4  ;;  %v230_v9 = vld [vmem:[#allocation2 + $0xc] sm:$0x1]  ;;  %s9559_s9 = scalar_lea.vmem %s14439_s0, %s9187_s6 }
  0x1b   : > { %265 = vst.msk [vmem:[#allocation2 + $0x28] sm:$0xf] %vm14476_vm4, %v14445_v4  ;;  %330 = vst.msk [vmem:[#allocation3 + $0x4] sm:$0xf] %vm14476_vm4, %v14445_v4  ;;  %v231_v10 = vsel %vm9484_vm2, 0, %v230_v9  ;;  %vm14474_vm7 = vcmask 0  }
  0x1c   : > { %333 = vst.msk [vmem:[#allocation3 + $0x10] sm:$0xf] %vm14476_vm4, %v14445_v4  ;;  %336 = vst.msk [vmem:[#allocation3 + $0x1c] sm:$0xf] %vm14476_vm4, %v14445_v4  ;;  %v244_v11 = vld [vmem:[#allocation2 + $0x14] sm:$0x1] }
  0x1d   : > { %339 = vst.msk [vmem:[#allocation3 + $0x28] sm:$0xf] %vm14476_vm4, %v14445_v4  ;;  %342 = vst.msk [vmem:[#allocation3 + $0x34] sm:$0xf] %vm14476_vm4, %v14445_v4  ;;  %v241_v12 = vld [vmem:[#allocation2 + $0x8] sm:$0x1] }
  0x1e   : > { %345 = vst.msk [vmem:[#allocation3 + $0x40] sm:$0xf] %vm14476_vm4, %v14445_v4  ;;  %348 = vst.msk [vmem:[#allocation3 + $0x4c] sm:$0xf] %vm14476_vm4, %v14445_v4  ;;  %v381_v13 = vld [vmem:[%s9559_s9 + $0x20] sm:$0xff]  ;;  %v383_v15 = vld [vmem:[%s9559_s9 + $0x30] sm:$0xff] }
  0x1f   : > { %351 = vst.msk [vmem:[#allocation3 + $0x58] sm:$0xf] %vm14476_vm4, %v14445_v4  ;;  %261 = vst.msk [vmem:[#allocation2 + $0x18] sm:$0xf] %vm14476_vm4, %v14445_v4  ;;  %v377_v14 = vld [vmem:[%s9559_s9] sm:$0xff]  ;;  %v245_v16 = vsel %vm9494_vm5, 0, %v244_v11  ;;  %v9192_v18 = vpack.c.bf16 %v381_v13, %v381_v13  ;;  %v9194_v20 = vpack.c.bf16 %v383_v15, %v383_v15 }
  0x20   : > { %269 = vst.msk [vmem:[#allocation2 + $0x4] sm:$0xf] %vm14475_vm6, %v14445_v4  ;;  %273 = vst.msk [vmem:[#allocation2 + $0x10] sm:$0xf] %vm14475_vm6, %v14445_v4  ;;  %vm14473_vm8 = vcmask 139400   ;;  %v242_v17 = vsel %vm9494_vm5, 0, %v241_v12  ;;  %v9188_v19 = vpack.c.bf16 %v377_v14, %v377_v14 }
  0x21   : > { %276 = vst.msk [vmem:[#allocation2 + $0x1c] sm:$0xf] %vm14475_vm6, %v14445_v4  ;;  %279 = vst.msk [vmem:[#allocation2 + $0x28] sm:$0xf] %vm14475_vm6, %v14445_v4  ;;  %v379_v21 = vld [vmem:[%s9559_s9 + $0x10] sm:$0xff]  ;;  %v380_v22 = vld [vmem:[%s9559_s9 + $0x18] sm:$0xff] }
  0x22   : > { %354 = vst.msk [vmem:[#allocation3 + $0x4] sm:$0xf] %vm14475_vm6, %v14445_v4  ;;  %357 = vst.msk [vmem:[#allocation3 + $0x10] sm:$0xf] %vm14475_vm6, %v14445_v4  ;;  %v378_v23 = vld [vmem:[%s9559_s9 + $0x8] sm:$0xff]  ;;  %v9190_v24 = vpack.c.bf16 %v379_v21, %v379_v21  ;;  %v9191_v25 = vpack.c.bf16 %v380_v22, %v380_v22  ;;  %v446_v27 = vshrl.u32 %v9192_v18, 16 }
  0x23   : > { %360 = vst.msk [vmem:[#allocation3 + $0x1c] sm:$0xf] %vm14475_vm6, %v14445_v4  ;;  %363 = vst.msk [vmem:[#allocation3 + $0x28] sm:$0xf] %vm14475_vm6, %v14445_v4  ;;  %v9189_v26 = vpack.c.bf16 %v378_v23, %v378_v23  ;;  %v449_v28 = vshll.u32 %v9192_v18, 16  ;;  %v412_v29 = vshrl.u32 %v9188_v19, 16 }
  0x24   : > { %366 = vst.msk [vmem:[#allocation3 + $0x34] sm:$0xf] %vm14475_vm6, %v14445_v4  ;;  %369 = vst.msk [vmem:[#allocation3 + $0x40] sm:$0xf] %vm14475_vm6, %v14445_v4  ;;  %v415_v30 = vshll.u32 %v9188_v19, 16  ;;  %v463_v31 = vshrl.u32 %v9194_v20, 16 }
  0x25   : > { %372 = vst.msk [vmem:[#allocation3 + $0x4c] sm:$0xf] %vm14475_vm6, %v14445_v4  ;;  %375 = vst.msk [vmem:[#allocation3 + $0x58] sm:$0xf] %vm14475_vm6, %v14445_v4  ;;  %v466_v32 = vshll.u32 %v9194_v20, 16  ;;  %v429_v33 = vshrl.u32 %v9190_v24, 16 }
  0x26   : > { %275 = vst.msk [vmem:[#allocation2 + $0x18] sm:$0xf] %vm14475_vm6, %v14445_v4  ;;  %229 = vst [vmem:[#allocation2] sm:$0x1] %v228_v7  ;;  %v432_v34 = vshll.u32 %v9190_v24, 16  ;;  %v448_v35 = vrot.slane %v446_v27, 7 }
  0x27   : > { %238 = vst [vmem:[#allocation2 + $0x24] sm:$0x1] %v237_v8  ;;  %254 = vst.msk [vmem:[#allocation2] sm:$0xf] %vm14476_vm4, %v14445_v4  ;;  %v414_v36 = vrot.slane %v412_v29, 7  ;;  %v437_v37 = vshrl.u32 %v9191_v25, 16 }
  0x28   : > { %264 = vst.msk [vmem:[#allocation2 + $0x24] sm:$0xf] %vm14476_vm4, %v14445_v4  ;;  %232 = vst [vmem:[#allocation2 + $0xc] sm:$0x1] %v231_v10  ;;  %v420_v38 = vshrl.u32 %v9189_v26, 16  ;;  %v465_v39 = vrot.slane %v463_v31, 7  ;;  %v451_v43 = vor.u32 %v449_v28, %v448_v35 }
  0x29   : > { %268 = vst.msk [vmem:[#allocation2] sm:$0xf] %vm14475_vm6, %v14445_v4  ;;  %278 = vst.msk [vmem:[#allocation2 + $0x24] sm:$0xf] %vm14475_vm6, %v14445_v4  ;;  %v431_v40 = vrot.slane %v429_v33, 7  ;;  %v384_v41 = vld [vmem:[%s9559_s9 + $0x38] sm:$0xff]  ;;  %v417_v44 = vor.u32 %v415_v30, %v414_v36 }
  0x2a   : > { %258 = vst.msk [vmem:[#allocation2 + $0xc] sm:$0xf] %vm14476_vm4, %v14445_v4  ;;  %246 = vst [vmem:[#allocation2 + $0x14] sm:$0x1] %v245_v16  ;;  %v382_v42 = vld [vmem:[%s9559_s9 + $0x28] sm:$0xff]  ;;  %v468_v45 = vor.u32 %v466_v32, %v465_v39  ;;  %v439_v46 = vrot.slane %v437_v37, 7  ;;  %v9195_v51 = vpack.c.bf16 %v384_v41, %v384_v41  ;;  %v584_v32 = vlaneseq }
  0x2b   : > { %243 = vst [vmem:[#allocation2 + $0x8] sm:$0x1] %v242_v17  ;;  %272 = vst.msk [vmem:[#allocation2 + $0xc] sm:$0xf] %vm14475_vm6, %v14445_v4  ;;  %v422_v47 = vrot.slane %v420_v38, 7  ;;  %v440_v48 = vshll.u32 %v9191_v25, 16  ;;  %v434_v49 = vor.u32 %v432_v34, %v431_v40  ;;  %v9193_v52 = vpack.c.bf16 %v382_v42, %v382_v42 }
  0x2c   : > { %260 = vst.msk [vmem:[#allocation2 + $0x14] sm:$0x1] %vm14474_vm7, %v14445_v4  ;;  %257 = vst.msk [vmem:[#allocation2 + $0x8] sm:$0x1] %vm14474_vm7, %v14445_v4  ;;  %s9391_s10 = smov 1   ;;  %v423_v50 = vshll.u32 %v9189_v26, 16 }
  0x2d   : > { %274 = vst.msk [vmem:[#allocation2 + $0x14] sm:$0x1] %vm14473_vm8, %v14445_v4  ;;  %271 = vst.msk [vmem:[#allocation2 + $0x8] sm:$0x1] %vm14473_vm8, %v14445_v4  ;;  %491 = vrot.lane.b32.xlu1 %v451_v43, %s9391_s10  ;;  %479 = vrot.lane.b32.xlu0 %v417_v44, %s9391_s10  ;;  %v250_v53 = vld [vmem:[#allocation2 + $0x2c] sm:$0x1]  ;;  %v442_v61 = vor.u32 %v440_v48, %v439_v46 }
  0x2e   : > { %vm409_vm9 = vsmask.f32 4368  ;;  %v471_v54 = vshrl.u32 %v9195_v51, 16  ;;  %v454_v55 = vshrl.u32 %v9193_v52, 16  ;;  %v247_v56 = vld [vmem:[#allocation2 + $0x20] sm:$0x1]  ;;  %v425_v62 = vor.u32 %v423_v50, %v422_v47 }
  0x2f   : > { %v418_v57 = vrot.slane %v414_v36, 4  ;;  %v444_v58 = vrot.slane %v439_v46, 4  ;;  %v427_v59 = vrot.slane %v422_v47, 4  ;;  %v435_v60 = vrot.slane %v431_v40, 4  ;;  %vm9607_vm10 = vmor %vm225_vm1, %vm409_vm9  ;;  %v534_v20 = vld [vmem:[#allocation2 + $0x18] sm:$0xf] }
  0x30   : > { %v474_v63 = vshll.u32 %v9195_v51, 16  ;;  %v251_v1 = vsel %vm9494_vm5, 0, %v250_v53  ;;  %v473_v2 = vrot.slane %v471_v54, 7  ;;  %v456_v5 = vrot.slane %v454_v55, 7  ;;  %v517_v21 = vld [vmem:[#allocation2] sm:$0xf] }
  0x31   : > { %497 = vrot.lane.b32.xlu1 %v468_v45, %s9391_s10  ;;  %485 = vrot.lane.b32.xlu0 %v434_v49, %s9391_s10  ;;  %v457_v6 = vshll.u32 %v9193_v52, 16  ;;  %252 = vst [vmem:[#allocation2 + $0x2c] sm:$0x1] %v251_v1  ;;  %v248_v7 = vsel %vm9494_vm5, 0, %v247_v56  ;;  %v14547_v8 = vmov 0  ;;  %v452_v9 = vrot.slane %v448_v35, 4 }
  0x32   : > { %v14548_v8 = vsel %vm9607_vm10, 4294967295, %v14547_v8  ;;  %266 = vst.msk [vmem:[#allocation2 + $0x2c] sm:$0x1] %vm14474_vm7, %v14445_v4  ;;  %249 = vst [vmem:[#allocation2 + $0x20] sm:$0x1] %v248_v7  ;;  %v469_v10 = vrot.slane %v465_v39, 4  ;;  %v443_v11 = vsel %vm9607_vm10, %v435_v60, %v442_v61  ;;  %v426_v12 = vsel %vm9607_vm10, %v418_v57, %v425_v62 }
  0x33   : > { %14549 = vst [vmem:[#allocation9_spill] sm:$0xff] %v14548_v8  ;;  %280 = vst.msk [vmem:[#allocation2 + $0x2c] sm:$0x1] %vm14473_vm8, %v14445_v4  ;;  %v476_v13 = vor.u32 %v474_v63, %v473_v2  ;;  %v459_v14 = vor.u32 %v457_v6, %v456_v5  ;;  %v478_v17 = vrot.slane %v473_v2, 4  ;;  %v461_v18 = vrot.slane %v456_v5, 4  ;;  %s9393_s11 = smov 127  }
  0x34   : > { %263 = vst.msk [vmem:[#allocation2 + $0x20] sm:$0x1] %vm14474_vm7, %v14445_v4  ;;  %vm14472_vm11 = vcmask 134152   ;;  %v14550_v19 = vmov 0  ;;  %v541_v26 = vld [vmem:[#allocation2 + $0x24] sm:$0xf] }
  0x35   : > { %489 = vrot.lane.b32.xlu1 %v444_v58, %s9391_s10  ;;  %483 = vrot.lane.b32.xlu0 %v427_v59, %s9391_s10  ;;  %277 = vst.msk [vmem:[#allocation2 + $0x20] sm:$0x1] %vm14473_vm8, %v14445_v4  ;;  %v477_v15 = vsel %vm9607_vm10, %v469_v10, %v476_v13  ;;  %v460_v16 = vsel %vm9607_vm10, %v452_v9, %v459_v14  ;;  %vm9637_vm12 = vmand %vm14472_vm11, %vm239_vm3  ;;  %v527_v27 = vld [vmem:[#allocation2 + $0xc] sm:$0xf]  ;;  %vm522_vm13 = vcmask 131080   ;;  %v14553_v35 = vmov 0 }
  0x36   : > { %v14551_v19 = vsel %vm9637_vm12, 4294967295, %v14550_v19  ;;  %v9392_v30 = vmov 1983009808   ;;  %vm9650_vm14 = vmand %vm522_vm13, %vm225_vm1  ;;  %v531_v36 = vld [vmem:[#allocation2 + $0x14] sm:$0x1]  ;;  %v9654_v41 = vshrl.u32 %v584_v32, 7 }
  0x37   : > { %14552 = vst [vmem:[#allocation10_spill] sm:$0xff] %v14551_v19  ;;  %v582_v31 = vunpack.c.l.s4 %v9392_v30  ;;  %v14554_v35 = vsel %vm9650_vm14, 4294967295, %v14553_v35  ;;  %v524_v37 = vld [vmem:[#allocation2 + $0x8] sm:$0x1]  ;;  %s9394_s12 = smov 126   ;;  %vm2871_vm15 = vcmask 1042432  }
  0x38   : > { %14555 = vst [vmem:[#allocation11_spill] sm:$0xff] %v14554_v35  ;;  %vm2872_vm0 = vcmask 1046532   ;;  %vm1564_vm3 = vsmask.f32 3328  ;;  %vm1565_vm9 = vsmask.f32 7440 }
  0x39   : > { %487 = vrot.lane.b32.xlu1 %v443_v11, %s9391_s10  ;;  %481 = vrot.lane.b32.xlu0 %v426_v12, %s9391_s10  ;;  %v583_v40 = vunpack.c.0.s8 %v582_v31  ;;  %v9395_v31 = vmov 1934713408   ;;  %vm9728_vm1 = vmor %vm2871_vm15, %vm2872_vm0  ;;  %s9396_s13 = smov 32   ;;  %s9397_s14 = smov 64   ;;  %vm786_vm15 = vcmask 130048   ;;  %vm790_vm0 = vcmask 261120  }
  0x3a   : > { %v545_v1 = vld [vmem:[#allocation2 + $0x2c] sm:$0x1]  ;;  %v599_v32 = vunpack.c.l.s4 %v9395_v31  ;;  %vm9855_vm13 = vmor %vm1564_vm3, %vm1565_vm9  ;;  %s9398_s15 = smov 96   ;;  %s9399_s16 = smov 16   ;;  %vm793_vm3 = vcmask 392192   ;;  %vm14480_vm9 = vcmask 523264  }
  0x3b   : > { %v9662_v48 = vsub.s32 %v583_v40, %v9654_v41  ;;  %s9400_s17 = smov 48   ;;  %s9401_s23 = smov 80   ;;  %vm14478_vm8 = vcmask 785408   ;;  %vm14477_vm7 = vcmask 916480   ;;  %vm1114_vm6 = vcmask 1041408  }
  0x3c   : > { %v538_v2 = vld [vmem:[#allocation2 + $0x20] sm:$0x1]  ;;  %v600_v40 = vunpack.c.0.s8 %v599_v32  ;;  %s9402_s25 = smov 112   ;;  %vm1110_vm4 = vcmask 31744  }
  0x3d   : > { %499 = vrot.lane.b32.xlu1 %v477_v15, %s9391_s10  ;;  %493 = vrot.lane.b32.xlu0 %v460_v16, %s9391_s10  ;;  %14556 = vst [vmem:[#allocation12_spill] sm:$0xff] %v9662_v48 }
  0x41   : > { %501 = vrot.lane.b32.xlu1 %v478_v17, %s9391_s10  ;;  %495 = vrot.lane.b32.xlu0 %v461_v18, %s9391_s10 }
  0x9f   : > { %v492_v22 = vpop.permute.xlu1 %491  ;;  %v480_v23 = vpop.permute.xlu0 %479 }
  0xa0   : > { %v535_v24 = vsel %vm9637_vm12, %v492_v22, %v534_v20  ;;  %v518_v25 = vsel %vm9637_vm12, %v480_v23, %v517_v21 }
  0xa1   : > { %536 = vst [vmem:[#allocation2 + $0x18] sm:$0xf] %v535_v24  ;;  %519 = vst [vmem:[#allocation2] sm:$0xf] %v518_v25 }
  0xa3   : > { %v498_v28 = vpop.permute.xlu1 %497  ;;  %v486_v29 = vpop.permute.xlu0 %485 }
  0xa4   : > { %v542_v33 = vsel %vm9637_vm12, %v498_v28, %v541_v26  ;;  %v528_v34 = vsel %vm9637_vm12, %v486_v29, %v527_v27 }
  0xa5   : > { %543 = vst [vmem:[#allocation2 + $0x24] sm:$0xf] %v542_v33  ;;  %529 = vst [vmem:[#allocation2 + $0xc] sm:$0xf] %v528_v34 }
  0xa7   : > { %v490_v38 = vpop.permute.xlu1 %489  ;;  %v484_v39 = vpop.permute.xlu0 %483 }
  0xa8   : > { %v532_v42 = vsel %vm9650_vm14, %v490_v38, %v531_v36  ;;  %v525_v43 = vsel %vm9650_vm14, %v484_v39, %v524_v37  ;;  %v548_v44 = vld [vmem:[#allocation2] sm:$0xf]  ;;  %v552_v45 = vld [vmem:[#allocation2 + $0x18] sm:$0xf] }
  0xa9   : > { %533 = vst [vmem:[#allocation2 + $0x14] sm:$0x1] %v532_v42  ;;  %526 = vst [vmem:[#allocation2 + $0x8] sm:$0x1] %v525_v43  ;;  %832 = vrot.lane.b32.xlu0 %v548_v44, %s9393_s11  ;;  %v565_v49 = vshrl.u32 %v552_v45, 16  ;;  %v559_v50 = vshrl.u32 %v548_v44, 16 }
  0xaa   : > { %v1208_v24 = vld [vmem:[#allocation2] sm:$0xf]  ;;  %v1212_v30 = vld [vmem:[#allocation2 + $0x18] sm:$0xf]  ;;  %v14557_v42 = vmov 0 }
  0xab   : > { %v488_v46 = vpop.permute.xlu1 %487  ;;  %v482_v47 = vpop.permute.xlu0 %481  ;;  %v3214_v36 = vld [vmem:[#allocation2] sm:$0xe]  ;;  %v3220_v39 = vld [vmem:[#allocation2 + $0x18] sm:$0xe]  ;;  %v14558_v42 = vsel %vm9728_vm1, 4294967295, %v14557_v42 }
  0xac   : > { %530 = vst.msk [vmem:[#allocation2 + $0x10] sm:$0xf] %vm14472_vm11, %v488_v46  ;;  %521 = vst.msk [vmem:[#allocation2 + $0x4] sm:$0xf] %vm14472_vm11, %v482_v47  ;;  %v550_v51 = vld [vmem:[#allocation2 + $0xc] sm:$0xf] }
  0xad   : > { %v554_v52 = vld [vmem:[#allocation2 + $0x24] sm:$0xf]  ;;  %836 = vrot.lane.b32.xlu0 %v550_v51, %s9393_s11  ;;  %v558_v53 = vpack.i.b16 %v550_v51, %v548_v44  ;;  %v560_v54 = vshrl.u32 %v550_v51, 16  ;;  %v1210_v29 = vld [vmem:[#allocation2 + $0xc] sm:$0xf]  ;;  %14559 = vst [vmem:[#allocation13_spill] sm:$0xff] %v14558_v42 }
  0xae   : > { %v564_v55 = vpack.i.b16 %v554_v52, %v552_v45  ;;  %v566_v56 = vshrl.u32 %v554_v52, 16  ;;  %v1214_v37 = vld [vmem:[#allocation2 + $0x24] sm:$0xf]  ;;  %v3217_v43 = vld [vmem:[#allocation2 + $0xc] sm:$0xe]  ;;  %v8950_v47 = vrot.slane %v3220_v39, 9 }
  0xaf   : > { %v561_v57 = vpack.i.b16 %v560_v54, %v559_v50  ;;  %v9668_v58 = vrot.slane %v558_v53, %v9662_v48  ;;  %v500_v59 = vpop.permute.xlu1 %499  ;;  %v494_v60 = vpop.permute.xlu0 %493  ;;  %v8949_v51 = vrot.slane %v3217_v43, 9  ;;  %v9735_v53 = vld [vmem:[#allocation2 + $0x18] sm:$0xe]  ;;  %v9737_v54 = vld [vmem:[#allocation2] sm:$0xf] }
  0xb0   : > { %v567_v61 = vpack.i.b16 %v566_v56, %v565_v49  ;;  %v9671_v62 = vrot.slane %v564_v55, %v9662_v48  ;;  %544 = vst.msk [vmem:[#allocation2 + $0x28] sm:$0xf] %vm14472_vm11, %v500_v59  ;;  %537 = vst.msk [vmem:[#allocation2 + $0x1c] sm:$0xf] %vm14472_vm11, %v494_v60  ;;  %v3594_v49 = vld [vmem:[#allocation2] sm:$0xe]  ;;  %v9740_v55 = vsub.s32 %v600_v40, %v9654_v41 }
  0xb1   : > { %v9676_v63 = vrot.slane %v561_v57, %v9662_v48  ;;  %840 = vrot.lane.b32.xlu0 %v552_v45, %s9393_s11  ;;  %v8948_v45 = vrot.slane %v3214_v36, 9  ;;  %v3223_v57 = vld [vmem:[#allocation2 + $0x24] sm:$0xe]  ;;  %v9743_v59 = vld [vmem:[#allocation2 + $0xc] sm:$0xe]  ;;  %vm14479_vm11 = vcmask 654336  }
  0xb2   : > { %v9680_v5 = vrot.slane %v567_v61, %v9662_v48  ;;  %v596_v11 = vcombine.low %v9668_v58, %v9671_v62  ;;  %v597_v12 = vcombine.high %v9668_v58, %v9671_v62  ;;  %14560 = vst [vmem:[#allocation14_spill] sm:$0xff] %v9740_v55  ;;  %v3216_v60 = vld [vmem:[#allocation2 + $0x8] sm:$0x1]  ;;  %v3219_v61 = vld [vmem:[#allocation2 + $0x14] sm:$0x1]  ;;  %v8970_v32 = vrot.slane %v9743_v59, 9 }
  0xb3   : > { %v502_v6 = vpop.permute.xlu1 %501  ;;  %v496_v7 = vpop.permute.xlu0 %495  ;;  %v9682_v9 = vld [vmem:[#allocation2 + $0x4] sm:$0xf]  ;;  %v9684_v10 = vld [vmem:[#allocation2 + $0x10] sm:$0xf]  ;;  %v3250_v31 = vrot.slane %v3219_v61, 5 }
  0xb4   : > { %v630_v13 = vcombine.low %v9676_v63, %v9680_v5  ;;  %v631_v14 = vcombine.high %v9676_v63, %v9680_v5  ;;  %v546_v15 = vsel %vm9650_vm14, %v502_v6, %v545_v1  ;;  %v539_v16 = vsel %vm9650_vm14, %v496_v7, %v538_v2  ;;  %834 = vrot.lane.b32.xlu1 %v9682_v9, %s9393_s11  ;;  %v3215_v33 = vld [vmem:[#allocation2 + $0x4] sm:$0xf]  ;;  %v3218_v44 = vld [vmem:[#allocation2 + $0x10] sm:$0xf]  ;;  %v9745_v1 = vld [vmem:[#allocation2 + $0x8] sm:$0x1] }
  0xb5   : > { %v571_v17 = vshrl.u32 %v9682_v9, 16  ;;  %v572_v18 = vshrl.u32 %v9684_v10, 16  ;;  %547 = vst [vmem:[#allocation2 + $0x2c] sm:$0x1] %v546_v15  ;;  %540 = vst [vmem:[#allocation2 + $0x20] sm:$0x1] %v539_v16  ;;  %844 = vrot.lane.b32.xlu0 %v554_v52, %s9393_s11  ;;  %v570_v20 = vpack.i.b16 %v9684_v10, %v9682_v9 }
  0xb6   : > { %v1209_v34 = vld [vmem:[#allocation2 + $0x4] sm:$0xf]  ;;  %v3240_v38 = vrot.slane %v3215_v33, 5  ;;  %v1211_v46 = vld [vmem:[#allocation2 + $0x10] sm:$0xf]  ;;  %v3247_v52 = vrot.slane %v3218_v44, 5 }
  0xb7   : > { %v9705_v21 = vpack.i.b16 %v572_v18, %v571_v17  ;;  %v9707_v22 = vld [vmem:[#allocation2 + $0x1c] sm:$0xf]  ;;  %v9709_v23 = vld [vmem:[#allocation2 + $0x28] sm:$0xf]  ;;  %v3595_v6 = vld [vmem:[#allocation2 + $0x4] sm:$0xf] }
  0xb8   : > { %838 = vrot.lane.b32.xlu1 %v9684_v10, %s9393_s11  ;;  %v577_v25 = vshrl.u32 %v9707_v22, 16  ;;  %v578_v26 = vshrl.u32 %v9709_v23, 16  ;;  %v576_v27 = vpack.i.b16 %v9709_v23, %v9707_v22  ;;  %v3241_v50 = vsel %vm9728_vm1, %v8948_v45, %v3240_v38  ;;  %v3221_v56 = vld [vmem:[#allocation2 + $0x1c] sm:$0xf]  ;;  %v9752_v18 = vld [vmem:[#allocation2 + $0x24] sm:$0xe] }
  0xb9   : > { %1224 = vrot.lane.b32.xlu0 %v1208_v24, %s9394_s12  ;;  %v1213_v2 = vld [vmem:[#allocation2 + $0x1c] sm:$0xf]  ;;  %v8969_v7 = vrot.slane %v3594_v49, 9  ;;  %v1988_v15 = vshrl.u32 %v9737_v54, 16  ;;  %v3248_v41 = vsel %vm9728_vm1, %v8949_v51, %v3247_v52  ;;  %v3254_v16 = vrot.slane %v3221_v56, 5 }
  0xba   : > { %v9718_v28 = vpack.i.b16 %v578_v26, %v577_v25  ;;  %v8971_v17 = vrot.slane %v9735_v53, 9  ;;  %v9754_v24 = vld [vmem:[#allocation2 + $0x14] sm:$0x1]  ;;  %v9760_v25 = vrot.slane %v596_v11, %v9740_v55  ;;  %v3243_v26 = vrot.slane %v3216_v60, 5  ;;  %v1215_v40 = vld [vmem:[#allocation2 + $0x28] sm:$0xf] }
  0xbb   : > { %v3242_v33 = vrot.slane %v3240_v38, 4  ;;  %v3620_v36 = vrot.slane %v3595_v6, 5  ;;  %v3623_v39 = vrot.slane %v9745_v1, 5  ;;  %v8972_v43 = vrot.slane %v9752_v18, 9  ;;  %v3601_v9 = vld [vmem:[#allocation2 + $0x1c] sm:$0xf] }
  0xbc   : > { %842 = vrot.lane.b32.xlu1 %v9707_v22, %s9393_s11  ;;  %v3630_v11 = vrot.slane %v9754_v24, 5  ;;  %v9767_v44 = vrot.slane %v1988_v15, 4  ;;  %v9773_v45 = vrot.slane %v597_v12, %v9740_v55  ;;  %v9779_v38 = vrot.slane %v570_v20, %v9662_v48  ;;  %v3225_v51 = vld [vmem:[#allocation2 + $0x2c] sm:$0x1]  ;;  %v1976_v56 = vld [vmem:[#allocation2 + $0x4] sm:$0xf] }
  0xbd   : > { %1228 = vrot.lane.b32.xlu0 %v1210_v29, %s9394_s12  ;;  %v3224_v29 = vld [vmem:[#allocation2 + $0x28] sm:$0xf]  ;;  %v9788_v58 = vrot.slane %v9705_v21, %v9662_v48  ;;  %v1991_v10 = vshll.u32 %v9737_v54, 16  ;;  %v9796_v12 = vrot.slane %v630_v13, %v9740_v55  ;;  %v9802_v20 = vrot.slane %v576_v27, %v9662_v48  ;;  %v1978_v13 = vld [vmem:[#allocation2 + $0xc] sm:$0xf] }
  0xbe   : > { %v3261_v49 = vrot.slane %v3224_v29, 5  ;;  %v3244_v21 = vsel %vm9728_vm1, %v3242_v33, %v3243_v26  ;;  %v3621_v54 = vsel %vm9728_vm1, %v8969_v7, %v3620_v36  ;;  %v3264_v61 = vrot.slane %v3225_v51, 5  ;;  %v3604_v22 = vld [vmem:[#allocation2 + $0x28] sm:$0xf]  ;;  %v3602_v6 = vld [vmem:[#allocation2 + $0x20] sm:$0x1] }
  0xbf   : > { %v3634_v1 = vrot.slane %v3601_v9, 5  ;;  %v1993_v15 = vrot.slane %v1991_v10, 5  ;;  %v1981_v26 = vld [vmem:[#allocation2 + $0x18] sm:$0xf]  ;;  %v3641_v29 = vrot.slane %v3604_v22, 5  ;;  %v2012_v33 = vshrl.u32 %v1978_v13, 16 }
  0xc0   : > { %846 = vrot.lane.b32.xlu1 %v9709_v23, %s9393_s11  ;;  %v3263_v60 = vrot.slane %v3261_v49, 4  ;;  %v9812_v23 = vrot.slane %v9718_v28, %v9662_v48  ;;  %v2039_v51 = vshll.u32 %v1981_v26, 16  ;;  %v14561_v24 = vmov 0 }
  0xc1   : > { %1232 = vrot.lane.b32.xlu0 %v1212_v30, %s9394_s12  ;;  %v8951_v30 = vrot.slane %v3223_v57, 9  ;;  %v3256_v57 = vrot.slane %v3254_v16, 4  ;;  %v14562_v24 = vsel %vm9855_vm13, 4294967295, %v14561_v24 }
  0xc2   : > { %14563 = vst [vmem:[#allocation15_spill] sm:$0xff] %v14562_v24 }
  0xc3   : > { %v3262_v27 = vsel %vm9728_vm1, %v8951_v30, %v3261_v49 }
  0xc4   : > { %1226 = vrot.lane.b32.xlu1 %v1209_v34, %s9394_s12  ;;  %v3249_v34 = vrot.slane %v3247_v52, 4 }
  0xc5   : > { %1236 = vrot.lane.b32.xlu0 %v1214_v37, %s9394_s12  ;;  %v3598_v37 = vld [vmem:[#allocation2 + $0x10] sm:$0xf] }
  0xc6   : > { %v3627_v62 = vrot.slane %v3598_v37, 5  ;;  %v3636_v37 = vrot.slane %v3634_v1, 4 }
  0xc8   : > { %1230 = vrot.lane.b32.xlu1 %v1211_v46, %s9394_s12  ;;  %v3255_v46 = vsel %vm9728_vm1, %v8950_v47, %v3254_v16  ;;  %v3251_v47 = vsel %vm9728_vm1, %v3249_v34, %v3250_v31  ;;  %v3628_v7 = vsel %vm9728_vm1, %v8970_v32, %v3627_v62  ;;  %v2001_v16 = vshrl.u32 %v1976_v56, 16  ;;  %v1979_v31 = vld [vmem:[#allocation2 + $0x10] sm:$0xf] }
  0xc9   : > { %3266 = vrot.lane.b32.xlu0 %v3241_v50, %s9393_s11  ;;  %v3222_v50 = vld [vmem:[#allocation2 + $0x20] sm:$0x1]  ;;  %v3629_v28 = vrot.slane %v3627_v62, 4  ;;  %v2015_v34 = vshll.u32 %v1978_v13, 16  ;;  %v3635_v32 = vsel %vm9728_vm1, %v8971_v17, %v3634_v1  ;;  %v1994_v62 = vor.u32 %v1993_v15, %v9767_v44 }
  0xca   : > { %v3257_v59 = vrot.slane %v3222_v50, 5  ;;  %v2036_v50 = vshrl.u32 %v1981_v26, 16  ;;  %v2021_v10 = vshll.u32 %v1979_v31, 16  ;;  %v2025_v53 = vshrl.u32 %v1979_v31, 16  ;;  %v2411_v1 = vld [vmem:[#allocation2] sm:$0xf] }
  0xcb   : > { %v2017_v13 = vrot.slane %v2015_v34, 5  ;;  %v9845_v44 = vsel %vm9728_vm1, %v3629_v28, %v3630_v11  ;;  %v2424_v31 = vshrl.u32 %v2411_v1, 16  ;;  %v664_v34 = vcombine.low %v9779_v38, %v9802_v20 }
  0xcc   : > { %1234 = vrot.lane.b32.xlu1 %v1213_v2, %s9394_s12  ;;  %v3622_v2 = vrot.slane %v3620_v36, 4  ;;  %v3258_v30 = vsel %vm9728_vm1, %v3256_v57, %v3257_v59  ;;  %v3265_v36 = vsel %vm9728_vm1, %v3263_v60, %v3264_v61  ;;  %v9835_v57 = vld [vmem:[#allocation2 + $0x1c] sm:$0xf]  ;;  %v1977_v59 = vld [vmem:[#allocation2 + $0x8] sm:$0x1]  ;;  %v3643_v61 = vrot.slane %v3641_v29, 4 }
  0xcd   : > { %3270 = vrot.lane.b32.xlu0 %v3248_v41, %s9393_s11  ;;  %v1997_v41 = vshll.u32 %v1976_v56, 16  ;;  %v2003_v56 = vrot.slane %v2001_v16, 4  ;;  %v2038_v18 = vrot.slane %v2036_v50, 4  ;;  %v9859_v11 = vrot.slane %v2021_v10, 5  ;;  %v1985_v16 = vld [vmem:[#allocation2 + $0x28] sm:$0xf] }
  0xce   : > { %v3624_v49 = vsel %vm9728_vm1, %v3622_v2, %v3623_v39  ;;  %v3642_v39 = vsel %vm9728_vm1, %v8972_v43, %v3641_v29  ;;  %v1995_v43 = vrot.slane %v1994_v62, 4  ;;  %v2045_v2 = vshll.u32 %v9835_v57, 16  ;;  %v2412_v10 = vld [vmem:[#allocation2 + $0x4] sm:$0xf] }
  0xcf   : > { %v9833_v9 = vrot.slane %v1997_v41, 5  ;;  %v2007_v41 = vshll.u32 %v1977_v59, 16  ;;  %v2027_v29 = vrot.slane %v2025_v53, 4  ;;  %v2069_v62 = vshll.u32 %v1985_v16, 16 }
  0xd0   : > { %1238 = vrot.lane.b32.xlu1 %v1215_v40, %s9394_s12  ;;  %v3637_v40 = vrot.slane %v3602_v6, 5  ;;  %v9875_v50 = vrot.slane %v2045_v2, 5 }
  0xd1   : > { %3274 = vrot.lane.b32.xlu0 %v3255_v46, %s9393_s11  ;;  %v1984_v46 = vld [vmem:[#allocation2 + $0x24] sm:$0xf]  ;;  %v2004_v6 = vor.u32 %v2003_v56, %v9833_v9  ;;  %v2028_v56 = vor.u32 %v2027_v29, %v9859_v11 }
  0xd2   : > { %v2060_v17 = vshrl.u32 %v1984_v46, 16  ;;  %v2063_v60 = vshll.u32 %v1984_v46, 16  ;;  %v2049_v46 = vshrl.u32 %v9835_v57, 16  ;;  %v2426_v57 = vrot.slane %v2424_v31, 4 }
  0xd4   : > { %3268 = vrot.lane.b32.xlu1 %v3244_v21, %s9393_s11  ;;  %v3605_v21 = vld [vmem:[#allocation2 + $0x2c] sm:$0x1]  ;;  %v2062_v26 = vrot.slane %v2060_v17, 4  ;;  %v2065_v28 = vrot.slane %v2063_v60, 5 }
  0xd5   : > { %3278 = vrot.lane.b32.xlu0 %v3262_v27, %s9393_s11  ;;  %v3644_v22 = vrot.slane %v3605_v21, 5  ;;  %v2041_v27 = vrot.slane %v2039_v51, 5  ;;  %v9877_v51 = vrot.slane %v2004_v6, 4  ;;  %v2417_v6 = vld [vmem:[#allocation2 + $0x18] sm:$0xf] }
  0xd6   : > { %v2066_v53 = vor.u32 %v2065_v28, %v2062_v26 }
  0xd8   : > { %3272 = vrot.lane.b32.xlu1 %v3251_v47, %s9393_s11  ;;  %v2014_v47 = vrot.slane %v2012_v33, 4  ;;  %v2427_v33 = vshll.u32 %v2411_v1, 16 }
  0xd9   : > { %3646 = vrot.lane.b32.xlu0 %v3621_v54, %s9394_s12  ;;  %v9849_v54 = vsel %vm9728_vm1, %v3636_v37, %v3637_v40  ;;  %v9871_v37 = vsel %vm9728_vm1, %v3643_v61, %v3644_v22  ;;  %v2042_v40 = vor.u32 %v2041_v27, %v2038_v18  ;;  %v2073_v22 = vshrl.u32 %v1985_v16, 16  ;;  %v2415_v27 = vld [vmem:[#allocation2 + $0x10] sm:$0xf] }
  0xda   : > { %v2018_v15 = vor.u32 %v2017_v13, %v2014_v47  ;;  %v2414_v13 = vld [vmem:[#allocation2 + $0xc] sm:$0xf]  ;;  %v2429_v17 = vrot.slane %v2427_v33, 5  ;;  %v2433_v18 = vshll.u32 %v2412_v10, 16  ;;  %v2051_v16 = vrot.slane %v2049_v46, 4 }
  0xdb   : > { %v9890_v61 = vrot.slane %v2042_v40, 4  ;;  %v2448_v2 = vshrl.u32 %v2414_v13, 16  ;;  %v2457_v28 = vshll.u32 %v2415_v27, 16  ;;  %v2472_v33 = vshrl.u32 %v2417_v6, 16 }
  0xdc   : > { %3276 = vrot.lane.b32.xlu1 %v3258_v30, %s9393_s11  ;;  %v2000_v30 = vsel %vm9855_vm13, %v1995_v43, %v9833_v9  ;;  %v2019_v21 = vrot.slane %v2018_v15, 4  ;;  %v9881_v9 = vrot.slane %v2007_v41, 5  ;;  %v9897_v43 = vrot.slane %v2069_v62, 5  ;;  %v2420_v62 = vld [vmem:[#allocation2 + $0x24] sm:$0xf] }
  0xdd   : > { %3650 = vrot.lane.b32.xlu0 %v3628_v7, %s9394_s12  ;;  %v1980_v7 = vld [vmem:[#allocation2 + $0x14] sm:$0x1]  ;;  %v9903_v15 = vrot.slane %v2028_v56, 4  ;;  %v2437_v41 = vshrl.u32 %v2412_v10, 16  ;;  %v2430_v29 = vor.u32 %v2429_v17, %v2426_v57  ;;  %v2475_v40 = vshll.u32 %v2417_v6, 16 }
  0xde   : > { %v2031_v47 = vshll.u32 %v1980_v7, 16  ;;  %v2024_v60 = vsel %vm9855_vm13, %v2019_v21, %v9859_v11  ;;  %v2010_v1 = vsel %vm9855_vm13, %v9877_v51, %v9881_v9  ;;  %v2048_v11 = vsel %vm9855_vm13, %v9890_v61, %v9875_v50  ;;  %v1986_v56 = vld [vmem:[#allocation2 + $0x2c] sm:$0x1]  ;;  %v2418_v57 = vld [vmem:[#allocation2 + $0x1c] sm:$0xf] }
  0xdf   : > { %v9911_v7 = vrot.slane %v2433_v18, 5  ;;  %v2450_v10 = vrot.slane %v2448_v2, 4  ;;  %v2439_v17 = vrot.slane %v2437_v41, 4  ;;  %v2421_v61 = vld [vmem:[#allocation2 + $0x28] sm:$0xf]  ;;  %v2496_v18 = vshrl.u32 %v2420_v62, 16 }
  0xe0   : > { %3280 = vrot.lane.b32.xlu1 %v3265_v36, %s9393_s11  ;;  %v665_v36 = vcombine.high %v9779_v38, %v9802_v20  ;;  %v9907_v26 = vrot.slane %v2031_v47, 5  ;;  %v2075_v47 = vrot.slane %v2073_v22, 4  ;;  %v2499_v2 = vshll.u32 %v2420_v62, 16  ;;  %v2854_v20 = vld [vmem:[#allocation2 + $0x1c] sm:$0xf] }
  0xe1   : > { %3654 = vrot.lane.b32.xlu0 %v3635_v32, %s9394_s12  ;;  %v1983_v32 = vld [vmem:[#allocation2 + $0x20] sm:$0x1]  ;;  %v2079_v22 = vshll.u32 %v1986_v56, 16  ;;  %v2477_v6 = vrot.slane %v2475_v40, 5  ;;  %v2481_v41 = vshll.u32 %v2418_v57, 16  ;;  %v2505_v4 = vshll.u32 %v2421_v61, 16 }
  0xe2   : > { %v2055_v31 = vshll.u32 %v1983_v32, 16  ;;  %v9925_v32 = vrot.slane %v2457_v28, 5  ;;  %v2440_v28 = vor.u32 %v2439_v17, %v9911_v7  ;;  %v2498_v40 = vrot.slane %v2496_v18, 4  ;;  %v2419_v17 = vld [vmem:[#allocation2 + $0x20] sm:$0x1] }
  0xe3   : > { %v2501_v56 = vrot.slane %v2499_v2, 5  ;;  %v9953_v2 = vrot.slane %v2505_v4, 5 }
  0xe4   : > { %3648 = vrot.lane.b32.xlu1 %v3624_v49, %s9394_s12  ;;  %v2451_v49 = vshll.u32 %v2414_v13, 16  ;;  %v2052_v13 = vor.u32 %v2051_v16, %v9875_v50  ;;  %v2413_v16 = vld [vmem:[#allocation2 + $0x8] sm:$0x1]  ;;  %v9951_v18 = vrot.slane %v2440_v28, 4 }
  0xe5   : > { %3658 = vrot.lane.b32.xlu0 %v3642_v39, %s9394_s12  ;;  %v9905_v39 = vrot.slane %v2066_v53, 4  ;;  %v2461_v53 = vshrl.u32 %v2415_v27, 16  ;;  %v2076_v27 = vor.u32 %v2075_v47, %v9897_v43 }
  0xe6   : > { %v2453_v21 = vrot.slane %v2451_v49, 5  ;;  %v2474_v49 = vrot.slane %v2472_v33, 4  ;;  %v9936_v33 = vrot.slane %v2055_v31, 5 }
  0xe7   : > { %v2072_v46 = vsel %vm9855_vm13, %v9905_v39, %v9897_v43  ;;  %v2485_v39 = vshrl.u32 %v2418_v57, 16  ;;  %v2463_v59 = vrot.slane %v2461_v53, 4  ;;  %v1552_v53 = vld [vmem:[#allocation2] sm:$0xf]  ;;  %v9945_v31 = vrot.slane %v2076_v27, 4 }
  0xe8   : > { %3652 = vrot.lane.b32.xlu1 %v9845_v44, %s9394_s12  ;;  %v2034_v44 = vsel %vm9855_vm13, %v9903_v15, %v9907_v26  ;;  %v2454_v50 = vor.u32 %v2453_v21, %v2450_v10  ;;  %v2478_v43 = vor.u32 %v2477_v6, %v2474_v49  ;;  %v2443_v10 = vshll.u32 %v2413_v16, 16  ;;  %v2416_v21 = vld [vmem:[#allocation2 + $0x14] sm:$0x1] }
  0xe9   : > { %2083 = vrot.lane.b32.xlu0 %v2000_v30, %s9393_s11  ;;  %v9923_v30 = vrot.slane %v2430_v29, 4  ;;  %v2509_v29 = vshrl.u32 %v2421_v61, 16  ;;  %v2487_v47 = vrot.slane %v2485_v39, 4  ;;  %v9947_v57 = vrot.slane %v2079_v22, 5 }
  0xea   : > { %v2502_v49 = vor.u32 %v2501_v56, %v2498_v40  ;;  %v2467_v6 = vshll.u32 %v2416_v21, 16  ;;  %v1568_v39 = vshrl.u32 %v1552_v53, 16  ;;  %v9962_v22 = vrot.slane %v2478_v43, 4 }
  0xeb   : > { %v2511_v61 = vrot.slane %v2509_v29, 4  ;;  %v2491_v27 = vshll.u32 %v2419_v17, 16 }
  0xec   : > { %3656 = vrot.lane.b32.xlu1 %v9849_v54, %s9394_s12  ;;  %v9934_v54 = vrot.slane %v2052_v13, 4  ;;  %v2455_v13 = vrot.slane %v2454_v50, 4  ;;  %v9964_v50 = vrot.slane %v2443_v10, 5  ;;  %v9992_v28 = vrot.slane %v2467_v6, 5  ;;  %v2857_v10 = vld [vmem:[#allocation2 + $0x28] sm:$0xf] }
  0xed   : > { %2087 = vrot.lane.b32.xlu0 %v2024_v60, %s9393_s11  ;;  %v2436_v60 = vsel %vm9855_vm13, %v9923_v30, %v9911_v7  ;;  %v2464_v7 = vor.u32 %v2463_v59, %v9925_v32  ;;  %v2422_v30 = vld [vmem:[#allocation2 + $0x2c] sm:$0x1]  ;;  %v2512_v51 = vor.u32 %v2511_v61, %v9953_v2  ;;  %v10002_v43 = vrot.slane %v2491_v27, 5  ;;  %v2848_v27 = vld [vmem:[#allocation2 + $0x4] sm:$0xf] }
  0xee   : > { %v2058_v59 = vsel %vm9855_vm13, %v9934_v54, %v9936_v33  ;;  %v2515_v9 = vshll.u32 %v2422_v30, 16  ;;  %v2446_v16 = vsel %vm9855_vm13, %v9951_v18, %v9964_v50  ;;  %v1555_v54 = vld [vmem:[#allocation2 + $0xc] sm:$0xf]  ;;  %v1570_v33 = vrot.slane %v1568_v39, 4 }
  0xef   : > { %v9988_v29 = vrot.slane %v2464_v7, 4  ;;  %v10015_v26 = vrot.slane %v2512_v51, 4  ;;  %v1592_v17 = vshrl.u32 %v1555_v54, 16  ;;  %v1595_v61 = vshll.u32 %v1555_v54, 16 }
  0xf0   : > { %3660 = vrot.lane.b32.xlu1 %v9871_v37, %s9394_s12  ;;  %v9949_v37 = vrot.slane %v2481_v41, 5  ;;  %v2460_v41 = vsel %vm9855_vm13, %v2455_v13, %v9925_v32  ;;  %v9990_v32 = vrot.slane %v2502_v49, 4  ;;  %v10023_v13 = vrot.slane %v664_v34, %v9740_v55 }
  0xf1   : > { %2091 = vrot.lane.b32.xlu0 %v2048_v11, %s9393_s11  ;;  %v1571_v11 = vshll.u32 %v1552_v53, 16  ;;  %v1558_v53 = vld [vmem:[#allocation2 + $0x18] sm:$0xf]  ;;  %v10058_v54 = vrot.slane %v631_v14, %v9740_v55  ;;  %v1594_v39 = vrot.slane %v1592_v17, 4  ;;  %v2856_v14 = vld [vmem:[#allocation2 + $0x24] sm:$0xe] }
  0xf2   : > { %v2488_v4 = vor.u32 %v2487_v47, %v9949_v37  ;;  %v10008_v47 = vld [vmem:[#allocation2 + $0x4] sm:$0xf]  ;;  %v1616_v49 = vshrl.u32 %v1558_v53, 16  ;;  %v1619_v6 = vshll.u32 %v1558_v53, 16  ;;  %v2851_v53 = vld [vmem:[#allocation2 + $0x10] sm:$0xf] }
  0xf3   : > { %v1573_v40 = vrot.slane %v1571_v11, 5  ;;  %v1577_v30 = vshll.u32 %v10008_v47, 16  ;;  %v1581_v62 = vshrl.u32 %v10008_v47, 16  ;;  %v2876_v34 = vrot.slane %v2848_v27, 5 }
  0xf4   : > { %2085 = vrot.lane.b32.xlu1 %v2010_v1, %s9393_s11  ;;  %v2082_v1 = vsel %vm9855_vm13, %v9945_v31, %v9947_v57  ;;  %v10000_v56 = vrot.slane %v2488_v4, 4  ;;  %v1561_v31 = vld [vmem:[#allocation2 + $0x24] sm:$0xf]  ;;  %v2847_v4 = vld [vmem:[#allocation2] sm:$0xe]  ;;  %v1597_v57 = vrot.slane %v1595_v61, 5 }
  0xf5   : > { %2095 = vrot.lane.b32.xlu0 %v2072_v46, %s9393_s11  ;;  %v2484_v46 = vsel %vm9855_vm13, %v9962_v22, %v9949_v37  ;;  %v10031_v37 = vld [vmem:[#allocation2 + $0x10] sm:$0xf]  ;;  %v1574_v7 = vor.u32 %v1573_v40, %v1570_v33  ;;  %v1640_v11 = vshrl.u32 %v1561_v31, 16  ;;  %v1643_v22 = vshll.u32 %v1561_v31, 16  ;;  %v10062_v33 = vld [vmem:[#allocation2 + $0x28] sm:$0xf] }
  0xf6   : > { %v2850_v40 = vld [vmem:[#allocation2 + $0xc] sm:$0xe]  ;;  %v2853_v31 = vld [vmem:[#allocation2 + $0x18] sm:$0xe]  ;;  %v1601_v38 = vshll.u32 %v10031_v37, 16  ;;  %v1618_v63 = vrot.slane %v1616_v49, 4  ;;  %v1598_v15 = vor.u32 %v1597_v57, %v1594_v39 }
  0xf7   : > { %v1621_v5 = vrot.slane %v1619_v6, 5  ;;  %v1642_v21 = vrot.slane %v1640_v11, 4  ;;  %v1645_v51 = vrot.slane %v1643_v22, 5  ;;  %v2883_v52 = vrot.slane %v2851_v53, 5  ;;  %v2852_v53 = vld [vmem:[#allocation2 + $0x14] sm:$0x1] }
  0xf8   : > { %2089 = vrot.lane.b32.xlu1 %v2034_v44, %s9393_s11  ;;  %v10017_v44 = vrot.slane %v2515_v9, 5  ;;  %v10052_v9 = vrot.slane %v665_v36, %v9740_v55  ;;  %v1575_v36 = vrot.slane %v1574_v7, 4  ;;  %v8927_v47 = vrot.slane %v2847_v4, 9 }
  0xf9   : > { %2519 = vrot.lane.b32.xlu0 %v2436_v60, %s9394_s12  ;;  %v8928_v17 = vrot.slane %v2850_v40, 9  ;;  %v8929_v61 = vrot.slane %v2853_v31, 9  ;;  %v2890_v60 = vrot.slane %v2854_v20, 5  ;;  %v8930_v49 = vrot.slane %v2856_v14, 9  ;;  %v2849_v40 = vld [vmem:[#allocation2 + $0x8] sm:$0x1] }
  0xfa   : > { %v2897_v11 = vrot.slane %v2857_v10, 5  ;;  %v10095_v39 = vrot.slane %v1601_v38, 5  ;;  %v1605_v22 = vshrl.u32 %v10031_v37, 16  ;;  %v14564_v10 = vsel %vm9855_vm13, %v9990_v32, %v9953_v2 }
  0xfb   : > { %v10078_v6 = vsel %vm9728_vm1, %v8928_v17, %v2883_v52  ;;  %v1622_v18 = vor.u32 %v1621_v5, %v1618_v63  ;;  %v1646_v50 = vor.u32 %v1645_v51, %v1642_v21  ;;  %v2878_v38 = vrot.slane %v2876_v34, 4  ;;  %v2855_v51 = vld [vmem:[#allocation2 + $0x20] sm:$0x1]  ;;  %v2858_v5 = vld [vmem:[#allocation2 + $0x2c] sm:$0x1] }
  0xfc   : > { %2093 = vrot.lane.b32.xlu1 %v2058_v59, %s9393_s11  ;;  %v10066_v59 = vrot.slane %v1577_v30, 5  ;;  %v1649_v30 = vshll.u32 %v10062_v33, 16  ;;  %v1599_v20 = vrot.slane %v1598_v15, 4  ;;  %v1653_v21 = vshrl.u32 %v10062_v33, 16 }
  0xfd   : > { %2523 = vrot.lane.b32.xlu0 %v2460_v41, %s9394_s12  ;;  %v10060_v41 = vld [vmem:[#allocation2 + $0x1c] sm:$0xf]  ;;  %v10124_v63 = vrot.slane %v1581_v62, 4  ;;  %v2879_v14 = vrot.slane %v2849_v40, 5  ;;  %v2886_v15 = vrot.slane %v2852_v53, 5  ;;  %v1623_v17 = vrot.slane %v1622_v18, 4 }
  0xfe   : > { %v1625_v7 = vshll.u32 %v10060_v41, 16  ;;  %v10093_v57 = vsel %vm9855_vm13, %v1575_v36, %v10066_v59  ;;  %v1629_v4 = vshrl.u32 %v10060_v41, 16  ;;  %v2906_v41 = vshrl.u32 %v10078_v6, 16 }
  0xff   : > { %v10115_v32 = vrot.slane %v1649_v30, 5  ;;  %v14565_v36 = vsel %vm9855_vm13, %v9988_v29, %v9992_v28  ;;  %v10133_v33 = vsel %vm9855_vm13, %v1599_v20, %v10095_v39  ;;  %v1647_v29 = vrot.slane %v1646_v50, 4 }
 0x100   : > { %2097 = vrot.lane.b32.xlu1 %v2082_v1, %s9393_s11  ;;  %v10074_v1 = vsel %vm9728_vm1, %v8927_v47, %v2876_v34  ;;  %v10113_v2 = vrot.slane %v1625_v7, 5  ;;  %v2885_v34 = vrot.slane %v2883_v52, 4  ;;  %v14566_v47 = vcombine.high %v9760_v25, %v9760_v25 }
 0x101   : > { %2527 = vrot.lane.b32.xlu0 %v2484_v46, %s9394_s12  ;;  %v10082_v46 = vsel %vm9728_vm1, %v8929_v61, %v2890_v60  ;;  %v2905_v37 = vshrl.u32 %v10074_v1, 16  ;;  %v2880_v61 = vsel %vm9728_vm1, %v2878_v38, %v2879_v14  ;;  %v2892_v7 = vrot.slane %v2890_v60, 4 }
 0x102   : > { %v2911_v27 = vshrl.u32 %v10082_v46, 16  ;;  %v2887_v52 = vsel %vm9728_vm1, %v2885_v34, %v2886_v15  ;;  %v2893_v30 = vrot.slane %v2855_v51, 5  ;;  %v2917_v40 = vshrl.u32 %v2880_v61, 16 }
 0x103   : > { %v2907_v62 = vpack.i.b16 %v2906_v41, %v2905_v37  ;;  %v14567_v18 = vsel %vm9855_vm13, %v10000_v56, %v10002_v43  ;;  %v10148_v50 = vsel %vm9855_vm13, %v1623_v17, %v10113_v2  ;;  %v10153_v60 = vsel %vm9855_vm13, %v1647_v29, %v10115_v32  ;;  %v1560_v56 = vld [vmem:[#allocation2 + $0x20] sm:$0x1] }
 0x104   : > { %2521 = vrot.lane.b32.xlu1 %v2446_v16, %s9394_s12  ;;  %v10107_v16 = vsel %vm9728_vm1, %v8930_v49, %v2897_v11  ;;  %v2899_v49 = vrot.slane %v2897_v11, 4  ;;  %v1631_v11 = vrot.slane %v1629_v4, 4  ;;  %v14568_v53 = vcombine.low %v9773_v45, %v9773_v45 }
 0x105   : > { %2531 = vrot.lane.b32.xlu0 %v14564_v10, %s9394_s12  ;;  %v2912_v31 = vshrl.u32 %v10107_v16, 16  ;;  %v2900_v10 = vrot.slane %v2858_v5, 5  ;;  %v2894_v37 = vsel %vm9728_vm1, %v2892_v7, %v2893_v30  ;;  %v2904_v4 = vpack.i.b16 %v10078_v6, %v10074_v1  ;;  %v1563_v5 = vld [vmem:[#allocation2 + $0x2c] sm:$0x1] }
 0x106   : > { %v2923_v20 = vshrl.u32 %v2894_v37, 16  ;;  %v1607_v14 = vrot.slane %v1605_v22, 4  ;;  %v10171_v34 = vrot.slane %v2907_v62, %v9662_v48  ;;  %v2910_v15 = vpack.i.b16 %v10107_v16, %v10082_v46  ;;  %v1554_v46 = vld [vmem:[#allocation2 + $0x8] sm:$0x1] }
 0x107   : > { %v2913_v28 = vpack.i.b16 %v2912_v31, %v2911_v27  ;;  %v2918_v27 = vshrl.u32 %v2887_v52, 16  ;;  %v2901_v41 = vsel %vm9728_vm1, %v2899_v49, %v2900_v10  ;;  %v1655_v31 = vrot.slane %v1653_v21, 4 }
 0x108   : > { %2525 = vrot.lane.b32.xlu1 %v14565_v36, %s9394_s12  ;;  %v2924_v51 = vshrl.u32 %v2901_v41, 16  ;;  %v1671_v36 = vpack.i.b16 %v10153_v60, %v10148_v50  ;;  %v14569_v1 = vsel %vm9855_vm13, %v10015_v26, %v10017_v44  ;;  %v1632_v6 = vor.u32 %v1631_v11, %v10113_v2 }
 0x109   : > { %724 = vrot.lane.b32.xlu0 %v14566_v47, %s9396_s13  ;;  %v10160_v43 = vrot.slane %v2913_v28, %v9662_v48  ;;  %v2919_v38 = vpack.i.b16 %v2918_v27, %v2917_v40  ;;  %v1635_v21 = vshll.u32 %v1560_v56, 16  ;;  %v10183_v17 = vrot.slane %v2904_v4, %v9662_v48 }
 0x10a   : > { %v2925_v47 = vpack.i.b16 %v2924_v51, %v2923_v20  ;;  %v14570_v22 = vcombine.high %v9773_v45, %v9773_v45  ;;  %v10190_v16 = vrot.slane %v2910_v15, %v9662_v48  ;;  %v2916_v29 = vpack.i.b16 %v2887_v52, %v2880_v61  ;;  %v1557_v45 = vld [vmem:[#allocation2 + $0x14] sm:$0x1] }
 0x10b   : > { %v2922_v26 = vpack.i.b16 %v2901_v41, %v2894_v37  ;;  %v1656_v2 = vor.u32 %v1655_v31, %v10115_v32  ;;  %v1659_v28 = vshll.u32 %v1563_v5, 16  ;;  %v10196_v62 = vrot.slane %v2919_v38, %v9662_v48 }
 0x10c   : > { %2529 = vrot.lane.b32.xlu1 %v14567_v18, %s9394_s12  ;;  %v10199_v7 = vrot.slane %v2925_v47, %v9662_v48  ;;  %v10204_v49 = vrot.slane %v2916_v29, %v9662_v48  ;;  %v14571_v52 = vcombine.high %v10023_v13, %v10023_v13  ;;  %v8836_v10 = vcombine.low %v10052_v9, %v10052_v9 }
 0x10d   : > { %734 = vrot.lane.b32.xlu0 %v14568_v53, %s9397_s14  ;;  %v10207_v61 = vrot.slane %v2922_v26, %v9662_v48  ;;  %v1665_v40 = vpack.i.b16 %v10133_v33, %v10093_v57  ;;  %v1587_v18 = vshll.u32 %v1554_v46, 16  ;;  %v14572_v27 = vcombine.low %v9796_v12, %v9796_v12 }
 0x10e   : > { %v1584_v53 = vor.u32 %v10124_v63, %v10066_v59  ;;  %v1608_v56 = vor.u32 %v1607_v14, %v10095_v39  ;;  %v1702_v4 = vrot.slane %v1671_v36, %v9662_v48  ;;  %v1672_v31 = vshrl.u32 %v10148_v50, 16 }
 0x10f   : > { %v1673_v38 = vshrl.u32 %v10153_v60, 16  ;;  %v1611_v20 = vshll.u32 %v1557_v45, 16  ;;  %v1633_v51 = vrot.slane %v1632_v6, 4  ;;  %v1637_v5 = vrot.slane %v1635_v21, 5 }
 0x110   : > { %2533 = vrot.lane.b32.xlu1 %v14569_v1, %s9394_s12  ;;  %v1657_v15 = vrot.slane %v1656_v2, 4  ;;  %v1661_v1 = vrot.slane %v1659_v28, 5  ;;  %v8830_v59 = vcombine.low %v10058_v54, %v10058_v54  ;;  %v1666_v39 = vshrl.u32 %v10093_v57, 16 }
 0x111   : > { %744 = vrot.lane.b32.xlu0 %v14570_v22, %s9398_s15  ;;  %v14573_v63 = vcombine.high %v9796_v12, %v9796_v12  ;;  %v1694_v50 = vrot.slane %v1665_v40, %v9662_v48  ;;  %v1667_v60 = vshrl.u32 %v10133_v33, 16  ;;  %v1585_v36 = vrot.slane %v1584_v53, 4 }
 0x112   : > { %v1609_v14 = vrot.slane %v1608_v56, 4  ;;  %v9202_v6 = vcombine.high %v10052_v9, %v10052_v9  ;;  %v14574_v21 = vcombine.low %v9788_v58, %v9812_v23  ;;  %v1674_v47 = vpack.i.b16 %v1673_v38, %v1672_v31 }
 0x113   : > { %v1589_v22 = vrot.slane %v1587_v18, 5  ;;  %v1703_v12 = vcombine.low %v1694_v50, %v1702_v4  ;;  %v1613_v29 = vrot.slane %v1611_v20, 5  ;;  %v1638_v26 = vsel %vm9855_vm13, %v1633_v51, %v1637_v5 }
 0x114   : > { %759 = vrot.lane.b32.xlu1 %v14571_v52, %s9396_s13  ;;  %v706_v57 = vrot.slane %v14574_v21, %v9740_v55  ;;  %v1662_v33 = vsel %vm9855_vm13, %v1657_v15, %v1661_v1  ;;  %v1668_v9 = vpack.i.b16 %v1667_v60, %v1666_v39  ;;  %v9199_v40 = vcombine.high %v10058_v54, %v10058_v54 }
 0x115   : > { %719 = vrot.lane.b32.xlu0 %v14572_v27, %s9399_s16  ;;  %v1590_v2 = vsel %vm9855_vm13, %v1585_v36, %v1589_v22  ;;  %v1614_v28 = vsel %vm9855_vm13, %v1609_v14, %v1613_v29  ;;  %v1683_v52 = vpack.i.b16 %v1662_v33, %v1638_v26  ;;  %v10268_v18 = vrot.slane %v1703_v12, %v9740_v55 }
 0x116   : > { %v8833_v45 = vcombine.low %v706_v57, %v706_v57  ;;  %v1704_v27 = vcombine.high %v1694_v50, %v1702_v4  ;;  %v1736_v53 = vrot.slane %v1674_v47, %v9662_v48  ;;  %v1677_v56 = vpack.i.b16 %v1614_v28, %v1590_v2 }
 0x117   : > { %v9201_v31 = vcombine.high %v706_v57, %v706_v57  ;;  %v1728_v38 = vrot.slane %v1668_v9, %v9662_v48  ;;  %v14575_v20 = vcombine.high %v9788_v58, %v9812_v23  ;;  %v1770_v51 = vrot.slane %v1683_v52, %v9662_v48 }
 0x118   : > { %769 = vrot.lane.b32.xlu1 %v8836_v10, %s9397_s14  ;;  %v1684_v5 = vshrl.u32 %v1638_v26, 16  ;;  %v1685_v4 = vshrl.u32 %v1662_v33, 16  ;;  %v9220_v1 = vcombine.high %v10268_v18, %v10268_v18  ;;  %v1678_v50 = vshrl.u32 %v1590_v2, 16 }
 0x119   : > { %729 = vrot.lane.b32.xlu0 %v14573_v63, %s9400_s17  ;;  %v713_v54 = vrot.slane %v14575_v20, %v9740_v55  ;;  %v1737_v39 = vcombine.low %v1728_v38, %v1736_v53  ;;  %v1762_v63 = vrot.slane %v1677_v56, %v9662_v48  ;;  %v1679_v60 = vshrl.u32 %v1614_v28, 16 }
 0x11a   : > { %v1686_v14 = vpack.i.b16 %v1685_v4, %v1684_v5  ;;  %v1738_v28 = vcombine.high %v1728_v38, %v1736_v53 }
 0x11b   : > { %v10251_v46 = vpop.permute.xlu0 %832  ;;  %v8837_v23 = vcombine.low %v713_v54, %v713_v54  ;;  %v1771_v36 = vcombine.low %v1762_v63, %v1770_v51  ;;  %v1745_v57 = vrot.slane %v1737_v39, %v9740_v55  ;;  %v1680_v47 = vpack.i.b16 %v1679_v60, %v1678_v50 }
 0x11c   : > { %779 = vrot.lane.b32.xlu1 %v9202_v6, %s9398_s15  ;;  %v9203_v12 = vcombine.high %v713_v54, %v713_v54  ;;  %v1772_v26 = vcombine.high %v1762_v63, %v1770_v51  ;;  %v1804_v33 = vrot.slane %v1686_v14, %v9662_v48  ;;  %v1752_v54 = vrot.slane %v1738_v28, %v9740_v55 }
 0x11d   : > { %739 = vrot.lane.b32.xlu0 %v8830_v59, %s9401_s23  ;;  %v1718_v59 = vrot.slane %v1704_v27, %v9740_v55  ;;  %v10297_v29 = vrot.slane %v1771_v36, %v9740_v55  ;;  %v8876_v2 = vcombine.low %v1745_v57, %v1745_v57  ;;  %v9221_v20 = vcombine.high %v1745_v57, %v1745_v57 }
 0x11e   : > { %v1786_v27 = vrot.slane %v1772_v26, %v9740_v55  ;;  %v9223_v28 = vcombine.high %v1752_v54, %v1752_v54 }
 0x11f   : > { %v10263_v10 = vpop.permute.xlu0 %836  ;;  %v8879_v21 = vcombine.low %v1718_v59, %v1718_v59  ;;  %v9222_v14 = vcombine.high %v1718_v59, %v1718_v59 }
 0x120   : > { %754 = vrot.lane.b32.xlu1 %v8833_v45, %s9399_s16  ;;  %v1796_v45 = vrot.slane %v1680_v47, %v9662_v48  ;;  %v8886_v38 = vcombine.low %v1786_v27, %v1786_v27  ;;  %v850_v39 = vpack.i.b16 %v10263_v10, %v10251_v46 }
 0x121   : > { %749 = vrot.lane.b32.xlu0 %v9199_v40, %s9402_s25  ;;  %v9224_v40 = vcombine.high %v10297_v29, %v10297_v29 }
 0x122   : > { %v1805_v56 = vcombine.low %v1796_v45, %v1804_v33  ;;  %v1806_v60 = vcombine.high %v1796_v45, %v1804_v33  ;;  %v879_v57 = vrot.slane %v850_v39, %v9662_v48 }
 0x123   : > { %v10279_v15 = vpop.permute.xlu0 %840 }
 0x124   : > { %764 = vrot.lane.b32.xlu1 %v9201_v31, %s9400_s17  ;;  %v1813_v51 = vrot.slane %v1805_v56, %v9740_v55  ;;  %v1820_v26 = vrot.slane %v1806_v60, %v9740_v55 }
 0x125   : > { %1831 = vrot.lane.b32.xlu0 %v9220_v1, %s9396_s13  ;;  %v8880_v1 = vcombine.low %v1752_v54, %v1752_v54 }
 0x126   : > { %v10287_v58 = vpop.permute.xlu1 %834  ;;  %v8883_v50 = vcombine.low %v1813_v51, %v1813_v51  ;;  %v8887_v56 = vcombine.low %v1820_v26, %v1820_v26 }
 0x127   : > { %v10289_v6 = vpop.permute.xlu0 %844 }
 0x128   : > { %774 = vrot.lane.b32.xlu1 %v8837_v23, %s9401_s23  ;;  %v856_v5 = vpack.i.b16 %v10289_v6, %v10279_v15  ;;  %v858_v11 = vshrl.u32 %v10289_v6, 16 }
 0x129   : > { %1841 = vrot.lane.b32.xlu0 %v8879_v21, %s9397_s14  ;;  %v2976_v21 = vcombine.low %v10171_v34, %v10160_v43 }
 0x12a   : > { %v10294_v22 = vpop.permute.xlu1 %838  ;;  %v887_v23 = vrot.slane %v856_v5, %v9662_v48 }
 0x12b   : > { %v10300_v9 = vpop.permute.xlu0 %1224  ;;  %v10342_v59 = vrot.slane %v2976_v21, %v9740_v55 }
 0x12c   : > { %784 = vrot.lane.b32.xlu1 %v9203_v12, %s9402_s25  ;;  %v9225_v12 = vcombine.high %v1813_v51, %v1813_v51  ;;  %v888_v33 = vcombine.low %v879_v57, %v887_v23 }
 0x12d   : > { %1826 = vrot.lane.b32.xlu0 %v8876_v2, %s9399_s16  ;;  %v8931_v54 = vcombine.low %v10342_v59, %v10342_v59 }
 0x12e   : > { %v10305_v52 = vpop.permute.xlu1 %842  ;;  %v10357_v5 = vrot.slane %v888_v33, %v9740_v55 }
 0x12f   : > { %v10310_v31 = vpop.permute.xlu0 %1228 }
 0x130   : > { %1866 = vrot.lane.b32.xlu1 %v9224_v40, %s9396_s13  ;;  %14576 = vst [vmem:[#allocation16_spill] sm:$0xff] %v10357_v5  ;;  %v1242_v39 = vpack.i.b16 %v10310_v31, %v10300_v9 }
 0x131   : > { %1836 = vrot.lane.b32.xlu0 %v9221_v20, %s9400_s17  ;;  %v889_v20 = vcombine.high %v879_v57, %v887_v23 }
 0x132   : > { %v10315_v53 = vpop.permute.xlu1 %846 }
 0x133   : > { %v10320_v4 = vpop.permute.xlu0 %1232  ;;  %v868_v45 = vpack.i.b16 %v10315_v53, %v10305_v52  ;;  %v903_v33 = vrot.slane %v889_v20, %v9740_v55 }
 0x134   : > { %1876 = vrot.lane.b32.xlu1 %v8886_v38, %s9397_s14 }
 0x135   : > { %1846 = vrot.lane.b32.xlu0 %v8880_v1, %s9401_s23  ;;  %v862_v1 = vpack.i.b16 %v10294_v22, %v10287_v58  ;;  %v955_v60 = vrot.slane %v868_v45, %v9662_v48  ;;  %v8843_v20 = vcombine.low %v903_v33, %v903_v33 }
 0x136   : > { %v10326_v63 = vpop.permute.xlu1 %1226 }
 0x137   : > { %v10329_v36 = vpop.permute.xlu0 %1236 }
 0x138   : > { %1861 = vrot.lane.b32.xlu1 %v8883_v50, %s9399_s16  ;;  %v1248_v38 = vpack.i.b16 %v10329_v36, %v10320_v4  ;;  %v3044_v50 = vcombine.low %v10196_v62, %v10199_v7  ;;  %v1250_v19 = vshrl.u32 %v10329_v36, 16 }
 0x139   : > { %1851 = vrot.lane.b32.xlu0 %v9222_v14, %s9398_s15  ;;  %v9226_v14 = vcombine.high %v1786_v27, %v1786_v27 }
 0x13a   : > { %v10336_v47 = vpop.permute.xlu1 %1230  ;;  %v1279_v21 = vrot.slane %v1248_v38, %v9662_v48  ;;  %v10381_v45 = vrot.slane %v3044_v50, %v9740_v55 }
 0x13b   : > { %v10339_v2 = vpop.permute.xlu0 %3266 }
 0x13c   : > { %1871 = vrot.lane.b32.xlu1 %v9225_v12, %s9400_s17  ;;  %v9204_v12 = vcombine.high %v10357_v5, %v10357_v5  ;;  %v8938_v50 = vcombine.low %v10381_v45, %v10381_v45 }
 0x13d   : > { %1856 = vrot.lane.b32.xlu0 %v9223_v28, %s9402_s25  ;;  %v947_v28 = vrot.slane %v862_v1, %v9662_v48  ;;  %v852_v1 = vshrl.u32 %v10263_v10, 16 }
 0x13e   : > { %v10348_v40 = vpop.permute.xlu1 %1234 }
 0x13f   : > { %v10352_v51 = vpop.permute.xlu0 %3270  ;;  %v956_v27 = vcombine.low %v947_v28, %v955_v60 }
 0x140   : > { %1881 = vrot.lane.b32.xlu1 %v8887_v56, %s9401_s23  ;;  %v1271_v56 = vrot.slane %v1242_v39, %v9662_v48  ;;  %v857_v39 = vshrl.u32 %v10279_v15, 16  ;;  %v9206_v15 = vcombine.high %v903_v33, %v903_v33 }
 0x141   : > { %3065 = vrot.lane.b32.xlu0 %v8931_v54, %s9399_s16  ;;  %v9227_v54 = vcombine.high %v1820_v26, %v1820_v26  ;;  %v957_v26 = vcombine.high %v947_v28, %v955_v60  ;;  %v10400_v32 = vrot.slane %v956_v27, %v9740_v55 }
 0x142   : > { %v10368_v23 = vpop.permute.xlu1 %1238  ;;  %v1280_v41 = vcombine.low %v1271_v56, %v1279_v21  ;;  %v1281_v10 = vcombine.high %v1271_v56, %v1279_v21 }
 0x143   : > { %v10371_v57 = vpop.permute.xlu0 %3274  ;;  %v1260_v6 = vpack.i.b16 %v10368_v23, %v10348_v40  ;;  %14577 = vst [vmem:[#allocation17_spill] sm:$0xff] %v10400_v32  ;;  %v971_v21 = vrot.slane %v957_v26, %v9740_v55 }
 0x144   : > { %1886 = vrot.lane.b32.xlu1 %v9226_v14, %s9398_s15  ;;  %v851_v14 = vshrl.u32 %v10251_v46, 16  ;;  %v1254_v46 = vpack.i.b16 %v10336_v47, %v10326_v63 }
 0x145   : > { %1016 = vrot.lane.b32.xlu0 %v9204_v12, %s9396_s13  ;;  %v1347_v28 = vrot.slane %v1260_v6, %v9662_v48  ;;  %v9210_v42 = vcombine.high %v971_v21, %v971_v21 }
 0x146   : > { %v10383_v38 = vpop.permute.xlu1 %3268  ;;  %v853_v60 = vpack.i.b16 %v852_v1, %v851_v14  ;;  %v1295_v1 = vrot.slane %v1281_v10, %v9740_v55  ;;  %v870_v14 = vshrl.u32 %v10315_v53, 16  ;;  %v864_v10 = vshrl.u32 %v10294_v22, 16 }
 0x147   : > { %v10386_v44 = vpop.permute.xlu0 %3278 }
 0x148   : > { %1891 = vrot.lane.b32.xlu1 %v9227_v54, %s9402_s25  ;;  %v859_v54 = vpack.i.b16 %v858_v11, %v857_v39  ;;  %v9208_v11 = vcombine.high %v10400_v32, %v10400_v32  ;;  %v1339_v39 = vrot.slane %v1254_v46, %v9662_v48  ;;  %v8862_v24 = vcombine.low %v1295_v1, %v1295_v1 }
 0x149   : > { %1026 = vrot.lane.b32.xlu0 %v8843_v20, %s9397_s14  ;;  %v10405_v20 = vrot.slane %v1280_v41, %v9740_v55  ;;  %v869_v46 = vshrl.u32 %v10305_v52, 16  ;;  %v9214_v22 = vcombine.high %v1295_v1, %v1295_v1 }
 0x14a   : > { %v10397_v12 = vpop.permute.xlu1 %3272  ;;  %v921_v41 = vrot.slane %v859_v54, %v9662_v48  ;;  %v1348_v26 = vcombine.low %v1339_v39, %v1347_v28  ;;  %v8850_v54 = vcombine.low %v971_v21, %v971_v21  ;;  %v1349_v53 = vcombine.high %v1339_v39, %v1347_v28 }
 0x14b   : > { %v10402_v37 = vpop.permute.xlu0 %3646  ;;  %14578 = vst [vmem:[#allocation18_spill] sm:$0xff] %v10405_v20  ;;  %v9212_v56 = vcombine.high %v10405_v20, %v10405_v20 }
 0x14c   : > { %3100 = vrot.lane.b32.xlu1 %v8938_v50, %s9399_s16  ;;  %v913_v50 = vrot.slane %v853_v60, %v9662_v48  ;;  %v863_v60 = vshrl.u32 %v10287_v58, 16  ;;  %v10440_v35 = vrot.slane %v1348_v26, %v9740_v55  ;;  %v1249_v58 = vshrl.u32 %v10320_v4, 16 }
 0x14d   : > { %1036 = vrot.lane.b32.xlu0 %v9206_v15, %s9398_s15  ;;  %v1363_v1 = vrot.slane %v1349_v53, %v9740_v55  ;;  %v1262_v53 = vshrl.u32 %v10368_v23, 16  ;;  %v1255_v23 = vshrl.u32 %v10326_v63, 16 }
 0x14e   : > { %v10412_v27 = vpop.permute.xlu1 %3276  ;;  %v922_v15 = vcombine.low %v913_v50, %v921_v41  ;;  %14580 = vst [vmem:[#allocation20_spill] sm:$0xff] %v10440_v35  ;;  %v9216_v36 = vcombine.high %v10440_v35, %v10440_v35  ;;  %v923_v39 = vcombine.high %v913_v50, %v921_v41  ;;  %v1251_v26 = vpack.i.b16 %v1250_v19, %v1249_v58 }
 0x14f   : > { %v10418_v33 = vpop.permute.xlu0 %3650 }
 0x150   : > { %1051 = vrot.lane.b32.xlu1 %v9208_v11, %s9396_s13  ;;  %v871_v11 = vpack.i.b16 %v870_v14, %v869_v46  ;;  %v930_v52 = vrot.slane %v922_v15, %v9740_v55  ;;  %v1243_v14 = vshrl.u32 %v10300_v9, 16  ;;  %v937_v19 = vrot.slane %v923_v39, %v9740_v55 }
 0x151   : > { %1408 = vrot.lane.b32.xlu0 %v9212_v56, %s9396_s13  ;;  %v1261_v39 = vshrl.u32 %v10348_v40, 16 }
 0x152   : > { %v10428_v6 = vpop.permute.xlu1 %3280  ;;  %v989_v28 = vrot.slane %v871_v11, %v9662_v48  ;;  %v1313_v11 = vrot.slane %v1251_v26, %v9662_v48  ;;  %v9205_v9 = vcombine.high %v930_v52, %v930_v52 }
 0x153   : > { %v10430_v30 = vpop.permute.xlu0 %3654 }
 0x154   : > { %1061 = vrot.lane.b32.xlu1 %v8850_v54, %s9397_s14  ;;  %v865_v54 = vpack.i.b16 %v864_v10, %v863_v60  ;;  %v8869_v60 = vcombine.low %v1363_v1, %v1363_v1 }
 0x155   : > { %1418 = vrot.lane.b32.xlu0 %v8862_v24, %s9397_s14  ;;  %v1244_v24 = vshrl.u32 %v10310_v31, 16  ;;  %v8840_v31 = vcombine.low %v930_v52, %v930_v52  ;;  %v1256_v52 = vshrl.u32 %v10336_v47, 16 }
 0x156   : > { %v10437_v56 = vpop.permute.xlu1 %3648  ;;  %v981_v4 = vrot.slane %v865_v54, %v9662_v48  ;;  %v9218_v54 = vcombine.high %v1363_v1, %v1363_v1 }
 0x157   : > { %14579 = vst [vmem:[#allocation19_spill] sm:$0xff] %v10437_v56  ;;  %v10443_v8 = vpop.permute.xlu0 %3658  ;;  %v1245_v15 = vpack.i.b16 %v1244_v24, %v1243_v14  ;;  %v8844_v14 = vcombine.low %v937_v19, %v937_v19  ;;  %v1257_v3 = vpack.i.b16 %v1256_v52, %v1255_v23 }
 0x158   : > { %1071 = vrot.lane.b32.xlu1 %v9210_v42, %s9398_s15  ;;  %v990_v10 = vcombine.low %v981_v4, %v989_v28  ;;  %v991_v26 = vcombine.high %v981_v4, %v989_v28 }
 0x159   : > { %1428 = vrot.lane.b32.xlu0 %v9214_v22, %s9398_s15  ;;  %v1305_v50 = vrot.slane %v1245_v15, %v9662_v48 }
 0x15a   : > { %v10451_v21 = vpop.permute.xlu1 %3652  ;;  %v998_v24 = vrot.slane %v990_v10, %v9740_v55  ;;  %v1005_v63 = vrot.slane %v991_v26, %v9740_v55 }
 0x15b   : > { %14581 = vst [vmem:[#allocation21_spill] sm:$0xff] %v10451_v21  ;;  %v10457_v42 = vpop.permute.xlu0 %2083  ;;  %v1314_v58 = vcombine.low %v1305_v50, %v1313_v11  ;;  %v1315_v4 = vcombine.high %v1305_v50, %v1313_v11 }
 0x15c   : > { %1443 = vrot.lane.b32.xlu1 %v9216_v36, %s9396_s13  ;;  %v8847_v1 = vcombine.low %v998_v24, %v998_v24  ;;  %v9209_v28 = vcombine.high %v998_v24, %v998_v24  ;;  %v8851_v24 = vcombine.low %v1005_v63, %v1005_v63 }
 0x15d   : > { %1011 = vrot.lane.b32.xlu0 %v8840_v31, %s9399_s16  ;;  %v1263_v31 = vpack.i.b16 %v1262_v53, %v1261_v39  ;;  %v1329_v23 = vrot.slane %v1315_v4, %v9740_v55 }
 0x15e   : > { %v10462_v46 = vpop.permute.xlu1 %3656 }
 0x15f   : > { %14582 = vst [vmem:[#allocation22_spill] sm:$0xff] %v10462_v46  ;;  %v10465_v41 = vpop.permute.xlu0 %2087  ;;  %v1381_v47 = vrot.slane %v1263_v31, %v9662_v48 }
 0x160   : > { %1453 = vrot.lane.b32.xlu1 %v8869_v60, %s9397_s14  ;;  %v9207_v60 = vcombine.high %v937_v19, %v937_v19 }
 0x161   : > { %1021 = vrot.lane.b32.xlu0 %v9205_v9, %s9400_s17  ;;  %v1322_v9 = vrot.slane %v1314_v58, %v9740_v55  ;;  %v1373_v58 = vrot.slane %v1257_v3, %v9662_v48 }
 0x162   : > { %v10472_v22 = vpop.permute.xlu1 %3660 }
 0x163   : > { %14583 = vst [vmem:[#allocation23_spill] sm:$0xff] %v10472_v22  ;;  %v10475_v36 = vpop.permute.xlu0 %2091  ;;  %v8859_v19 = vcombine.low %v1322_v9, %v1322_v9  ;;  %v1382_v52 = vcombine.low %v1373_v58, %v1381_v47  ;;  %v9213_v26 = vcombine.high %v1322_v9, %v1322_v9  ;;  %v1383_v9 = vcombine.high %v1373_v58, %v1381_v47 }
 0x164   : > { %1463 = vrot.lane.b32.xlu1 %v9218_v54, %s9398_s15  ;;  %v2103_v58 = vshrl.u32 %v10465_v41, 16 }
 0x165   : > { %1031 = vrot.lane.b32.xlu0 %v8844_v14, %s9401_s23  ;;  %v2101_v14 = vpack.i.b16 %v10465_v41, %v10457_v42  ;;  %v1397_v20 = vrot.slane %v1383_v9, %v9740_v55 }
 0x166   : > { %v10482_v15 = vpop.permute.xlu1 %2085 }
 0x167   : > { %v2096_v10 = vpop.permute.xlu0 %2095  ;;  %v2130_v3 = vrot.slane %v2101_v14, %v9662_v48 }
 0x168   : > { %1046 = vrot.lane.b32.xlu1 %v8847_v1, %s9399_s16  ;;  %v2107_v53 = vpack.i.b16 %v2096_v10, %v10475_v36  ;;  %v9211_v1 = vcombine.high %v1005_v63, %v1005_v63 }
 0x169   : > { %1041 = vrot.lane.b32.xlu0 %v9207_v60, %s9402_s25  ;;  %v1390_v60 = vrot.slane %v1382_v52, %v9740_v55  ;;  %v9215_v52 = vcombine.high %v1329_v23, %v1329_v23 }
 0x16a   : > { %v10488_v40 = vpop.permute.xlu1 %2089  ;;  %v2138_v11 = vrot.slane %v2107_v53, %v9662_v48  ;;  %v8863_v53 = vcombine.low %v1329_v23, %v1329_v23 }
 0x16b   : > { %v10492_v54 = vpop.permute.xlu0 %2519 }
 0x16c   : > { %1056 = vrot.lane.b32.xlu1 %v9209_v28, %s9400_s17  ;;  %v2139_v28 = vcombine.low %v2130_v3, %v2138_v11  ;;  %v2140_v0 = vcombine.high %v2130_v3, %v2138_v11  ;;  %v2102_v11 = vshrl.u32 %v10457_v42, 16 }
 0x16d   : > { %1403 = vrot.lane.b32.xlu0 %v8859_v19, %s9399_s16 }
 0x16e   : > { %v10499_v39 = vpop.permute.xlu1 %2093  ;;  %v10522_v35 = vrot.slane %v2139_v28, %v9740_v55  ;;  %v9217_v28 = vcombine.high %v1390_v60, %v1390_v60 }
 0x16f   : > { %v10502_v50 = vpop.permute.xlu0 %2523 }
 0x170   : > { %1066 = vrot.lane.b32.xlu1 %v8851_v24, %s9401_s23  ;;  %v8866_v24 = vcombine.low %v1390_v60, %v1390_v60  ;;  %14584 = vst [vmem:[#allocation24_spill] sm:$0xff] %v10522_v35 }
 0x171   : > { %1413 = vrot.lane.b32.xlu0 %v9213_v26, %s9400_s17  ;;  %v2109_v26 = vshrl.u32 %v2096_v10, 16  ;;  %v2537_v10 = vpack.i.b16 %v10502_v50, %v10492_v54 }
 0x172   : > { %v10508_v31 = vpop.permute.xlu1 %2097 }
 0x173   : > { %v10511_v19 = vpop.permute.xlu0 %2527  ;;  %v2119_v4 = vpack.i.b16 %v10508_v31, %v10499_v39  ;;  %v10550_v60 = vrot.slane %v2537_v10, %v9662_v48  ;;  %v2121_v10 = vshrl.u32 %v10508_v31, 16  ;;  %v2120_v31 = vshrl.u32 %v10499_v39, 16 }
 0x174   : > { %1076 = vrot.lane.b32.xlu1 %v9211_v1, %s9402_s25  ;;  %v2113_v1 = vpack.i.b16 %v10488_v40, %v10482_v15 }
 0x175   : > { %1423 = vrot.lane.b32.xlu0 %v8863_v53, %s9401_s23  ;;  %v2108_v53 = vshrl.u32 %v10475_v36, 16  ;;  %v2206_v23 = vrot.slane %v2119_v4, %v9662_v48  ;;  %v9228_v36 = vcombine.high %v10522_v35, %v10522_v35  ;;  %v2104_v4 = vpack.i.b16 %v2103_v58, %v2102_v11 }
 0x176   : > { %v10517_v14 = vpop.permute.xlu1 %2521  ;;  %v2198_v42 = vrot.slane %v2113_v1, %v9662_v48 }
 0x177   : > { %v10519_v63 = vpop.permute.xlu0 %2531  ;;  %v2110_v32 = vpack.i.b16 %v2109_v26, %v2108_v53  ;;  %v2164_v58 = vrot.slane %v2104_v4, %v9662_v48 }
 0x178   : > { %v2543_v47 = vpack.i.b16 %v10519_v63, %v10511_v19  ;;  %1438 = vrot.lane.b32.xlu1 %v8866_v24, %s9399_s16  ;;  %v2207_v9 = vcombine.low %v2198_v42, %v2206_v23  ;;  %v2208_v11 = vcombine.high %v2198_v42, %v2206_v23  ;;  %v2114_v23 = vshrl.u32 %v10482_v15, 16 }
 0x179   : > { %1433 = vrot.lane.b32.xlu0 %v9215_v52, %s9402_s25  ;;  %v2154_v52 = vrot.slane %v2140_v0, %v9740_v55  ;;  %v2172_v53 = vrot.slane %v2110_v32, %v9662_v48  ;;  %v2122_v42 = vpack.i.b16 %v2121_v10, %v2120_v31  ;;  %v2545_v39 = vshrl.u32 %v10519_v63, 16 }
 0x17a   : > { %v10536_v3 = vpop.permute.xlu1 %2525  ;;  %v10540_v24 = vrot.slane %v2543_v47, %v9662_v48  ;;  %v8870_v47 = vcombine.low %v1397_v20, %v1397_v20  ;;  %v10567_v32 = vrot.slane %v2207_v9, %v9740_v55 }
 0x17b   : > { %v10542_v41 = vpop.permute.xlu0 %724  ;;  %v8896_v1 = vcombine.low %v2154_v52, %v2154_v52  ;;  %v2173_v5 = vcombine.low %v2164_v58, %v2172_v53  ;;  %v10601_v63 = vrot.slane %v2122_v42, %v9662_v48 }
 0x17c   : > { %1448 = vrot.lane.b32.xlu1 %v9217_v28, %s9400_s17  ;;  %v2575_v35 = vcombine.low %v10550_v60, %v10540_v24  ;;  %14585 = vst [vmem:[#allocation25_spill] sm:$0xff] %v10567_v32 }
 0x17d   : > { %2267 = vrot.lane.b32.xlu0 %v9228_v36, %s9396_s13  ;;  %v9219_v36 = vcombine.high %v1397_v20, %v1397_v20  ;;  %v2549_v20 = vpack.i.b16 %v10536_v3, %v10517_v14  ;;  %v2181_v15 = vrot.slane %v2173_v5, %v9740_v55 }
 0x17e   : > { %v10553_v26 = vpop.permute.xlu1 %2529  ;;  %v10574_v4 = vrot.slane %v2575_v35, %v9740_v55  ;;  %v9232_v35 = vcombine.high %v10567_v32, %v10567_v32 }
 0x17f   : > { %v10558_v0 = vpop.permute.xlu0 %734  ;;  %v10594_v10 = vrot.slane %v2549_v20, %v9662_v48  ;;  %v2538_v20 = vshrl.u32 %v10492_v54, 16 }
 0x180   : > { %1458 = vrot.lane.b32.xlu1 %v8870_v47, %s9401_s23  ;;  %v9230_v47 = vcombine.high %v2154_v52, %v2154_v52  ;;  %14586 = vst [vmem:[#allocation26_spill] sm:$0xff] %v10574_v4 }
 0x181   : > { %2277 = vrot.lane.b32.xlu0 %v8896_v1, %s9397_s14  ;;  %v2115_v1 = vshrl.u32 %v10488_v40, 16  ;;  %v2222_v40 = vrot.slane %v2208_v11, %v9740_v55 }
 0x182   : > { %v10564_v28 = vpop.permute.xlu1 %2533 }
 0x183   : > { %v2555_v56 = vpack.i.b16 %v10564_v28, %v10553_v26  ;;  %v10571_v46 = vpop.permute.xlu0 %744  ;;  %v2116_v22 = vpack.i.b16 %v2115_v1, %v2114_v23  ;;  %v8903_v5 = vcombine.low %v2222_v40, %v2222_v40  ;;  %v2174_v1 = vcombine.high %v2164_v58, %v2172_v53 }
 0x184   : > { %1468 = vrot.lane.b32.xlu1 %v9219_v36, %s9402_s25  ;;  %v9236_v36 = vcombine.high %v10574_v4, %v10574_v4  ;;  %v9234_v32 = vcombine.high %v2222_v40, %v2222_v40  ;;  %v2557_v40 = vshrl.u32 %v10564_v28, 16 }
 0x185   : > { %2287 = vrot.lane.b32.xlu0 %v9230_v47, %s9398_s15  ;;  %v10584_v9 = vrot.slane %v2555_v56, %v9662_v48  ;;  %v2539_v56 = vshrl.u32 %v10502_v50, 16  ;;  %v2544_v47 = vshrl.u32 %v10511_v19, 16  ;;  %v2232_v50 = vrot.slane %v2116_v22, %v9662_v48 }
 0x186   : > { %v760_v52 = vpop.permute.xlu1 %759  ;;  %v2188_v22 = vrot.slane %v2174_v1, %v9740_v55 }
 0x187   : > { %v720_v21 = vpop.permute.xlu0 %719  ;;  %v2643_v11 = vcombine.low %v10594_v10, %v10584_v9  ;;  %v2546_v23 = vpack.i.b16 %v2545_v39, %v2544_v47  ;;  %v2540_v19 = vpack.i.b16 %v2539_v56, %v2538_v20  ;;  %v2241_v42 = vcombine.low %v2232_v50, %v10601_v63 }
 0x188   : > { %2302 = vrot.lane.b32.xlu1 %v9232_v35, %s9396_s13  ;;  %v8893_v35 = vcombine.low %v2181_v15, %v2181_v15  ;;  %v9229_v39 = vcombine.high %v2181_v15, %v2181_v15  ;;  %v789_v47 = vsel %vm786_vm15, %v9760_v25, %v720_v21  ;;  %v8897_v25 = vcombine.low %v2188_v22, %v2188_v22 }
 0x189   : > { %2703 = vrot.lane.b32.xlu0 %v9236_v36, %s9396_s13  ;;  %v10613_v53 = vrot.slane %v2643_v11, %v9740_v55  ;;  %v10616_v54 = vrot.slane %v2546_v23, %v9662_v48  ;;  %v10621_v56 = vrot.slane %v2540_v19, %v9662_v48  ;;  %v2551_v21 = vshrl.u32 %v10536_v3, 16 }
 0x18a   : > { %v770_v31 = vpop.permute.xlu1 %769  ;;  %v2556_v23 = vshrl.u32 %v10553_v26, 16  ;;  %v792_v28 = vsel %vm790_vm0, %v789_v47, %v10542_v41  ;;  %v9231_v47 = vcombine.high %v2188_v22, %v2188_v22 }
 0x18b   : > { %v730_v4 = vpop.permute.xlu0 %729  ;;  %v9240_v15 = vcombine.high %v10613_v53, %v10613_v53 }
 0x18c   : > { %2312 = vrot.lane.b32.xlu1 %v8903_v5, %s9397_s14  ;;  %v2249_v5 = vrot.slane %v2241_v42, %v9740_v55  ;;  %v795_v19 = vsel %vm793_vm3, %v792_v28, %v730_v4  ;;  %v2558_v42 = vpack.i.b16 %v2557_v40, %v2556_v23 }
 0x18d   : > { %2262 = vrot.lane.b32.xlu0 %v8893_v35, %s9399_s16  ;;  %v2550_v35 = vshrl.u32 %v10517_v14, 16  ;;  %v798_v4 = vsel %vm14480_vm9, %v795_v19, %v10558_v0  ;;  %v2576_v0 = vcombine.high %v10550_v60, %v10540_v24 }
 0x18e   : > { %v10610_v36 = vpop.permute.xlu1 %779  ;;  %v8900_v26 = vcombine.low %v2249_v5, %v2249_v5  ;;  %v9233_v40 = vcombine.high %v2249_v5, %v2249_v5 }
 0x18f   : > { %v740_v58 = vpop.permute.xlu0 %739 }
 0x190   : > { %2322 = vrot.lane.b32.xlu1 %v9234_v32, %s9398_s15  ;;  %v2609_v32 = vcombine.low %v10621_v56, %v10616_v54 }
 0x191   : > { %2272 = vrot.lane.b32.xlu0 %v9229_v39, %s9400_s17 }
 0x192   : > { %v755_v11 = vpop.permute.xlu1 %754  ;;  %v2617_v14 = vrot.slane %v2609_v32, %v9740_v55 }
 0x193   : > { %v810_v1 = vsel %vm786_vm15, %v10023_v13, %v755_v11  ;;  %v750_v20 = vpop.permute.xlu0 %749  ;;  %v2242_v13 = vcombine.high %v2232_v50, %v10601_v63  ;;  %v801_v63 = vsel %vm14479_vm11, %v798_v4, %v740_v58  ;;  %v14588_v4 = vmov 0  }
 0x194   : > { %2738 = vrot.lane.b32.xlu1 %v9240_v15, %s9396_s13  ;;  %v812_v3 = vsel %vm790_vm0, %v810_v1, %v760_v52  ;;  %v2552_v15 = vpack.i.b16 %v2551_v21, %v2550_v35  ;;  %v10654_v52 = vrot.slane %v2558_v42, %v9662_v48  ;;  %v8910_v58 = vcombine.low %v2617_v14, %v2617_v14 }
 0x195   : > { %2282 = vrot.lane.b32.xlu0 %v8897_v25, %s9401_s23  ;;  %v2256_v32 = vrot.slane %v2242_v13, %v9740_v55  ;;  %v804_v23 = vsel %vm14478_vm8, %v801_v63, %v10571_v46  ;;  %v9237_v13 = vcombine.high %v2617_v14, %v2617_v14  ;;  %v2590_v42 = vrot.slane %v2576_v0, %v9740_v55 }
 0x196   : > { %v765_v39 = vpop.permute.xlu1 %764  ;;  %v2668_v21 = vrot.slane %v2552_v15, %v9662_v48  ;;  %v14587_v14 = vcombine.low %v10183_v17, %v10190_v16  ;;  %v2644_v63 = vcombine.high %v10594_v10, %v10584_v9 }
 0x197   : > { %v814_v11 = vsel %vm793_vm3, %v812_v3, %v765_v39  ;;  %v10645_v41 = vpop.permute.xlu0 %1831  ;;  %v8904_v28 = vcombine.low %v2256_v32, %v2256_v32  ;;  %v9235_v3 = vcombine.high %v2256_v32, %v2256_v32 }
 0x198   : > { %2297 = vrot.lane.b32.xlu1 %v8900_v26, %s9399_s16  ;;  %v816_v50 = vsel %vm14480_vm9, %v814_v11, %v770_v31  ;;  %v807_v31 = vsel %vm14477_vm7, %v804_v23, %v750_v20  ;;  %v2677_v5 = vcombine.low %v2668_v21, %v10654_v52  ;;  %v2610_v26 = vcombine.high %v10621_v56, %v10616_v54 }
 0x199   : > { %2292 = vrot.lane.b32.xlu0 %v9231_v47, %s9402_s25  ;;  %v1163_v46 = vsel %vm1114_vm6, %v807_v31, 0  ;;  %v8913_v47 = vcombine.low %v2590_v42, %v2590_v42  ;;  %v10688_v15 = vrot.slane %v14587_v14, %v9740_v55  ;;  %v2678_v9 = vcombine.high %v2668_v21, %v10654_v52 }
 0x19a   : > { %v775_v22 = vpop.permute.xlu1 %774  ;;  %v2685_v39 = vrot.slane %v2677_v5, %v9740_v55  ;;  %v14589_v5 = vcombine.low %v10204_v49, %v10207_v61 }
 0x19b   : > { %v818_v1 = vsel %vm14479_vm11, %v816_v50, %v775_v22  ;;  %v10661_v25 = vpop.permute.xlu0 %1841  ;;  %v9244_v22 = vcombine.high %v10688_v15, %v10688_v15 }
 0x19c   : > { %2307 = vrot.lane.b32.xlu1 %v9233_v40, %s9400_s17  ;;  %v820_v60 = vsel %vm14478_vm8, %v818_v1, %v10610_v36  ;;  %v823_v36 = vld [vmem:[%s14440_s1] sm:$0xf]  ;;  %v8917_v56 = vcombine.low %v2685_v39, %v2685_v39  ;;  %v2624_v40 = vrot.slane %v2610_v26, %v9740_v55  ;;  %v9241_v0 = vcombine.high %v2685_v39, %v2685_v39 }
 0x19d   : > { %2698 = vrot.lane.b32.xlu0 %v8910_v58, %s9399_s16  ;;  %v10702_v1 = vrot.slane %v2644_v63, %v9740_v55 }
 0x19e   : > { %v785_v24 = vpop.permute.xlu1 %784  ;;  %v8914_v23 = vcombine.low %v2624_v40, %v2624_v40 }
 0x19f   : > { %v1827_v35 = vpop.permute.xlu0 %1826  ;;  %v822_v19 = vsel %vm14477_vm7, %v820_v60, %v785_v24  ;;  %v8920_v31 = vcombine.low %v10702_v1, %v10702_v1  ;;  %v10713_v24 = vrot.slane %v14589_v5, %v9740_v55 }
 0x1a0   : > { %8857 = vmatprep.subr.msk.bf16.mxu1 %vm1114_vm6, %v822_v19  ;;  %2317 = vrot.lane.b32.xlu1 %v8904_v28, %s9401_s23  ;;  %v1895_v60 = vsel %vm786_vm15, %v10268_v18, %v1827_v35  ;;  %v9245_v19 = vcombine.high %v10342_v59, %v10342_v59  ;;  %v10728_v18 = vrot.slane %v2678_v9, %v9740_v55  ;;  %v3285_v9 = vshrl.u32 %v10339_v2, 16 }
 0x1a1   : > { %2708 = vrot.lane.b32.xlu0 %v9237_v13, %s9400_s17  ;;  %1168 = vmatpush1.bf16.msra.mxu1 %v1163_v46  ;;  %v1897_v21 = vsel %vm790_vm0, %v1895_v60, %v10645_v41  ;;  %v9248_v46 = vcombine.high %v10713_v24, %v10713_v24  ;;  %v9239_v60 = vcombine.high %v2624_v40, %v2624_v40 }
 0x1a2   : > { %v1867_v20 = vpop.permute.xlu1 %1866  ;;  %v14592_v40 = vcombine.high %v10204_v49, %v10207_v61 }
 0x1a3   : > { %v1837_v11 = vpop.permute.xlu0 %1836 }
 0x1a4   : > { %2327 = vrot.lane.b32.xlu1 %v9235_v3, %s9402_s25  ;;  %8858 = vmatmul.mubr.msk.bf16.vlgmr.msra.gmra.mrb[0].mxu1 %vm1110_vm4, %v823_v36  ;;  %v1899_v35 = vsel %vm793_vm3, %v1897_v21, %v1837_v11  ;;  %v9238_v36 = vcombine.high %v2590_v42, %v2590_v42  ;;  %v8921_v42 = vcombine.low %v10728_v18, %v10728_v18 }
 0x1a5   : > { %2713 = vrot.lane.b32.xlu0 %v8913_v47, %s9397_s14  ;;  %1964 = vmatprep.mubr.bf16.mxu1 %v14588_v4  ;;  %v1901_v26 = vsel %vm14480_vm9, %v1899_v35, %v10661_v25  ;;  %v3292_v47 = vshrl.u32 %v10386_v44, 16  ;;  %v3286_v25 = vshrl.u32 %v10352_v51, 16  ;;  %v3290_v21 = vpack.i.b16 %v10386_v44, %v10371_v57 }
 0x1a6   : > { %v1877_v54 = vpop.permute.xlu1 %1876  ;;  %v3304_v44 = vshrl.u32 %v10428_v6, 16 }
 0x1a7   : > { %v1847_v50 = vpop.permute.xlu0 %1846 }
 0x1a8   : > { %2733 = vrot.lane.b32.xlu1 %v8917_v56, %s9399_s16  ;;  %v3291_v56 = vshrl.u32 %v10371_v57, 16 }
 0x1a9   : > { %3070 = vrot.lane.b32.xlu0 %v9244_v22, %s9396_s13 }
 0x1aa   : > { %v1862_v32 = vpop.permute.xlu1 %1861 }
 0x1ab   : > { %v1852_v58 = vpop.permute.xlu0 %1851  ;;  %v1910_v52 = vsel %vm786_vm15, %v10297_v29, %v1862_v32  ;;  %v14590_v29 = vcombine.high %v10183_v17, %v10190_v16  ;;  %v1903_v17 = vsel %vm14479_vm11, %v1901_v26, %v1847_v50  ;;  %v3303_v26 = vshrl.u32 %v10412_v27, 16 }
 0x1ac   : > { %2743 = vrot.lane.b32.xlu1 %v9241_v0, %s9400_s17  ;;  %v1912_v41 = vsel %vm790_vm0, %v1910_v52, %v1867_v20  ;;  %v1905_v14 = vsel %vm14478_vm8, %v1903_v17, %v1852_v58  ;;  %v9249_v58 = vcombine.high %v10381_v45, %v10381_v45  ;;  %v3287_v45 = vpack.i.b16 %v3286_v25, %v3285_v9 }
 0x1ad   : > { %2718 = vrot.lane.b32.xlu0 %v8914_v23, %s9401_s23  ;;  %v10737_v3 = vrot.slane %v14590_v29, %v9740_v55  ;;  %v10787_v52 = vrot.slane %v14592_v40, %v9740_v55  ;;  %v14593_v25 = vcombine.high %v10196_v62, %v10199_v7  ;;  %v3302_v62 = vpack.i.b16 %v10428_v6, %v10412_v27  ;;  %v14594_v40 = vld [vmem:[#allocation23_spill] sm:$0xff] }
 0x1ae   : > { %v1872_v10 = vpop.permute.xlu1 %1871  ;;  %v10801_v49 = vrot.slane %v3287_v45, %v9662_v48  ;;  %v3296_v45 = vpack.i.b16 %v10397_v12, %v10383_v38 }
 0x1af   : > { %v1857_v28 = vpop.permute.xlu0 %1856  ;;  %v1914_v39 = vsel %vm793_vm3, %v1912_v41, %v1872_v10  ;;  %v8934_v20 = vcombine.low %v10737_v3, %v10737_v3  ;;  %v3293_v10 = vpack.i.b16 %v3292_v47, %v3291_v56  ;;  %v8941_v57 = vcombine.low %v10787_v52, %v10787_v52 }
 0x1b0   : > { %2748 = vrot.lane.b32.xlu1 %v8920_v31, %s9397_s14  ;;  %v1916_v63 = vsel %vm14480_vm9, %v1914_v39, %v1877_v54  ;;  %v1907_v22 = vsel %vm14477_vm7, %v1905_v14, %v1857_v28  ;;  %v14591_v54 = vcombine.high %v10171_v34, %v10160_v43  ;;  %v8890_v43 = vld [vmem:[%s14440_s1 + $0xc] sm:$0xf]  ;;  %v9246_v41 = vcombine.high %v10737_v3, %v10737_v3 }
 0x1b1   : > { %3075 = vrot.lane.b32.xlu0 %v9245_v19, %s9400_s17  ;;  %v1928_v28 = vsel %vm1114_vm6, %v1907_v22, 0  ;;  %v9242_v19 = vcombine.high %v10702_v1, %v10702_v1  ;;  %v3284_v1 = vpack.i.b16 %v10352_v51, %v10339_v2  ;;  %v3672_v51 = vshrl.u32 %v10443_v8, 16 }
 0x1b2   : > { %v1882_v13 = vpop.permute.xlu1 %1881  ;;  %v2991_v23 = vrot.slane %v14591_v54, %v9740_v55  ;;  %v3298_v39 = vshrl.u32 %v10397_v12, 16  ;;  %v3671_v47 = vshrl.u32 %v10430_v30, 16  ;;  %v3305_v14 = vpack.i.b16 %v3304_v44, %v3303_v26 }
 0x1b3   : > { %v10731_v59 = vpop.permute.xlu0 %3065  ;;  %v1918_v32 = vsel %vm14479_vm11, %v1916_v63, %v1882_v13  ;;  %v10792_v13 = vrot.slane %v3293_v10, %v9662_v48  ;;  %v9243_v63 = vcombine.high %v10728_v18, %v10728_v18  ;;  %v3059_v56 = vrot.slane %v14593_v25, %v9740_v55 }
 0x1b4   : > { %3105 = vrot.lane.b32.xlu1 %v9248_v46, %s9396_s13  ;;  %v8935_v35 = vcombine.low %v2991_v23, %v2991_v23  ;;  %v9247_v17 = vcombine.high %v2991_v23, %v2991_v23  ;;  %v10849_v7 = vrot.slane %v3305_v14, %v9662_v48  ;;  %v3670_v12 = vpack.i.b16 %v10443_v8, %v10430_v30 }
 0x1b5   : > { %2723 = vrot.lane.b32.xlu0 %v9238_v36, %s9398_s15  ;;  %v10811_v36 = vrot.slane %v3290_v21, %v9662_v48  ;;  %v3356_v2 = vcombine.low %v10801_v49, %v10792_v13  ;;  %v8942_v9 = vcombine.low %v3059_v56, %v3059_v56  ;;  %v3684_v21 = vshrl.u32 %v14594_v40, 16 }
 0x1b6   : > { %v1887_v11 = vpop.permute.xlu1 %1886  ;;  %v9251_v8 = vcombine.high %v3059_v56, %v3059_v56  ;;  %v10905_v25 = vrot.slane %v3670_v12, %v9662_v48 }
 0x1b7   : > { %v10749_v16 = vpop.permute.xlu0 %1016  ;;  %v1920_v50 = vsel %vm14478_vm8, %v1918_v32, %v1887_v11  ;;  %v10824_v11 = vrot.slane %v3284_v1, %v9662_v48  ;;  %v3665_v32 = vshrl.u32 %v10402_v37, 16 }
 0x1b8   : > { %2753 = vrot.lane.b32.xlu1 %v8921_v42, %s9401_s23  ;;  %v3666_v42 = vshrl.u32 %v10418_v33, 16 }
 0x1b9   : > { %3080 = vrot.lane.b32.xlu0 %v8934_v20, %s9397_s14  ;;  %v3297_v20 = vshrl.u32 %v10383_v38, 16  ;;  %v3322_v22 = vcombine.low %v10824_v11, %v10811_v36  ;;  %v9250_v38 = vcombine.high %v10787_v52, %v10787_v52  ;;  %v3664_v52 = vpack.i.b16 %v10418_v33, %v10402_v37 }
 0x1ba   : > { %v1892_v0 = vpop.permute.xlu1 %1891  ;;  %v3667_v23 = vpack.i.b16 %v3666_v42, %v3665_v32  ;;  %v14597_v42 = vld [vmem:[#allocation19_spill] sm:$0xff] }
 0x1bb   : > { %v1922_v31 = vsel %vm14477_vm7, %v1920_v50, %v1892_v0  ;;  %v10770_v5 = vpop.permute.xlu0 %1026  ;;  %v3673_v50 = vpack.i.b16 %v3672_v51, %v3671_v47  ;;  %v3299_v54 = vpack.i.b16 %v3298_v39, %v3297_v20  ;;  %v14595_v51 = vld [vmem:[#allocation21_spill] sm:$0xff]  ;;  %v14596_v39 = vld [vmem:[#allocation22_spill] sm:$0xff]  ;;  %v3677_v47 = vshrl.u32 %v14597_v42, 16 }
 0x1bc   : > { %3110 = vrot.lane.b32.xlu1 %v9249_v58, %s9400_s17  ;;  %8891 = vmatprep.subr.msk.bf16.mxu1 %vm1114_vm6, %v1922_v31  ;;  %v3364_v58 = vrot.slane %v3356_v2, %v9740_v55  ;;  %v10868_v6 = vrot.slane %v3667_v23, %v9662_v48  ;;  %v10888_v2 = vrot.slane %v3296_v45, %v9662_v48  ;;  %v3683_v26 = vshrl.u32 %v14596_v39, 16  ;;  %v14598_v45 = vld [vmem:[#allocation16_spill] sm:$0xff] }
 0x1bd   : > { %2728 = vrot.lane.b32.xlu0 %v9239_v60, %s9402_s25  ;;  %1933 = vmatpush1.bf16.msra.mxu1 %v1928_v28  ;;  %v10854_v10 = vrot.slane %v3673_v50, %v9662_v48  ;;  %v10859_v28 = vrot.slane %v3322_v22, %v9740_v55  ;;  %v10864_v27 = vrot.slane %v3299_v54, %v9662_v48 }
 0x1be   : > { %v10779_v34 = vpop.permute.xlu1 %3100  ;;  %v8952_v60 = vcombine.low %v3364_v58, %v3364_v58  ;;  %v9253_v33 = vcombine.high %v3364_v58, %v3364_v58  ;;  %v10912_v32 = vrot.slane %v3664_v52, %v9662_v48 }
 0x1bf   : > { %v10794_v46 = vpop.permute.xlu0 %1036  ;;  %v3736_v1 = vcombine.low %v10868_v6, %v10854_v10 }
 0x1c0   : > { %2758 = vrot.lane.b32.xlu1 %v9242_v19, %s9398_s15  ;;  %8892 = vmatmul.mubr.msk.bf16.vlgmr.msra.gmra.mrb[4].mxu1 %vm1110_vm4, %v8890_v43  ;;  %v10872_v43 = vrot.slane %v3302_v62, %v9662_v48  ;;  %v3424_v19 = vcombine.low %v10864_v27, %v10849_v7  ;;  %v3702_v58 = vcombine.low %v10912_v32, %v10905_v25 }
 0x1c1   : > { %3085 = vrot.lane.b32.xlu0 %v8935_v35, %s9401_s23  ;;  %2836 = vmatprep.mubr.bf16.mxu1 %v14588_v4  ;;  %v10908_v56 = vrot.slane %v3736_v1, %v9740_v55 }
 0x1c2   : > { %v10806_v61 = vpop.permute.xlu1 %1051  ;;  %v3390_v30 = vcombine.low %v10888_v2, %v10872_v43  ;;  %v3432_v14 = vrot.slane %v3424_v19, %v9740_v55 }
 0x1c3   : > { %v10816_v29 = vpop.permute.xlu0 %1408  ;;  %v8973_v62 = vcombine.low %v10908_v56, %v10908_v56 }
 0x1c4   : > { %3115 = vrot.lane.b32.xlu1 %v8941_v57, %s9397_s14  ;;  %v9252_v57 = vcombine.high %v10859_v28, %v10859_v28  ;;  %v10921_v54 = vrot.slane %v3390_v30, %v9740_v55 }
 0x1c5   : > { %3090 = vrot.lane.b32.xlu0 %v9246_v41, %s9398_s15  ;;  %v3678_v41 = vshrl.u32 %v14595_v51, 16 }
 0x1c6   : > { %v10830_v3 = vpop.permute.xlu1 %1061  ;;  %v9256_v1 = vcombine.high %v10921_v54, %v10921_v54 }
 0x1c7   : > { %v10841_v0 = vpop.permute.xlu0 %1418  ;;  %v3679_v22 = vpack.i.b16 %v3678_v41, %v3677_v47  ;;  %v14599_v41 = vld [vmem:[#allocation17_spill] sm:$0xff] }
 0x1c8   : > { %2763 = vrot.lane.b32.xlu1 %v9243_v63, %s9402_s25  ;;  %v3323_v63 = vcombine.high %v10824_v11, %v10811_v36  ;;  %v8959_v11 = vcombine.low %v3432_v14, %v3432_v14 }
 0x1c9   : > { %3095 = vrot.lane.b32.xlu0 %v9247_v17, %s9402_s25  ;;  %v3685_v17 = vpack.i.b16 %v3684_v21, %v3683_v26  ;;  %v3682_v21 = vpack.i.b16 %v14594_v40, %v14596_v39  ;;  %v3676_v40 = vpack.i.b16 %v14595_v51, %v14597_v42  ;;  %v9257_v51 = vcombine.high %v3432_v14, %v3432_v14 }
 0x1ca   : > { %v10851_v18 = vpop.permute.xlu1 %1071 }
 0x1cb   : > { %v10856_v31 = vpop.permute.xlu0 %1428  ;;  %v10916_v50 = vrot.slane %v3685_v17, %v9662_v48  ;;  %v10962_v30 = vrot.slane %v3682_v21, %v9662_v48  ;;  %v3425_v21 = vcombine.high %v10864_v27, %v10849_v7  ;;  %v14600_v27 = vld [vmem:[#allocation18_spill] sm:$0xff] }
 0x1cc   : > { %3120 = vrot.lane.b32.xlu1 %v8942_v9, %s9401_s23  ;;  %v10928_v9 = vrot.slane %v3323_v63, %v9740_v55 }
 0x1cd   : > { %3445 = vrot.lane.b32.xlu0 %v8952_v60, %s9399_s16  ;;  %v10931_v60 = vrot.slane %v3679_v22, %v9662_v48 }
 0x1ce   : > { %v10877_v35 = vpop.permute.xlu1 %1443 }
 0x1cf   : > { %v1012_v44 = vpop.permute.xlu0 %1011 }
 0x1d0   : > { %3125 = vrot.lane.b32.xlu1 %v9250_v38, %s9398_s15  ;;  %v1080_v19 = vsel %vm786_vm15, %v14598_v45, %v1012_v44  ;;  %v3804_v38 = vcombine.low %v10931_v60, %v10916_v50  ;;  %v8955_v44 = vcombine.low %v10928_v9, %v10928_v9 }
 0x1d1   : > { %3450 = vrot.lane.b32.xlu0 %v9252_v57, %s9396_s13  ;;  %v3357_v57 = vcombine.high %v10801_v49, %v10792_v13  ;;  %v1082_v39 = vsel %vm790_vm0, %v1080_v19, %v10749_v16  ;;  %v3391_v13 = vcombine.high %v10888_v2, %v10872_v43 }
 0x1d2   : > { %v10899_v20 = vpop.permute.xlu1 %1453  ;;  %v10967_v42 = vrot.slane %v3804_v38, %v9740_v55 }
 0x1d3   : > { %v1022_v37 = vpop.permute.xlu0 %1021  ;;  %v10973_v2 = vrot.slane %v3357_v57, %v9740_v55 }
 0x1d4   : > { %3130 = vrot.lane.b32.xlu1 %v9251_v8, %s9402_s25  ;;  %v10950_v8 = vrot.slane %v3702_v58, %v9740_v55  ;;  %v1084_v49 = vsel %vm793_vm3, %v1082_v39, %v1022_v37  ;;  %v10976_v37 = vrot.slane %v3676_v40, %v9662_v48  ;;  %v8980_v58 = vcombine.low %v10967_v42, %v10967_v42  ;;  %v14601_v40 = vld [vmem:[#allocation20_spill] sm:$0xff] }
 0x1d5   : > { %3455 = vrot.lane.b32.xlu0 %v9253_v33, %s9400_s17 }
 0x1d6   : > { %v10918_v36 = vpop.permute.xlu1 %1463  ;;  %v9260_v43 = vcombine.high %v10950_v8, %v10950_v8  ;;  %v3770_v33 = vcombine.low %v10976_v37, %v10962_v30 }
 0x1d7   : > { %v1032_v23 = vpop.permute.xlu0 %1031 }
 0x1d8   : > { %3480 = vrot.lane.b32.xlu1 %v8959_v11, %s9399_s16  ;;  %v11007_v57 = vrot.slane %v3770_v33, %v9740_v55 }
 0x1d9   : > { %3825 = vrot.lane.b32.xlu0 %v8973_v62, %s9399_s16  ;;  %v10990_v62 = vrot.slane %v3391_v13, %v9740_v55 }
 0x1da   : > { %v1047_v12 = vpop.permute.xlu1 %1046 }
 0x1db   : > { %v1095_v26 = vsel %vm786_vm15, %v14599_v41, %v1047_v12  ;;  %v1042_v52 = vpop.permute.xlu0 %1041  ;;  %v8962_v12 = vcombine.low %v10990_v62, %v10990_v62 }
 0x1dc   : > { %3485 = vrot.lane.b32.xlu1 %v9256_v1, %s9396_s13  ;;  %v1097_v47 = vsel %vm790_vm0, %v1095_v26, %v10806_v61  ;;  %v1086_v61 = vsel %vm14480_vm9, %v1084_v49, %v10770_v5  ;;  %v9254_v49 = vcombine.high %v10928_v9, %v10928_v9 }
 0x1dd   : > { %3460 = vrot.lane.b32.xlu0 %v8955_v44, %s9397_s14  ;;  %v1088_v14 = vsel %vm14479_vm11, %v1086_v61, %v1032_v23  ;;  %v8956_v23 = vcombine.low %v10973_v2, %v10973_v2  ;;  %v3439_v44 = vrot.slane %v3425_v21, %v9740_v55 }
 0x1de   : > { %v1057_v17 = vpop.permute.xlu1 %1056  ;;  %v1090_v19 = vsel %vm14478_vm8, %v1088_v14, %v10794_v46  ;;  %v3703_v46 = vcombine.high %v10912_v32, %v10905_v25  ;;  %v8854_v25 = vld [vmem:[%s14440_s1 + $0x4] sm:$0xf] }
 0x1df   : > { %v1099_v16 = vsel %vm793_vm3, %v1097_v47, %v1057_v17  ;;  %v1404_v63 = vpop.permute.xlu0 %1403  ;;  %v8963_v9 = vcombine.low %v3439_v44, %v3439_v44 }
 0x1e0   : > { %3490 = vrot.lane.b32.xlu1 %v9257_v51, %s9400_s17  ;;  %v1101_v22 = vsel %vm14480_vm9, %v1099_v16, %v10830_v3  ;;  %v1092_v3 = vsel %vm14477_vm7, %v1090_v19, %v1042_v52  ;;  %v9261_v52 = vcombine.high %v10908_v56, %v10908_v56  ;;  %v9264_v56 = vcombine.high %v11007_v57, %v11007_v57 }
 0x1e1   : > { %3830 = vrot.lane.b32.xlu0 %v9260_v43, %s9396_s13  ;;  %v1115_v7 = vsel %vm1114_vm6, %v1092_v3, 0  ;;  %v3717_v47 = vrot.slane %v3703_v46, %v9740_v55  ;;  %v3737_v43 = vcombine.high %v10868_v6, %v10854_v10 }
 0x1e2   : > { %v1067_v11 = vpop.permute.xlu1 %1066 }
 0x1e3   : > { %v1103_v5 = vsel %vm14479_vm11, %v1101_v22, %v1067_v11  ;;  %v1414_v45 = vpop.permute.xlu0 %1413  ;;  %v8976_v14 = vcombine.low %v3717_v47, %v3717_v47  ;;  %v9265_v11 = vcombine.high %v10967_v42, %v10967_v42  ;;  %v9262_v46 = vcombine.high %v3717_v47, %v3717_v47  ;;  %v14603_v47 = vld [vmem:[#allocation25_spill] sm:$0xff] }
 0x1e4   : > { %3860 = vrot.lane.b32.xlu1 %v8980_v58, %s9399_s16  ;;  %v1105_v1 = vsel %vm14478_vm8, %v1103_v5, %v10851_v18  ;;  %v1472_v18 = vsel %vm786_vm15, %v14600_v27, %v1404_v63 }
 0x1e5   : > { %3465 = vrot.lane.b32.xlu0 %v8956_v23, %s9401_s23  ;;  %v1474_v17 = vsel %vm790_vm0, %v1472_v18, %v10816_v29 }
 0x1e6   : > { %v1077_v38 = vpop.permute.xlu1 %1076  ;;  %v1476_v51 = vsel %vm793_vm3, %v1474_v17, %v1414_v45  ;;  %v3751_v45 = vrot.slane %v3737_v43, %v9740_v55 }
 0x1e7   : > { %v1424_v41 = vpop.permute.xlu0 %1423  ;;  %v1107_v26 = vsel %vm14477_vm7, %v1105_v1, %v1077_v38  ;;  %v1478_v33 = vsel %vm14480_vm9, %v1476_v51, %v10841_v0  ;;  %v9255_v0 = vcombine.high %v10973_v2, %v10973_v2 }
 0x1e8   : > { %3495 = vrot.lane.b32.xlu1 %v8962_v12, %s9397_s14  ;;  %8855 = vmatprep.subr.msk.bf16.mxu0 %vm1114_vm6, %v1107_v26  ;;  %v1480_v22 = vsel %vm14479_vm11, %v1478_v33, %v1424_v41  ;;  %v8977_v21 = vcombine.low %v3751_v45, %v3751_v45  ;;  %v9259_v26 = vcombine.high %v3439_v44, %v3439_v44 }
 0x1e9   : > { %3835 = vrot.lane.b32.xlu0 %v9261_v52, %s9400_s17  ;;  %1120 = vmatpush1.bf16.msra.mxu0 %v1115_v7  ;;  %v1482_v23 = vsel %vm14478_vm8, %v1480_v22, %v10856_v31  ;;  %v9263_v27 = vcombine.high %v3751_v45, %v3751_v45 }
 0x1ea   : > { %v1439_v32 = vpop.permute.xlu1 %1438 }
 0x1eb   : > { %v1487_v39 = vsel %vm786_vm15, %v14601_v40, %v1439_v32  ;;  %v1434_v13 = vpop.permute.xlu0 %1433  ;;  %v14602_v40 = vld [vmem:[#allocation24_spill] sm:$0xff] }
 0x1ec   : > { %3865 = vrot.lane.b32.xlu1 %v9264_v56, %s9396_s13  ;;  %8856 = vmatmul.mubr.msk.bf16.vlgmr.msra.gmra.mrb[0].mxu0 %vm1110_vm4, %v8854_v25  ;;  %v1489_v16 = vsel %vm790_vm0, %v1487_v39, %v10877_v35  ;;  %v3771_v35 = vcombine.high %v10976_v37, %v10962_v30  ;;  %v1484_v30 = vsel %vm14477_vm7, %v1482_v23, %v1434_v13  ;;  %v3974_v25 = vld [vmem:[%s14441_s2] sm:$0xff] }
 0x1ed   : > { %3470 = vrot.lane.b32.xlu0 %v9254_v49, %s9398_s15  ;;  %1541 = vmatprep.mubr.bf16.mxu0 %v14588_v4  ;;  %v9258_v37 = vcombine.high %v10990_v62, %v10990_v62  ;;  %v1505_v31 = vsel %vm1114_vm6, %v1484_v30, 0  ;;  %v3805_v62 = vcombine.high %v10931_v60, %v10916_v50 }
 0x1ee   : > { %v1449_v63 = vpop.permute.xlu1 %1448  ;;  %v3785_v2 = vrot.slane %v3771_v35, %v9740_v55 }
 0x1ef   : > { %v1491_v29 = vsel %vm793_vm3, %v1489_v16, %v1449_v63  ;;  %v11043_v61 = vpop.permute.xlu0 %2267  ;;  %v3819_v52 = vrot.slane %v3805_v62, %v9740_v55 }
 0x1f0   : > { %3500 = vrot.lane.b32.xlu1 %v8963_v9, %s9401_s23  ;;  %v1493_v10 = vsel %vm14480_vm9, %v1491_v29, %v10899_v20  ;;  %v8983_v12 = vcombine.low %v3785_v2, %v3785_v2  ;;  %v9266_v56 = vcombine.high %v3785_v2, %v3785_v2 }
 0x1f1   : > { %3840 = vrot.lane.b32.xlu0 %v8976_v14, %s9397_s14  ;;  %v8984_v60 = vcombine.low %v3819_v52, %v3819_v52  ;;  %v9267_v49 = vcombine.high %v3819_v52, %v3819_v52 }
 0x1f2   : > { %v1459_v6 = vpop.permute.xlu1 %1458 }
 0x1f3   : > { %v1495_v58 = vsel %vm14479_vm11, %v1493_v10, %v1459_v6  ;;  %v2278_v5 = vpop.permute.xlu0 %2277 }
 0x1f4   : > { %3870 = vrot.lane.b32.xlu1 %v9265_v11, %s9400_s17  ;;  %v1497_v20 = vsel %vm14478_vm8, %v1495_v58, %v10918_v36  ;;  %v8873_v36 = vld [vmem:[%s14440_s1 + $0x8] sm:$0xf] }
 0x1f5   : > { %3475 = vrot.lane.b32.xlu0 %v9255_v0, %s9402_s25 }
 0x1f6   : > { %v1469_v42 = vpop.permute.xlu1 %1468 }
 0x1f7   : > { %v1499_v19 = vsel %vm14477_vm7, %v1497_v20, %v1469_v42  ;;  %v2288_v3 = vpop.permute.xlu0 %2287  ;;  %v8907_v20 = vld [vmem:[%s14440_s1 + $0x10] sm:$0xf] }
 0x1f8   : > { %3505 = vrot.lane.b32.xlu1 %v9258_v37, %s9398_s15  ;;  %8874 = vmatprep.subr.msk.bf16.mxu0 %vm1114_vm6, %v1499_v19 }
 0x1f9   : > { %3845 = vrot.lane.b32.xlu0 %v8977_v21, %s9401_s23  ;;  %1510 = vmatpush1.bf16.msra.mxu0 %v1505_v31 }
 0x1fa   : > { %v2303_v38 = vpop.permute.xlu1 %2302 }
 0x1fb   : > { %v11080_v1 = vpop.permute.xlu0 %2703 }
 0x1fc   : > { %3875 = vrot.lane.b32.xlu1 %v8983_v12, %s9397_s14  ;;  %8875 = vmatmul.mubr.msk.bf16.vlgmr.msra.gmra.mrb[4].mxu0 %vm1110_vm4, %v8873_v36 }
 0x1fd   : > { %3850 = vrot.lane.b32.xlu0 %v9262_v46, %s9398_s15  ;;  %2400 = vmatprep.mubr.bf16.mxu0 %v14588_v4 }
 0x1fe   : > { %v2313_v41 = vpop.permute.xlu1 %2312 }
 0x1ff   : > { %v2263_v7 = vpop.permute.xlu0 %2262 }
 0x200   : > { %3510 = vrot.lane.b32.xlu1 %v9259_v26, %s9402_s25  ;;  %v2331_v39 = vsel %vm786_vm15, %v14602_v40, %v2263_v7 }
 0x201   : > { %3855 = vrot.lane.b32.xlu0 %v9263_v27, %s9402_s25  ;;  %v2333_v16 = vsel %vm790_vm0, %v2331_v39, %v11043_v61 }
 0x202   : > { %v2323_v50 = vpop.permute.xlu1 %2322 }
 0x203   : > { %v2273_v18 = vpop.permute.xlu0 %2272 }
 0x204   : > { %3880 = vrot.lane.b32.xlu1 %v8984_v60, %s9401_s23  ;;  %v2335_v63 = vsel %vm793_vm3, %v2333_v16, %v2273_v18 }
 0x205   : > { %3977 = vperm.xlu0 %9321, %v3974_v25   ;;  %v2337_v33 = vsel %vm14480_vm9, %v2335_v63, %v2278_v5  ;;  %v8924_v63 = vld [vmem:[%s14440_s1 + $0x14] sm:$0xf] }
 0x206   : > { %v2739_v32 = vpop.permute.xlu1 %2738 }
 0x207   : > { %v2283_v44 = vpop.permute.xlu0 %2282 }
 0x208   : > { %3885 = vrot.lane.b32.xlu1 %v9266_v56, %s9398_s15  ;;  %v2339_v22 = vsel %vm14479_vm11, %v2337_v33, %v2283_v44  ;;  %v3149_v33 = vsel %vm786_vm15, %v10713_v24, %v10779_v34 }
 0x209   : > { %v2341_v11 = vsel %vm14478_vm8, %v2339_v22, %v2288_v3 }
 0x20a   : > { %v2298_v13 = vpop.permute.xlu1 %2297 }
 0x20b   : > { %v2346_v17 = vsel %vm786_vm15, %v14603_v47, %v2298_v13  ;;  %v2293_v51 = vpop.permute.xlu0 %2292 }
 0x20c   : > { %3890 = vrot.lane.b32.xlu1 %v9267_v49, %s9402_s25  ;;  %v2348_v9 = vsel %vm790_vm0, %v2346_v17, %v2303_v38  ;;  %v2343_v58 = vsel %vm14477_vm7, %v2341_v11, %v2293_v51 }
 0x20d   : > { %v2364_v5 = vsel %vm1114_vm6, %v2343_v58, 0 }
 0x20e   : > { %v2308_v43 = vpop.permute.xlu1 %2307 }
 0x20f   : > { %v2350_v29 = vsel %vm793_vm3, %v2348_v9, %v2308_v43  ;;  %v2699_v14 = vpop.permute.xlu0 %2698  ;;  %v3134_v43 = vsel %vm786_vm15, %v10688_v15, %v10731_v59 }
 0x210   : > { %v2352_v35 = vsel %vm14480_vm9, %v2350_v29, %v2313_v41  ;;  %v14604_v41 = vld [vmem:[#allocation26_spill] sm:$0xff] }
 0x211   : > { %v2767_v26 = vsel %vm786_vm15, %v14604_v41, %v2699_v14 }
 0x212   : > { %v2318_v10 = vpop.permute.xlu1 %2317 }
 0x213   : > { %v2354_v6 = vsel %vm14479_vm11, %v2352_v35, %v2318_v10  ;;  %v2709_v61 = vpop.permute.xlu0 %2708 }
 0x214   : > { %v2356_v0 = vsel %vm14478_vm8, %v2354_v6, %v2323_v50  ;;  %v2769_v50 = vsel %vm790_vm0, %v2767_v26, %v11080_v1 }
 0x215   : > { %v2771_v60 = vsel %vm793_vm3, %v2769_v50, %v2709_v61 }
 0x216   : > { %v2328_v45 = vpop.permute.xlu1 %2327 }
 0x217   : > { %v2358_v23 = vsel %vm14477_vm7, %v2356_v0, %v2328_v45  ;;  %v2714_v30 = vpop.permute.xlu0 %2713 }
 0x218   : > { %8908 = vmatprep.subr.msk.bf16.mxu0 %vm1114_vm6, %v2358_v23  ;;  %v2773_v18 = vsel %vm14480_vm9, %v2771_v60, %v2714_v30 }
 0x219   : > { %2369 = vmatpush1.bf16.msra.mxu0 %v2364_v5 }
 0x21a   : > { %v2734_v42 = vpop.permute.xlu1 %2733 }
 0x21b   : > { %v3071_v37 = vpop.permute.xlu0 %3070  ;;  %v2782_v7 = vsel %vm786_vm15, %v10613_v53, %v2734_v42 }
 0x21c   : > { %8909 = vmatmul.mubr.msk.bf16.vlgmr.msra.gmra.mrb[8].mxu0 %vm1110_vm4, %v8907_v20  ;;  %v2784_v25 = vsel %vm790_vm0, %v2782_v7, %v2739_v32  ;;  %v3136_v14 = vsel %vm790_vm0, %v3134_v43, %v3071_v37  ;;  %v8945_v20 = vld [vmem:[%s14440_s1 + $0x18] sm:$0xf] }
 0x21d   : > { %3203 = vmatprep.mubr.bf16.mxu0 %v14588_v4 }
 0x21e   : > { %v2744_v2 = vpop.permute.xlu1 %2743 }
 0x21f   : > { %v2719_v19 = vpop.permute.xlu0 %2718  ;;  %v2786_v44 = vsel %vm793_vm3, %v2784_v25, %v2744_v2 }
 0x220   : > { %v2775_v40 = vsel %vm14479_vm11, %v2773_v18, %v2719_v19 }
 0x222   : > { %v2749_v3 = vpop.permute.xlu1 %2748 }
 0x223   : > { %v3076_v21 = vpop.permute.xlu0 %3075  ;;  %v2788_v13 = vsel %vm14480_vm9, %v2786_v44, %v2749_v3 }
 0x224   : > { %v3138_v22 = vsel %vm793_vm3, %v3136_v14, %v3076_v21 }
 0x226   : > { %v3106_v31 = vpop.permute.xlu1 %3105 }
 0x227   : > { %v2724_v36 = vpop.permute.xlu0 %2723  ;;  %v3151_v35 = vsel %vm790_vm0, %v3149_v33, %v3106_v31 }
 0x228   : > { %v2777_v53 = vsel %vm14478_vm8, %v2775_v40, %v2724_v36 }
 0x22a   : > { %v2754_v62 = vpop.permute.xlu1 %2753 }
 0x22b   : > { %v3081_v38 = vpop.permute.xlu0 %3080  ;;  %v2790_v49 = vsel %vm14479_vm11, %v2788_v13, %v2754_v62 }
 0x22c   : > { %v3140_v10 = vsel %vm14480_vm9, %v3138_v22, %v3081_v38 }
 0x22e   : > { %v3111_v12 = vpop.permute.xlu1 %3110 }
 0x22f   : > { %v2729_v46 = vpop.permute.xlu0 %2728  ;;  %v3153_v15 = vsel %vm793_vm3, %v3151_v35, %v3111_v12 }
 0x230   : > { %v2779_v1 = vsel %vm14477_vm7, %v2777_v53, %v2729_v46 }
 0x231   : > { %v2800_v16 = vsel %vm1114_vm6, %v2779_v1, 0 }
 0x232   : > { %v2759_v52 = vpop.permute.xlu1 %2758 }
 0x233   : > { %v3086_v27 = vpop.permute.xlu0 %3085  ;;  %v2792_v47 = vsel %vm14478_vm8, %v2790_v49, %v2759_v52 }
 0x234   : > { %v3142_v59 = vsel %vm14479_vm11, %v3140_v10, %v3086_v27 }
 0x236   : > { %v3116_v56 = vpop.permute.xlu1 %3115 }
 0x237   : > { %v3091_v39 = vpop.permute.xlu0 %3090  ;;  %v3155_v11 = vsel %vm14480_vm9, %v3153_v15, %v3116_v56 }
 0x238   : > { %v3144_v58 = vsel %vm14478_vm8, %v3142_v59, %v3091_v39 }
 0x23a   : > { %v2764_v17 = vpop.permute.xlu1 %2763 }
 0x23b   : > { %v2794_v51 = vsel %vm14477_vm7, %v2792_v47, %v2764_v17  ;;  %v3096_v32 = vpop.permute.xlu0 %3095 }
 0x23c   : > { %8925 = vmatprep.subr.msk.bf16.mxu1 %vm1114_vm6, %v2794_v51  ;;  %v3146_v24 = vsel %vm14477_vm7, %v3144_v58, %v3096_v32 }
 0x23d   : > { %2805 = vmatpush1.bf16.msra.mxu1 %v2800_v16  ;;  %v3167_v5 = vsel %vm1114_vm6, %v3146_v24, 0 }
 0x23e   : > { %v3121_v9 = vpop.permute.xlu1 %3120 }
 0x23f   : > { %v3446_v29 = vpop.permute.xlu0 %3445  ;;  %v3157_v34 = vsel %vm14479_vm11, %v3155_v11, %v3121_v9 }
 0x240   : > { %8926 = vmatmul.mubr.msk.bf16.vlgmr.msra.gmra.mrb[8].mxu1 %vm1110_vm4, %v8924_v63  ;;  %v3514_v50 = vsel %vm786_vm15, %v10859_v28, %v3446_v29  ;;  %v8966_v63 = vld [vmem:[%s14440_s1 + $0x1c] sm:$0xf] }
 0x241   : > { %3583 = vmatprep.mubr.bf16.mxu1 %v14588_v4 }
 0x242   : > { %v3126_v6 = vpop.permute.xlu1 %3125 }
 0x243   : > { %v3451_v61 = vpop.permute.xlu0 %3450  ;;  %v3159_v0 = vsel %vm14478_vm8, %v3157_v34, %v3126_v6 }
 0x244   : > { %v3516_v60 = vsel %vm790_vm0, %v3514_v50, %v3451_v61 }
 0x246   : > { %v3131_v45 = vpop.permute.xlu1 %3130 }
 0x247   : > { %v3161_v23 = vsel %vm14477_vm7, %v3159_v0, %v3131_v45  ;;  %v3456_v30 = vpop.permute.xlu0 %3455 }
 0x248   : > { %8946 = vmatprep.subr.msk.bf16.mxu0 %vm1114_vm6, %v3161_v23  ;;  %v3518_v18 = vsel %vm793_vm3, %v3516_v60, %v3456_v30 }
 0x249   : > { %3172 = vmatpush1.bf16.msra.mxu0 %v3167_v5 }
 0x24a   : > { %v3481_v42 = vpop.permute.xlu1 %3480 }
 0x24b   : > { %v3826_v37 = vpop.permute.xlu0 %3825  ;;  %v3529_v25 = vsel %vm786_vm15, %v10921_v54, %v3481_v42 }
 0x24c   : > { %8947 = vmatmul.mubr.msk.bf16.vlgmr.msra.gmra.mrb[12].mxu0 %vm1110_vm4, %v8945_v20  ;;  %v3894_v43 = vsel %vm786_vm15, %v10950_v8, %v3826_v37  ;;  %v8987_v20 = vld [vmem:[%s14440_s1 + $0x20] sm:$0xf] }
 0x24d   : > { %3963 = vmatprep.mubr.bf16.mxu0 %v14588_v4 }
 0x24e   : > { %v3486_v2 = vpop.permute.xlu1 %3485 }
 0x24f   : > { %v3461_v19 = vpop.permute.xlu0 %3460  ;;  %v3531_v44 = vsel %vm790_vm0, %v3529_v25, %v3486_v2 }
 0x250   : > { %v3520_v40 = vsel %vm14480_vm9, %v3518_v18, %v3461_v19 }
 0x252   : > { %v3491_v3 = vpop.permute.xlu1 %3490 }
 0x253   : > { %v3831_v21 = vpop.permute.xlu0 %3830  ;;  %v3533_v13 = vsel %vm793_vm3, %v3531_v44, %v3491_v3 }
 0x254   : > { %v3896_v14 = vsel %vm790_vm0, %v3894_v43, %v3831_v21 }
 0x256   : > { %v3861_v31 = vpop.permute.xlu1 %3860 }
 0x257   : > { %v3466_v36 = vpop.permute.xlu0 %3465  ;;  %v3909_v22 = vsel %vm786_vm15, %v11007_v57, %v3861_v31 }
 0x258   : > { %v3522_v53 = vsel %vm14479_vm11, %v3520_v40, %v3466_v36 }
 0x25a   : > { %v3496_v62 = vpop.permute.xlu1 %3495 }
 0x25b   : > { %v3836_v38 = vpop.permute.xlu0 %3835  ;;  %v3535_v49 = vsel %vm14480_vm9, %v3533_v13, %v3496_v62 }
 0x25c   : > { %v3898_v35 = vsel %vm793_vm3, %v3896_v14, %v3836_v38 }
 0x25e   : > { %v3866_v12 = vpop.permute.xlu1 %3865 }
 0x25f   : > { %v3471_v46 = vpop.permute.xlu0 %3470  ;;  %v3911_v15 = vsel %vm790_vm0, %v3909_v22, %v3866_v12 }
 0x260   : > { %v3524_v28 = vsel %vm14478_vm8, %v3522_v53, %v3471_v46 }
 0x262   : > { %v3501_v41 = vpop.permute.xlu1 %3500 }
 0x263   : > { %v3841_v26 = vpop.permute.xlu0 %3840  ;;  %v3537_v1 = vsel %vm14479_vm11, %v3535_v49, %v3501_v41 }
 0x264   : > { %v3900_v59 = vsel %vm14480_vm9, %v3898_v35, %v3841_v26 }
 0x266   : > { %v3871_v52 = vpop.permute.xlu1 %3870 }
 0x267   : > { %v3476_v7 = vpop.permute.xlu0 %3475  ;;  %v3913_v11 = vsel %vm793_vm3, %v3911_v15, %v3871_v52 }
 0x268   : > { %v3526_v47 = vsel %vm14477_vm7, %v3524_v28, %v3476_v7 }
 0x269   : > { %v3547_v16 = vsel %vm1114_vm6, %v3526_v47, 0 }
 0x26a   : > { %v3506_v27 = vpop.permute.xlu1 %3505 }
 0x26b   : > { %v3846_v56 = vpop.permute.xlu0 %3845  ;;  %v3539_v54 = vsel %vm14478_vm8, %v3537_v1, %v3506_v27 }
 0x26c   : > { %v3902_v58 = vsel %vm14479_vm11, %v3900_v59, %v3846_v56 }
 0x26e   : > { %v3876_v39 = vpop.permute.xlu1 %3875 }
 0x26f   : > { %v3851_v51 = vpop.permute.xlu0 %3850  ;;  %v3915_v24 = vsel %vm14480_vm9, %v3913_v11, %v3876_v39 }
 0x270   : > { %v3904_v57 = vsel %vm14478_vm8, %v3902_v58, %v3851_v51 }
 0x272   : > { %v3511_v17 = vpop.permute.xlu1 %3510 }
 0x273   : > { %v3541_v32 = vsel %vm14477_vm7, %v3539_v54, %v3511_v17  ;;  %v3856_v10 = vpop.permute.xlu0 %3855 }
 0x274   : > { %8967 = vmatprep.subr.msk.bf16.mxu1 %vm1114_vm6, %v3541_v32  ;;  %v3906_v34 = vsel %vm14477_vm7, %v3904_v57, %v3856_v10 }
 0x275   : > { %3552 = vmatpush1.bf16.msra.mxu1 %v3547_v16  ;;  %v3927_v5 = vsel %vm1114_vm6, %v3906_v34, 0 }
 0x276   : > { %v3881_v9 = vpop.permute.xlu1 %3880 }
 0x277   : > { %v1201_v29 = vpop.f32.mrb[0].mxu1  ;;  %v3917_v0 = vsel %vm14479_vm11, %v3915_v24, %v3881_v9  ;;  %vm14619_vm11 = vcmask 0  }
 0x278   : > { %8968 = vmatmul.mubr.msk.bf16.vlgmr.msra.gmra.mrb[12].mxu1 %vm1110_vm4, %v8966_v63  ;;  %v1203_v33 = vpop.f32.mrb[1].mxu1 }
 0x279   : > { %v1205_v6 = vpop.f32.mrb[2].mxu1  ;;  %5150 = vmatprep.mubr.bf16.mxu1 %v14588_v4 }
 0x27a   : > { %v3886_v8 = vpop.permute.xlu1 %3885  ;;  %v1206_v61 = vpop.f32.mrb[3].mxu1 }
 0x27b   : > { %v3919_v45 = vsel %vm14478_vm8, %v3917_v0, %v3886_v8  ;;  %v281_v0 = vld [vmem:[#allocation3] sm:$0x1]  ;;  %vm14618_vm8 = vcmask 3072  }
 0x27e   : > { %v3891_v23 = vpop.permute.xlu1 %3890 }
 0x27f   : > { %v3921_v30 = vsel %vm14477_vm7, %v3919_v45, %v3891_v23  ;;  %v282_v23 = vsel %vm9484_vm2, 0, %v281_v0 }
 0x280   : > { %8988 = vmatprep.subr.msk.bf16.mxu0 %vm1114_vm6, %v3921_v30  ;;  %283 = vst [vmem:[#allocation3] sm:$0x1] %v282_v23  ;;  %vm14607_vm6 = vcmask 142472  }
 0x281   : > { %3932 = vmatpush1.bf16.msra.mxu0 %v3927_v5 }
 0x284   : > { %8989 = vmatmul.mubr.msk.bf16.vlgmr.msra.gmra.mrb[16].mxu0 %vm1110_vm4, %v8987_v20  ;;  %v3978_v35 = vpop.permute.xlu0 %3977  ;;  %vm14606_vm4 = vcmask 3072  }
 0x285   : > { %5198 = vmatprep.mubr.bf16.mxu0 %v14588_v4  ;;  %329 = vst.msk [vmem:[#allocation3] sm:$0xf] %vm14606_vm4, %v14588_v4  ;;  %vm14609_vm4 = vcmask 0  }
 0x286   : > { %353 = vst.msk [vmem:[#allocation3] sm:$0xf] %vm14607_vm6, %v14588_v4  ;;  %vm14610_vm6 = vcmask 139400  }
 0x293   : > { %v1966_v42 = vpop.f32.mrb[4].mxu1 }
 0x294   : > { %v1968_v37 = vpop.f32.mrb[5].mxu1 }
 0x295   : > { %v1970_v2 = vpop.f32.mrb[6].mxu1 }
 0x296   : > { %v1971_v19 = vpop.f32.mrb[7].mxu1 }
 0x2bf   : > { %v1153_v3 = vpop.f32.mrb[0].mxu0 }
 0x2c0   : > { %v1155_v21 = vpop.f32.mrb[1].mxu0  ;;  %v1202_v31 = vadd.f32 %v1201_v29, %v1153_v3 }
 0x2c1   : > { %v1157_v36 = vpop.f32.mrb[2].mxu0  ;;  %v1204_v62 = vadd.f32 %v1203_v33, %v1155_v21 }
 0x2c2   : > { %v1158_v38 = vpop.f32.mrb[3].mxu0 }
 0x2cf   : > { %v1543_v12 = vpop.f32.mrb[4].mxu0 }
 0x2d0   : > { %v1550_v46 = vadd.f32 %v1543_v12, %v1202_v31  ;;  %v1545_v41 = vpop.f32.mrb[5].mxu0 }
 0x2d1   : > { %v1551_v26 = vadd.f32 %v1545_v41, %v1204_v62  ;;  %v1547_v52 = vpop.f32.mrb[6].mxu0 }
 0x2d2   : > { %v1973_v7 = vadd.f32 %v1966_v42, %v1550_v46  ;;  %v1548_v27 = vpop.f32.mrb[7].mxu0 }
 0x2d3   : > { %v1974_v50 = vadd.f32 %v1968_v37, %v1551_v26 }
 0x2ef   : > { %v2402_v60 = vpop.f32.mrb[8].mxu0 }
 0x2f0   : > { %v2409_v18 = vadd.f32 %v2402_v60, %v1973_v7  ;;  %v2404_v25 = vpop.f32.mrb[9].mxu0 }
 0x2f1   : > { %v2410_v56 = vadd.f32 %v2404_v25, %v1974_v50  ;;  %v2406_v44 = vpop.f32.mrb[10].mxu0 }
 0x2f2   : > { %v2407_v40 = vpop.f32.mrb[11].mxu0 }
 0x313   : > { %v2838_v39 = vpop.f32.mrb[8].mxu1 }
 0x314   : > { %v2845_v13 = vadd.f32 %v2838_v39, %v2409_v18  ;;  %v2840_v53 = vpop.f32.mrb[9].mxu1 }
 0x315   : > { %v2846_v49 = vadd.f32 %v2840_v53, %v2410_v56  ;;  %v2842_v28 = vpop.f32.mrb[10].mxu1 }
 0x316   : > { %v2843_v1 = vpop.f32.mrb[11].mxu1 }
 0x31f   : > { %v3205_v47 = vpop.f32.mrb[12].mxu0 }
 0x320   : > { %v3212_v54 = vadd.f32 %v3205_v47, %v2845_v13  ;;  %v3207_v17 = vpop.f32.mrb[13].mxu0 }
 0x321   : > { %v3213_v51 = vadd.f32 %v3207_v17, %v2846_v49  ;;  %v3209_v32 = vpop.f32.mrb[14].mxu0 }
 0x322   : > { %v3210_v16 = vpop.f32.mrb[15].mxu0 }
 0x34b   : > { %v3585_v63 = vpop.f32.mrb[12].mxu1 }
 0x34c   : > { %v3592_v9 = vadd.f32 %v3585_v63, %v3212_v54  ;;  %v3587_v43 = vpop.f32.mrb[13].mxu1 }
 0x34d   : > { %v3593_v29 = vadd.f32 %v3587_v43, %v3213_v51  ;;  %v3589_v14 = vpop.f32.mrb[14].mxu1 }
 0x34e   : > { %v3590_v33 = vpop.f32.mrb[15].mxu1 }
 0x357   : > { %v3965_v22 = vpop.f32.mrb[16].mxu0 }
 0x358   : > { %v3972_v10 = vadd.f32 %v3965_v22, %v3592_v9  ;;  %v3967_v6 = vpop.f32.mrb[17].mxu0 }
 0x359   : > { %v3973_v15 = vadd.f32 %v3967_v6, %v3593_v29  ;;  %v3969_v59 = vpop.f32.mrb[18].mxu0 }
 0x35a   : > { %v3980_v8 = vadd.f32 %v3978_v35, %v3972_v10  ;;  %v3970_v61 = vpop.f32.mrb[19].mxu0 }
 0x35b   : > { %v3981_v24 = vadd.f32 %v3978_v35, %v3973_v15 }
 0x35c   : > { %v3982_v11 = vmax.f32 %v3980_v8, 0.0  ;;  %v305_v8 = vld [vmem:[#allocation3 + $0x8] sm:$0x1] }
 0x35d   : > { %v3983_v57 = vmax.f32 %v3981_v24, 0.0 }
 0x35e   : > { %v3984_v58 = vpack.c.bf16 %v3982_v11, %v3982_v11 }
 0x35f   : > { %v3985_v34 = vpack.c.bf16 %v3983_v57, %v3983_v57 }
 0x360   : > { %3993 = vrot.lane.b32.xlu0 %v3984_v58, %s9401_s23  ;;  %3987 = vrot.lane.b32.xlu1 %v3984_v58, %s9402_s25 }
 0x364   : > { %3999 = vrot.lane.b32.xlu0 %v3984_v58, %s9400_s17  ;;  %3990 = vrot.lane.b32.xlu1 %v3984_v58, %s9398_s15 }
 0x368   : > { %4005 = vrot.lane.b32.xlu0 %v3984_v58, %s9399_s16  ;;  %3996 = vrot.lane.b32.xlu1 %v3984_v58, %s9397_s14 }
 0x36c   : > { %4012 = vrot.lane.b32.xlu0 %v3985_v34, %s9398_s15  ;;  %4002 = vrot.lane.b32.xlu1 %v3984_v58, %s9396_s13 }
 0x370   : > { %4018 = vrot.lane.b32.xlu0 %v3985_v34, %s9397_s14  ;;  %4009 = vrot.lane.b32.xlu1 %v3985_v34, %s9402_s25 }
 0x374   : > { %4024 = vrot.lane.b32.xlu0 %v3985_v34, %s9396_s13  ;;  %4015 = vrot.lane.b32.xlu1 %v3985_v34, %s9401_s23 }
 0x378   : > { %4021 = vrot.lane.b32.xlu1 %v3985_v34, %s9400_s17 }
 0x37c   : > { %4027 = vrot.lane.b32.xlu1 %v3985_v34, %s9399_s16 }
 0x3d2   : > { %v3994_v30 = vpop.permute.xlu0 %3993  ;;  %v3988_v5 = vpop.permute.xlu1 %3987 }
 0x3d6   : > { %v4000_v20 = vpop.permute.xlu0 %3999  ;;  %v3991_v42 = vpop.permute.xlu1 %3990 }
 0x3d7   : > { %v4098_v27 = vcombine.low %v3988_v5, %v4000_v20 }
 0x3d9   : > { %v4105_v39 = vrot.slane %v4098_v27, %v9662_v48 }
 0x3da   : > { %v4006_v37 = vpop.permute.xlu0 %4005  ;;  %v3997_v2 = vpop.permute.xlu1 %3996 }
 0x3db   : > { %v4106_v41 = vcombine.low %v3994_v30, %v4006_v37  ;;  %v4030_v52 = vcombine.low %v3984_v58, %v3997_v2  ;;  %v306_v58 = vsel %vm9494_vm5, 0, %v305_v8 }
 0x3dc   : > { %307 = vst [vmem:[#allocation3 + $0x8] sm:$0x1] %v306_v58 }
 0x3dd   : > { %v4113_v18 = vrot.slane %v4106_v41, %v9662_v48  ;;  %v4037_v44 = vrot.slane %v4030_v52, %v9662_v48  ;;  %331 = vst.msk [vmem:[#allocation3 + $0x8] sm:$0x1] %vm14609_vm4, %v14588_v4  ;;  %vm14612_vm4 = vcmask 3072  }
 0x3de   : > { %v4013_v19 = vpop.permute.xlu0 %4012  ;;  %v4003_v3 = vpop.permute.xlu1 %4002  ;;  %355 = vst.msk [vmem:[#allocation3 + $0x8] sm:$0x1] %vm14610_vm6, %v14588_v4  ;;  %vm14613_vm6 = vcmask 0   ;;  %vm14614_vm7 = vmmov %vm14612_vm4 }
 0x3df   : > { %v4038_v12 = vcombine.low %v3991_v42, %v4003_v3  ;;  %v4130_v28 = vcombine.low %v4105_v39, %v4113_v18  ;;  %v4131_v1 = vcombine.high %v4105_v39, %v4113_v18 }
 0x3e1   : > { %v4045_v50 = vrot.slane %v4038_v12, %v9662_v48  ;;  %v4138_v43 = vrot.slane %v4130_v28, %v9740_v55  ;;  %v4145_v29 = vrot.slane %v4131_v1, %v9740_v55 }
 0x3e2   : > { %v4019_v21 = vpop.permute.xlu0 %4018  ;;  %v4010_v31 = vpop.permute.xlu1 %4009 }
 0x3e3   : > { %v4046_v46 = vcombine.low %v3985_v34, %v4019_v21  ;;  %v4062_v53 = vcombine.low %v4037_v44, %v4045_v50  ;;  %v4063_v17 = vcombine.high %v4037_v44, %v4045_v50 }
 0x3e5   : > { %v4053_v60 = vrot.slane %v4046_v46, %v9662_v48  ;;  %v4070_v63 = vrot.slane %v4062_v53, %v9740_v55  ;;  %v4077_v22 = vrot.slane %v4063_v17, %v9740_v55 }
 0x3e6   : > { %v4025_v36 = vpop.permute.xlu0 %4024  ;;  %v4016_v62 = vpop.permute.xlu1 %4015 }
 0x3e7   : > { %v4054_v38 = vcombine.low %v4013_v19, %v4025_v36 }
 0x3e9   : > { %v4061_v7 = vrot.slane %v4054_v38, %v9662_v48 }
 0x3ea   : > { %v4022_v26 = vpop.permute.xlu1 %4021 }
 0x3eb   : > { %v4114_v25 = vcombine.low %v4010_v31, %v4022_v26  ;;  %v4078_v40 = vcombine.low %v4053_v60, %v4061_v7  ;;  %v4079_v49 = vcombine.high %v4053_v60, %v4061_v7 }
 0x3ed   : > { %v4121_v47 = vrot.slane %v4114_v25, %v9662_v48  ;;  %v4086_v51 = vrot.slane %v4078_v40, %v9740_v55  ;;  %v4093_v9 = vrot.slane %v4079_v49, %v9740_v55 }
 0x3ee   : > { %v4028_v56 = vpop.permute.xlu1 %4027 }
 0x3ef   : > { %v4122_v13 = vcombine.low %v4016_v62, %v4028_v56  ;;  %v4094_v35 = vcombine.low %v4070_v63, %v4086_v51  ;;  %v4095_v10 = vcombine.high %v4070_v63, %v4086_v51  ;;  %v11252_v61 = vcombine.low %v4077_v22, %v4093_v9 }
 0x3f1   : > { %v4129_v54 = vrot.slane %v4122_v13, %v9662_v48  ;;  %v4169_v0 = vshrl.u32 %v4094_v35, 16  ;;  %v4175_v56 = vshrl.u32 %v4095_v10, 16  ;;  %v4181_v58 = vshrl.u32 %v11252_v61, 16 }
 0x3f3   : > { %v4146_v32 = vcombine.low %v4121_v47, %v4129_v54  ;;  %v4147_v16 = vcombine.high %v4121_v47, %v4129_v54  ;;  %v11272_v47 = vcombine.high %v4077_v22, %v4093_v9 }
 0x3f5   : > { %v4154_v14 = vrot.slane %v4146_v32, %v9740_v55  ;;  %v4161_v33 = vrot.slane %v4147_v16, %v9740_v55 }
 0x3f7   : > { %v4162_v6 = vcombine.low %v4138_v43, %v4154_v14  ;;  %v4163_v15 = vcombine.high %v4138_v43, %v4154_v14  ;;  %v11250_v59 = vcombine.low %v4145_v29, %v4161_v33  ;;  %v11265_v44 = vcombine.high %v4145_v29, %v4161_v33 }
 0x3f9   : > { %v4168_v24 = vpack.i.b16 %v4162_v6, %v4094_v35  ;;  %v4170_v57 = vshrl.u32 %v4162_v6, 16  ;;  %v4174_v34 = vpack.i.b16 %v4163_v15, %v4095_v10  ;;  %v4180_v23 = vpack.i.b16 %v11250_v59, %v11252_v61 }
 0x3fa   : > { %v4176_v52 = vshrl.u32 %v4163_v15, 16  ;;  %v4186_v32 = vpack.i.b16 %v11265_v44, %v11272_v47  ;;  %v4182_v35 = vshrl.u32 %v11250_v59, 16 }
 0x3fb   : > { %v8990_v30 = vcombine.low %v4168_v24, %v4168_v24  ;;  %v8991_v5 = vcombine.high %v4168_v24, %v4168_v24  ;;  %v8994_v20 = vcombine.low %v4174_v34, %v4174_v34  ;;  %v8995_v42 = vcombine.high %v4174_v34, %v4174_v34 }
 0x3fc   : > { %v11262_v37 = vcombine.low %v4180_v23, %v4180_v23  ;;  %v8999_v2 = vcombine.high %v4180_v23, %v4180_v23  ;;  %v4171_v21 = vpack.i.b16 %v4170_v57, %v4169_v0  ;;  %v4177_v51 = vpack.i.b16 %v4176_v52, %v4175_v56  ;;  %v317_v52 = vld [vmem:[#allocation3 + $0x38] sm:$0x1] }
 0x3fd   : > { %v4223_v19 = vshrl.u32 %v8990_v30, 16  ;;  %v4231_v3 = vshrl.u32 %v8991_v5, 16  ;;  %v4226_v31 = vshll.u32 %v8990_v30, 16  ;;  %v4234_v36 = vshll.u32 %v8991_v5, 16 }
 0x3fe   : > { %v4257_v62 = vshrl.u32 %v8994_v20, 16  ;;  %v4265_v38 = vshrl.u32 %v8995_v42, 16  ;;  %v4291_v41 = vshrl.u32 %v11262_v37, 16  ;;  %v4299_v26 = vshrl.u32 %v8999_v2, 16 }
 0x3ff   : > { %v4225_v12 = vrot.slane %v4223_v19, 7  ;;  %v4233_v46 = vrot.slane %v4231_v3, 7  ;;  %v4268_v25 = vshll.u32 %v8995_v42, 16  ;;  %v8992_v39 = vcombine.low %v4171_v21, %v4171_v21  ;;  %v287_v3 = vld [vmem:[#allocation3 + $0x18] sm:$0x1] }
 0x400   : > { %v4259_v7 = vrot.slane %v4257_v62, 7  ;;  %v4267_v27 = vrot.slane %v4265_v38, 7  ;;  %v4293_v28 = vrot.slane %v4291_v41, 7  ;;  %v11270_v1 = vrot.slane %v4299_v26, 7  ;;  %v284_v38 = vld [vmem:[#allocation3 + $0xc] sm:$0x1] }
 0x401   : > { %v4228_v50 = vor.u32 %v4226_v31, %v4225_v12  ;;  %v4229_v60 = vrot.slane %v4225_v12, 4  ;;  %v4236_v18 = vor.u32 %v4234_v36, %v4233_v46  ;;  %v4238_v54 = vrot.slane %v4233_v46, 4  ;;  %v293_v12 = vld [vmem:[#allocation3 + $0x30] sm:$0x1]  ;;  %v308_v26 = vld [vmem:[#allocation3 + $0x14] sm:$0x1] }
 0x402   : > { %v4263_v40 = vrot.slane %v4259_v7, 4  ;;  %v4270_v49 = vor.u32 %v4268_v25, %v4267_v27  ;;  %v4302_v17 = vshll.u32 %v8999_v2, 16  ;;  %v4240_v16 = vshrl.u32 %v8992_v39, 16 }
 0x403   : > { %4358 = vrot.lane.b32.xlu0 %v4228_v50, %s9391_s10  ;;  %v4237_v53 = vsel %vm9607_vm10, %v4229_v60, %v4236_v18  ;;  %v11277_v63 = vcombine.high %v4171_v21, %v4171_v21  ;;  %v4260_v29 = vshll.u32 %v8994_v20, 16  ;;  %v4297_v14 = vrot.slane %v4293_v28, 4  ;;  %v311_v21 = vld [vmem:[#allocation3 + $0x20] sm:$0x1]  ;;  %v290_v50 = vld [vmem:[#allocation3 + $0x24] sm:$0x1] }
 0x404   : > { %4360 = vrot.lane.b32.xlu1 %v4237_v53, %s9391_s10  ;;  %v4271_v43 = vsel %vm9607_vm10, %v4263_v40, %v4270_v49  ;;  %v4304_v9 = vor.u32 %v4302_v17, %v11270_v1  ;;  %v8996_v22 = vcombine.low %v4177_v51, %v4177_v51  ;;  %v11285_v10 = vrot.slane %v4240_v16, 7  ;;  %v299_v60 = vld [vmem:[#allocation3 + $0x48] sm:$0x1]  ;;  %v314_v40 = vld [vmem:[#allocation3 + $0x2c] sm:$0x1] }
 0x405   : > { %v4262_v33 = vor.u32 %v4260_v29, %v4259_v7  ;;  %v4248_v6 = vshrl.u32 %v11277_v63, 16  ;;  %v11291_v8 = vcombine.low %v4186_v32, %v4186_v32  ;;  %v4243_v24 = vshll.u32 %v8992_v39, 16  ;;  %v320_v16 = vld [vmem:[#allocation3 + $0x44] sm:$0x1] }
 0x406   : > { %v4305_v15 = vsel %vm9607_vm10, %v4297_v14, %v4304_v9  ;;  %v11295_v57 = vcombine.high %v4177_v51, %v4177_v51  ;;  %v4272_v34 = vrot.slane %v4267_v27, 4  ;;  %v4274_v59 = vshrl.u32 %v8996_v22, 16 }
 0x407   : > { %4362 = vrot.lane.b32.xlu0 %v4238_v54, %s9391_s10  ;;  %v4245_v0 = vor.u32 %v4243_v24, %v11285_v10  ;;  %v11298_v23 = vrot.slane %v4248_v6, 7  ;;  %v4183_v30 = vpack.i.b16 %v4182_v35, %v4181_v58  ;;  %v4187_v5 = vshrl.u32 %v11272_v47, 16  ;;  %v296_v47 = vld [vmem:[#allocation3 + $0x3c] sm:$0x1] }
 0x408   : > { %4372 = vrot.lane.b32.xlu1 %v4271_v43, %s9391_s10  ;;  %v4294_v20 = vshll.u32 %v11262_v37, 16  ;;  %v4325_v61 = vshrl.u32 %v11291_v8, 16  ;;  %v11304_v42 = vcombine.high %v4186_v32, %v4186_v32  ;;  %v4188_v2 = vshrl.u32 %v11265_v44, 16 }
 0x409   : > { %v4282_v19 = vshrl.u32 %v11295_v57, 16  ;;  %v4306_v36 = vrot.slane %v11270_v1, 4  ;;  %v11310_v62 = vrot.slane %v4274_v59, 7  ;;  %v4255_v37 = vrot.slane %v11298_v23, 4  ;;  %v323_v1 = vld [vmem:[#allocation3 + $0x50] sm:$0x1] }
 0x40a   : > { %v4296_v31 = vor.u32 %v4294_v20, %v4293_v28  ;;  %v4277_v46 = vshll.u32 %v8996_v22, 16  ;;  %v11313_v41 = vcombine.low %v4183_v30, %v4183_v30  ;;  %v11316_v7 = vrot.slane %v4325_v61, 7  ;;  %v302_v20 = vld [vmem:[#allocation3 + $0x54] sm:$0x1] }
 0x40b   : > { %4370 = vrot.lane.b32.xlu0 %v4262_v33, %s9391_s10  ;;  %v4333_v27 = vshrl.u32 %v11304_v42, 16  ;;  %v11320_v18 = vrot.slane %v4282_v19, 7  ;;  %v288_v25 = vsel %vm9484_vm2, 0, %v287_v3  ;;  %v312_v56 = vsel %vm9494_vm5, 0, %v311_v21 }
 0x40c   : > { %4384 = vrot.lane.b32.xlu1 %v4305_v15, %s9391_s10  ;;  %v285_v44 = vsel %vm9484_vm2, 0, %v284_v38  ;;  %v4279_v39 = vor.u32 %v4277_v46, %v11310_v62  ;;  %v11329_v53 = vcombine.high %v4183_v30, %v4183_v30  ;;  %289 = vst [vmem:[#allocation3 + $0x18] sm:$0x1] %v288_v25  ;;  %313 = vst [vmem:[#allocation3 + $0x20] sm:$0x1] %v312_v56  ;;  %v294_v49 = vsel %vm9484_vm2, 0, %v293_v12 }
 0x40d   : > { %286 = vst [vmem:[#allocation3 + $0xc] sm:$0x1] %v285_v44  ;;  %v309_v28 = vsel %vm9494_vm5, 0, %v308_v26  ;;  %v4308_v54 = vshrl.u32 %v11313_v41, 16  ;;  %v4189_v17 = vpack.i.b16 %v4188_v2, %v4187_v5  ;;  %335 = vst.msk [vmem:[#allocation3 + $0x18] sm:$0xf] %vm14612_vm4, %v14588_v4 }
 0x40e   : > { %337 = vst.msk [vmem:[#allocation3 + $0x20] sm:$0x1] %vm14613_vm6, %v14588_v4  ;;  %295 = vst [vmem:[#allocation3 + $0x30] sm:$0x1] %v294_v49  ;;  %v318_v51 = vsel %vm9494_vm5, 0, %v317_v52  ;;  %v291_v32 = vsel %vm9484_vm2, 0, %v290_v50 }
 0x40f   : > { %4374 = vrot.lane.b32.xlu0 %v4272_v34, %s9391_s10  ;;  %332 = vst.msk [vmem:[#allocation3 + $0xc] sm:$0xf] %vm14614_vm7, %v14588_v4  ;;  %310 = vst [vmem:[#allocation3 + $0x14] sm:$0x1] %v309_v28  ;;  %v4328_v43 = vshll.u32 %v11291_v8, 16  ;;  %vm14615_vm4 = vcmask 142472   ;;  %v9004_v24 = vcombine.low %v4189_v17, %v4189_v17  ;;  %v9005_v19 = vcombine.high %v4189_v17, %v4189_v17 }
 0x410   : > { %4364 = vrot.lane.b32.xlu1 %v4245_v0, %s9391_s10  ;;  %359 = vst.msk [vmem:[#allocation3 + $0x18] sm:$0xf] %vm14615_vm4, %v14588_v4  ;;  %vm14616_vm6 = vcmask 139400   ;;  %vm14617_vm7 = vmmov %vm14615_vm4  ;;  %v300_v29 = vsel %vm9484_vm2, 0, %v299_v60  ;;  %v315_v14 = vsel %vm9494_vm5, 0, %v314_v40  ;;  %v324_v9 = vsel %vm9494_vm5, 0, %v323_v1 }
 0x411   : > { %361 = vst.msk [vmem:[#allocation3 + $0x20] sm:$0x1] %vm14616_vm6, %v14588_v4  ;;  %319 = vst [vmem:[#allocation3 + $0x38] sm:$0x1] %v318_v51  ;;  %v297_v33 = vsel %vm9484_vm2, 0, %v296_v47  ;;  %v321_v22 = vsel %vm9494_vm5, 0, %v320_v16  ;;  %v4330_v35 = vor.u32 %v4328_v43, %v11316_v7 }
 0x412   : > { %356 = vst.msk [vmem:[#allocation3 + $0xc] sm:$0xf] %vm14617_vm7, %v14588_v4  ;;  %292 = vst [vmem:[#allocation3 + $0x24] sm:$0x1] %v291_v32  ;;  %v4335_v6 = vrot.slane %v4333_v27, 7  ;;  %v4289_v15 = vrot.slane %v11320_v18, 4 }
 0x413   : > { %4382 = vrot.lane.b32.xlu0 %v4296_v31, %s9391_s10  ;;  %341 = vst.msk [vmem:[#allocation3 + $0x30] sm:$0xf] %vm14618_vm8, %v14588_v4  ;;  %vm14620_vm8 = vmmov %vm14619_vm11  ;;  %v11387_v8 = vrot.slane %v4308_v54, 7  ;;  %v4316_v58 = vshrl.u32 %v11329_v53, 16  ;;  %v4336_v34 = vshll.u32 %v11304_v42, 16  ;;  %v4311_v59 = vshll.u32 %v11313_v41, 16 }
 0x414   : > { %4368 = vrot.lane.b32.xlu1 %v4255_v37, %s9391_s10  ;;  %334 = vst.msk [vmem:[#allocation3 + $0x14] sm:$0x1] %vm14619_vm11, %v14588_v4  ;;  %vm14621_vm11 = vcmask 3072   ;;  %301 = vst [vmem:[#allocation3 + $0x48] sm:$0x1] %v300_v29  ;;  %v4340_v0 = vrot.slane %v4335_v6, 4 }
 0x415   : > { %365 = vst.msk [vmem:[#allocation3 + $0x30] sm:$0xf] %vm14615_vm4, %v14588_v4  ;;  %316 = vst [vmem:[#allocation3 + $0x2c] sm:$0x1] %v315_v14  ;;  %v4331_v30 = vrot.slane %v11316_v7, 4  ;;  %v4338_v5 = vor.u32 %v4336_v34, %v4335_v6  ;;  %v4313_v61 = vor.u32 %v4311_v59, %v11387_v8  ;;  %v4318_v42 = vrot.slane %v4316_v58, 7 }
 0x416   : > { %358 = vst.msk [vmem:[#allocation3 + $0x14] sm:$0x1] %vm14616_vm6, %v14588_v4  ;;  %vm14622_vm7 = vmmov %vm14616_vm6  ;;  %v4342_v2 = vshrl.u32 %v9004_v24, 16  ;;  %v303_v3 = vsel %vm9484_vm2, 0, %v302_v20  ;;  %v4251_v21 = vshll.u32 %v11277_v63, 16  ;;  %v4246_v38 = vrot.slane %v11285_v10, 4 }
 0x417   : > { %4386 = vrot.lane.b32.xlu0 %v4306_v36, %s9391_s10  ;;  %343 = vst.msk [vmem:[#allocation3 + $0x38] sm:$0x1] %vm14620_vm8, %v14588_v4  ;;  %vm14623_vm6 = vmmov %vm14621_vm11  ;;  %v326_v31 = vld [vmem:[#allocation3 + $0x5c] sm:$0x1]  ;;  %v4339_v36 = vsel %vm9607_vm10, %v4331_v30, %v4338_v5  ;;  %v4323_v37 = vrot.slane %v4318_v42, 4  ;;  %v4350_v41 = vshrl.u32 %v9005_v19, 16 }
 0x418   : > { %4376 = vrot.lane.b32.xlu1 %v4279_v39, %s9391_s10  ;;  %338 = vst.msk [vmem:[#allocation3 + $0x24] sm:$0xf] %vm14621_vm11, %v14588_v4  ;;  %325 = vst [vmem:[#allocation3 + $0x50] sm:$0x1] %v324_v9  ;;  %v327_v12 = vsel %vm9494_vm5, 0, %v326_v31  ;;  %v4253_v45 = vor.u32 %v4251_v21, %v11298_v23  ;;  %v4344_v46 = vrot.slane %v4342_v2, 7 }
 0x419   : > { %367 = vst.msk [vmem:[#allocation3 + $0x38] sm:$0x1] %vm14622_vm7, %v14588_v4  ;;  %298 = vst [vmem:[#allocation3 + $0x3c] sm:$0x1] %v297_v33  ;;  %v4345_v63 = vshll.u32 %v9004_v24, 16  ;;  %v4285_v11 = vshll.u32 %v11295_v57, 16 }
 0x41a   : > { %362 = vst.msk [vmem:[#allocation3 + $0x24] sm:$0xf] %vm14615_vm4, %v14588_v4  ;;  %322 = vst [vmem:[#allocation3 + $0x44] sm:$0x1] %v321_v22  ;;  %v4280_v10 = vrot.slane %v11310_v62, 4  ;;  %v4254_v23 = vsel %vm9607_vm10, %v4246_v38, %v4253_v45  ;;  %v4352_v7 = vrot.slane %v4350_v41, 7 }
 0x41b   : > { %347 = vst.msk [vmem:[#allocation3 + $0x48] sm:$0xf] %vm14623_vm6, %v14588_v4  ;;  %vm14624_vm11 = vmmov %vm14615_vm4  ;;  %4394 = vrot.lane.b32.xlu0 %v4330_v35, %s9391_s10  ;;  %v4347_v26 = vor.u32 %v4345_v63, %v4344_v46  ;;  %v4287_v52 = vor.u32 %v4285_v11, %v11320_v18  ;;  %v4319_v27 = vshll.u32 %v11329_v53, 16  ;;  %v4353_v50 = vshll.u32 %v9005_v19, 16  ;;  %v4430_v39 = vld [vmem:[#allocation3] sm:$0xf] }
 0x41c   : > { %340 = vst.msk [vmem:[#allocation3 + $0x2c] sm:$0x1] %vm14620_vm8, %v14588_v4  ;;  %vm14625_vm4 = vmmov %vm14620_vm8  ;;  %4380 = vrot.lane.b32.xlu1 %v4289_v15, %s9391_s10  ;;  %v4357_v60 = vrot.slane %v4352_v7, 4  ;;  %v4314_v62 = vrot.slane %v11387_v8, 4  ;;  %v4348_v56 = vrot.slane %v4344_v46, 4 }
 0x41d   : > { %371 = vst.msk [vmem:[#allocation3 + $0x48] sm:$0xf] %vm14624_vm11, %v14588_v4  ;;  %vm14626_vm8 = vmmov %vm14625_vm4  ;;  %v4288_v57 = vsel %vm9607_vm10, %v4280_v10, %v4287_v52  ;;  %v4321_v25 = vor.u32 %v4319_v27, %v4318_v42  ;;  %v4355_v44 = vor.u32 %v4353_v50, %v4352_v7  ;;  %v4434_v47 = vld [vmem:[#allocation3 + $0x8] sm:$0x1]  ;;  %v4444_v13 = vld [vmem:[#allocation3 + $0x18] sm:$0xf] }
 0x41e   : > { %364 = vst.msk [vmem:[#allocation3 + $0x2c] sm:$0x1] %vm14622_vm7, %v14588_v4  ;;  %vm14627_vm9 = vmmov %vm14622_vm7  ;;  %v4448_v33 = vld [vmem:[#allocation3 + $0x20] sm:$0x1]  ;;  %v4437_v22 = vld [vmem:[#allocation3 + $0xc] sm:$0xf] }
 0x41f   : > { %349 = vst.msk [vmem:[#allocation3 + $0x50] sm:$0x1] %vm14625_vm4, %v14588_v4  ;;  %4398 = vrot.lane.b32.xlu0 %v4340_v0, %s9391_s10  ;;  %304 = vst [vmem:[#allocation3 + $0x54] sm:$0x1] %v303_v3  ;;  %v4322_v18 = vsel %vm9607_vm10, %v4314_v62, %v4321_v25  ;;  %v4356_v40 = vsel %vm9607_vm10, %v4348_v56, %v4355_v44  ;;  %v4458_v24 = vld [vmem:[#allocation3 + $0x30] sm:$0xf] }
 0x420   : > { %344 = vst.msk [vmem:[#allocation3 + $0x3c] sm:$0xf] %vm14623_vm6, %v14588_v4  ;;  %4388 = vrot.lane.b32.xlu1 %v4313_v61, %s9391_s10  ;;  %vm14629_vm2 = vmmov %vm14624_vm11  ;;  %v4441_v34 = vld [vmem:[#allocation3 + $0x14] sm:$0x1]  ;;  %v4462_v2 = vld [vmem:[#allocation3 + $0x38] sm:$0x1] }
 0x421   : > { %346 = vst.msk [vmem:[#allocation3 + $0x44] sm:$0x1] %vm14626_vm8, %v14588_v4  ;;  %328 = vst [vmem:[#allocation3 + $0x5c] sm:$0x1] %v327_v12  ;;  %v4451_v19 = vld [vmem:[#allocation3 + $0x24] sm:$0xf] }
 0x422   : > { %373 = vst.msk [vmem:[#allocation3 + $0x50] sm:$0x1] %vm14627_vm9, %v14588_v4  ;;  %vm14628_vm9 = vmmov %vm14623_vm6  ;;  %vm14632_vm6 = vcmask 134152  }
 0x423   : > { %368 = vst.msk [vmem:[#allocation3 + $0x3c] sm:$0xf] %vm14624_vm11, %v14588_v4  ;;  %4396 = vrot.lane.b32.xlu0 %v4339_v36, %s9391_s10  ;;  %vm14630_vm5 = vmmov %vm14622_vm7 }
 0x424   : > { %370 = vst.msk [vmem:[#allocation3 + $0x44] sm:$0x1] %vm14622_vm7, %v14588_v4  ;;  %4392 = vrot.lane.b32.xlu1 %v4323_v37, %s9391_s10  ;;  %vm14634_vm8 = vmmov %vm14632_vm6  ;;  %v4472_v38 = vld [vmem:[#allocation3 + $0x48] sm:$0xf] }
 0x425   : > { %350 = vst.msk [vmem:[#allocation3 + $0x54] sm:$0xf] %vm14628_vm9, %v14588_v4  ;;  %vm14635_vm10 = vmmov %vm14632_vm6  ;;  %v4455_v12 = vld [vmem:[#allocation3 + $0x2c] sm:$0x1] }
 0x426   : > { %374 = vst.msk [vmem:[#allocation3 + $0x54] sm:$0xf] %vm14629_vm2, %v14588_v4  ;;  %vm14636_vm11 = vmmov %vm14632_vm6  ;;  %vm14928_vm2 = vcmask 785408  }
 0x427   : > { %352 = vst.msk [vmem:[#allocation3 + $0x5c] sm:$0x1] %vm14625_vm4, %v14588_v4  ;;  %4366 = vrot.lane.b32.xlu0 %v4254_v23, %s9391_s10  ;;  %vm14637_vm7 = vmmov %vm14632_vm6 }
 0x428   : > { %376 = vst.msk [vmem:[#allocation3 + $0x5c] sm:$0x1] %vm14630_vm5, %v14588_v4  ;;  %4400 = vrot.lane.b32.xlu1 %v4347_v26, %s9391_s10  ;;  %vm14638_vm9 = vmmov %vm14632_vm6  ;;  %vm5113_vm5 = vcmask 1043456  }
 0x429   : > { %v4476_v10 = vld [vmem:[#allocation3 + $0x50] sm:$0x1] }
 0x42a   : > { %v4465_v23 = vld [vmem:[#allocation3 + $0x3c] sm:$0xf] }
 0x42b   : > { %4378 = vrot.lane.b32.xlu0 %v4288_v57, %s9391_s10  ;;  %v4469_v50 = vld [vmem:[#allocation3 + $0x44] sm:$0x1] }
 0x42c   : > { %4404 = vrot.lane.b32.xlu1 %v4357_v60, %s9391_s10 }
 0x42d   : > { %v4479_v44 = vld [vmem:[#allocation3 + $0x54] sm:$0xf] }
 0x42f   : > { %4390 = vrot.lane.b32.xlu0 %v4322_v18, %s9391_s10 }
 0x430   : > { %4402 = vrot.lane.b32.xlu1 %v4356_v40, %s9391_s10 }
 0x475   : > { %v4359_v53 = vpop.permute.xlu0 %4358 }
 0x476   : > { %v4431_v28 = vsel %vm9637_vm12, %v4359_v53, %v4430_v39  ;;  %v4361_v1 = vpop.permute.xlu1 %4360 }
 0x477   : > { %4432 = vst [vmem:[#allocation3] sm:$0xf] %v4431_v28  ;;  %4433 = vst.msk [vmem:[#allocation3 + $0x4] sm:$0xf] %vm14632_vm6, %v4361_v1 }
 0x479   : > { %v4363_v54 = vpop.permute.xlu0 %4362 }
 0x47a   : > { %v4435_v51 = vsel %vm9650_vm14, %v4363_v54, %v4434_v47  ;;  %v4373_v32 = vpop.permute.xlu1 %4372 }
 0x47b   : > { %4436 = vst [vmem:[#allocation3 + $0x8] sm:$0x1] %v4435_v51  ;;  %4447 = vst.msk [vmem:[#allocation3 + $0x1c] sm:$0xf] %vm14634_vm8, %v4373_v32 }
 0x47d   : > { %v4371_v16 = vpop.permute.xlu0 %4370 }
 0x47e   : > { %v4445_v43 = vsel %vm9637_vm12, %v4371_v16, %v4444_v13  ;;  %v4385_v29 = vpop.permute.xlu1 %4384  ;;  %v11460_v14 = vld [vmem:[#allocation3 + $0x4] sm:$0xf]  ;;  %v11462_v9 = vld [vmem:[#allocation3] sm:$0xf]  ;;  %v4483_v13 = vld [vmem:[#allocation3 + $0x5c] sm:$0x1] }
 0x47f   : > { %4446 = vst [vmem:[#allocation3 + $0x18] sm:$0xf] %v4445_v43  ;;  %4461 = vst.msk [vmem:[#allocation3 + $0x34] sm:$0xf] %vm14635_vm10, %v4385_v29  ;;  %4791 = vrot.lane.b32.xlu1 %v11460_v14, %s9393_s11  ;;  %4789 = vrot.lane.b32.xlu0 %v11462_v9, %s9393_s11  ;;  %v5207_v28 = vld [vmem:[#allocation3] sm:$0xf] }
 0x480   : > { %vm14932_vm10 = vmmov %vm14928_vm2 }
 0x481   : > { %v4375_v35 = vpop.permute.xlu0 %4374 }
 0x482   : > { %v4449_v6 = vsel %vm9650_vm14, %v4375_v35, %v4448_v33  ;;  %v4365_v15 = vpop.permute.xlu1 %4364  ;;  %v11471_v8 = vld [vmem:[#allocation3 + $0x1c] sm:$0xf] }
 0x483   : > { %4450 = vst [vmem:[#allocation3 + $0x20] sm:$0x1] %v4449_v6  ;;  %v4438_v58 = vsel %vm9637_vm12, %v4365_v15, %v4437_v22  ;;  %4799 = vrot.lane.b32.xlu1 %v11471_v8, %s9393_s11 }
 0x484   : > { %4439 = vst [vmem:[#allocation3 + $0xc] sm:$0xf] %v4438_v58  ;;  %v5208_v58 = vld [vmem:[#allocation3 + $0x4] sm:$0xf] }
 0x485   : > { %v4383_v59 = vpop.permute.xlu0 %4382 }
 0x486   : > { %v4459_v0 = vsel %vm9637_vm12, %v4383_v59, %v4458_v24  ;;  %v4369_v30 = vpop.permute.xlu1 %4368  ;;  %v11479_v5 = vld [vmem:[#allocation3 + $0x34] sm:$0xf]  ;;  %v4490_v20 = vld [vmem:[#allocation3 + $0x18] sm:$0xf] }
 0x487   : > { %4460 = vst [vmem:[#allocation3 + $0x30] sm:$0xf] %v4459_v0  ;;  %v4442_v61 = vsel %vm9650_vm14, %v4369_v30, %v4441_v34  ;;  %4807 = vrot.lane.b32.xlu1 %v11479_v5, %s9393_s11  ;;  %v4570_v42 = vcombine.low %v11460_v14, %v11479_v5  ;;  %4797 = vrot.lane.b32.xlu0 %v4490_v20, %s9393_s11  ;;  %v5211_v22 = vld [vmem:[#allocation3 + $0x18] sm:$0xf]  ;;  %v5212_v30 = vld [vmem:[#allocation3 + $0x1c] sm:$0xf] }
 0x488   : > { %4443 = vst [vmem:[#allocation3 + $0x14] sm:$0x1] %v4442_v61 }
 0x489   : > { %v4387_v3 = vpop.permute.xlu0 %4386  ;;  %v11530_v35 = vrot.slane %v4570_v42, %v9662_v48 }
 0x48a   : > { %v4463_v21 = vsel %vm9650_vm14, %v4387_v3, %v4462_v2  ;;  %v4377_v31 = vpop.permute.xlu1 %4376 }
 0x48b   : > { %4464 = vst [vmem:[#allocation3 + $0x38] sm:$0x1] %v4463_v21  ;;  %v4452_v36 = vsel %vm9637_vm12, %v4377_v31, %v4451_v19  ;;  %v4488_v51 = vld [vmem:[#allocation3 + $0xc] sm:$0xf]  ;;  %v5216_v19 = vld [vmem:[#allocation3 + $0x34] sm:$0xf] }
 0x48c   : > { %4453 = vst [vmem:[#allocation3 + $0x24] sm:$0xf] %v4452_v36 }
 0x48d   : > { %v4395_v37 = vpop.permute.xlu0 %4394 }
 0x48e   : > { %v4473_v45 = vsel %vm9637_vm12, %v4395_v37, %v4472_v38  ;;  %v4381_v46 = vpop.permute.xlu1 %4380  ;;  %v4494_v41 = vld [vmem:[#allocation3 + $0x30] sm:$0xf] }
 0x48f   : > { %4474 = vst [vmem:[#allocation3 + $0x48] sm:$0xf] %v4473_v45  ;;  %v4456_v63 = vsel %vm9650_vm14, %v4381_v46, %v4455_v12  ;;  %4805 = vrot.lane.b32.xlu0 %v4494_v41, %s9393_s11  ;;  %v4502_v11 = vcombine.low %v11462_v9, %v4494_v41  ;;  %v5215_v14 = vld [vmem:[#allocation3 + $0x30] sm:$0xf] }
 0x490   : > { %4457 = vst [vmem:[#allocation3 + $0x2c] sm:$0x1] %v4456_v63 }
 0x491   : > { %v4399_v26 = vpop.permute.xlu0 %4398  ;;  %v11507_v18 = vrot.slane %v4502_v11, %v9662_v48  ;;  %v5209_v11 = vld [vmem:[#allocation3 + $0xc] sm:$0xf] }
 0x492   : > { %v4477_v52 = vsel %vm9650_vm14, %v4399_v26, %v4476_v10  ;;  %v4389_v7 = vpop.permute.xlu1 %4388 }
 0x493   : > { %4478 = vst [vmem:[#allocation3 + $0x50] sm:$0x1] %v4477_v52  ;;  %v4466_v27 = vsel %vm9637_vm12, %v4389_v7, %v4465_v23  ;;  %v4492_v34 = vld [vmem:[#allocation3 + $0x24] sm:$0xf]  ;;  %v7777_v52 = vld [vmem:[#allocation3] sm:$0xe] }
 0x494   : > { %4467 = vst [vmem:[#allocation3 + $0x3c] sm:$0xf] %v4466_v27  ;;  %v5213_v10 = vld [vmem:[#allocation3 + $0x24] sm:$0xf] }
 0x495   : > { %v4397_v57 = vpop.permute.xlu0 %4396  ;;  %v7778_v7 = vld [vmem:[#allocation3 + $0x4] sm:$0xf] }
 0x496   : > { %4475 = vst.msk [vmem:[#allocation3 + $0x4c] sm:$0xf] %vm14636_vm11, %v4397_v57  ;;  %v4393_v60 = vpop.permute.xlu1 %4392  ;;  %v4498_v62 = vld [vmem:[#allocation3 + $0x48] sm:$0xf]  ;;  %v9132_v57 = vrot.slane %v7777_v52, 9 }
 0x497   : > { %v4470_v25 = vsel %vm9650_vm14, %v4393_v60, %v4469_v50  ;;  %4813 = vrot.lane.b32.xlu0 %v4498_v62, %s9393_s11  ;;  %v4510_v56 = vcombine.low %v4490_v20, %v4498_v62  ;;  %v5219_v5 = vld [vmem:[#allocation3 + $0x48] sm:$0xf]  ;;  %v7827_v60 = vrot.slane %v7778_v7, 5  ;;  %v7783_v62 = vld [vmem:[#allocation3 + $0x18] sm:$0xe] }
 0x498   : > { %4471 = vst [vmem:[#allocation3 + $0x44] sm:$0x1] %v4470_v25  ;;  %v11581_v25 = vld [vmem:[#allocation3] sm:$0xe]  ;;  %v7795_v7 = vld [vmem:[#allocation3 + $0x48] sm:$0xe] }
 0x499   : > { %v11510_v40 = vrot.slane %v4510_v56, %v9662_v48  ;;  %v4367_v39 = vpop.permute.xlu0 %4366  ;;  %v11583_v56 = vld [vmem:[#allocation3 + $0x4] sm:$0xf] }
 0x49a   : > { %4440 = vst.msk [vmem:[#allocation3 + $0x10] sm:$0xf] %vm14637_vm7, %v4367_v39  ;;  %v4401_v53 = vpop.permute.xlu1 %4400  ;;  %vm5109_vm7 = vcmask 64512  }
 0x49b   : > { %v4518_v1 = vcombine.low %v11507_v18, %v11510_v40  ;;  %v4519_v47 = vcombine.high %v11507_v18, %v11510_v40  ;;  %v4480_v54 = vsel %vm9637_vm12, %v4401_v53, %v4479_v44  ;;  %5239 = vrot.lane.b32.xlu0 %v5207_v28, %s9394_s12  ;;  %v4496_v32 = vld [vmem:[#allocation3 + $0x3c] sm:$0xf]  ;;  %vm14639_vm12 = vmmov %vm14632_vm6  ;;  %v6163_v44 = vld [vmem:[#allocation3] sm:$0xf] }
 0x49c   : > { %4481 = vst [vmem:[#allocation3 + $0x54] sm:$0xf] %v4480_v54  ;;  %v4536_v16 = vcombine.low %v4488_v51, %v4496_v32  ;;  %v5217_v26 = vld [vmem:[#allocation3 + $0x3c] sm:$0xf]  ;;  %v7779_v28 = vld [vmem:[#allocation3 + $0x8] sm:$0x1] }
 0x49d   : > { %v4379_v43 = vpop.permute.xlu0 %4378  ;;  %v4499_v29 = vld [vmem:[#allocation3 + $0x4c] sm:$0xf]  ;;  %v7784_v53 = vld [vmem:[#allocation3 + $0x1c] sm:$0xf] }
 0x49e   : > { %4454 = vst.msk [vmem:[#allocation3 + $0x28] sm:$0xf] %vm14638_vm9, %v4379_v43  ;;  %v4405_v9 = vpop.permute.xlu1 %4404  ;;  %4815 = vrot.lane.b32.xlu1 %v4499_v29, %s9393_s11  ;;  %v4578_v33 = vcombine.low %v11471_v8, %v4499_v29  ;;  %v11545_v20 = vrot.slane %v4536_v16, %v9662_v48  ;;  %v5220_v45 = vld [vmem:[#allocation3 + $0x4c] sm:$0xf]  ;;  %v9157_v16 = vrot.slane %v11581_v25, 9  ;;  %v8301_v43 = vrot.slane %v11583_v56, 5 }
 0x49f   : > { %v4484_v49 = vsel %vm9650_vm14, %v4405_v9, %v4483_v13  ;;  %5247 = vrot.lane.b32.xlu0 %v5211_v22, %s9394_s12  ;;  %vm14640_vm14 = vmmov %vm14632_vm6  ;;  %v7789_v13 = vld [vmem:[#allocation3 + $0x30] sm:$0xe]  ;;  %v6188_v29 = vshrl.u32 %v6163_v44, 16  ;;  %v6191_v9 = vshll.u32 %v6163_v44, 16  ;;  %v7830_v22 = vrot.slane %v7779_v28, 5 }
 0x4a0   : > { %4485 = vst [vmem:[#allocation3 + $0x5c] sm:$0x1] %v4484_v49  ;;  %v11533_v6 = vrot.slane %v4578_v33, %v9662_v48  ;;  %v7841_v33 = vrot.slane %v7784_v53, 5  ;;  %v11591_v49 = vld [vmem:[#allocation3 + $0x1c] sm:$0xf]  ;;  %vm14930_vm6 = vcmask 916480  }
 0x4a1   : > { %v4391_v15 = vpop.permute.xlu0 %4390  ;;  %v4489_v3 = vld [vmem:[#allocation3 + $0x10] sm:$0xf]  ;;  %v8259_v44 = vld [vmem:[#allocation3 + $0x20] sm:$0x1]  ;;  %v11646_v56 = vld [vmem:[#allocation3 + $0x24] sm:$0xe] }
 0x4a2   : > { %v4586_v8 = vcombine.low %v11530_v35, %v11533_v6  ;;  %v4587_v17 = vcombine.high %v11530_v35, %v11533_v6  ;;  %4468 = vst.msk [vmem:[#allocation3 + $0x40] sm:$0xf] %vm14639_vm12, %v4391_v15  ;;  %v4403_v24 = vpop.permute.xlu1 %4402  ;;  %5241 = vrot.lane.b32.xlu1 %v5208_v58, %s9394_s12  ;;  %v5210_v23 = vld [vmem:[#allocation3 + $0x10] sm:$0xf]  ;;  %v8253_v15 = vld [vmem:[#allocation3 + $0x8] sm:$0x1]  ;;  %vm14933_vm11 = vmmov %vm14930_vm6 }
 0x4a3   : > { %4482 = vst.msk [vmem:[#allocation3 + $0x58] sm:$0xf] %vm14640_vm14, %v4403_v24  ;;  %5255 = vrot.lane.b32.xlu0 %v5215_v14, %s9394_s12  ;;  %v4500_v59 = vld [vmem:[#allocation3 + $0x54] sm:$0xf]  ;;  %v11593_v14 = vld [vmem:[#allocation3 + $0x4] sm:$0xf]  ;;  %vm14972_vm14 = vmmov %vm14928_vm2 }
 0x4a4   : > { %v4544_v0 = vcombine.low %v4492_v34, %v4500_v59  ;;  %v5221_v50 = vld [vmem:[#allocation3 + $0x54] sm:$0xf] }
 0x4a5   : > { %v4493_v31 = vld [vmem:[#allocation3 + $0x28] sm:$0xf]  ;;  %v7790_v24 = vld [vmem:[#allocation3 + $0x34] sm:$0xf] }
 0x4a6   : > { %5249 = vrot.lane.b32.xlu1 %v5212_v30, %s9394_s12  ;;  %v11548_v61 = vrot.slane %v4544_v0, %v9662_v48  ;;  %v5214_v27 = vld [vmem:[#allocation3 + $0x28] sm:$0xf]  ;;  %v7829_v0 = vrot.slane %v7827_v60, 4  ;;  %v9136_v30 = vrot.slane %v7789_v13, 9  ;;  %v7798_v42 = vld [vmem:[#allocation3 + $0x54] sm:$0xe] }
 0x4a7   : > { %5263 = vrot.lane.b32.xlu0 %v5219_v5, %s9394_s12  ;;  %v7785_v5 = vld [vmem:[#allocation3 + $0x20] sm:$0x1] }
 0x4a8   : > { %v7844_v52 = vrot.slane %v7785_v5, 5  ;;  %v11624_v5 = vld [vmem:[#allocation3 + $0x14] sm:$0x1] }
 0x4a9   : > { %v4497_v21 = vld [vmem:[#allocation3 + $0x40] sm:$0xf] }
 0x4aa   : > { %5257 = vrot.lane.b32.xlu1 %v5216_v19, %s9394_s12  ;;  %v4604_v36 = vcombine.low %v4489_v3, %v4497_v21  ;;  %v4501_v38 = vld [vmem:[#allocation3 + $0x58] sm:$0xf]  ;;  %v5218_v39 = vld [vmem:[#allocation3 + $0x40] sm:$0xf]  ;;  %v11598_v19 = vld [vmem:[#allocation3 + $0x34] sm:$0xf] }
 0x4ab   : > { %4793 = vrot.lane.b32.xlu0 %v4488_v51, %s9393_s11  ;;  %v4612_v12 = vcombine.low %v4493_v31, %v4501_v38  ;;  %v7828_v51 = vsel %vm9728_vm1, %v9132_v57, %v7827_v60  ;;  %v5222_v58 = vld [vmem:[#allocation3 + $0x58] sm:$0xf] }
 0x4ac   : > { %v11558_v37 = vrot.slane %v4604_v36, %v9662_v48  ;;  %v6190_v36 = vrot.slane %v6188_v29, 4  ;;  %v9138_v29 = vrot.slane %v7795_v7, 9 }
 0x4ad   : > { %v11561_v46 = vrot.slane %v4612_v12, %v9662_v48  ;;  %v7855_v12 = vrot.slane %v7790_v24, 5  ;;  %v8318_v24 = vrot.slane %v8259_v44, 5 }
 0x4ae   : > { %5265 = vrot.lane.b32.xlu1 %v5220_v45, %s9394_s12  ;;  %v7843_v45 = vrot.slane %v7841_v33, 4 }
 0x4af   : > { %4801 = vrot.lane.b32.xlu0 %v4492_v34, %s9393_s11  ;;  %v4621_v63 = vcombine.high %v11558_v37, %v11561_v46  ;;  %v6169_v34 = vld [vmem:[#allocation3 + $0x18] sm:$0xf]  ;;  %v7856_v57 = vsel %vm9728_vm1, %v9136_v30, %v7855_v12 }
 0x4b2   : > { %4795 = vrot.lane.b32.xlu1 %v4489_v3, %s9393_s11  ;;  %v7796_v3 = vld [vmem:[#allocation3 + $0x4c] sm:$0xf] }
 0x4b3   : > { %4809 = vrot.lane.b32.xlu0 %v4496_v32, %s9393_s11  ;;  %v9134_v32 = vrot.slane %v7783_v62, 9  ;;  %v7869_v60 = vrot.slane %v7796_v3, 5  ;;  %v7791_v62 = vld [vmem:[#allocation3 + $0x38] sm:$0x1]  ;;  %v11627_v3 = vld [vmem:[#allocation3 + $0x14] sm:$0x1] }
 0x4b6   : > { %4803 = vrot.lane.b32.xlu1 %v4493_v31, %s9393_s11  ;;  %v8303_v31 = vrot.slane %v8301_v43, 4 }
 0x4b7   : > { %4817 = vrot.lane.b32.xlu0 %v4500_v59, %s9393_s11  ;;  %v7842_v59 = vsel %vm9728_vm1, %v9134_v32, %v7841_v33  ;;  %v11614_v32 = vld [vmem:[#allocation3 + $0xc] sm:$0xe]  ;;  %v8263_v33 = vld [vmem:[#allocation3 + $0x30] sm:$0xe] }
 0x4ba   : > { %4811 = vrot.lane.b32.xlu1 %v4497_v21, %s9393_s11  ;;  %v8315_v21 = vrot.slane %v11591_v49, 5 }
 0x4bb   : > { %5243 = vrot.lane.b32.xlu0 %v5209_v11, %s9394_s12  ;;  %v8257_v11 = vld [vmem:[#allocation3 + $0x18] sm:$0xe] }
 0x4bc   : > { %v9159_v53 = vrot.slane %v8257_v11, 9  ;;  %v8317_v28 = vrot.slane %v8315_v21, 4  ;;  %v11640_v11 = vld [vmem:[#allocation3 + $0x24] sm:$0xe] }
 0x4bd   : > { %v9135_v44 = vrot.slane %v11640_v11, 9 }
 0x4be   : > { %4819 = vrot.lane.b32.xlu1 %v4501_v38, %s9393_s11  ;;  %v6193_v38 = vrot.slane %v6191_v9, 5  ;;  %v7857_v9 = vrot.slane %v7855_v12, 4  ;;  %v9161_v12 = vrot.slane %v8263_v33, 9  ;;  %v11655_v7 = vsel %vm9728_vm1, %v8317_v28, %v8318_v24 }
 0x4bf   : > { %5251 = vrot.lane.b32.xlu0 %v5213_v10, %s9394_s12  ;;  %v6236_v10 = vshrl.u32 %v6169_v34, 16  ;;  %v9160_v33 = vrot.slane %v11646_v56, 9  ;;  %v14647_v56 = vcombine.low %v11545_v20, %v11548_v61 }
 0x4c0   : > { %v6194_v13 = vor.u32 %v6193_v38, %v6190_v36  ;;  %v8302_v36 = vsel %vm9728_vm1, %v9157_v16, %v8301_v43  ;;  %v6201_v16 = vshrl.u32 %v11593_v14, 16 }
 0x4c2   : > { %5245 = vrot.lane.b32.xlu1 %v5210_v23, %s9394_s12  ;;  %v6239_v23 = vshll.u32 %v6169_v34, 16 }
 0x4c3   : > { %5259 = vrot.lane.b32.xlu0 %v5217_v26, %s9394_s12  ;;  %v7831_v26 = vsel %vm9728_vm1, %v7829_v0, %v7830_v22  ;;  %v6238_v22 = vrot.slane %v6236_v10, 4  ;;  %v7870_v0 = vsel %vm9728_vm1, %v9138_v29, %v7869_v60  ;;  %v11642_v10 = vrot.slane %v6194_v13, 4  ;;  %v11666_v13 = vld [vmem:[#allocation3 + $0x30] sm:$0xf] }
 0x4c4   : > { %v6241_v49 = vrot.slane %v6239_v23, 5  ;;  %v7797_v23 = vld [vmem:[#allocation3 + $0x50] sm:$0x1] }
 0x4c5   : > { %v7872_v28 = vrot.slane %v7797_v23, 5  ;;  %v11690_v23 = vld [vmem:[#allocation3 + $0x3c] sm:$0xe] }
 0x4c6   : > { %5253 = vrot.lane.b32.xlu1 %v5214_v27, %s9394_s12  ;;  %v8304_v27 = vrot.slane %v8253_v15, 5  ;;  %v7845_v15 = vsel %vm9728_vm1, %v7843_v45, %v7844_v52  ;;  %v8265_v45 = vld [vmem:[#allocation3 + $0x38] sm:$0x1]  ;;  %v6242_v43 = vor.u32 %v6241_v49, %v6238_v22  ;;  %v7871_v52 = vrot.slane %v7869_v60, 4  ;;  %v11664_v60 = vld [vmem:[#allocation3 + $0x8] sm:$0x1] }
 0x4c7   : > { %5267 = vrot.lane.b32.xlu0 %v5221_v50, %s9394_s12  ;;  %v8329_v50 = vrot.slane %v11598_v19, 5  ;;  %v9158_v19 = vrot.slane %v11614_v32, 9  ;;  %v11672_v22 = vld [vmem:[#allocation3 + $0x2c] sm:$0x1] }
 0x4c8   : > { %v11638_v38 = vsel %vm9728_vm1, %v8303_v31, %v8304_v27  ;;  %v8269_v27 = vld [vmem:[#allocation3 + $0x48] sm:$0xe] }
 0x4c9   : > { %v8331_v34 = vrot.slane %v8329_v50, 4  ;;  %v8330_v29 = vsel %vm9728_vm1, %v9161_v12, %v8329_v50  ;;  %v11686_v50 = vrot.slane %v4518_v1, %v9740_v55  ;;  %v7873_v12 = vsel %vm9728_vm1, %v7871_v52, %v7872_v28  ;;  %v8255_v28 = vld [vmem:[#allocation3 + $0x10] sm:$0xf] }
 0x4ca   : > { %5261 = vrot.lane.b32.xlu1 %v5218_v39, %s9394_s12  ;;  %v6197_v39 = vshll.u32 %v11593_v14, 16  ;;  %v8308_v18 = vrot.slane %v8255_v28, 5  ;;  %v11755_v28 = vrot.slane %v4621_v63, %v9740_v55  ;;  %v8273_v63 = vld [vmem:[#allocation3 + $0x58] sm:$0xf] }
 0x4cb   : > { %7881 = vrot.lane.b32.xlu0 %v7828_v51, %s9393_s11  ;;  %v11612_v51 = vld [vmem:[#allocation3 + $0xc] sm:$0xe]  ;;  %14643 = vst [vmem:[#allocation23_spill] sm:$0xff] %v11686_v50 }
 0x4cc   : > { %v9133_v30 = vrot.slane %v11612_v51, 9  ;;  %v11648_v25 = vrot.slane %v6197_v39, 5  ;;  %v11660_v39 = vld [vmem:[#allocation3 + $0x2c] sm:$0x1] }
 0x4ce   : > { %5269 = vrot.lane.b32.xlu1 %v5222_v58, %s9394_s12  ;;  %v7858_v58 = vrot.slane %v7791_v62, 5  ;;  %v7837_v62 = vrot.slane %v11624_v5, 5  ;;  %v14646_v5 = vcombine.high %v11545_v20, %v11548_v61  ;;  %v14651_v61 = vrot.slane %v11660_v39, 5 }
 0x4cf   : > { %7889 = vrot.lane.b32.xlu0 %v7842_v59, %s9393_s11  ;;  %v11618_v59 = vld [vmem:[#allocation3 + $0x1c] sm:$0xf]  ;;  %v14652_v39 = vrot.slane %v11672_v22, 5 }
 0x4d0   : > { %v7859_v31 = vsel %vm9728_vm1, %v7857_v9, %v7858_v58  ;;  %v7781_v9 = vld [vmem:[#allocation3 + $0x10] sm:$0xf]  ;;  %v9163_v58 = vrot.slane %v8269_v27, 9  ;;  %v11693_v27 = vld [vmem:[#allocation3 + $0x3c] sm:$0xe] }
 0x4d1   : > { %v7834_v52 = vrot.slane %v7781_v9, 5  ;;  %v7799_v9 = vld [vmem:[#allocation3 + $0x58] sm:$0xf]  ;;  %v9162_v40 = vrot.slane %v11693_v27, 9  ;;  %v11740_v27 = vrot.slane %v4586_v8, %v9740_v55 }
 0x4d2   : > { %7883 = vrot.lane.b32.xlu1 %v7831_v26, %s9393_s11  ;;  %v8316_v26 = vsel %vm9728_vm1, %v9159_v53, %v8315_v21  ;;  %v8332_v21 = vrot.slane %v8265_v45, 5  ;;  %v6245_v53 = vshll.u32 %v11618_v59, 16  ;;  %v11678_v45 = vrot.slane %v6242_v43, 4  ;;  %v7787_v43 = vld [vmem:[#allocation3 + $0x28] sm:$0xf] }
 0x4d3   : > { %7897 = vrot.lane.b32.xlu0 %v7856_v57, %s9393_s11  ;;  %v8270_v57 = vld [vmem:[#allocation3 + $0x4c] sm:$0xf]  ;;  %v7836_v14 = vrot.slane %v7834_v52, 4  ;;  %14645 = vst [vmem:[#allocation22_spill] sm:$0xff] %v11740_v27  ;;  %v7835_v8 = vsel %vm9728_vm1, %v9133_v30, %v7834_v52  ;;  %v7876_v6 = vrot.slane %v7799_v9, 5  ;;  %v8350_v52 = vrot.slane %v8273_v63, 5 }
 0x4d4   : > { %v8343_v24 = vrot.slane %v8270_v57, 5  ;;  %v11705_v1 = vsel %vm9728_vm1, %v8331_v34, %v8332_v21  ;;  %v11707_v57 = vld [vmem:[#allocation3 + $0x44] sm:$0x1]  ;;  %v9137_v34 = vrot.slane %v11690_v23, 9  ;;  %v8261_v21 = vld [vmem:[#allocation3 + $0x28] sm:$0xf] }
 0x4d5   : > { %v6181_v63 = vld [vmem:[#allocation3 + $0x48] sm:$0xf] }
 0x4d6   : > { %7891 = vrot.lane.b32.xlu1 %v7845_v15, %s9393_s11  ;;  %v11709_v15 = vrot.slane %v6245_v53, 5  ;;  %v8344_v23 = vsel %vm9728_vm1, %v9163_v58, %v8343_v24  ;;  %v7848_v53 = vrot.slane %v7787_v43, 5  ;;  %v11749_v43 = vld [vmem:[#allocation3 + $0x44] sm:$0x1] }
 0x4d7   : > { %7905 = vrot.lane.b32.xlu0 %v7870_v0, %s9393_s11  ;;  %v8271_v0 = vld [vmem:[#allocation3 + $0x50] sm:$0x1] }
 0x4d8   : > { %v8346_v41 = vrot.slane %v8271_v0, 5  ;;  %v7865_v0 = vrot.slane %v11707_v57, 5  ;;  %v7850_v51 = vrot.slane %v7848_v53, 4 }
 0x4da   : > { %7899 = vrot.lane.b32.xlu1 %v7859_v31, %s9393_s11  ;;  %v7793_v31 = vld [vmem:[#allocation3 + $0x40] sm:$0xf] }
 0x4db   : > { %8355 = vrot.lane.b32.xlu0 %v8302_v36, %s9394_s12  ;;  %v11680_v36 = vrot.slane %v6201_v16, 4  ;;  %v11700_v16 = vrot.slane %v4519_v47, %v9740_v55  ;;  %v11726_v47 = vcombine.high %v11686_v50, %v14588_v4  ;;  %v7862_v58 = vrot.slane %v7793_v31, 5 }
 0x4dc   : > { %v11767_v31 = vsel %vm9728_vm1, %v9158_v19, %v8308_v18  ;;  %v7800_v19 = vld [vmem:[#allocation3 + $0x5c] sm:$0x1] }
 0x4dd   : > { %14644 = vst [vmem:[#allocation21_spill] sm:$0xff] %v11726_v47  ;;  %v11734_v57 = vcombine.high %v11700_v16, %v14588_v4  ;;  %v7864_v30 = vrot.slane %v7862_v58, 4  ;;  %v7863_v20 = vsel %vm9728_vm1, %v9137_v34, %v7862_v58  ;;  %v6176_v58 = vld [vmem:[#allocation3 + $0x34] sm:$0xf] }
 0x4de   : > { %7907 = vrot.lane.b32.xlu1 %v7873_v12, %s9393_s11  ;;  %v8345_v12 = vrot.slane %v8343_v24, 4  ;;  %v8322_v24 = vrot.slane %v8261_v21, 5  ;;  %v8310_v21 = vrot.slane %v8308_v18, 4 }
 0x4df   : > { %8363 = vrot.lane.b32.xlu0 %v8316_v26, %s9394_s12  ;;  %v8272_v26 = vld [vmem:[#allocation3 + $0x54] sm:$0xe] }
 0x4e0   : > { %v8347_v35 = vsel %vm9728_vm1, %v8345_v12, %v8346_v41  ;;  %v9164_v2 = vrot.slane %v8272_v26, 9  ;;  %v7849_v41 = vsel %vm9728_vm1, %v9135_v44, %v7848_v53  ;;  %v11785_v11 = vsel %vm9728_vm1, %v9160_v33, %v8322_v24 }
 0x4e1   : > { %v8324_v44 = vrot.slane %v8322_v24, 4  ;;  %v11799_v12 = vrot.slane %v14647_v56, %v9740_v55  ;;  %v14649_v33 = vrot.slane %v11627_v3, 5  ;;  %v11809_v26 = vcombine.high %v11740_v27, %v14588_v4  ;;  %v6177_v27 = vld [vmem:[#allocation3 + $0x38] sm:$0x1] }
 0x4e2   : > { %8357 = vrot.lane.b32.xlu1 %v11638_v38, %s9394_s12  ;;  %v11746_v38 = vrot.slane %v4587_v17, %v9740_v55  ;;  %v8267_v17 = vld [vmem:[#allocation3 + $0x40] sm:$0xf]  ;;  %v7852_v3 = vsel %vm9728_vm1, %v7850_v51, %v14651_v61  ;;  %v6287_v24 = vshll.u32 %v11666_v13, 16  ;;  %v6335_v61 = vshll.u32 %v6181_v63, 16 }
 0x4e3   : > { %8371 = vrot.lane.b32.xlu0 %v8330_v29, %s9394_s12  ;;  %v9139_v29 = vrot.slane %v7798_v42, 9  ;;  %v7838_v42 = vsel %vm9728_vm1, %v7836_v14, %v7837_v62  ;;  %v4567_v62 = vrot.slane %v14646_v5, %v9740_v55  ;;  %v7878_v14 = vrot.slane %v7876_v6, 4  ;;  %14648 = vst [vmem:[#allocation19_spill] sm:$0xff] %v11799_v12  ;;  %14650 = vst [vmem:[#allocation16_spill] sm:$0xff] %v11809_v26 }
 0x4e4   : > { %v11793_v18 = vpack.i.b16 %v11755_v28, %v11746_v38  ;;  %v11805_v53 = vsel %vm9728_vm1, %v8310_v21, %v14649_v33  ;;  %v11813_v9 = vcombine.high %v11746_v38, %v14588_v4  ;;  %v11829_v21 = vsel %vm9728_vm1, %v7864_v30, %v7865_v0 }
 0x4e5   : > { %v11839_v34 = vsel %vm9728_vm1, %v8324_v44, %v14652_v39  ;;  %v11847_v0 = vsel %vm9728_vm1, %v9164_v2, %v8350_v52  ;;  %v11852_v22 = vpack.i.b16 %v4567_v62, %v11700_v16  ;;  %v14655_v30 = vshrl.u32 %v11666_v13, 16  ;;  %v6182_v44 = vld [vmem:[#allocation3 + $0x4c] sm:$0xf] }
 0x4e6   : > { %8365 = vrot.lane.b32.xlu1 %v11655_v7, %s9394_s12  ;;  %v8336_v7 = vrot.slane %v8267_v17, 5  ;;  %v7877_v17 = vsel %vm9728_vm1, %v9139_v29, %v7876_v6  ;;  %v6171_v6 = vld [vmem:[#allocation3 + $0x20] sm:$0x1]  ;;  %v4653_v5 = vshrl.u32 %v11700_v16, 16  ;;  %v6289_v56 = vrot.slane %v6287_v24, 5 }
 0x4e7   : > { %8379 = vrot.lane.b32.xlu0 %v8344_v23, %s9394_s12  ;;  %v7879_v23 = vrot.slane %v7800_v19, 5  ;;  %14654 = vst [vmem:[#allocation17_spill] sm:$0xff] %v11852_v22  ;;  %v6286_v19 = vrot.slane %v14655_v30, 4  ;;  %v6293_v2 = vshll.u32 %v6176_v58, 16  ;;  %v6332_v33 = vshrl.u32 %v6181_v63, 16 }
 0x4e8   : > { %v8338_v51 = vrot.slane %v8336_v7, 4  ;;  %v11866_v13 = vcombine.high %v11755_v28, %v14588_v4  ;;  %v8274_v16 = vld [vmem:[#allocation3 + $0x5c] sm:$0x1]  ;;  %v6255_v24 = vshll.u32 %v6171_v6, 16  ;;  %v6341_v30 = vshll.u32 %v6182_v44, 16 }
 0x4e9   : > { %v14659_v6 = vcombine.low %v11558_v37, %v11561_v46  ;;  %v14663_v37 = vshll.u32 %v11664_v60, 16 }
 0x4ea   : > { %8373 = vrot.lane.b32.xlu1 %v11705_v1, %s9394_s12  ;;  %v11833_v1 = vsel %vm9728_vm1, %v9162_v40, %v8336_v7  ;;  %v14653_v40 = vshrl.u32 %v11618_v59, 16  ;;  %v6297_v59 = vshrl.u32 %v6176_v58, 16  ;;  %v11862_v7 = vcombine.high %v4567_v62, %v14588_v4 }
 0x4eb   : > { %7885 = vrot.lane.b32.xlu0 %v7835_v8, %s9393_s11  ;;  %v11843_v8 = vsel %vm9728_vm1, %v7878_v14, %v7879_v23  ;;  %v4654_v14 = vshrl.u32 %v4567_v62, 16  ;;  %v6749_v23 = vld [vmem:[#allocation3] sm:$0xf]  ;;  %v11875_v62 = vpack.i.b16 %v11866_v13, %v11813_v9  ;;  %v6290_v58 = vor.u32 %v6289_v56, %v6286_v19  ;;  %v6755_v56 = vld [vmem:[#allocation3 + $0x18] sm:$0xf] }
 0x4ec   : > { %v6251_v29 = vrot.slane %v14653_v40, 4  ;;  %v8352_v40 = vrot.slane %v8350_v52, 4  ;;  %v6774_v63 = vshrl.u32 %v6749_v23, 16  ;;  %v6777_v32 = vshll.u32 %v6749_v23, 16 }
 0x4ed   : > { %v11859_v39 = vpack.i.b16 %v4654_v14, %v4653_v5  ;;  %14658 = vst [vmem:[#allocation24_spill] sm:$0xff] %v11875_v62  ;;  %v6334_v5 = vrot.slane %v6332_v33, 4  ;;  %v6337_v14 = vrot.slane %v6335_v61, 5  ;;  %v6345_v52 = vshrl.u32 %v6182_v44, 16 }
 0x4ee   : > { %8381 = vrot.lane.b32.xlu1 %v8347_v35, %s9394_s12  ;;  %v6252_v35 = vor.u32 %v6251_v29, %v11709_v15  ;;  %v11882_v29 = vrot.slane %v14659_v6, %v9740_v55  ;;  %v8353_v23 = vrot.slane %v8274_v16, 5  ;;  %v14661_v62 = vrot.slane %v11749_v43, 5  ;;  %v6750_v43 = vld [vmem:[#allocation3 + $0x4] sm:$0xf] }
 0x4ef   : > { %7893 = vrot.lane.b32.xlu0 %v7849_v41, %s9393_s11  ;;  %14656 = vst [vmem:[#allocation18_spill] sm:$0xff] %v11859_v39  ;;  %v11871_v41 = vpack.i.b16 %v11862_v7, %v11734_v57  ;;  %v6299_v39 = vrot.slane %v6297_v59, 4  ;;  %v14662_v19 = vor.u32 %v11680_v36, %v11648_v25  ;;  %v11900_v46 = vrot.slane %v14663_v37, 5  ;;  %v6756_v37 = vld [vmem:[#allocation3 + $0x1c] sm:$0xf] }
 0x4f0   : > { %14660 = vst [vmem:[#allocation25_spill] sm:$0xff] %v11882_v29  ;;  %v11906_v33 = vrot.slane %v6341_v30, 5  ;;  %v6776_v61 = vrot.slane %v6774_v63, 4  ;;  %v11909_v59 = vrot.slane %v6290_v58, 4  ;;  %v6338_v36 = vor.u32 %v6337_v14, %v6334_v5 }
 0x4f1   : > { %14657 = vst [vmem:[#allocation20_spill] sm:$0xff] %v11871_v41  ;;  %v11885_v41 = vrot.slane %v6293_v2, 5  ;;  %v11896_v44 = vrot.slane %v14662_v19, 4  ;;  %v11904_v2 = vrot.slane %v6252_v35, 4  ;;  %v6303_v16 = vshll.u32 %v6177_v27, 16  ;;  %v11966_v14 = vpop.permute.xlu1 %4791 }
 0x4f2   : > { %7887 = vrot.lane.b32.xlu1 %v7838_v42, %s9393_s11  ;;  %v11891_v42 = vsel %vm9728_vm1, %v8338_v51, %v14661_v62  ;;  %v6779_v51 = vrot.slane %v6777_v32, 5  ;;  %v6183_v62 = vld [vmem:[#allocation3 + $0x50] sm:$0x1]  ;;  %v6347_v60 = vrot.slane %v6345_v52, 4  ;;  %v6822_v30 = vshrl.u32 %v6755_v56, 16  ;;  %14666 = vst [vmem:[#allocation8_spill] sm:$0xff] %v11966_v14 }
 0x4f3   : > { %7901 = vrot.lane.b32.xlu0 %v7863_v20, %s9393_s11  ;;  %v11902_v20 = vrot.slane %v6255_v24, 5  ;;  %v11914_v24 = vsel %vm9728_vm1, %v8352_v40, %v8353_v23  ;;  %v6300_v35 = vor.u32 %v6299_v39, %v11885_v41  ;;  %v6825_v6 = vshll.u32 %v6755_v56, 16  ;;  %v6761_v40 = vld [vmem:[#allocation3 + $0x30] sm:$0xf] }
 0x4f4   : > { %v6780_v63 = vor.u32 %v6779_v51, %v6776_v61  ;;  %v6351_v58 = vshll.u32 %v6183_v62, 16  ;;  %v4677_v5 = vshrl.u32 %v11746_v38, 16  ;;  %v4678_v39 = vshrl.u32 %v11755_v28, 16  ;;  %v6751_v61 = vld [vmem:[#allocation3 + $0x8] sm:$0x1] }
 0x4f5   : > { %v11933_v52 = vrot.slane %v6338_v36, 4  ;;  %v11935_v23 = vrot.slane %v6303_v16, 5  ;;  %v6348_v19 = vor.u32 %v6347_v60, %v11906_v33  ;;  %v11940_v38 = vrot.slane %v6300_v35, 4  ;;  %v11946_v16 = vpop.permute.xlu0 %4789  ;;  %v6767_v60 = vld [vmem:[#allocation3 + $0x48] sm:$0xf] }
 0x4f6   : > { %7895 = vrot.lane.b32.xlu1 %v7852_v3, %s9393_s11  ;;  %v6783_v3 = vshll.u32 %v6750_v43, 16  ;;  %v6824_v28 = vrot.slane %v6822_v30, 4  ;;  %v6827_v56 = vrot.slane %v6825_v6, 5  ;;  %v6870_v36 = vshrl.u32 %v6761_v40, 16  ;;  %14665 = vst [vmem:[#allocation7_spill] sm:$0xff] %v11946_v16 }
 0x4f7   : > { %7909 = vrot.lane.b32.xlu0 %v7877_v17, %s9393_s11  ;;  %v6787_v17 = vshrl.u32 %v6750_v43, 16  ;;  %v6873_v62 = vshll.u32 %v6761_v40, 16  ;;  %v11954_v35 = vrot.slane %v6351_v58, 5  ;;  %v6831_v30 = vshll.u32 %v6756_v37, 16 }
 0x4f8   : > { %v11944_v43 = vrot.slane %v6783_v3, 5  ;;  %v11958_v6 = vrot.slane %v6348_v19, 4  ;;  %v6835_v3 = vshrl.u32 %v6756_v37, 16  ;;  %v4659_v40 = vshrl.u32 %v11734_v57, 16 }
 0x4f9   : > { %v6789_v51 = vrot.slane %v6787_v17, 4  ;;  %v6762_v17 = vld [vmem:[#allocation3 + $0x34] sm:$0xf]  ;;  %v4683_v58 = vshrl.u32 %v11813_v9, 16  ;;  %v4684_v27 = vshrl.u32 %v11866_v13, 16  ;;  %v6872_v19 = vrot.slane %v6870_v36, 4  ;;  %v11971_v57 = vpop.permute.xlu0 %4797 }
 0x4fa   : > { %7903 = vrot.lane.b32.xlu1 %v11829_v21, %s9393_s11  ;;  %v11942_v21 = vpack.i.b16 %v4678_v39, %v4677_v5  ;;  %v4660_v5 = vshrl.u32 %v11862_v7, 16  ;;  %v6828_v39 = vor.u32 %v6827_v56, %v6824_v28  ;;  %v6875_v37 = vrot.slane %v6873_v62, 5  ;;  %14668 = vst [vmem:[#allocation10_spill] sm:$0xff] %v11971_v57  ;;  %v6768_v13 = vld [vmem:[#allocation3 + $0x4c] sm:$0xf] }
 0x4fb   : > { %8359 = vrot.lane.b32.xlu0 %v11767_v31, %s9394_s12  ;;  %v11952_v31 = vrot.slane %v6780_v63, 4  ;;  %v6793_v63 = vshll.u32 %v6751_v61, 16  ;;  %v11981_v7 = vrot.slane %v6831_v30, 5  ;;  %v6166_v28 = vld [vmem:[#allocation3 + $0xc] sm:$0xf]  ;;  %v11983_v56 = vpack.i.b16 %v4684_v27, %v4683_v58 }
 0x4fc   : > { %14664 = vst [vmem:[#allocation26_spill] sm:$0xff] %v11942_v21  ;;  %v11969_v32 = vpack.i.b16 %v4660_v5, %v4659_v40  ;;  %v6918_v36 = vshrl.u32 %v6767_v60, 16  ;;  %v6921_v62 = vshll.u32 %v6767_v60, 16  ;;  %v6167_v40 = vld [vmem:[#allocation3 + $0x10] sm:$0xf]  ;;  %v11993_v30 = vrot.slane %v6828_v39, 4 }
 0x4fd   : > { %14669 = vst [vmem:[#allocation11_spill] sm:$0xff] %v11983_v56  ;;  %v11995_v5 = vrot.slane %v6793_v63, 5  ;;  %v6883_v27 = vshrl.u32 %v6762_v17, 16  ;;  %v6757_v58 = vld [vmem:[#allocation3 + $0x20] sm:$0x1]  ;;  %v6837_v9 = vrot.slane %v6835_v3, 4 }
 0x4fe   : > { %7911 = vrot.lane.b32.xlu1 %v11843_v8, %s9393_s11  ;;  %v6790_v8 = vor.u32 %v6789_v51, %v11944_v43  ;;  %14667 = vst [vmem:[#allocation9_spill] sm:$0xff] %v11969_v32  ;;  %v6879_v51 = vshll.u32 %v6762_v17, 16  ;;  %v6927_v14 = vshll.u32 %v6768_v13, 16  ;;  %v6212_v16 = vshrl.u32 %v6166_v28, 16  ;;  %v6172_v61 = vld [vmem:[#allocation3 + $0x24] sm:$0xf] }
 0x4ff   : > { %8367 = vrot.lane.b32.xlu0 %v11785_v11, %s9394_s12  ;;  %v6876_v11 = vor.u32 %v6875_v37, %v6872_v19  ;;  %v6931_v60 = vshrl.u32 %v6768_v13, 16  ;;  %v6215_v56 = vshll.u32 %v6166_v28, 16  ;;  %v6221_v32 = vshll.u32 %v6167_v40, 16  ;;  %v6178_v28 = vld [vmem:[#allocation3 + $0x3c] sm:$0xf] }
 0x500   : > { %v6225_v21 = vshrl.u32 %v6167_v40, 16  ;;  %v12005_v17 = vrot.slane %v6879_v51, 5  ;;  %v6841_v3 = vshll.u32 %v6757_v58, 16  ;;  %v6920_v39 = vrot.slane %v6918_v36, 4 }
 0x501   : > { %v11999_v57 = vpop.permute.xlu0 %4805  ;;  %v6923_v63 = vrot.slane %v6921_v62, 5  ;;  %v6838_v19 = vor.u32 %v6837_v9, %v11981_v7  ;;  %v6260_v37 = vshrl.u32 %v6172_v61, 16  ;;  %v6263_v13 = vshll.u32 %v6172_v61, 16  ;;  %v6173_v62 = vld [vmem:[#allocation3 + $0x28] sm:$0xf] }
 0x502   : > { %8361 = vrot.lane.b32.xlu1 %v11805_v53, %s9394_s12  ;;  %v11997_v53 = vrot.slane %v6790_v8, 4  ;;  %14670 = vst [vmem:[#allocation13_spill] sm:$0xff] %v11999_v57  ;;  %v12014_v40 = vrot.slane %v6876_v11, 4  ;;  %v6885_v51 = vrot.slane %v6883_v27, 4  ;;  %v6214_v36 = vrot.slane %v6212_v16, 4 }
 0x503   : > { %8375 = vrot.lane.b32.xlu0 %v11833_v1, %s9394_s12  ;;  %v12001_v1 = vpop.permute.xlu1 %4799  ;;  %v12020_v57 = vrot.slane %v6221_v32, 5  ;;  %v6933_v55 = vrot.slane %v6931_v60, 4  ;;  %v6227_v8 = vrot.slane %v6225_v21, 4  ;;  %v6924_v11 = vor.u32 %v6923_v63, %v6920_v39 }
 0x504   : > { %14671 = vst [vmem:[#allocation15_spill] sm:$0xff] %v12001_v1  ;;  %v6217_v1 = vrot.slane %v6215_v56, 5  ;;  %v6308_v9 = vshrl.u32 %v6178_v28, 16  ;;  %v6311_v16 = vshll.u32 %v6178_v28, 16  ;;  %v14673_v32 = vsel %vm9855_vm13, %v11642_v10, %v11648_v25  ;;  %v6769_v56 = vld [vmem:[#allocation3 + $0x50] sm:$0x1] }
 0x505   : > { %v6262_v21 = vrot.slane %v6260_v37, 4  ;;  %v6265_v61 = vrot.slane %v6263_v13, 5  ;;  %v6269_v27 = vshll.u32 %v6173_v62, 16  ;;  %v6886_v39 = vor.u32 %v6885_v51, %v12005_v17  ;;  %v6168_v28 = vld [vmem:[#allocation3 + $0x14] sm:$0x1] }
 0x506   : > { %8369 = vrot.lane.b32.xlu1 %v11839_v34, %s9394_s12  ;;  %v12016_v34 = vrot.slane %v6927_v14, 5  ;;  %v12038_v14 = vrot.slane %v6841_v3, 5  ;;  %v6218_v25 = vor.u32 %v6217_v1, %v6214_v36  ;;  %v6228_v13 = vor.u32 %v6227_v8, %v12020_v57  ;;  %v6179_v51 = vld [vmem:[#allocation3 + $0x40] sm:$0xf]  ;;  %v6184_v10 = vld [vmem:[#allocation3 + $0x54] sm:$0xf] }
 0x507   : > { %8383 = vrot.lane.b32.xlu0 %v11847_v0, %s9394_s12  ;;  %v6763_v0 = vld [vmem:[#allocation3 + $0x38] sm:$0x1]  ;;  %v12034_v60 = vpop.permute.xlu1 %4807  ;;  %v12051_v3 = vrot.slane %v6924_v11, 4  ;;  %v6266_v1 = vor.u32 %v6265_v61, %v6262_v21  ;;  %v6231_v8 = vshll.u32 %v6168_v28, 16  ;;  %v6359_v11 = vshll.u32 %v6184_v10, 16 }
 0x508   : > { %14674 = vst [vmem:[#allocation28_spill] sm:$0xff] %v12034_v60  ;;  %v6889_v63 = vshll.u32 %v6763_v0, 16  ;;  %v6934_v37 = vor.u32 %v6933_v55, %v12016_v34  ;;  %v6313_v0 = vrot.slane %v6311_v16, 5  ;;  %v12059_v55 = vrot.slane %v6269_v27, 5  ;;  %v6174_v16 = vld [vmem:[#allocation3 + $0x2c] sm:$0x1] }
 0x509   : > { %v12018_v58 = vpop.permute.xlu0 %4813  ;;  %v12077_v21 = vrot.slane %v6218_v25, 4  ;;  %v12081_v27 = vrot.slane %v6228_v13, 4  ;;  %v6185_v28 = vld [vmem:[#allocation3 + $0x58] sm:$0xf]  ;;  %v14680_v25 = vsel %vm9855_vm13, %v11909_v59, %v11885_v41  ;;  %v12097_v13 = vrot.slane %v6266_v1, 4 }
 0x50a   : > { %14672 = vst [vmem:[#allocation27_spill] sm:$0xff] %v12018_v58  ;;  %8377 = vrot.lane.b32.xlu1 %v11891_v42, %s9394_s12  ;;  %v6273_v42 = vshrl.u32 %v6173_v62, 16  ;;  %v12036_v58 = vrot.slane %v6838_v19, 4  ;;  %v6937_v19 = vshll.u32 %v6769_v56, 16  ;;  %v6310_v62 = vrot.slane %v6308_v9, 4 }
 0x50b   : > { %6379 = vrot.lane.b32.xlu0 %v14673_v32, %s9393_s11  ;;  %v14676_v32 = vsel %vm9855_vm13, %v11678_v45, %v11709_v15  ;;  %v12071_v15 = vrot.slane %v6886_v39, 4  ;;  %v12073_v45 = vrot.slane %v6889_v63, 5  ;;  %v12079_v61 = vrot.slane %v6934_v37, 4  ;;  %v6759_v60 = vld [vmem:[#allocation3 + $0x28] sm:$0xf] }
 0x50c   : > { %v6275_v36 = vrot.slane %v6273_v42, 4  ;;  %v6317_v42 = vshll.u32 %v6179_v51, 16  ;;  %v14679_v39 = vsel %vm9855_vm13, %v11896_v44, %v11900_v46  ;;  %v6314_v63 = vor.u32 %v6313_v0, %v6310_v62 }
 0x50d   : > { %v12041_v26 = vpop.permute.xlu0 %5239  ;;  %v6356_v9 = vshrl.u32 %v6184_v10, 16  ;;  %v12095_v37 = vrot.slane %v6937_v19, 5  ;;  %v6279_v59 = vshll.u32 %v6174_v16, 16  ;;  %v6365_v19 = vshll.u32 %v6185_v28, 16  ;;  %v6752_v16 = vld [vmem:[#allocation3 + $0xc] sm:$0xf] }
 0x50e   : > { %14675 = vst [vmem:[#allocation29_spill] sm:$0xff] %v12041_v26  ;;  %8385 = vrot.lane.b32.xlu1 %v11914_v24, %s9394_s12  ;;  %v6276_v44 = vor.u32 %v6275_v36, %v12059_v55  ;;  %v12126_v36 = vrot.slane %v6317_v42, 5  ;;  %v12134_v0 = vrot.slane %v6314_v63, 4  ;;  %v6361_v1 = vrot.slane %v6359_v11, 5 }
 0x50f   : > { %6387 = vrot.lane.b32.xlu0 %v14676_v32, %s9393_s11  ;;  %v6321_v32 = vshrl.u32 %v6179_v51, 16  ;;  %v6753_v51 = vld [vmem:[#allocation3 + $0x10] sm:$0xf]  ;;  %v6358_v41 = vrot.slane %v6356_v9, 4  ;;  %v14684_v42 = vsel %vm9855_vm13, %v11933_v52, %v11906_v33  ;;  %v6369_v26 = vshrl.u32 %v6185_v28, 16 }
 0x510   : > { %v12061_v24 = vpop.permute.xlu1 %4815  ;;  %v12146_v63 = vrot.slane %v6279_v59, 5  ;;  %v12148_v11 = vrot.slane %v6365_v19, 5  ;;  %v6798_v9 = vshrl.u32 %v6752_v16, 16  ;;  %v14687_v28 = vsel %vm9855_vm13, %v11940_v38, %v11935_v23 }
 0x511   : > { %14677 = vst [vmem:[#allocation30_spill] sm:$0xff] %v12061_v24  ;;  %v12075_v56 = vpop.permute.xlu0 %5247  ;;  %v6323_v10 = vrot.slane %v6321_v32, 4  ;;  %v6807_v24 = vshll.u32 %v6753_v51, 16  ;;  %v6801_v32 = vshll.u32 %v6752_v16, 16  ;;  %v6362_v19 = vor.u32 %v6361_v1, %v6358_v41  ;;  %v6770_v41 = vld [vmem:[#allocation3 + $0x54] sm:$0xf] }
 0x512   : > { %14678 = vst [vmem:[#allocation31_spill] sm:$0xff] %v12075_v56  ;;  %6381 = vrot.lane.b32.xlu1 %v14679_v39, %s9393_s11  ;;  %v12099_v56 = vrot.slane %v6231_v8, 5  ;;  %v6758_v39 = vld [vmem:[#allocation3 + $0x24] sm:$0xf]  ;;  %v12142_v8 = vrot.slane %v6276_v44, 4  ;;  %v6855_v59 = vshll.u32 %v6759_v60, 16 }
 0x513   : > { %6395 = vrot.lane.b32.xlu0 %v14680_v25, %s9393_s11  ;;  %v14683_v25 = vsel %vm9855_vm13, %v11904_v2, %v11902_v20  ;;  %v6811_v20 = vshrl.u32 %v6753_v51, 16  ;;  %v6846_v22 = vshrl.u32 %v6758_v39, 16  ;;  %v6849_v33 = vshll.u32 %v6758_v39, 16 }
 0x514   : > { %v12102_v46 = vpop.permute.xlu1 %5241  ;;  %v6324_v51 = vor.u32 %v6323_v10, %v12126_v36  ;;  %v12173_v38 = vrot.slane %v6807_v24, 5  ;;  %v6371_v39 = vrot.slane %v6369_v26, 4  ;;  %v6800_v10 = vrot.slane %v6798_v9, 4  ;;  %v6754_v9 = vld [vmem:[#allocation3 + $0x14] sm:$0x1] }
 0x515   : > { %14681 = vst [vmem:[#allocation32_spill] sm:$0xff] %v12102_v46  ;;  %v12112_v62 = vpop.permute.xlu0 %5255  ;;  %v6764_v46 = vld [vmem:[#allocation3 + $0x3c] sm:$0xf]  ;;  %v14691_v26 = vsel %vm9855_vm13, %v11958_v6, %v11954_v35  ;;  %v12185_v24 = vrot.slane %v6362_v19, 4 }
 0x516   : > { %14682 = vst [vmem:[#allocation33_spill] sm:$0xff] %v12112_v62  ;;  %6389 = vrot.lane.b32.xlu1 %v14683_v25, %s9393_s11  ;;  %v6180_v62 = vld [vmem:[#allocation3 + $0x44] sm:$0x1]  ;;  %v6894_v52 = vshrl.u32 %v6764_v46, 16  ;;  %v6897_v44 = vshll.u32 %v6764_v46, 16  ;;  %v14688_v46 = vsel %vm9855_vm13, %v11952_v31, %v11944_v43  ;;  %v6848_v43 = vrot.slane %v6846_v22, 4 }
 0x517   : > { %6403 = vrot.lane.b32.xlu0 %v14684_v42, %s9393_s11  ;;  %v6327_v16 = vshll.u32 %v6180_v62, 16  ;;  %v6813_v42 = vrot.slane %v6811_v20, 4  ;;  %v6803_v62 = vrot.slane %v6801_v32, 5  ;;  %v6851_v31 = vrot.slane %v6849_v33, 5 }
 0x518   : > { %v12144_v2 = vpop.permute.xlu1 %5249  ;;  %v6896_v48 = vrot.slane %v6894_v52, 4  ;;  %v6899_v47 = vrot.slane %v6897_v44, 5  ;;  %v6945_v32 = vshll.u32 %v6770_v41, 16  ;;  %v14692_v22 = vsel %vm9855_vm13, %v11993_v30, %v11981_v7  ;;  %v6771_v44 = vld [vmem:[#allocation3 + $0x58] sm:$0xf] }
 0x519   : > { %14685 = vst [vmem:[#allocation34_spill] sm:$0xff] %v12144_v2  ;;  %v12150_v25 = vpop.permute.xlu0 %5263  ;;  %v6859_v2 = vshrl.u32 %v6759_v60, 16  ;;  %v12187_v20 = vrot.slane %v6327_v16, 5  ;;  %v6942_v60 = vshrl.u32 %v6770_v41, 16  ;;  %v12195_v33 = vrot.slane %v6324_v51, 4 }
 0x51a   : > { %14686 = vst [vmem:[#allocation35_spill] sm:$0xff] %v12150_v25  ;;  %6397 = vrot.lane.b32.xlu1 %v14687_v28, %s9393_s11  ;;  %v6186_v28 = vld [vmem:[#allocation3 + $0x5c] sm:$0x1]  ;;  %v6372_v52 = vor.u32 %v6371_v39, %v12148_v11  ;;  %v6814_v6 = vor.u32 %v6813_v42, %v12173_v38  ;;  %v6804_v16 = vor.u32 %v6803_v62, %v6800_v10  ;;  %v6817_v7 = vshll.u32 %v6754_v9, 16 }
 0x51b   : > { %6965 = vrot.lane.b32.xlu0 %v14688_v46, %s9394_s12  ;;  %v6765_v46 = vld [vmem:[#allocation3 + $0x40] sm:$0xf]  ;;  %v6375_v35 = vshll.u32 %v6186_v28, 16  ;;  %v6861_v23 = vrot.slane %v6859_v2, 4  ;;  %v6900_v30 = vor.u32 %v6899_v47, %v6896_v48  ;;  %v14695_v39 = vsel %vm9855_vm13, %v11997_v53, %v11995_v5  ;;  %v12229_v28 = vld [vmem:[#allocation3 + $0x44] sm:$0x1] }
 0x51c   : > { %v12175_v1 = vpop.permute.xlu1 %5257  ;;  %v6903_v41 = vshll.u32 %v6765_v46, 16  ;;  %v6907_v51 = vshrl.u32 %v6765_v46, 16  ;;  %v6944_v42 = vrot.slane %v6942_v60, 4  ;;  %v6947_v10 = vrot.slane %v6945_v32, 5  ;;  %v12238_v9 = vld [vmem:[#allocation3 + $0x5c] sm:$0x1] }
 0x51d   : > { %14689 = vst [vmem:[#allocation36_spill] sm:$0xff] %v12175_v1  ;;  %v12177_v25 = vpop.permute.xlu0 %4793  ;;  %v6955_v62 = vshrl.u32 %v6771_v44, 16  ;;  %v14696_v2 = vsel %vm9855_vm13, %v12014_v40, %v12005_v17  ;;  %v12225_v5 = vrot.slane %v6372_v52, 4  ;;  %v12227_v53 = vrot.slane %v6814_v6, 4 }
 0x51e   : > { %14690 = vst [vmem:[#allocation37_spill] sm:$0xff] %v12177_v25  ;;  %6405 = vrot.lane.b32.xlu1 %v14691_v26, %s9393_s11  ;;  %v12201_v26 = vrot.slane %v6855_v59, 5  ;;  %v6852_v25 = vor.u32 %v6851_v31, %v6848_v43  ;;  %v6951_v59 = vshll.u32 %v6771_v44, 16  ;;  %v12233_v17 = vrot.slane %v6375_v35, 5  ;;  %v12252_v35 = vld [vmem:[#allocation3 + $0x40] sm:$0xf] }
 0x51f   : > { %6973 = vrot.lane.b32.xlu0 %v14692_v22, %s9394_s12  ;;  %v6760_v22 = vld [vmem:[#allocation3 + $0x2c] sm:$0x1]  ;;  %14697 = vst [vmem:[#allocation40_spill] sm:$0xff] %v12227_v53  ;;  %v12235_v40 = vrot.slane %v6903_v41, 5  ;;  %v12242_v32 = vrot.slane %v6804_v16, 4  ;;  %v12246_v6 = vrot.slane %v6817_v7, 5  ;;  %v6948_v16 = vor.u32 %v6947_v10, %v6944_v42 }
 0x520   : > { %v12199_v19 = vpop.permute.xlu1 %5265  ;;  %v6862_v31 = vor.u32 %v6861_v23, %v12201_v26  ;;  %v6865_v46 = vshll.u32 %v6760_v22, 16  ;;  %v12244_v52 = vrot.slane %v6852_v25, 4  ;;  %v12248_v44 = vrot.slane %v6907_v51, 4  ;;  %v12264_v22 = vld [vmem:[#allocation3 + $0x58] sm:$0xf] }
 0x521   : > { %14693 = vst [vmem:[#allocation38_spill] sm:$0xff] %v12199_v19  ;;  %v12203_v1 = vpop.permute.xlu0 %4801  ;;  %14699 = vst [vmem:[#allocation42_spill] sm:$0xff] %v12235_v40  ;;  %v14702_v23 = vsel %vm9855_vm13, %v12036_v58, %v12038_v14  ;;  %v12260_v41 = vrot.slane %v6900_v30, 4  ;;  %v12262_v25 = vrot.slane %v6951_v59, 5  ;;  %v6957_v7 = vrot.slane %v6955_v62, 4 }
 0x522   : > { %14694 = vst [vmem:[#allocation39_spill] sm:$0xff] %v12203_v1  ;;  %6967 = vrot.lane.b32.xlu1 %v14695_v39, %s9394_s12  ;;  %14701 = vst [vmem:[#allocation44_spill] sm:$0xff] %v12246_v6  ;;  %v12250_v39 = vld [vmem:[#allocation3 + $0x10] sm:$0xf]  ;;  %v14704_v51 = vsel %vm9855_vm13, %v12051_v3, %v12016_v34  ;;  %v7338_v3 = vld [vmem:[#allocation3 + $0xc] sm:$0xe]  ;;  %v6910_v48 = vor.u32 %v12248_v44, %v12235_v40 }
 0x523   : > { %6981 = vrot.lane.b32.xlu0 %v14696_v2, %s9394_s12  ;;  %14703 = vst [vmem:[#allocation45_spill] sm:$0xff] %v12260_v41  ;;  %v7341_v42 = vld [vmem:[#allocation3 + $0x18] sm:$0xe]  ;;  %v7344_v10 = vld [vmem:[#allocation3 + $0x24] sm:$0xe]  ;;  %v12298_v30 = vrot.slane %v6862_v31, 4  ;;  %v6958_v44 = vor.u32 %v6957_v7, %v12262_v25  ;;  %v14708_v31 = vsel %vm9855_vm13, %v12077_v21, %v12020_v57 }
 0x524   : > { %v12231_v43 = vpop.permute.xlu1 %4795  ;;  %v12288_v59 = vld [vmem:[#allocation3 + $0x28] sm:$0xf]  ;;  %v7350_v62 = vld [vmem:[#allocation3 + $0x3c] sm:$0xe]  ;;  %v12290_v2 = vld [vmem:[#allocation3 + $0x4c] sm:$0xf] }
 0x525   : > { %14698 = vst [vmem:[#allocation41_spill] sm:$0xff] %v12231_v43  ;;  %v12240_v60 = vpop.permute.xlu0 %4809  ;;  %v12300_v14 = vrot.slane %v6865_v46, 5  ;;  %v6913_v34 = vshll.u32 %v12229_v28, 16  ;;  %v7356_v58 = vld [vmem:[#allocation3 + $0x54] sm:$0xe]  ;;  %v6961_v19 = vshll.u32 %v12238_v9, 16  ;;  %v14707_v28 = vsel %vm9855_vm13, %v12071_v15, %v12073_v45 }
 0x526   : > { %14700 = vst [vmem:[#allocation43_spill] sm:$0xff] %v12240_v60  ;;  %6975 = vrot.lane.b32.xlu1 %v14702_v23, %s9394_s12  ;;  %v12308_v43 = vld [vmem:[#allocation3 + $0x4] sm:$0xf]  ;;  %v7347_v60 = vld [vmem:[#allocation3 + $0x30] sm:$0xe]  ;;  %v12318_v46 = vrot.slane %v6948_v16, 4 }
 0x527   : > { %6989 = vrot.lane.b32.xlu0 %v14704_v51, %s9394_s12  ;;  %v4641_v9 = vshrl.u32 %v11686_v50, 16  ;;  %v7353_v1 = vld [vmem:[#allocation3 + $0x48] sm:$0xe]  ;;  %v12329_v51 = vld [vmem:[#allocation3 + $0x1c] sm:$0xf]  ;;  %v14503_v15 = vrot.slane %v12288_v59, 5 }
 0x528   : > { %v12292_v23 = vpop.permute.xlu1 %4803  ;;  %v9112_v45 = vrot.slane %v7350_v62, 9  ;;  %v9114_v7 = vrot.slane %v7356_v58, 9  ;;  %v4642_v50 = vshrl.u32 %v11799_v12, 16  ;;  %v9108_v40 = vrot.slane %v7338_v3, 9  ;;  %v14757_v54 = vld [vmem:[#allocation42_spill] sm:$0xff] }
 0x529   : > { %14705 = vst [vmem:[#allocation46_spill] sm:$0xff] %v12292_v23  ;;  %v12303_v47 = vpop.permute.xlu0 %4817  ;;  %v7335_v23 = vld [vmem:[#allocation3] sm:$0xe]  ;;  %v9109_v41 = vrot.slane %v7341_v42, 9  ;;  %v9110_v6 = vrot.slane %v7344_v10, 9  ;;  %v9111_v57 = vrot.slane %v7347_v60, 9  ;;  %v14713_v3 = vsel %vm9855_vm13, %v12079_v61, %v12095_v37 }
 0x52a   : > { %14706 = vst [vmem:[#allocation47_spill] sm:$0xff] %v12303_v47  ;;  %6983 = vrot.lane.b32.xlu1 %v14707_v28, %s9394_s12  ;;  %v12336_v47 = vld [vmem:[#allocation3 + $0x34] sm:$0xf]  ;;  %v14711_v21 = vrot.slane %v12252_v35, 5  ;;  %v14712_v58 = vrot.slane %v12264_v22, 5  ;;  %v12356_v60 = vcombine.high %v11799_v12, %v14588_v4  ;;  %v9107_v42 = vrot.slane %v7335_v23, 9 }
 0x52b   : > { %6383 = vrot.lane.b32.xlu0 %v14708_v31, %s9393_s11  ;;  %v9113_v31 = vrot.slane %v7353_v1, 9  ;;  %v14502_v1 = vrot.slane %v12329_v51, 5  ;;  %v7407_v37 = vsel %vm9728_vm1, %v9110_v6, %v14503_v15  ;;  %v14501_v23 = vrot.slane %v12336_v47, 5  ;;  %v7358_v15 = vld [vmem:[#allocation3 + $0x5c] sm:$0x1] }
 0x52c   : > { %v12333_v28 = vpop.permute.xlu1 %4811  ;;  %v7421_v62 = vsel %vm9728_vm1, %v9112_v45, %v14711_v21  ;;  %v7435_v16 = vsel %vm9728_vm1, %v9114_v7, %v14712_v58  ;;  %v14714_v45 = vsel %vm9855_vm13, %v12097_v13, %v12059_v55  ;;  %v14715_v7 = vrot.slane %v12250_v39, 5 }
 0x52d   : > { %14709 = vst [vmem:[#allocation48_spill] sm:$0xff] %v12333_v28  ;;  %v12338_v53 = vpop.permute.xlu0 %5243  ;;  %v14716_v21 = vrot.slane %v12290_v2, 5  ;;  %v12381_v55 = vrot.slane %v6910_v48, 4  ;;  %v12383_v13 = vrot.slane %v6958_v44, 4  ;;  %v12387_v10 = vpack.i.b16 %v4642_v50, %v4641_v9 }
 0x52e   : > { %14710 = vst [vmem:[#allocation49_spill] sm:$0xff] %v12338_v53  ;;  %6991 = vrot.lane.b32.xlu1 %v14713_v3, %s9394_s12  ;;  %v7393_v61 = vsel %vm9728_vm1, %v9108_v40, %v14715_v7  ;;  %v7497_v40 = vcombine.low %v7407_v37, %v7435_v16  ;;  %v12391_v6 = vcombine.high %v11882_v29, %v14588_v4  ;;  %v12411_v9 = vrot.slane %v6913_v34, 5  ;;  %v14721_v34 = vld [vmem:[#allocation21_spill] sm:$0xff] }
 0x52f   : > { %6391 = vrot.lane.b32.xlu0 %v14714_v45, %s9393_s11  ;;  %v7428_v58 = vsel %vm9728_vm1, %v9113_v31, %v14716_v21  ;;  %v7489_v45 = vcombine.low %v7393_v61, %v7421_v62  ;;  %v7400_v31 = vsel %vm9728_vm1, %v9109_v41, %v14502_v1  ;;  %v7414_v48 = vsel %vm9728_vm1, %v9111_v57, %v14501_v23  ;;  %v7352_v1 = vld [vmem:[#allocation3 + $0x44] sm:$0x1] }
 0x530   : > { %v12379_v3 = vpop.permute.xlu1 %4819  ;;  %v14719_v50 = vsel %vm9855_vm13, %v12081_v27, %v12099_v56  ;;  %v7463_v16 = vcombine.low %v7400_v31, %v7428_v58  ;;  %v14720_v57 = vsel %vm9855_vm13, %v12134_v0, %v12126_v36  ;;  %v12425_v27 = vrot.slane %v6961_v19, 5  ;;  %v14724_v58 = vld [vmem:[#allocation12_spill] sm:$0xff] }
 0x531   : > { %14717 = vst [vmem:[#allocation50_spill] sm:$0xff] %v12379_v3  ;;  %v12385_v7 = vpop.permute.xlu0 %5251  ;;  %v12429_v62 = vpack.i.b16 %v12356_v60, %v14721_v34  ;;  %v14722_v61 = vrot.slane %v12308_v43, 5  ;;  %v12442_v19 = vrot.slane %v7489_v45, %v14724_v58  ;;  %v12445_v31 = vrot.slane %v7497_v40, %v14724_v58  ;;  %v7343_v40 = vld [vmem:[#allocation3 + $0x20] sm:$0x1] }
 0x532   : > { %14718 = vst [vmem:[#allocation51_spill] sm:$0xff] %v12385_v7  ;;  %6385 = vrot.lane.b32.xlu1 %v14719_v50, %s9393_s11  ;;  %v14728_v0 = vsel %vm9855_vm13, %v12142_v8, %v12146_v63  ;;  %v4666_v41 = vshrl.u32 %v11882_v29, 16  ;;  %v12472_v23 = vrot.slane %v7463_v16, %v14724_v58  ;;  %v14731_v12 = vsel %vm9855_vm13, %v12185_v24, %v12148_v11  ;;  %v7349_v11 = vld [vmem:[#allocation3 + $0x38] sm:$0x1]  ;;  %v7355_v24 = vld [vmem:[#allocation3 + $0x50] sm:$0x1] }
 0x533   : > { %6399 = vrot.lane.b32.xlu0 %v14720_v57, %s9393_s11  ;;  %v7386_v37 = vsel %vm9728_vm1, %v9107_v42, %v14722_v61  ;;  %v14726_v61 = vld [vmem:[#allocation17_spill] sm:$0xff]  ;;  %v14729_v42 = vld [vmem:[#allocation18_spill] sm:$0xff]  ;;  %v4647_v63 = vshrl.u32 %v14721_v34, 16  ;;  %v14732_v56 = vrot.slane %v12252_v35, 5  ;;  %v14733_v16 = vrot.slane %v12264_v22, 5 }
 0x534   : > { %v12435_v21 = vpop.permute.xlu1 %5245  ;;  %v7455_v36 = vcombine.low %v7386_v37, %v7414_v48  ;;  %v14727_v48 = vld [vmem:[#allocation16_spill] sm:$0xff]  ;;  %v7340_v37 = vld [vmem:[#allocation3 + $0x14] sm:$0x1]  ;;  %v14730_v57 = vld [vmem:[#allocation22_spill] sm:$0xff]  ;;  %v14735_v34 = vrot.slane %v12250_v39, 5  ;;  %v14737_v22 = vrot.slane %v12288_v59, 5  ;;  %v14740_v59 = vsel %vm9855_vm13, %v12242_v32, %v12173_v38 }
 0x535   : > { %14723 = vst [vmem:[#allocation21_spill] sm:$0xff] %v12435_v21  ;;  %v12447_v50 = vpop.permute.xlu0 %5259  ;;  %v12459_v45 = vpack.i.b16 %v12391_v6, %v14727_v48  ;;  %v4665_v44 = vshrl.u32 %v14730_v57, 16  ;;  %v7422_v29 = vrot.slane %v14732_v56, 4  ;;  %v7436_v57 = vrot.slane %v14733_v16, 4  ;;  %v7337_v35 = vld [vmem:[#allocation3 + $0x8] sm:$0x1] }
 0x536   : > { %14725 = vst [vmem:[#allocation52_spill] sm:$0xff] %v12447_v50  ;;  %6393 = vrot.lane.b32.xlu1 %v14728_v0, %s9393_s11  ;;  %v7346_v0 = vld [vmem:[#allocation3 + $0x2c] sm:$0x1]  ;;  %v7462_v53 = vrot.slane %v7455_v36, %v14724_v58  ;;  %v4648_v50 = vshrl.u32 %v12356_v60, 16  ;;  %v7394_v8 = vrot.slane %v14735_v34, 4  ;;  %v7408_v56 = vrot.slane %v14737_v22, 4 }
 0x537   : > { %6407 = vrot.lane.b32.xlu0 %v14731_v12, %s9393_s11  ;;  %v7505_v12 = vcombine.low %v12442_v19, %v12445_v31  ;;  %v7423_v16 = vrot.slane %v7352_v1, 5  ;;  %v7437_v28 = vrot.slane %v7358_v15, 5  ;;  %v14739_v60 = vsel %vm9855_vm13, %v12195_v33, %v12187_v20 }
 0x538   : > { %v12487_v21 = vpop.permute.xlu1 %5253  ;;  %v7471_v39 = vcombine.low %v7462_v53, %v12472_v23  ;;  %v7395_v34 = vrot.slane %v7340_v37, 5  ;;  %v7402_v7 = vrot.slane %v7343_v40, 5  ;;  %v7430_v1 = vrot.slane %v7355_v24, 5  ;;  %v14742_v37 = vld [vmem:[#allocation14_spill] sm:$0xff] }
 0x539   : > { %14734 = vst [vmem:[#allocation17_spill] sm:$0xff] %v12487_v21  ;;  %v12495_v3 = vpop.permute.xlu0 %5267  ;;  %v14738_v21 = vrot.slane %v12290_v2, 5  ;;  %v7416_v2 = vrot.slane %v7349_v11, 5  ;;  %v7424_v15 = vsel %vm9728_vm1, %v7422_v29, %v7423_v16  ;;  %v7438_v20 = vsel %vm9728_vm1, %v7436_v57, %v7437_v28 }
 0x53a   : > { %14736 = vst [vmem:[#allocation16_spill] sm:$0xff] %v12495_v3  ;;  %6401 = vrot.lane.b32.xlu1 %v14739_v60, %s9393_s11  ;;  %v7409_v3 = vrot.slane %v7346_v0, 5  ;;  %v12523_v40 = vrot.slane %v7505_v12, %v14742_v37  ;;  %v7388_v0 = vrot.slane %v7337_v35, 5  ;;  %v14744_v38 = vrot.slane %v12329_v51, 5 }
 0x53b   : > { %v7429_v36 = vrot.slane %v14738_v21, 4  ;;  %6969 = vrot.lane.b32.xlu0 %v14740_v59, %s9394_s12  ;;  %v7506_v21 = vcombine.high %v12442_v19, %v12445_v31  ;;  %v7396_v29 = vsel %vm9728_vm1, %v7394_v8, %v7395_v34  ;;  %v14746_v57 = vrot.slane %v12336_v47, 5  ;;  %v14756_v59 = vld [vmem:[#allocation45_spill] sm:$0xff] }
 0x53c   : > { %v12518_v33 = vpop.permute.xlu1 %5261  ;;  %14743 = vst [vmem:[#allocation53_spill] sm:$0xff] %v12523_v40  ;;  %v7401_v32 = vrot.slane %v14744_v38, 4  ;;  %v7410_v28 = vsel %vm9728_vm1, %v7408_v56, %v7409_v3  ;;  %v14747_v51 = vsel %vm9855_vm13, %v12225_v5, %v12233_v17  ;;  %v7472_v31 = vcombine.high %v7462_v53, %v12472_v23 }
 0x53d   : > { %14741 = vst [vmem:[#allocation18_spill] sm:$0xff] %v12518_v33  ;;  %v12527_v11 = vpop.permute.xlu0 %7881  ;;  %v7415_v24 = vrot.slane %v14746_v57, 4  ;;  %v7431_v19 = vsel %vm9728_vm1, %v7429_v36, %v7430_v1  ;;  %v4672_v8 = vshrl.u32 %v12391_v6, 16  ;;  %v7557_v12 = vcombine.low %v7396_v29, %v7424_v15  ;;  %v14759_v15 = vld [vmem:[#allocation20_spill] sm:$0xff]  ;;  %v5625_v57 = vld [vmem:[#allocation3 + $0x40] sm:$0xf] }
 0x53e   : > { %14745 = vst [vmem:[#allocation54_spill] sm:$0xff] %v12527_v11  ;;  %6409 = vrot.lane.b32.xlu1 %v14747_v51, %s9393_s11  ;;  %v7565_v35 = vcombine.low %v7410_v28, %v7438_v20  ;;  %v14748_v47 = vsel %vm9855_vm13, %v12244_v52, %v12201_v26  ;;  %v12552_v3 = vrot.slane %v7471_v39, %v14742_v37  ;;  %v14750_v22 = vrot.slane %v12308_v43, 5  ;;  %v14760_v20 = vld [vmem:[#allocation24_spill] sm:$0xff]  ;;  %v14762_v28 = vld [vmem:[#allocation26_spill] sm:$0xff]  ;;  %v5613_v51 = vld [vmem:[#allocation3 + $0x10] sm:$0xf] }
 0x53f   : > { %6977 = vrot.lane.b32.xlu0 %v14748_v47, %s9394_s12  ;;  %v7403_v53 = vsel %vm9728_vm1, %v7401_v32, %v7402_v7  ;;  %v7417_v17 = vsel %vm9728_vm1, %v7415_v24, %v7416_v2  ;;  %v12562_v6 = vpack.i.b16 %v4666_v41, %v4665_v44  ;;  %v12564_v56 = vpack.i.b16 %v4648_v50, %v4647_v63  ;;  %v14753_v44 = vld [vmem:[#allocation40_spill] sm:$0xff]  ;;  %v5624_v33 = vld [vmem:[#allocation3 + $0x3c] sm:$0xf] }
 0x540   : > { %14749 = vst [vmem:[#allocation55_spill] sm:$0xff] %v12552_v3  ;;  %v7387_v5 = vrot.slane %v14750_v22, 4  ;;  %v12560_v23 = vpop.permute.xlu1 %5269  ;;  %v4671_v26 = vshrl.u32 %v14727_v48, 16  ;;  %v7531_v52 = vcombine.low %v7403_v53, %v7431_v19  ;;  %v7520_v36 = vrot.slane %v7506_v21, %v14742_v37  ;;  %v14754_v41 = vld [vmem:[#allocation44_spill] sm:$0xff] }
 0x541   : > { %14751 = vst [vmem:[#allocation56_spill] sm:$0xff] %v12560_v23  ;;  %v12567_v16 = vpop.permute.xlu0 %7889  ;;  %v7595_v7 = vshrl.u32 %v12523_v40, 16  ;;  %v14755_v50 = vsel %vm9855_vm13, %v14753_v44, %v14754_v41  ;;  %v7564_v39 = vrot.slane %v7557_v12, %v14724_v58  ;;  %v7572_v34 = vrot.slane %v7565_v35, %v14724_v58  ;;  %v14769_v41 = vld [vmem:[#allocation9_spill] sm:$0xff] }
 0x542   : > { %14752 = vst [vmem:[#allocation57_spill] sm:$0xff] %v12567_v16  ;;  %v7389_v60 = vsel %vm9728_vm1, %v7387_v5, %v7388_v0  ;;  %6971 = vrot.lane.b32.xlu1 %v14755_v50, %s9394_s12  ;;  %v12581_v48 = vpack.i.b16 %v4672_v8, %v4671_v26  ;;  %v14758_v2 = vsel %vm9855_vm13, %v14756_v59, %v14757_v54  ;;  %v7594_v38 = vshrl.u32 %v12552_v3, 16  ;;  %v5610_v54 = vld [vmem:[#allocation3 + $0x4] sm:$0xf] }
 0x543   : > { %v7523_v63 = vcombine.low %v7389_v60, %v7417_v17  ;;  %6985 = vrot.lane.b32.xlu0 %v14758_v2, %s9394_s12  ;;  %v7486_v0 = vrot.slane %v7472_v31, %v14742_v37  ;;  %v7538_v19 = vrot.slane %v7531_v52, %v14724_v58  ;;  %v12614_v35 = vcombine.high %v12523_v40, %v14588_v4 }
 0x544   : > { %v12597_v32 = vpop.permute.xlu1 %7883  ;;  %v12610_v31 = vpack.i.b16 %v7595_v7, %v7594_v38  ;;  %v7607_v47 = vshrl.u32 %v7520_v36, 16  ;;  %v14765_v22 = vsel %vm9855_vm13, %v12298_v30, %v12300_v14  ;;  %v7574_v17 = vcombine.high %v7564_v39, %v7572_v34 }
 0x545   : > { %14761 = vst [vmem:[#allocation40_spill] sm:$0xff] %v12597_v32  ;;  %v12606_v8 = vpop.permute.xlu0 %7897  ;;  %v12608_v12 = vpack.i.b16 %v7520_v36, %v7486_v0  ;;  %14764 = vst [vmem:[#allocation45_spill] sm:$0xff] %v12614_v35  ;;  %v7530_v53 = vrot.slane %v7523_v63, %v14724_v58  ;;  %v7573_v26 = vcombine.low %v7564_v39, %v7572_v34  ;;  %v7606_v14 = vshrl.u32 %v7486_v0, 16  ;;  %v14770_v63 = vld [vmem:[#allocation11_spill] sm:$0xff] }
 0x546   : > { %14763 = vst [vmem:[#allocation44_spill] sm:$0xff] %v12606_v8  ;;  %6979 = vrot.lane.b32.xlu1 %v14765_v22, %s9394_s12  ;;  %v14766_v52 = vsel %vm9855_vm13, %v12318_v46, %v12262_v25  ;;  %v12633_v7 = vcombine.high %v12552_v3, %v14588_v4  ;;  %v5667_v30 = vshll.u32 %v5613_v51, 16  ;;  %v5671_v60 = vshrl.u32 %v5613_v51, 16  ;;  %v5616_v22 = vld [vmem:[#allocation3 + $0x1c] sm:$0xf] }
 0x547   : > { %6993 = vrot.lane.b32.xlu0 %v14766_v52, %s9394_s12  ;;  %v7540_v34 = vcombine.high %v7530_v53, %v7538_v19  ;;  %v7539_v59 = vcombine.low %v7530_v53, %v7538_v19  ;;  %v12651_v51 = vpack.i.b16 %v7607_v47, %v7606_v14  ;;  %v14773_v19 = vsel %vm9855_vm13, %v12381_v55, %v12411_v9  ;;  %v5619_v14 = vld [vmem:[#allocation3 + $0x28] sm:$0xf] }
 0x548   : > { %14767 = vst [vmem:[#allocation42_spill] sm:$0xff] %v12633_v7  ;;  %v12635_v44 = vpop.permute.xlu1 %7891  ;;  %v12649_v38 = vpack.i.b16 %v12614_v35, %v12633_v7  ;;  %v12660_v53 = vrot.slane %v7574_v17, %v14742_v37  ;;  %v12663_v52 = vrot.slane %v7573_v26, %v14742_v37  ;;  %v12666_v2 = vcombine.high %v7486_v0, %v14588_v4 }
 0x549   : > { %14768 = vst [vmem:[#allocation20_spill] sm:$0xff] %v12635_v44  ;;  %v12641_v25 = vpop.permute.xlu0 %7905  ;;  %14772 = vst [vmem:[#allocation26_spill] sm:$0xff] %v12651_v51  ;;  %v12669_v47 = vcombine.high %v7520_v36, %v14588_v4  ;;  %v14777_v39 = vcombine.low %v11793_v18, %v11793_v18  ;;  %v5643_v55 = vshll.u32 %v5610_v54, 16  ;;  %v5647_v9 = vshrl.u32 %v5610_v54, 16  ;;  %v5620_v18 = vld [vmem:[#allocation3 + $0x2c] sm:$0x1] }
 0x54a   : > { %14771 = vst [vmem:[#allocation24_spill] sm:$0xff] %v12641_v25  ;;  %6987 = vrot.lane.b32.xlu1 %v14773_v19, %s9394_s12  ;;  %14774 = vst [vmem:[#allocation9_spill] sm:$0xff] %v12663_v52  ;;  %v12675_v19 = vrot.slane %v5667_v30, 5  ;;  %v5673_v17 = vrot.slane %v5671_v60, 4  ;;  %v12680_v26 = vrot.slane %v7540_v34, %v14742_v37  ;;  %v12683_v0 = vrot.slane %v7539_v59, %v14742_v37  ;;  %v5627_v37 = vld [vmem:[#allocation3 + $0x48] sm:$0xf] }
 0x54b   : > { %14775 = vst [vmem:[#allocation11_spill] sm:$0xff] %v12666_v2  ;;  %14776 = vst [vmem:[#allocation58_spill] sm:$0xff] %v12669_v47  ;;  %4728 = vrot.lane.b32.xlu0 %v14777_v39, %s9397_s14  ;;  %v5691_v36 = vshll.u32 %v5616_v22, 16  ;;  %v5695_v5 = vshrl.u32 %v5616_v22, 16  ;;  %v5614_v39 = vld [vmem:[#allocation3 + $0x14] sm:$0x1]  ;;  %v14782_v34 = vsel %vm9855_vm13, %v12383_v13, %v12425_v27  ;;  %v12703_v22 = vpack.i.b16 %v12669_v47, %v12666_v2 }
 0x54c   : > { %v12677_v50 = vpop.permute.xlu1 %7899  ;;  %14779 = vst [vmem:[#allocation60_spill] sm:$0xff] %v12680_v26  ;;  %14780 = vst [vmem:[#allocation61_spill] sm:$0xff] %v12683_v0  ;;  %v5715_v60 = vshll.u32 %v5619_v14, 16  ;;  %v5719_v54 = vshrl.u32 %v5619_v14, 16  ;;  %v12699_v59 = vpack.i.b16 %v12660_v53, %v12680_v26  ;;  %v5611_v14 = vld [vmem:[#allocation3 + $0x8] sm:$0x1]  ;;  %v14784_v46 = vcombine.low %v12387_v10, %v12387_v10 }
 0x54d   : > { %14778 = vst [vmem:[#allocation59_spill] sm:$0xff] %v12677_v50  ;;  %v12685_v24 = vpop.permute.xlu0 %8355  ;;  %14783 = vst [vmem:[#allocation63_spill] sm:$0xff] %v12703_v22  ;;  %v7619_v13 = vshrl.u32 %v12663_v52, 16  ;;  %v5617_v27 = vld [vmem:[#allocation3 + $0x20] sm:$0x1]  ;;  %v5649_v29 = vrot.slane %v5647_v9, 4  ;;  %v5674_v21 = vor.u32 %v5673_v17, %v12675_v19  ;;  %v14788_v9 = vcombine.low %v14726_v61, %v14726_v61 }
 0x54e   : > { %14781 = vst [vmem:[#allocation62_spill] sm:$0xff] %v12685_v24  ;;  %6995 = vrot.lane.b32.xlu1 %v14782_v34, %s9394_s12  ;;  %v12712_v34 = vrot.slane %v5643_v55, 5  ;;  %v7618_v30 = vshrl.u32 %v12683_v0, 16  ;;  %v5677_v43 = vshll.u32 %v5614_v39, 16  ;;  %v12718_v40 = vrot.slane %v5691_v36, 5 }
 0x54f   : > { %4688 = vrot.lane.b32.xlu0 %v14784_v46, %s9399_s16  ;;  %v5697_v3 = vrot.slane %v5695_v5, 4  ;;  %v5622_v10 = vld [vmem:[#allocation3 + $0x34] sm:$0xf]  ;;  %v12722_v46 = vrot.slane %v5715_v60, 5  ;;  %v5721_v50 = vrot.slane %v5719_v54, 4  ;;  %v5763_v55 = vshll.u32 %v5625_v57, 16 }
 0x550   : > { %14785 = vst [vmem:[#allocation64_spill] sm:$0xff] %v12712_v34  ;;  %v12715_v1 = vpop.permute.xlu1 %7907  ;;  %v5767_v44 = vshrl.u32 %v5625_v57, 16  ;;  %v12732_v36 = vcombine.high %v12683_v0, %v14588_v4  ;;  %v12736_v5 = vcombine.high %v12663_v52, %v14588_v4  ;;  %v5653_v39 = vshll.u32 %v5611_v14, 16  ;;  %v12744_v61 = vld [vmem:[#allocation3 + $0x38] sm:$0x1] }
 0x551   : > { %14786 = vst [vmem:[#allocation65_spill] sm:$0xff] %v12715_v1  ;;  %v12720_v32 = vpop.permute.xlu0 %8363  ;;  %v14790_v57 = vcombine.low %v14729_v42, %v14729_v42  ;;  %v12742_v60 = vpack.i.b16 %v7619_v13, %v7618_v30  ;;  %v5628_v54 = vld [vmem:[#allocation3 + $0x4c] sm:$0xf]  ;;  %v5650_v17 = vor.u32 %v5649_v29, %v12712_v34  ;;  %v12747_v0 = vrot.slane %v5674_v21, 4  ;;  %v12751_v52 = vld [vmem:[#allocation3 + $0x44] sm:$0x1] }
 0x552   : > { %14787 = vst [vmem:[#allocation66_spill] sm:$0xff] %v12720_v32  ;;  %4700 = vrot.lane.b32.xlu1 %v14788_v9, %s9397_s14  ;;  %14789 = vst [vmem:[#allocation67_spill] sm:$0xff] %v12736_v5  ;;  %v5631_v9 = vld [vmem:[#allocation3 + $0x58] sm:$0xf]  ;;  %v5701_v1 = vshll.u32 %v5617_v27, 16  ;;  %v12753_v14 = vrot.slane %v5677_v43, 5  ;;  %v5698_v42 = vor.u32 %v5697_v3, %v12718_v40  ;;  %v5722_v16 = vor.u32 %v5721_v50, %v12722_v46 }
 0x553   : > { %4704 = vrot.lane.b32.xlu0 %v14790_v57, %s9401_s23  ;;  %v5725_v57 = vshll.u32 %v5620_v18, 16  ;;  %v5739_v30 = vshll.u32 %v5622_v10, 16  ;;  %v12758_v24 = vld [vmem:[#allocation3 + $0x5c] sm:$0x1]  ;;  %v5743_v29 = vshrl.u32 %v5622_v10, 16  ;;  %v12761_v21 = vrot.slane %v5763_v55, 5 }
 0x554   : > { %v12749_v32 = vpop.permute.xlu1 %8357  ;;  %v12763_v27 = vrot.slane %v5767_v44, 4  ;;  %v14793_v43 = vcombine.low %v12429_v62, %v12429_v62  ;;  %v5787_v3 = vshll.u32 %v5628_v54, 16  ;;  %v5791_v18 = vshrl.u32 %v5628_v54, 16  ;;  %v14824_v49 = vld [vmem:[#allocation63_spill] sm:$0xff] }
 0x555   : > { %14791 = vst [vmem:[#allocation68_spill] sm:$0xff] %v12749_v32  ;;  %v12756_v13 = vpop.permute.xlu0 %8371  ;;  %v12769_v32 = vrot.slane %v5653_v39, 5  ;;  %v5811_v25 = vshll.u32 %v5631_v9, 16  ;;  %v14795_v50 = vcombine.low %v12459_v45, %v12459_v45  ;;  %v12777_v10 = vrot.slane %v5650_v17, 4  ;;  %v5612_v39 = vld [vmem:[#allocation3 + $0xc] sm:$0xf] }
 0x556   : > { %14792 = vst [vmem:[#allocation69_spill] sm:$0xff] %v12756_v13  ;;  %4692 = vrot.lane.b32.xlu1 %v14793_v43, %s9396_s13  ;;  %v12771_v13 = vld [vmem:[#allocation3] sm:$0xf]  ;;  %v12783_v44 = vrot.slane %v5701_v1, 5  ;;  %v5815_v55 = vshrl.u32 %v5631_v9, 16  ;;  %v12787_v43 = vrot.slane %v5698_v42, 4  ;;  %v5770_v9 = vor.u32 %v12763_v27, %v12761_v21 }
 0x557   : > { %14794 = vst [vmem:[#allocation70_spill] sm:$0xff] %v12769_v32  ;;  %4720 = vrot.lane.b32.xlu0 %v14795_v50, %s9396_s13  ;;  %14796 = vst [vmem:[#allocation71_spill] sm:$0xff] %v12777_v10  ;;  %v12789_v11 = vrot.slane %v5725_v57, 5  ;;  %v12791_v8 = vrot.slane %v5739_v30, 5  ;;  %v5615_v17 = vld [vmem:[#allocation3 + $0x18] sm:$0xf]  ;;  %v14799_v30 = vcombine.low %v14759_v15, %v14759_v15  ;;  %v14800_v27 = vcombine.low %v14760_v20, %v14760_v20 }
 0x558   : > { %v12785_v54 = vpop.permute.xlu1 %8365  ;;  %v5618_v50 = vld [vmem:[#allocation3 + $0x24] sm:$0xf]  ;;  %v12796_v62 = vrot.slane %v5722_v16, 4  ;;  %v12798_v1 = vrot.slane %v5743_v29, 4  ;;  %v5773_v42 = vshll.u32 %v12751_v52, 16  ;;  %v12807_v45 = vrot.slane %v5787_v3, 5 }
 0x559   : > { %14797 = vst [vmem:[#allocation72_spill] sm:$0xff] %v12785_v54  ;;  %v12794_v23 = vpop.permute.xlu0 %8379  ;;  %v5630_v57 = vld [vmem:[#allocation3 + $0x54] sm:$0xf]  ;;  %v12809_v54 = vrot.slane %v5791_v18, 4  ;;  %v5821_v16 = vshll.u32 %v12758_v24, 16  ;;  %v5817_v52 = vrot.slane %v5815_v55, 4  ;;  %v14803_v20 = vcombine.low %v12562_v6, %v12562_v6 }
 0x55a   : > { %14798 = vst [vmem:[#allocation73_spill] sm:$0xff] %v12794_v23  ;;  %4708 = vrot.lane.b32.xlu1 %v14799_v30, %s9398_s15  ;;  %v12811_v23 = vrot.slane %v5811_v25, 5  ;;  %v5621_v29 = vld [vmem:[#allocation3 + $0x30] sm:$0xf]  ;;  %v5634_v2 = vshrl.u32 %v12771_v13, 16  ;;  %v5658_v15 = vshrl.u32 %v5612_v39, 16 }
 0x55b   : > { %4736 = vrot.lane.b32.xlu0 %v14800_v27, %s9398_s15  ;;  %v5661_v30 = vshll.u32 %v5612_v39, 16  ;;  %v5754_v18 = vshrl.u32 %v5624_v33, 16  ;;  %v5757_v47 = vshll.u32 %v5624_v33, 16  ;;  %v5802_v25 = vshrl.u32 %v5630_v57, 16 }
 0x55c   : > { %v12819_v3 = vpop.permute.xlu1 %8373  ;;  %v5805_v4 = vshll.u32 %v5630_v57, 16  ;;  %v5682_v24 = vshrl.u32 %v5615_v17, 16  ;;  %v5685_v7 = vshll.u32 %v5615_v17, 16  ;;  %v5706_v22 = vshrl.u32 %v5618_v50, 16 }
 0x55d   : > { %14801 = vst [vmem:[#allocation74_spill] sm:$0xff] %v12819_v3  ;;  %v12821_v35 = vpop.permute.xlu0 %7885  ;;  %v5709_v51 = vshll.u32 %v5618_v50, 16  ;;  %v5730_v55 = vshrl.u32 %v5621_v29, 16  ;;  %v5733_v27 = vshll.u32 %v5621_v29, 16  ;;  %v5778_v39 = vshrl.u32 %v5627_v37, 16 }
 0x55e   : > { %14802 = vst [vmem:[#allocation75_spill] sm:$0xff] %v12821_v35  ;;  %4716 = vrot.lane.b32.xlu1 %v14803_v20, %s9399_s16  ;;  %v5781_v26 = vshll.u32 %v5627_v37, 16  ;;  %v14804_v33 = vcombine.low %v12608_v12, %v12608_v12  ;;  %v5818_v57 = vor.u32 %v5817_v52, %v12811_v23  ;;  %v5637_v17 = vshll.u32 %v12771_v13, 16  ;;  %v5629_v13 = vld [vmem:[#allocation3 + $0x50] sm:$0x1] }
 0x55f   : > { %v5660_v3 = vrot.slane %v5658_v15, 4  ;;  %v5663_v50 = vrot.slane %v5661_v30, 5  ;;  %v5756_v34 = vrot.slane %v5754_v18, 4  ;;  %v5759_v6 = vrot.slane %v5757_v47, 5 }
 0x560   : > { %7653 = vrot.lane.b32.xlu0 %v14804_v33, %s9397_s14  ;;  %v12833_v35 = vpop.permute.xlu1 %8381  ;;  %v5804_v20 = vrot.slane %v5802_v25, 4  ;;  %v5807_v58 = vrot.slane %v5805_v4, 5  ;;  %v5684_v37 = vrot.slane %v5682_v24, 4  ;;  %v5687_v10 = vrot.slane %v5685_v7, 5 }
 0x561   : > { %14805 = vst [vmem:[#allocation76_spill] sm:$0xff] %v12833_v35  ;;  %v12835_v29 = vpop.permute.xlu0 %7893  ;;  %v5708_v32 = vrot.slane %v5706_v22, 4  ;;  %v5711_v5 = vrot.slane %v5709_v51, 5  ;;  %v14806_v12 = vcombine.low %v14762_v28, %v14762_v28  ;;  %v5732_v52 = vrot.slane %v5730_v55, 4 }
 0x562   : > { %v5735_v15 = vrot.slane %v5733_v27, 5  ;;  %v5780_v30 = vrot.slane %v5778_v39, 4  ;;  %v5783_v33 = vrot.slane %v5781_v26, 5  ;;  %v14807_v4 = vcombine.low %v12564_v56, %v12564_v56 }
 0x563   : > { %4732 = vrot.lane.b32.xlu1 %v14806_v12, %s9401_s23  ;;  %v5771_v47 = vrot.slane %v5770_v9, 4  ;;  %v5775_v18 = vrot.slane %v5773_v42, 5  ;;  %v5794_v7 = vor.u32 %v12809_v54, %v12807_v45  ;;  %v5636_v51 = vrot.slane %v5634_v2, 4 }
 0x564   : > { %4696 = vrot.lane.b32.xlu0 %v14807_v4, %s9400_s17  ;;  %v12847_v22 = vpop.permute.xlu1 %7887  ;;  %v5819_v28 = vrot.slane %v5818_v57, 4  ;;  %v5639_v25 = vrot.slane %v5637_v17, 5  ;;  %v5760_v24 = vor.u32 %v5759_v6, %v5756_v34  ;;  %v5808_v55 = vor.u32 %v5807_v58, %v5804_v20 }
 0x565   : > { %v12849_v27 = vpop.permute.xlu0 %7901  ;;  %v5797_v26 = vshll.u32 %v5629_v13, 16  ;;  %v5664_v39 = vor.u32 %v5663_v50, %v5660_v3  ;;  %v5688_v12 = vor.u32 %v5687_v10, %v5684_v37  ;;  %v5712_v35 = vor.u32 %v5711_v5, %v5708_v32 }
 0x566   : > { %v14808_v56 = vcombine.low %v12581_v48, %v12581_v48  ;;  %v14809_v54 = vshll.u32 %v12744_v61, 16  ;;  %v5823_v9 = vrot.slane %v5821_v16, 5  ;;  %v5736_v42 = vor.u32 %v5735_v15, %v5732_v52 }
 0x567   : > { %v5784_v57 = vor.u32 %v5783_v33, %v5780_v30  ;;  %v14810_v58 = vcombine.low %v14769_v41, %v14769_v41  ;;  %v5728_v32 = vsel %vm9855_vm13, %v12796_v62, %v12789_v11  ;;  %v5746_v48 = vor.u32 %v12798_v1, %v12791_v8 }
 0x568   : > { %4724 = vrot.lane.b32.xlu1 %v14808_v56, %s9400_s17  ;;  %v5751_v2 = vrot.slane %v14809_v54, 5  ;;  %v5776_v34 = vsel %vm9855_vm13, %v5771_v47, %v5775_v18  ;;  %v5795_v5 = vrot.slane %v5794_v7, 4  ;;  %v12869_v61 = vpop.permute.xlu1 %7895  ;;  %v5824_v10 = vsel %vm9855_vm13, %v5819_v28, %v5823_v9  ;;  %v14819_v54 = vld [vmem:[#allocation12_spill] sm:$0xff] }
 0x569   : > { %4712 = vrot.lane.b32.xlu0 %v14810_v58, %s9402_s25  ;;  %v5640_v16 = vor.u32 %v5639_v25, %v5636_v51  ;;  %v5761_v41 = vrot.slane %v5760_v24, 4  ;;  %v5809_v3 = vrot.slane %v5808_v55, 4  ;;  %v12873_v17 = vpop.permute.xlu0 %7909  ;;  %v5799_v50 = vrot.slane %v5797_v26, 5  ;;  %v14816_v24 = vld [vmem:[#allocation67_spill] sm:$0xff]  ;;  %v14817_v26 = vld [vmem:[#allocation70_spill] sm:$0xff]  ;;  %v14820_v9 = vld [vmem:[#allocation64_spill] sm:$0xff] }
 0x56a   : > { %v5665_v6 = vrot.slane %v5664_v39, 4  ;;  %v5689_v11 = vrot.slane %v5688_v12, 4  ;;  %v5713_v62 = vrot.slane %v5712_v35, 4  ;;  %v14811_v1 = vcombine.low %v14770_v63, %v14770_v63  ;;  %v14818_v39 = vld [vmem:[#allocation71_spill] sm:$0xff] }
 0x56b   : > { %v5737_v20 = vrot.slane %v5736_v42, 4  ;;  %v5766_v37 = vsel %vm9855_vm13, %v5761_v41, %v12761_v21  ;;  %v5785_v13 = vrot.slane %v5784_v57, 4  ;;  %v5814_v52 = vsel %vm9855_vm13, %v5809_v3, %v12811_v23  ;;  %v14821_v57 = vld [vmem:[#allocation60_spill] sm:$0xff] }
 0x56c   : > { %4740 = vrot.lane.b32.xlu1 %v14811_v1, %s9402_s25  ;;  %v14812_v15 = vcombine.low %v12610_v31, %v12610_v31  ;;  %v5747_v35 = vrot.slane %v5746_v48, 4  ;;  %v5800_v63 = vsel %vm9855_vm13, %v5795_v5, %v5799_v50  ;;  %v14813_v30 = vsel %vm9855_vm13, %v12747_v0, %v12753_v14  ;;  %v12896_v4 = vpop.permute.xlu1 %7903  ;;  %v14825_v50 = vld [vmem:[#allocation42_spill] sm:$0xff] }
 0x56d   : > { %v5943_v21 = vcombine.low %v14813_v30, %v5776_v34  ;;  %v5951_v33 = vcombine.low %v5728_v32, %v5824_v10  ;;  %v5641_v47 = vrot.slane %v5640_v16, 4  ;;  %v5670_v23 = vsel %vm9855_vm13, %v5665_v6, %v12675_v19  ;;  %v12907_v7 = vpop.permute.xlu0 %8359  ;;  %v14822_v10 = vld [vmem:[#allocation26_spill] sm:$0xff] }
 0x56e   : > { %7641 = vrot.lane.b32.xlu0 %v14812_v15, %s9399_s16  ;;  %v5718_v31 = vsel %vm9855_vm13, %v5713_v62, %v12722_v46  ;;  %v5790_v18 = vsel %vm9855_vm13, %v5785_v13, %v12807_v45  ;;  %v5704_v0 = vsel %vm9855_vm13, %v12787_v43, %v12783_v44  ;;  %v5752_v14 = vsel %vm9855_vm13, %v5747_v35, %v5751_v2 }
 0x56f   : > { %v5875_v51 = vcombine.low %v5670_v23, %v5766_v37  ;;  %v5883_v19 = vcombine.low %v5718_v31, %v5814_v52  ;;  %v14814_v46 = vcombine.low %v12699_v59, %v12699_v59  ;;  %v7631_v28 = vshrl.u32 %v12660_v53, 16 }
 0x570   : > { %v5917_v45 = vcombine.low %v5704_v0, %v5800_v63  ;;  %v5694_v25 = vsel %vm9855_vm13, %v5689_v11, %v12718_v40  ;;  %v5742_v44 = vsel %vm9855_vm13, %v5737_v20, %v12791_v8  ;;  %v14815_v43 = vcombine.low %v12649_v38, %v12649_v38  ;;  %v12938_v56 = vpop.permute.xlu1 %7911  ;;  %v14827_v11 = vld [vmem:[#allocation45_spill] sm:$0xff]  ;;  %v14831_v0 = vld [vmem:[#allocation11_spill] sm:$0xff] }
 0x571   : > { %7681 = vrot.lane.b32.xlu1 %v14814_v46, %s9397_s14  ;;  %v9122_v59 = vcombine.low %v12742_v60, %v12742_v60  ;;  %v7623_v55 = vpack.i.b16 %v14816_v24, %v12732_v36  ;;  %v5656_v40 = vsel %vm9855_vm13, %v14818_v39, %v14817_v26  ;;  %v5849_v12 = vcombine.low %v5694_v25, %v5790_v18  ;;  %v12949_v42 = vpop.permute.xlu0 %8367  ;;  %v14832_v25 = vld [vmem:[#allocation14_spill] sm:$0xff] }
 0x572   : > { %7645 = vrot.lane.b32.xlu0 %v14815_v43, %s9396_s13  ;;  %v5909_v8 = vcombine.low %v5656_v40, %v5752_v14  ;;  %v12941_v2 = vrot.slane %v5943_v21, %v14819_v54  ;;  %v12944_v38 = vrot.slane %v5951_v33, %v14819_v54  ;;  %v5646_v60 = vsel %vm9855_vm13, %v5641_v47, %v14820_v9  ;;  %v14830_v21 = vld [vmem:[#allocation58_spill] sm:$0xff] }
 0x573   : > { %v7630_v58 = vshrl.u32 %v14821_v57, 16  ;;  %v5841_v32 = vcombine.low %v5646_v60, %v5742_v44  ;;  %v5882_v48 = vrot.slane %v5875_v51, %v14819_v54  ;;  %v5890_v34 = vrot.slane %v5883_v19, %v14819_v54 }
 0x574   : > { %v12956_v5 = vrot.slane %v5917_v45, %v14819_v54  ;;  %v14823_v16 = vcombine.low %v14822_v10, %v14822_v10  ;;  %v9120_v41 = vcombine.low %v14824_v49, %v14824_v49  ;;  %v14826_v6 = vshrl.u32 %v14825_v50, 16  ;;  %v12969_v37 = vpop.permute.xlu1 %8361  ;;  %v14836_v50 = vld [vmem:[#allocation10_spill] sm:$0xff] }
 0x575   : > { %7669 = vrot.lane.b32.xlu1 %v9122_v59, %s9399_s16  ;;  %v7632_v3 = vpack.i.b16 %v7631_v28, %v7630_v58  ;;  %v14828_v62 = vshrl.u32 %v14827_v11, 16  ;;  %v5856_v20 = vrot.slane %v5849_v12, %v14819_v54  ;;  %v9123_v13 = vcombine.low %v7623_v55, %v7623_v55  ;;  %v12978_v30 = vpop.permute.xlu0 %8375 }
 0x576   : > { %7657 = vrot.lane.b32.xlu0 %v14823_v16, %s9401_s23  ;;  %v14829_v52 = vmov 0   ;;  %v5916_v35 = vrot.slane %v5909_v8, %v14819_v54  ;;  %v5960_v63 = vcombine.high %v12941_v2, %v12944_v38  ;;  %v7613_v33 = vshrl.u32 %v14830_v21, 16 }
 0x577   : > { %v7602_v1 = vpack.i.b16 %v14828_v62, %v14826_v6  ;;  %v12973_v15 = vcombine.high %v12660_v53, %v14829_v52  ;;  %v5848_v47 = vrot.slane %v5841_v32, %v14819_v54  ;;  %v5892_v23 = vcombine.high %v5882_v48, %v5890_v34 }
 0x578   : > { %v5891_v31 = vcombine.low %v5882_v48, %v5890_v34  ;;  %v7556_v18 = vcombine.high %v14821_v57, %v14829_v52  ;;  %v5926_v53 = vcombine.high %v5916_v35, %v12956_v5  ;;  %v7612_v14 = vshrl.u32 %v14831_v0, 16  ;;  %v12988_v46 = vpop.permute.xlu1 %8369 }
 0x579   : > { %7673 = vrot.lane.b32.xlu1 %v9123_v13, %s9396_s13  ;;  %v5858_v51 = vcombine.high %v5848_v47, %v5856_v20  ;;  %v5857_v19 = vcombine.low %v5848_v47, %v5856_v20  ;;  %v9126_v28 = vcombine.low %v7632_v3, %v7632_v3  ;;  %v12992_v44 = vrot.slane %v5960_v63, %v14832_v25  ;;  %v12994_v43 = vpop.permute.xlu0 %8383  ;;  %v14835_v3 = vld [vmem:[#allocation27_spill] sm:$0xff]  ;;  %v14838_v20 = vld [vmem:[#allocation13_spill] sm:$0xff] }
 0x57a   : > { %7661 = vrot.lane.b32.xlu0 %v9120_v41, %s9398_s15  ;;  %v7635_v45 = vpack.i.b16 %v12973_v15, %v7556_v18  ;;  %v9117_v59 = vcombine.low %v7602_v1, %v7602_v1  ;;  %v7614_v55 = vpack.i.b16 %v7613_v33, %v7612_v14  ;;  %v5906_v26 = vrot.slane %v5892_v23, %v14832_v25 }
 0x57b   : > { %v12998_v39 = vrot.slane %v5891_v31, %v14832_v25  ;;  %v13002_v40 = vrot.slane %v5926_v53, %v14832_v25  ;;  %v13006_v12 = vrot.slane %v5858_v51, %v14832_v25  ;;  %v13009_v8 = vrot.slane %v5857_v19, %v14832_v25 }
 0x57c   : > { %v13011_v9 = vpop.permute.xlu1 %8377  ;;  %v9127_v60 = vcombine.low %v7635_v45, %v7635_v45  ;;  %v7625_v58 = vshrl.u32 %v14816_v24, 16  ;;  %v5959_v32 = vcombine.low %v12941_v2, %v12944_v38  ;;  %v9121_v34 = vcombine.low %v7614_v55, %v7614_v55  ;;  %v14842_v55 = vld [vmem:[#allocation8_spill] sm:$0xff] }
 0x57d   : > { %14833 = vst [vmem:[#allocation67_spill] sm:$0xff] %v12998_v39  ;;  %7685 = vrot.lane.b32.xlu1 %v9126_v28, %s9401_s23  ;;  %14834 = vst [vmem:[#allocation70_spill] sm:$0xff] %v13009_v8  ;;  %v6015_v57 = vpack.i.b16 %v12992_v44, %v13002_v40  ;;  %v13018_v48 = vpop.permute.xlu0 %6379  ;;  %v5991_v10 = vpack.i.b16 %v5906_v26, %v13006_v12  ;;  %v5981_v16 = vshrl.u32 %v12998_v39, 16  ;;  %v7624_v49 = vshrl.u32 %v12732_v36, 16  ;;  %v14839_v36 = vld [vmem:[#allocation7_spill] sm:$0xff] }
 0x57e   : > { %7649 = vrot.lane.b32.xlu0 %v9117_v59, %s9400_s17  ;;  %v5925_v41 = vcombine.low %v5916_v35, %v12956_v5  ;;  %v4845_v6 = vcombine.low %v14836_v50, %v14835_v3  ;;  %v5980_v24 = vshrl.u32 %v13009_v8, 16  ;;  %v7637_v62 = vshrl.u32 %v12973_v15, 16  ;;  %v14841_v59 = vld [vmem:[#allocation28_spill] sm:$0xff] }
 0x57f   : > { %v9066_v38 = vcombine.low %v6015_v57, %v6015_v57  ;;  %v7626_v11 = vpack.i.b16 %v7625_v58, %v7624_v49  ;;  %v13033_v1 = vrot.slane %v5959_v32, %v14832_v25  ;;  %v4837_v13 = vcombine.low %v14839_v36, %v14838_v20  ;;  %v14845_v20 = vld [vmem:[#allocation43_spill] sm:$0xff]  ;;  %v14846_v36 = vld [vmem:[#allocation37_spill] sm:$0xff] }
 0x580   : > { %v13029_v2 = vpop.permute.xlu1 %8385  ;;  %v9059_v35 = vcombine.low %v5991_v10, %v5991_v10  ;;  %v5982_v63 = vpack.i.b16 %v5981_v16, %v5980_v24  ;;  %v13041_v21 = vcombine.high %v12998_v39, %v14829_v52  ;;  %v7636_v33 = vshrl.u32 %v7556_v18, 16  ;;  %v14844_v10 = vld [vmem:[#allocation39_spill] sm:$0xff]  ;;  %v14860_v39 = vld [vmem:[#allocation52_spill] sm:$0xff] }
 0x581   : > { %7689 = vrot.lane.b32.xlu1 %v9127_v60, %s9398_s15  ;;  %14837 = vst [vmem:[#allocation71_spill] sm:$0xff] %v13033_v1  ;;  %v13037_v5 = vpop.permute.xlu0 %6387  ;;  %v13045_v47 = vrot.slane %v5925_v41, %v14832_v25  ;;  %v13048_v15 = vrot.slane %v4845_v6, %v14819_v54  ;;  %v13053_v23 = vcombine.high %v13009_v8, %v14829_v52  ;;  %v6005_v14 = vshrl.u32 %v13033_v1, 16 }
 0x582   : > { %7665 = vrot.lane.b32.xlu0 %v9121_v34, %s9402_s25  ;;  %v9124_v53 = vcombine.low %v7626_v11, %v7626_v11  ;;  %v7638_v0 = vpack.i.b16 %v7637_v62, %v7636_v33  ;;  %v13059_v18 = vrot.slane %v4837_v13, %v14819_v54  ;;  %v9056_v19 = vcombine.low %v5982_v63, %v5982_v63  ;;  %v14843_v34 = vld [vmem:[#allocation47_spill] sm:$0xff]  ;;  %v14856_v63 = vld [vmem:[#allocation48_spill] sm:$0xff] }
 0x583   : > { %14840 = vst [vmem:[#allocation12_spill] sm:$0xff] %v13045_v47  ;;  %v5985_v28 = vpack.i.b16 %v13041_v21, %v13053_v23  ;;  %v5993_v45 = vshrl.u32 %v5906_v26, 16  ;;  %v4905_v60 = vcombine.low %v14842_v55, %v14841_v59  ;;  %v6004_v57 = vshrl.u32 %v13045_v47, 16 }
 0x584   : > { %v13055_v31 = vpop.permute.xlu1 %6381  ;;  %v4854_v58 = vcombine.high %v13059_v18, %v13048_v15  ;;  %v5992_v32 = vshrl.u32 %v13006_v12, 16  ;;  %v4879_v16 = vcombine.low %v14844_v10, %v14843_v34  ;;  %v9128_v41 = vcombine.low %v7638_v0, %v7638_v0 }
 0x585   : > { %6067 = vrot.lane.b32.xlu1 %v9066_v38, %s9397_s14  ;;  %v13061_v51 = vpop.permute.xlu0 %6395  ;;  %v6006_v3 = vpack.i.b16 %v6005_v14, %v6004_v57  ;;  %v13079_v50 = vcombine.high %v13033_v1, %v14829_v52  ;;  %v9057_v24 = vcombine.low %v5985_v28, %v5985_v28  ;;  %v5908_v11 = vcombine.high %v5906_v26, %v14829_v52  ;;  %v14848_v26 = vld [vmem:[#allocation15_spill] sm:$0xff]  ;;  %v14858_v1 = vld [vmem:[#allocation50_spill] sm:$0xff] }
 0x586   : > { %6039 = vrot.lane.b32.xlu0 %v9059_v35, %s9397_s14  ;;  %v5994_v38 = vpack.i.b16 %v5993_v45, %v5992_v32  ;;  %v13085_v62 = vrot.slane %v4905_v60, %v14819_v54  ;;  %v4871_v13 = vcombine.low %v14846_v36, %v14845_v20  ;;  %v13092_v35 = vcombine.high %v13045_v47, %v14829_v52  ;;  %v14849_v60 = vld [vmem:[#allocation16_spill] sm:$0xff]  ;;  %v14850_v57 = vld [vmem:[#allocation51_spill] sm:$0xff] }
 0x587   : > { %v13097_v33 = vrot.slane %v4854_v58, %v14832_v25  ;;  %v5874_v14 = vcombine.high %v13006_v12, %v14829_v52  ;;  %v9063_v45 = vcombine.low %v6006_v3, %v6006_v3  ;;  %v6017_v55 = vshrl.u32 %v12992_v44, 16  ;;  %v14852_v12 = vld [vmem:[#allocation33_spill] sm:$0xff]  ;;  %v14854_v20 = vld [vmem:[#allocation35_spill] sm:$0xff] }
 0x588   : > { %v13075_v49 = vpop.permute.xlu1 %6389  ;;  %v6009_v59 = vpack.i.b16 %v13079_v50, %v13092_v35  ;;  %v5329_v58 = vcombine.low %v14850_v57, %v14849_v60  ;;  %v9060_v34 = vcombine.low %v5994_v38, %v5994_v38  ;;  %v14855_v36 = vld [vmem:[#allocation31_spill] sm:$0xff]  ;;  %v14857_v60 = vld [vmem:[#allocation41_spill] sm:$0xff]  ;;  %v14859_v38 = vld [vmem:[#allocation46_spill] sm:$0xff]  ;;  %vm14926_vm1 = vcmask 523264  }
 0x589   : > { %7677 = vrot.lane.b32.xlu1 %v9124_v53, %s9400_s17  ;;  %v13081_v6 = vpop.permute.xlu0 %6403  ;;  %v14847_v53 = vld [vmem:[#allocation30_spill] sm:$0xff]  ;;  %v5997_v10 = vpack.i.b16 %v5908_v11, %v5874_v14  ;;  %v5295_v3 = vcombine.low %v14855_v36, %v14854_v20  ;;  %v4939_v57 = vcombine.low %v14857_v60, %v14856_v63  ;;  %v4947_v47 = vcombine.low %v14859_v38, %v14858_v1  ;;  %vm14929_vm4 = vmmov %vm14926_vm1 }
 0x58a   : > { %6027 = vrot.lane.b32.xlu0 %v9056_v19, %s9399_s16  ;;  %v4913_v0 = vcombine.low %v14848_v26, %v14847_v53  ;;  %v4886_v19 = vrot.slane %v4879_v16, %v14819_v54  ;;  %v4878_v53 = vrot.slane %v4871_v13, %v14819_v54  ;;  %v6016_v26 = vshrl.u32 %v13002_v40, 16  ;;  %vm14970_vm9 = vmmov %vm14926_vm1 }
 0x58b   : > { %v9064_v13 = vcombine.low %v6009_v59, %v6009_v59  ;;  %v5976_v36 = vcombine.high %v12992_v44, %v14829_v52  ;;  %v13135_v63 = vrot.slane %v5329_v58, %v14819_v54  ;;  %v9061_v1 = vcombine.low %v5997_v10, %v5997_v10  ;;  %v14863_v10 = vld [vmem:[#allocation56_spill] sm:$0xff] }
 0x58c   : > { %v13105_v28 = vpop.permute.xlu1 %6397  ;;  %v5942_v44 = vcombine.high %v13002_v40, %v14829_v52  ;;  %v4946_v59 = vrot.slane %v4939_v57, %v14819_v54  ;;  %vm14927_vm13 = vcmask 654336  }
 0x58d   : > { %7693 = vrot.lane.b32.xlu1 %v9128_v41, %s9402_s25  ;;  %v13112_v32 = vpop.permute.xlu0 %6965  ;;  %v5987_v41 = vshrl.u32 %v13041_v21, 16  ;;  %v14861_v21 = vld [vmem:[#allocation49_spill] sm:$0xff]  ;;  %vm14931_vm8 = vmmov %vm14927_vm13 }
 0x58e   : > { %6031 = vrot.lane.b32.xlu0 %v9057_v24, %s9396_s13  ;;  %14851 = vst [vmem:[#allocation64_spill] sm:$0xff] %v13112_v32  ;;  %v14853_v24 = vld [vmem:[#allocation29_spill] sm:$0xff]  ;;  %v5321_v8 = vcombine.low %v14861_v21, %v14860_v39  ;;  %v5999_v39 = vshrl.u32 %v5908_v11, 16  ;;  %v4887_v21 = vcombine.low %v4878_v53, %v4886_v19  ;;  %v5998_v11 = vshrl.u32 %v5874_v14, 16  ;;  %v14872_v32 = vld [vmem:[#allocation32_spill] sm:$0xff]  ;;  %vm14971_vm12 = vmmov %vm14931_vm8 }
 0x58f   : > { %v5287_v16 = vcombine.low %v14853_v24, %v14852_v12  ;;  %v5986_v12 = vshrl.u32 %v13053_v23, 16  ;;  %v4888_v24 = vcombine.high %v4878_v53, %v4886_v19  ;;  %v13143_v23 = vrot.slane %v5295_v3, %v14819_v54 }
 0x590   : > { %v13130_v20 = vpop.permute.xlu1 %6405  ;;  %v13151_v58 = vrot.slane %v5321_v8, %v14819_v54  ;;  %v6021_v53 = vpack.i.b16 %v5976_v36, %v5942_v44  ;;  %v4920_v14 = vrot.slane %v4913_v0, %v14819_v54 }
 0x591   : > { %6055 = vrot.lane.b32.xlu1 %v9063_v45, %s9399_s16  ;;  %v6018_v45 = vpack.i.b16 %v6017_v55, %v6016_v26  ;;  %v13137_v60 = vpop.permute.xlu0 %6973  ;;  %v5988_v38 = vpack.i.b16 %v5987_v41, %v5986_v12  ;;  %v4954_v55 = vrot.slane %v4947_v47, %v14819_v54  ;;  %v14864_v41 = vld [vmem:[#allocation17_spill] sm:$0xff]  ;;  %v6011_v26 = vshrl.u32 %v13079_v50, 16 }
 0x592   : > { %6043 = vrot.lane.b32.xlu0 %v9060_v34, %s9401_s23  ;;  %14862 = vst [vmem:[#allocation60_spill] sm:$0xff] %v13137_v60  ;;  %v13140_v34 = vrot.slane %v5287_v16, %v14819_v54  ;;  %v5397_v16 = vcombine.low %v14864_v41, %v14863_v10  ;;  %v13160_v40 = vrot.slane %v4888_v24, %v14832_v25  ;;  %v14869_v41 = vld [vmem:[#allocation18_spill] sm:$0xff]  ;;  %v6010_v50 = vshrl.u32 %v13092_v35, 16 }
 0x593   : > { %v9067_v19 = vcombine.low %v6018_v45, %v6018_v45  ;;  %v5338_v47 = vcombine.high %v13151_v58, %v13135_v63  ;;  %v9058_v57 = vcombine.low %v5988_v38, %v5988_v38  ;;  %v6000_v12 = vpack.i.b16 %v5999_v39, %v5998_v11  ;;  %v14870_v45 = vld [vmem:[#allocation21_spill] sm:$0xff] }
 0x594   : > { %v13156_v3 = vpop.permute.xlu1 %6967  ;;  %v5389_v60 = vcombine.low %v14870_v45, %v14869_v41  ;;  %v5304_v24 = vcombine.high %v13140_v34, %v13143_v23  ;;  %v13178_v38 = vrot.slane %v4887_v21, %v14832_v25  ;;  %v4956_v0 = vcombine.high %v4946_v59, %v4954_v55 }
 0x595   : > { %6059 = vrot.lane.b32.xlu1 %v9064_v13, %s9396_s13  ;;  %14865 = vst [vmem:[#allocation26_spill] sm:$0xff] %v13156_v3  ;;  %v13164_v8 = vpop.permute.xlu0 %6981  ;;  %v14867_v13 = vld [vmem:[#allocation38_spill] sm:$0xff]  ;;  %v14871_v3 = vld [vmem:[#allocation36_spill] sm:$0xff]  ;;  %v13182_v39 = vrot.slane %v5397_v16, %v14819_v54  ;;  %v6023_v35 = vshrl.u32 %v5976_v36, 16  ;;  %v13187_v41 = vrot.slane %v5338_v47, %v14832_v25  ;;  %v4987_v21 = vpack.i.b16 %v13160_v40, %v13097_v33 }
 0x596   : > { %6047 = vrot.lane.b32.xlu0 %v9061_v1, %s9398_s15  ;;  %14866 = vst [vmem:[#allocation63_spill] sm:$0xff] %v13164_v8  ;;  %v14868_v1 = vld [vmem:[#allocation34_spill] sm:$0xff]  ;;  %v5355_v8 = vcombine.low %v14872_v32, %v14871_v3  ;;  %14873 = vst [vmem:[#allocation42_spill] sm:$0xff] %v13178_v38  ;;  %v9062_v32 = vcombine.low %v6000_v12, %v6000_v12  ;;  %v4922_v3 = vcombine.high %v13085_v62, %v4920_v14 }
 0x597   : > { %v5363_v10 = vcombine.low %v14868_v1, %v14867_v13  ;;  %v6012_v13 = vpack.i.b16 %v6011_v26, %v6010_v50  ;;  %v4955_v1 = vcombine.low %v4946_v59, %v4954_v55  ;;  %v6022_v36 = vshrl.u32 %v5942_v44, 16 }
 0x598   : > { %v13184_v11 = vpop.permute.xlu1 %6975  ;;  %v14876_v59 = vcombine.low %v13059_v18, %v13048_v15  ;;  %v13207_v26 = vrot.slane %v5304_v24, %v14832_v25  ;;  %v5362_v47 = vrot.slane %v5355_v8, %v14819_v54  ;;  %v4977_v50 = vshrl.u32 %v13178_v38, 16 }
 0x599   : > { %6071 = vrot.lane.b32.xlu1 %v9067_v19, %s9401_s23  ;;  %14874 = vst [vmem:[#allocation45_spill] sm:$0xff] %v13184_v11  ;;  %v9068_v19 = vcombine.low %v6021_v53, %v6021_v53  ;;  %v13189_v45 = vpop.permute.xlu0 %6989  ;;  %v13195_v16 = vrot.slane %v5363_v10, %v14819_v54  ;;  %v4921_v53 = vcombine.low %v13085_v62, %v4920_v14  ;;  %v14896_v11 = vld [vmem:[#allocation44_spill] sm:$0xff] }
 0x59a   : > { %6035 = vrot.lane.b32.xlu0 %v9058_v57, %s9400_s17  ;;  %14875 = vst [vmem:[#allocation58_spill] sm:$0xff] %v13189_v45  ;;  %v5396_v57 = vrot.slane %v5389_v60, %v14819_v54  ;;  %v13203_v55 = vrot.slane %v14876_v59, %v14832_v25  ;;  %v13212_v60 = vrot.slane %v4956_v0, %v14832_v25 }
 0x59b   : > { %v9065_v10 = vcombine.low %v6012_v13, %v6012_v13  ;;  %v6024_v15 = vpack.i.b16 %v6023_v35, %v6022_v36  ;;  %v13218_v18 = vrot.slane %v4955_v1, %v14832_v25  ;;  %v9023_v14 = vcombine.low %v4987_v21, %v4987_v21 }
 0x59c   : > { %14877 = vst [vmem:[#allocation11_spill] sm:$0xff] %v13203_v55  ;;  %v5406_v44 = vcombine.high %v5396_v57, %v13182_v39  ;;  %v13215_v12 = vpop.permute.xlu1 %6983  ;;  %v5437_v8 = vpack.i.b16 %v13187_v41, %v13207_v26  ;;  %v13226_v24 = vrot.slane %v4922_v3, %v14832_v25  ;;  %v5372_v0 = vcombine.high %v5362_v47, %v13195_v16 }
 0x59d   : > { %6075 = vrot.lane.b32.xlu1 %v9068_v19, %s9398_s15  ;;  %14878 = vst [vmem:[#allocation14_spill] sm:$0xff] %v13215_v12  ;;  %14879 = vst [vmem:[#allocation27_spill] sm:$0xff] %v13218_v18  ;;  %v13220_v62 = vpop.permute.xlu0 %6383  ;;  %v13231_v19 = vrot.slane %v4921_v53, %v14832_v25  ;;  %v4976_v13 = vshrl.u32 %v13203_v55, 16  ;;  %v5001_v53 = vshrl.u32 %v13218_v18, 16 }
 0x59e   : > { %6051 = vrot.lane.b32.xlu0 %v9062_v32, %s9402_s25  ;;  %14880 = vst [vmem:[#allocation10_spill] sm:$0xff] %v13220_v62  ;;  %v13236_v35 = vrot.slane %v5406_v44, %v14832_v25  ;;  %v9069_v32 = vcombine.low %v6024_v15, %v6024_v15  ;;  %v5011_v21 = vpack.i.b16 %v13212_v60, %v13226_v24 }
 0x59f   : > { %14881 = vst [vmem:[#allocation13_spill] sm:$0xff] %v13231_v19  ;;  %v9042_v36 = vcombine.low %v5437_v8, %v5437_v8  ;;  %v4978_v59 = vpack.i.b16 %v4977_v50, %v4976_v13  ;;  %v5303_v44 = vcombine.low %v13140_v34, %v13143_v23  ;;  %v5337_v15 = vcombine.low %v13151_v58, %v13135_v63 }
 0x5a0   : > { %v13238_v1 = vpop.permute.xlu1 %6991  ;;  %v5405_v8 = vcombine.low %v5396_v57, %v13182_v39  ;;  %v9030_v13 = vcombine.low %v5011_v21, %v5011_v21  ;;  %v4989_v58 = vshrl.u32 %v13160_v40, 16  ;;  %v13270_v39 = vcombine.high %v13203_v55, %v14829_v52 }
 0x5a1   : > { %6063 = vrot.lane.b32.xlu1 %v9065_v10, %s9400_s17  ;;  %14882 = vst [vmem:[#allocation7_spill] sm:$0xff] %v13238_v1  ;;  %v13242_v3 = vpop.permute.xlu0 %6391  ;;  %v13246_v10 = vrot.slane %v5372_v0, %v14832_v25  ;;  %v9020_v23 = vcombine.low %v4978_v59, %v4978_v59  ;;  %v13273_v57 = vrot.slane %v5303_v44, %v14832_v25  ;;  %v4988_v59 = vshrl.u32 %v13097_v33, 16  ;;  %v14897_v1 = vld [vmem:[#allocation54_spill] sm:$0xff] }
 0x5a2   : > { %5035 = vrot.lane.b32.xlu0 %v9023_v14, %s9397_s14  ;;  %14883 = vst [vmem:[#allocation28_spill] sm:$0xff] %v13242_v3  ;;  %v5000_v14 = vshrl.u32 %v13231_v19, 16  ;;  %v5371_v21 = vcombine.low %v5362_v47, %v13195_v16  ;;  %v13290_v44 = vcombine.high %v13218_v18, %v14829_v52  ;;  %v13337_v62 = vcombine.high %v13212_v60, %v14829_v52 }
 0x5a3   : > { %v5461_v0 = vpack.i.b16 %v13236_v35, %v13246_v10  ;;  %14886 = vst [vmem:[#allocation39_spill] sm:$0xff] %v13273_v57  ;;  %v7929_v3 = vcombine.low %v14897_v1, %v14896_v11 }
 0x5a4   : > { %v13256_v50 = vpop.permute.xlu1 %6385  ;;  %v5002_v63 = vpack.i.b16 %v5001_v53, %v5000_v14  ;;  %v13282_v53 = vrot.slane %v5405_v8, %v14832_v25  ;;  %v13306_v55 = vrot.slane %v5371_v21, %v14832_v25  ;;  %v5013_v8 = vshrl.u32 %v13212_v60, 16 }
 0x5a5   : > { %6079 = vrot.lane.b32.xlu1 %v9069_v32, %s9402_s25  ;;  %14884 = vst [vmem:[#allocation8_spill] sm:$0xff] %v13256_v50  ;;  %v13262_v32 = vcombine.high %v13178_v38, %v14829_v52  ;;  %v13264_v34 = vpop.permute.xlu0 %6399  ;;  %v13354_v60 = vcombine.high %v13226_v24, %v14829_v52 }
 0x5a6   : > { %5485 = vrot.lane.b32.xlu0 %v9042_v36, %s9397_s14  ;;  %14885 = vst [vmem:[#allocation47_spill] sm:$0xff] %v13264_v34  ;;  %v13277_v36 = vrot.slane %v5337_v15, %v14832_v25  ;;  %14888 = vst [vmem:[#allocation37_spill] sm:$0xff] %v13282_v53  ;;  %v9027_v47 = vcombine.low %v5002_v63, %v5002_v63  ;;  %v4990_v15 = vpack.i.b16 %v4989_v58, %v4988_v59 }
 0x5a7   : > { %v4981_v38 = vpack.i.b16 %v13262_v32, %v13270_v39  ;;  %14891 = vst [vmem:[#allocation16_spill] sm:$0xff] %v13306_v55  ;;  %v13311_v63 = vcombine.high %v13097_v33, %v14829_v52 }
 0x5a8   : > { %14887 = vst [vmem:[#allocation43_spill] sm:$0xff] %v13277_v36  ;;  %v13284_v14 = vpop.permute.xlu1 %6393  ;;  %v9024_v21 = vcombine.low %v4990_v15, %v4990_v15  ;;  %v5427_v33 = vshrl.u32 %v13277_v36, 16 }
 0x5a9   : > { %5063 = vrot.lane.b32.xlu1 %v9030_v13, %s9397_s14  ;;  %14889 = vst [vmem:[#allocation30_spill] sm:$0xff] %v13284_v14  ;;  %v9049_v13 = vcombine.low %v5461_v0, %v5461_v0  ;;  %v13292_v16 = vpop.permute.xlu0 %6407  ;;  %v13303_v0 = vcombine.high %v13231_v19, %v14829_v52  ;;  %v9021_v59 = vcombine.low %v4981_v38, %v4981_v38  ;;  %v5012_v38 = vshrl.u32 %v13226_v24, 16 }
 0x5aa   : > { %5023 = vrot.lane.b32.xlu0 %v9020_v23, %s9399_s16  ;;  %14890 = vst [vmem:[#allocation15_spill] sm:$0xff] %v13292_v16  ;;  %v13296_v23 = vcombine.high %v13160_v40, %v14829_v52  ;;  %v5426_v40 = vshrl.u32 %v13273_v57, 16  ;;  %v8445_v24 = vcombine.low %v12949_v42, %v12994_v43  ;;  %v5450_v42 = vshrl.u32 %v13306_v55, 16  ;;  %v14903_v43 = vld [vmem:[#allocation69_spill] sm:$0xff] }
 0x5ab   : > { %v5014_v12 = vpack.i.b16 %v5013_v8, %v5012_v38  ;;  %v14900_v8 = vld [vmem:[#allocation75_spill] sm:$0xff] }
 0x5ac   : > { %v13315_v58 = vpop.permute.xlu1 %6401  ;;  %v5428_v34 = vpack.i.b16 %v5427_v33, %v5426_v40  ;;  %v13359_v40 = vcombine.high %v13273_v57, %v14829_v52  ;;  %v14905_v57 = vld [vmem:[#allocation73_spill] sm:$0xff] }
 0x5ad   : > { %5513 = vrot.lane.b32.xlu1 %v9049_v13, %s9397_s14  ;;  %14892 = vst [vmem:[#allocation51_spill] sm:$0xff] %v13315_v58  ;;  %v5005_v13 = vpack.i.b16 %v13290_v44, %v13303_v0  ;;  %v13320_v19 = vpop.permute.xlu0 %6969 }
 0x5ae   : > { %5051 = vrot.lane.b32.xlu0 %v9027_v47, %s9399_s16  ;;  %14893 = vst [vmem:[#allocation33_spill] sm:$0xff] %v13320_v19  ;;  %v4993_v47 = vpack.i.b16 %v13296_v23, %v13311_v63  ;;  %v7971_v19 = vcombine.low %v12835_v29, %v12873_v17  ;;  %v14898_v29 = vld [vmem:[#allocation24_spill] sm:$0xff]  ;;  %v14899_v17 = vld [vmem:[#allocation57_spill] sm:$0xff]  ;;  %v9039_v38 = vcombine.low %v5428_v34, %v5428_v34  ;;  %v14904_v34 = vld [vmem:[#allocation62_spill] sm:$0xff] }
 0x5af   : > { %v9028_v45 = vcombine.low %v5005_v13, %v5005_v13  ;;  %v7937_v16 = vcombine.low %v14899_v17, %v14898_v29  ;;  %v7963_v13 = vcombine.low %v14900_v8, %v12849_v27  ;;  %v5017_v27 = vpack.i.b16 %v13337_v62, %v13354_v60 }
 0x5b0   : > { %v13333_v15 = vpop.permute.xlu1 %6409  ;;  %v13362_v11 = vrot.slane %v7971_v19, %v14819_v54  ;;  %v5439_v19 = vshrl.u32 %v13187_v41, 16  ;;  %v13377_v29 = vrot.slane %v7929_v3, %v14819_v54  ;;  %v8403_v8 = vcombine.low %v14904_v34, %v14903_v43 }
 0x5b1   : > { %5027 = vrot.lane.b32.xlu1 %v9021_v59, %s9396_s13  ;;  %14894 = vst [vmem:[#allocation29_spill] sm:$0xff] %v13333_v15  ;;  %v13339_v18 = vpop.permute.xlu0 %6977  ;;  %v9025_v59 = vcombine.low %v4993_v47, %v4993_v47  ;;  %v9031_v47 = vcombine.low %v5014_v12, %v5014_v12  ;;  %v13380_v12 = vrot.slane %v7937_v16, %v14819_v54  ;;  %v5438_v16 = vshrl.u32 %v13207_v26, 16 }
 0x5b2   : > { %5039 = vrot.lane.b32.xlu0 %v9024_v21, %s9401_s23  ;;  %14895 = vst [vmem:[#allocation35_spill] sm:$0xff] %v13339_v18  ;;  %v13343_v21 = vcombine.high %v13277_v36, %v14829_v52  ;;  %v13383_v17 = vrot.slane %v7963_v13, %v14819_v54  ;;  %v14906_v36 = vld [vmem:[#allocation66_spill] sm:$0xff]  ;;  %v8437_v3 = vcombine.low %v12907_v7, %v12978_v30 }
 0x5b3   : > { %v13401_v43 = vcombine.high %v13282_v53, %v14829_v52  ;;  %v5440_v30 = vpack.i.b16 %v5439_v19, %v5438_v16  ;;  %v7946_v34 = vcombine.high %v13377_v29, %v13380_v12  ;;  %v13433_v19 = vrot.slane %v8403_v8, %v14819_v54 }
 0x5b4   : > { %v13364_v1 = vpop.permute.xlu1 %6971  ;;  %v7980_v13 = vcombine.high %v13383_v17, %v13362_v11 }
 0x5b5   : > { %5055 = vrot.lane.b32.xlu1 %v9028_v45, %s9396_s13  ;;  %14901 = vst [vmem:[#allocation31_spill] sm:$0xff] %v13364_v1  ;;  %v5451_v45 = vshrl.u32 %v13282_v53, 16  ;;  %v13371_v33 = vpop.permute.xlu0 %6985 }
 0x5b6   : > { %5043 = vrot.lane.b32.xlu0 %v9025_v59, %s9398_s15  ;;  %14902 = vst [vmem:[#allocation48_spill] sm:$0xff] %v13371_v33  ;;  %v5431_v59 = vpack.i.b16 %v13343_v21, %v13359_v40  ;;  %v8411_v33 = vcombine.low %v14906_v36, %v14905_v57  ;;  %v13404_v57 = vrot.slane %v8445_v24, %v14819_v54  ;;  %v14910_v24 = vld [vmem:[#allocation20_spill] sm:$0xff] }
 0x5b7   : > { %v5452_v1 = vpack.i.b16 %v5451_v45, %v5450_v42  ;;  %v14909_v45 = vld [vmem:[#allocation65_spill] sm:$0xff] }
 0x5b8   : > { %v13397_v18 = vpop.permute.xlu1 %6979  ;;  %v9040_v7 = vcombine.low %v5431_v59, %v5431_v59  ;;  %v8005_v42 = vcombine.low %v14910_v24, %v14909_v45  ;;  %v13422_v53 = vrot.slane %v8411_v33, %v14819_v54  ;;  %v13425_v59 = vrot.slane %v8437_v3, %v14819_v54 }
 0x5b9   : > { %5067 = vrot.lane.b32.xlu1 %v9031_v47, %s9401_s23  ;;  %14907 = vst [vmem:[#allocation41_spill] sm:$0xff] %v13397_v18  ;;  %v9032_v47 = vcombine.low %v5017_v27, %v5017_v27  ;;  %v13406_v36 = vpop.permute.xlu0 %6993  ;;  %v13417_v27 = vcombine.high %v13306_v55, %v14829_v52  ;;  %v5463_v33 = vshrl.u32 %v13236_v35, 16  ;;  %v13441_v3 = vrot.slane %v7980_v13, %v14832_v25 }
 0x5ba   : > { %5473 = vrot.lane.b32.xlu0 %v9039_v38, %s9399_s16  ;;  %14908 = vst [vmem:[#allocation50_spill] sm:$0xff] %v13406_v36  ;;  %v13410_v38 = vcombine.high %v13187_v41, %v14829_v52  ;;  %v13430_v41 = vcombine.high %v13207_v26, %v14829_v52  ;;  %v9043_v26 = vcombine.low %v5440_v30, %v5440_v30  ;;  %v14912_v36 = vld [vmem:[#allocation59_spill] sm:$0xff] }
 0x5bb   : > { %v5455_v45 = vpack.i.b16 %v13401_v43, %v13417_v27  ;;  %v13452_v55 = vrot.slane %v7946_v34, %v14832_v25  ;;  %v8420_v18 = vcombine.high %v13433_v19, %v13422_v53  ;;  %v8012_v14 = vrot.slane %v8005_v42, %v14819_v54 }
 0x5bc   : > { %v13435_v16 = vpop.permute.xlu1 %6987  ;;  %v5443_v8 = vpack.i.b16 %v13410_v38, %v13430_v41 }
 0x5bd   : > { %5071 = vrot.lane.b32.xlu1 %v9032_v47, %s9398_s15  ;;  %14911 = vst [vmem:[#allocation46_spill] sm:$0xff] %v13435_v16  ;;  %v9046_v47 = vcombine.low %v5452_v1, %v5452_v1  ;;  %v13445_v24 = vpop.permute.xlu0 %4728  ;;  %v5462_v1 = vshrl.u32 %v13246_v10, 16  ;;  %v14913_v16 = vld [vmem:[#allocation40_spill] sm:$0xff]  ;;  %v9047_v30 = vcombine.low %v5455_v45, %v5455_v45  ;;  %v13476_v45 = vcombine.high %v13246_v10, %v14829_v52 }
 0x5be   : > { %5477 = vrot.lane.b32.xlu0 %v9040_v7, %s9396_s13  ;;  %v8454_v7 = vcombine.high %v13425_v59, %v13404_v57  ;;  %v7997_v13 = vcombine.low %v14913_v16, %v14912_v36  ;;  %v9044_v36 = vcombine.low %v5443_v8, %v5443_v8  ;;  %v8079_v16 = vpack.i.b16 %v13441_v3, %v13452_v55 }
 0x5bf   : > { %v5464_v58 = vpack.i.b16 %v5463_v33, %v5462_v1  ;;  %v13482_v33 = vrot.slane %v8420_v18, %v14832_v25  ;;  %v5007_v1 = vshrl.u32 %v13290_v44, 16  ;;  %v4983_v18 = vshrl.u32 %v13262_v32, 16 }
 0x5c0   : > { %v13459_v50 = vpop.permute.xlu1 %6995  ;;  %v13467_v34 = vrot.slane %v8454_v7, %v14832_v25  ;;  %v8004_v42 = vrot.slane %v7997_v13, %v14819_v54 }
 0x5c1   : > { %5501 = vrot.lane.b32.xlu1 %v9046_v47, %s9399_s16  ;;  %14914 = vst [vmem:[#allocation52_spill] sm:$0xff] %v13459_v50  ;;  %v13463_v47 = vcombine.high %v13236_v35, %v14829_v52  ;;  %v13469_v15 = vpop.permute.xlu0 %4688  ;;  %v7945_v35 = vcombine.low %v13377_v29, %v13380_v12  ;;  %14916 = vst [vmem:[#allocation56_spill] sm:$0xff] %v13482_v33  ;;  %v9143_v50 = vcombine.low %v8079_v16, %v8079_v16 }
 0x5c2   : > { %5489 = vrot.lane.b32.xlu0 %v9043_v26, %s9401_s23  ;;  %14915 = vst [vmem:[#allocation49_spill] sm:$0xff] %v13467_v34  ;;  %v9050_v26 = vcombine.low %v5464_v58, %v5464_v58  ;;  %v8013_v10 = vcombine.low %v8004_v42, %v8012_v14  ;;  %v8553_v29 = vpack.i.b16 %v13467_v34, %v13482_v33  ;;  %v5006_v58 = vshrl.u32 %v13303_v0, 16 }
 0x5c3   : > { %v5467_v8 = vpack.i.b16 %v13463_v47, %v13476_v45  ;;  %v8039_v12 = vcombine.low %v12869_v61, %v12938_v56  ;;  %v13500_v13 = vrot.slane %v7945_v35, %v14832_v25  ;;  %v8014_v44 = vcombine.high %v8004_v42, %v8012_v14  ;;  %v14917_v42 = vld [vmem:[#allocation74_spill] sm:$0xff] }
 0x5c4   : > { %v13485_v7 = vpop.permute.xlu1 %4700  ;;  %v8031_v16 = vcombine.low %v12847_v22, %v12896_v4  ;;  %v5008_v34 = vpack.i.b16 %v5007_v1, %v5006_v58  ;;  %v5019_v61 = vshrl.u32 %v13337_v62, 16  ;;  %v13510_v56 = vrot.slane %v8013_v10, %v14832_v25  ;;  %v14918_v22 = vld [vmem:[#allocation68_spill] sm:$0xff] }
 0x5c5   : > { %5505 = vrot.lane.b32.xlu1 %v9047_v30, %s9396_s13  ;;  %v13490_v30 = vpop.permute.xlu0 %4704  ;;  %v9051_v32 = vcombine.low %v5467_v8, %v5467_v8  ;;  %v9168_v35 = vcombine.low %v8553_v29, %v8553_v29  ;;  %v8471_v4 = vcombine.low %v14918_v22, %v14917_v42  ;;  %v5018_v62 = vshrl.u32 %v13354_v60, 16  ;;  %v14919_v8 = vld [vmem:[#allocation76_spill] sm:$0xff] }
 0x5c6   : > { %5493 = vrot.lane.b32.xlu0 %v9044_v36, %s9398_s15  ;;  %v4982_v36 = vshrl.u32 %v13270_v39, 16  ;;  %v8419_v39 = vcombine.low %v13433_v19, %v13422_v53  ;;  %v14920_v1 = vld [vmem:[#allocation72_spill] sm:$0xff]  ;;  %v7979_v29 = vcombine.low %v13383_v17, %v13362_v11  ;;  %v4994_v53 = vshrl.u32 %v13311_v63, 16 }
 0x5c7   : > { %v8479_v10 = vcombine.low %v14920_v1, %v14919_v8  ;;  %v8038_v19 = vrot.slane %v8031_v16, %v14819_v54  ;;  %v5020_v58 = vpack.i.b16 %v5019_v61, %v5018_v62  ;;  %v5457_v60 = vshrl.u32 %v13401_v43, 16  ;;  %v14922_v8 = vld [vmem:[#allocation23_spill] sm:$0xff] }
 0x5c8   : > { %v13506_v33 = vpop.permute.xlu1 %4692  ;;  %v4984_v14 = vpack.i.b16 %v4983_v18, %v4982_v36  ;;  %v8505_v36 = vcombine.low %v12969_v37, %v13011_v9  ;;  %v13543_v63 = vrot.slane %v8471_v4, %v14819_v54  ;;  %v5456_v43 = vshrl.u32 %v13417_v27, 16  ;;  %v14923_v1 = vld [vmem:[#allocation19_spill] sm:$0xff] }
 0x5c9   : > { %5517 = vrot.lane.b32.xlu1 %v9050_v26, %s9401_s23  ;;  %v13512_v0 = vpop.permute.xlu0 %4720  ;;  %v8046_v26 = vrot.slane %v8039_v12, %v14819_v54  ;;  %v9029_v12 = vcombine.low %v5008_v34, %v5008_v34  ;;  %v13548_v34 = vrot.slane %v8419_v39, %v14832_v25  ;;  %v13551_v37 = vrot.slane %v8479_v10, %v14819_v54 }
 0x5ca   : > { %8127 = vrot.lane.b32.xlu0 %v9143_v50, %s9397_s14  ;;  %v4995_v50 = vshrl.u32 %v13296_v23, 16  ;;  %v8513_v23 = vcombine.low %v12988_v46, %v13029_v2  ;;  %v9022_v11 = vcombine.low %v4984_v14, %v4984_v14  ;;  %v5433_v46 = vshrl.u32 %v13343_v21, 16 }
 0x5cb   : > { %v13540_v2 = vrot.slane %v8014_v44, %v14832_v25  ;;  %v8048_v16 = vcombine.high %v8038_v19, %v8046_v26  ;;  %v5432_v21 = vshrl.u32 %v13359_v40, 16  ;;  %v13559_v44 = vrot.slane %v7979_v29, %v14832_v25 }
 0x5cc   : > { %v13531_v18 = vpop.permute.xlu1 %4708  ;;  %v4996_v17 = vpack.i.b16 %v4995_v50, %v4994_v53  ;;  %v13554_v9 = vrot.slane %v8513_v23, %v14819_v54  ;;  %v5458_v14 = vpack.i.b16 %v5457_v60, %v5456_v43  ;;  %v5469_v27 = vshrl.u32 %v13463_v47, 16  ;;  %v14924_v53 = vld [vmem:[#allocation22_spill] sm:$0xff] }
 0x5cd   : > { %5521 = vrot.lane.b32.xlu1 %v9051_v32, %s9398_s15  ;;  %v13536_v32 = vpop.permute.xlu0 %4736  ;;  %v13563_v50 = vrot.slane %v8505_v36, %v14819_v54  ;;  %v5434_v22 = vpack.i.b16 %v5433_v46, %v5432_v21  ;;  %v5445_v4 = vshrl.u32 %v13410_v38, 16  ;;  %v8047_v62 = vcombine.low %v8038_v19, %v8046_v26 }
 0x5ce   : > { %8601 = vrot.lane.b32.xlu0 %v9168_v35, %s9397_s14  ;;  %v9033_v35 = vcombine.low %v5020_v58, %v5020_v58  ;;  %v9026_v42 = vcombine.low %v4996_v17, %v4996_v17  ;;  %v13569_v40 = vrot.slane %v8048_v16, %v14832_v25  ;;  %v4640_v10 = vpack.i.b16 %v14923_v1, %v14922_v8 }
 0x5cf   : > { %v5468_v47 = vshrl.u32 %v13476_v45, 16  ;;  %v8453_v29 = vcombine.low %v13425_v59, %v13404_v57  ;;  %v8522_v23 = vcombine.high %v13563_v50, %v13554_v9  ;;  %v5444_v26 = vshrl.u32 %v13430_v41, 16 }
 0x5d0   : > { %v4717_v61 = vpop.permute.xlu1 %4716  ;;  %v4744_v19 = vsel %vm786_vm15, %v4640_v10, %v13469_v15  ;;  %v9048_v60 = vcombine.low %v5458_v14, %v5458_v14  ;;  %v8069_v45 = vshrl.u32 %v13559_v44, 16  ;;  %v9041_v17 = vcombine.low %v5434_v22, %v5434_v22 }
 0x5d1   : > { %5059 = vrot.lane.b32.xlu1 %v9029_v12, %s9400_s17  ;;  %v14925_v12 = vld [vmem:[#allocation25_spill] sm:$0xff]  ;;  %v5470_v36 = vpack.i.b16 %v5469_v27, %v5468_v47  ;;  %v4746_v57 = vsel %vm790_vm0, %v4744_v19, %v13506_v33  ;;  %v5446_v46 = vpack.i.b16 %v5445_v4, %v5444_v26  ;;  %v8488_v16 = vcombine.high %v13543_v63, %v13551_v37 }
 0x5d2   : > { %5031 = vrot.lane.b32.xlu0 %v9022_v11, %s9400_s17  ;;  %v13565_v39 = vpop.permute.xlu0 %7653  ;;  %v4664_v38 = vpack.i.b16 %v14925_v12, %v14924_v53  ;;  %v13592_v41 = vrot.slane %v8047_v62, %v14832_v25  ;;  %v8068_v43 = vshrl.u32 %v13500_v13, 16  ;;  %v13598_v21 = vrot.slane %v8453_v29, %v14832_v25 }
 0x5d3   : > { %14921 = vst [vmem:[#allocation17_spill] sm:$0xff] %v13565_v39  ;;  %v13601_v33 = vrot.slane %v8522_v23, %v14832_v25  ;;  %v9052_v22 = vcombine.low %v5470_v36, %v5470_v36  ;;  %v9045_v1 = vcombine.low %v5446_v46, %v5446_v46  ;;  %v13617_v10 = vcombine.high %v13559_v44, %v14829_v52 }
 0x5d4   : > { %v4759_v59 = vsel %vm786_vm15, %v4664_v38, %v4717_v61  ;;  %v8070_v4 = vpack.i.b16 %v8069_v45, %v8068_v43  ;;  %v8487_v47 = vcombine.low %v13543_v63, %v13551_v37  ;;  %v13634_v63 = vcombine.high %v13500_v13, %v14829_v52 }
 0x5d5   : > { %5075 = vrot.lane.b32.xlu1 %v9033_v35, %s9402_s25  ;;  %v4733_v58 = vpop.permute.xlu1 %4732  ;;  %v8103_v35 = vpack.i.b16 %v13569_v40, %v13540_v2  ;;  %v4761_v27 = vsel %vm790_vm0, %v4759_v59, %v13512_v0  ;;  %v13622_v0 = vrot.slane %v8488_v16, %v14832_v25  ;;  %v8093_v53 = vshrl.u32 %v13592_v41, 16 }
 0x5d6   : > { %5047 = vrot.lane.b32.xlu0 %v9026_v42, %s9402_s25  ;;  %v4697_v11 = vpop.permute.xlu0 %4696  ;;  %v9140_v26 = vcombine.low %v8070_v4, %v8070_v4  ;;  %v8073_v19 = vpack.i.b16 %v13617_v10, %v13634_v63  ;;  %v8542_v45 = vshrl.u32 %v13548_v34, 16  ;;  %v13663_v46 = vcombine.high %v13592_v41, %v14829_v52 }
 0x5d7   : > { %v4748_v15 = vsel %vm793_vm3, %v4746_v57, %v4697_v11  ;;  %v4772_v57 = vld [vmem:[%s14442_s3] sm:$0xf]  ;;  %v13666_v16 = vrot.slane %v8487_v47, %v14832_v25 }
 0x5d8   : > { %v4750_v61 = vsel %vm14926_vm1, %v4748_v15, %v13485_v7  ;;  %v9141_v43 = vcombine.low %v8073_v19, %v8073_v19 }
 0x5d9   : > { %5509 = vrot.lane.b32.xlu1 %v9048_v60, %s9400_s17  ;;  %v4752_v42 = vsel %vm14927_vm13, %v4750_v61, %v13490_v30  ;;  %v8521_v30 = vcombine.low %v13563_v50, %v13554_v9  ;;  %v9150_v50 = vcombine.low %v8103_v35, %v8103_v35  ;;  %v13672_v35 = vcombine.high %v13598_v21, %v14829_v52  ;;  %vm14973_vm13 = vmmov %vm14930_vm6 }
 0x5da   : > { %5481 = vrot.lane.b32.xlu0 %v9041_v17, %s9400_s17  ;;  %v4725_v14 = vpop.permute.xlu1 %4724  ;;  %v4754_v8 = vsel %vm14928_vm2, %v4752_v42, %v13531_v18  ;;  %v6495_v42 = vcombine.low %v13055_v31, %v13105_v28  ;;  %v6427_v31 = vcombine.low %v13018_v48, %v13061_v51  ;;  %v8566_v47 = vshrl.u32 %v13666_v16, 16  ;;  %vm14974_vm2 = vmmov %vm14931_vm8 }
 0x5db   : > { %v4763_v62 = vsel %vm793_vm3, %v4761_v27, %v4725_v14  ;;  %v4713_v7 = vpop.permute.xlu0 %4712  ;;  %v13652_v36 = vrot.slane %v8521_v30, %v14832_v25  ;;  %v6503_v14 = vcombine.low %v13075_v49, %v13130_v20  ;;  %v13679_v27 = vcombine.high %v13510_v56, %v14829_v52 }
 0x5dc   : > { %v4765_v29 = vsel %vm14929_vm4, %v4763_v62, %v13445_v24  ;;  %v4756_v18 = vsel %vm14930_vm6, %v4754_v8, %v4713_v7  ;;  %v8577_v24 = vpack.i.b16 %v13601_v33, %v13622_v0  ;;  %v8081_v8 = vshrl.u32 %v13441_v3, 16  ;;  %vm14975_vm4 = vmmov %vm14932_vm10 }
 0x5dd   : > { %5525 = vrot.lane.b32.xlu1 %v9052_v22, %s9402_s25  ;;  %v4767_v23 = vsel %vm14931_vm8, %v4765_v29, %v4733_v58  ;;  %v8543_v58 = vshrl.u32 %v13598_v21, 16  ;;  %v5162_v60 = vsel %vm5113_vm5, %v4756_v18, 0  ;;  %v13687_v22 = vcombine.high %v13548_v34, %v14829_v52  ;;  %vm14983_vm8 = vmmov %vm14926_vm1 }
 0x5de   : > { %5497 = vrot.lane.b32.xlu0 %v9045_v1, %s9402_s25  ;;  %v4741_v37 = vpop.permute.xlu1 %4740  ;;  %v4769_v9 = vsel %vm14932_vm10, %v4767_v23, %v13536_v32  ;;  %v8092_v32 = vshrl.u32 %v13510_v56, 16  ;;  %v9175_v11 = vcombine.low %v8577_v24, %v8577_v24  ;;  %v8567_v4 = vshrl.u32 %v13652_v36, 16  ;;  %vm14984_vm10 = vmmov %vm14926_vm1 }
 0x5df   : > { %v4771_v12 = vsel %vm14933_vm11, %v4769_v9, %v4741_v37  ;;  %v8544_v61 = vpack.i.b16 %v8543_v58, %v8542_v45  ;;  %v8097_v62 = vpack.i.b16 %v13663_v46, %v13679_v27  ;;  %v8547_v1 = vpack.i.b16 %v13672_v35, %v13687_v22  ;;  %v14936_v37 = vld [vmem:[#allocation29_spill] sm:$0xff]  ;;  %v14937_v9 = vld [vmem:[#allocation30_spill] sm:$0xff]  ;;  %v14939_v45 = vld [vmem:[#allocation51_spill] sm:$0xff] }
 0x5e0   : > { %v13642_v38 = vpop.permute.xlu0 %7641  ;;  %9037 = vmatprep.subr.msk.bf16.mxu0 %vm5113_vm5, %v4771_v12  ;;  %v8094_v17 = vpack.i.b16 %v8093_v53, %v8092_v32  ;;  %v6435_v30 = vcombine.low %v13037_v5, %v13081_v6  ;;  %v13706_v29 = vrot.slane %v6503_v14, %v14819_v54  ;;  %v8080_v18 = vshrl.u32 %v13452_v55, 16  ;;  %vm14985_vm11 = vmmov %vm14974_vm2 }
 0x5e1   : > { %8155 = vrot.lane.b32.xlu1 %v9150_v50, %s9397_s14  ;;  %5167 = vmatpush1.bf16.msra.mxu0 %v5162_v60  ;;  %v9165_v7 = vcombine.low %v8544_v61, %v8544_v61  ;;  %v13712_v48 = vcombine.high %v13652_v36, %v14829_v52  ;;  %v13715_v51 = vrot.slane %v6495_v42, %v14819_v54  ;;  %v14942_v61 = vld [vmem:[#allocation64_spill] sm:$0xff] }
 0x5e2   : > { %8115 = vrot.lane.b32.xlu0 %v9140_v26, %s9399_s16  ;;  %v9147_v20 = vcombine.low %v8094_v17, %v8094_v17  ;;  %v8568_v23 = vpack.i.b16 %v8567_v4, %v8566_v47  ;;  %v6537_v5 = vcombine.low %v14937_v9, %v14936_v37  ;;  %v9148_v50 = vcombine.low %v8097_v62, %v8097_v62  ;;  %v14943_v62 = vld [vmem:[#allocation52_spill] sm:$0xff] }
 0x5e3   : > { %v13659_v59 = vpop.permute.xlu1 %7681  ;;  %v8082_v24 = vpack.i.b16 %v8081_v8, %v8080_v18  ;;  %v13724_v53 = vcombine.high %v13666_v16, %v14829_v52  ;;  %v13727_v12 = vrot.slane %v6427_v31, %v14819_v54  ;;  %v9166_v19 = vcombine.low %v8547_v1, %v8547_v1  ;;  %v14944_v8 = vld [vmem:[#allocation41_spill] sm:$0xff]  ;;  %v14947_v18 = vld [vmem:[#allocation28_spill] sm:$0xff] }
 0x5e4   : > { %14934 = vst [vmem:[#allocation38_spill] sm:$0xff] %v13659_v59  ;;  %v13668_v15 = vpop.permute.xlu0 %7645  ;;  %9038 = vmatmul.mubr.msk.bf16.vlgmr.msra.gmra.mrb[20].mxu0 %vm5109_vm7, %v4772_v57  ;;  %v13733_v58 = vcombine.high %v13441_v3, %v14829_v52  ;;  %v13736_v60 = vrot.slane %v6435_v30, %v14819_v54  ;;  %v6512_v32 = vcombine.high %v13715_v51, %v13706_v29  ;;  %v14940_v57 = vld [vmem:[#allocation8_spill] sm:$0xff]  ;;  %v8105_v4 = vshrl.u32 %v13569_v40, 16  ;;  %v14946_v30 = vld [vmem:[#allocation15_spill] sm:$0xff] }
 0x5e5   : > { %8629 = vrot.lane.b32.xlu1 %v9175_v11, %s9397_s14  ;;  %6152 = vmatprep.mubr.bf16.mxu0 %v14829_v52  ;;  %v6529_v11 = vcombine.low %v14940_v57, %v14939_v45  ;;  %v8571_v17 = vpack.i.b16 %v13712_v48, %v13724_v53  ;;  %v9172_v3 = vcombine.low %v8568_v23, %v8568_v23  ;;  %v8104_v47 = vshrl.u32 %v13540_v2, 16 }
 0x5e6   : > { %8119 = vrot.lane.b32.xlu0 %v9141_v43, %s9396_s13  ;;  %v14941_v43 = vld [vmem:[#allocation63_spill] sm:$0xff]  ;;  %v13750_v42 = vcombine.high %v13452_v55, %v14829_v52  ;;  %v7123_v31 = vcombine.low %v14944_v8, %v14943_v62  ;;  %v9144_v1 = vcombine.low %v8082_v24, %v8082_v24  ;;  %v6469_v23 = vcombine.low %v14947_v18, %v14946_v30  ;;  %v14950_v24 = vld [vmem:[#allocation46_spill] sm:$0xff] }
 0x5e7   : > { %v13691_v49 = vpop.permute.xlu1 %7669  ;;  %v7013_v14 = vcombine.low %v14942_v61, %v14941_v43  ;;  %v8074_v9 = vshrl.u32 %v13634_v63, 16  ;;  %v13772_v57 = vrot.slane %v6529_v11, %v14819_v54  ;;  %v14951_v43 = vld [vmem:[#allocation31_spill] sm:$0xff]  ;;  %v9173_v62 = vcombine.low %v8571_v17, %v8571_v17  ;;  %v14953_v30 = vld [vmem:[#allocation10_spill] sm:$0xff] }
 0x5e8   : > { %v13698_v28 = vpop.permute.xlu0 %7657  ;;  %v8085_v55 = vpack.i.b16 %v13733_v58, %v13750_v42  ;;  %v7115_v61 = vcombine.low %v14951_v43, %v14950_v24  ;;  %v14952_v8 = vld [vmem:[#allocation47_spill] sm:$0xff]  ;;  %v8106_v63 = vpack.i.b16 %v8105_v4, %v8104_v47  ;;  %v13786_v11 = vcombine.high %v13569_v40, %v14829_v52 }
 0x5e9   : > { %14935 = vst [vmem:[#allocation34_spill] sm:$0xff] %v13698_v28  ;;  %8143 = vrot.lane.b32.xlu1 %v9147_v20, %s9399_s16  ;;  %v13754_v20 = vrot.slane %v6537_v5, %v14819_v54  ;;  %v8075_v5 = vshrl.u32 %v13617_v10, 16  ;;  %v6461_v18 = vcombine.low %v14953_v30, %v14952_v8  ;;  %v13782_v10 = vcombine.high %v13540_v2, %v14829_v52  ;;  %v14958_v47 = vld [vmem:[#allocation35_spill] sm:$0xff] }
 0x5ea   : > { %8589 = vrot.lane.b32.xlu0 %v9165_v7, %s9399_s16  ;;  %v8549_v4 = vshrl.u32 %v13672_v35, 16  ;;  %v6476_v2 = vrot.slane %v6469_v23, %v14819_v54  ;;  %v9145_v30 = vcombine.low %v8085_v55, %v8085_v55  ;;  %v8548_v35 = vshrl.u32 %v13687_v22, 16 }
 0x5eb   : > { %v13720_v6 = vpop.permute.xlu1 %7673  ;;  %v6546_v17 = vcombine.high %v13772_v57, %v13754_v20  ;;  %v6468_v23 = vrot.slane %v6461_v18, %v14819_v54  ;;  %v9151_v55 = vcombine.low %v8106_v63, %v8106_v63 }
 0x5ec   : > { %v13729_v26 = vpop.permute.xlu0 %7661 }
 0x5ed   : > { %14938 = vst [vmem:[#allocation18_spill] sm:$0xff] %v13729_v26  ;;  %8147 = vrot.lane.b32.xlu1 %v9148_v50, %s9396_s13  ;;  %v14948_v50 = vld [vmem:[#allocation7_spill] sm:$0xff]  ;;  %v8076_v26 = vpack.i.b16 %v8075_v5, %v8074_v9  ;;  %v8109_v9 = vpack.i.b16 %v13786_v11, %v13782_v10  ;;  %v6478_v18 = vcombine.high %v6468_v23, %v6476_v2 }
 0x5ee   : > { %8593 = vrot.lane.b32.xlu0 %v9166_v19, %s9396_s13  ;;  %v14949_v19 = vld [vmem:[#allocation45_spill] sm:$0xff] }
 0x5ef   : > { %v13758_v7 = vpop.permute.xlu1 %7685  ;;  %v7089_v45 = vcombine.low %v14949_v19, %v14948_v50  ;;  %v14954_v50 = vld [vmem:[#allocation14_spill] sm:$0xff] }
 0x5f0   : > { %14945 = vst [vmem:[#allocation21_spill] sm:$0xff] %v13758_v7  ;;  %v13763_v37 = vpop.permute.xlu0 %7649  ;;  %v14955_v19 = vld [vmem:[#allocation26_spill] sm:$0xff] }
 0x5f1   : > { %8617 = vrot.lane.b32.xlu1 %v9172_v3, %s9399_s16  ;;  %v7081_v24 = vcombine.low %v14955_v19, %v14954_v50  ;;  %v13793_v3 = vrot.slane %v7123_v31, %v14819_v54  ;;  %v14960_v50 = vld [vmem:[#allocation58_spill] sm:$0xff]  ;;  %v14961_v19 = vld [vmem:[#allocation60_spill] sm:$0xff]  ;;  %v13806_v28 = vrot.slane %v7089_v45, %v14819_v54  ;;  %v13809_v31 = vrot.slane %v7115_v61, %v14819_v54 }
 0x5f2   : > { %8131 = vrot.lane.b32.xlu0 %v9144_v1, %s9401_s23  ;;  %v14957_v1 = vld [vmem:[#allocation50_spill] sm:$0xff]  ;;  %v7021_v7 = vcombine.low %v14961_v19, %v14960_v50  ;;  %v13823_v45 = vrot.slane %v6546_v17, %v14832_v25  ;;  %v8087_v19 = vshrl.u32 %v13733_v58, 16  ;;  %v13838_v17 = vrot.slane %v6512_v32, %v14832_v25 }
 0x5f3   : > { %v13795_v43 = vpop.permute.xlu1 %7689  ;;  %v7055_v8 = vcombine.low %v14958_v47, %v14957_v1  ;;  %v14962_v1 = vld [vmem:[#allocation48_spill] sm:$0xff]  ;;  %v14963_v47 = vld [vmem:[#allocation33_spill] sm:$0xff]  ;;  %v13820_v5 = vrot.slane %v7081_v24, %v14819_v54  ;;  %v7132_v22 = vcombine.high %v13809_v31, %v13793_v3  ;;  %v6444_v24 = vcombine.high %v13727_v12, %v13736_v60 }
 0x5f4   : > { %14956 = vst [vmem:[#allocation36_spill] sm:$0xff] %v13795_v43  ;;  %v13801_v40 = vpop.permute.xlu0 %7665  ;;  %v8086_v58 = vshrl.u32 %v13750_v42, 16  ;;  %v6477_v43 = vcombine.low %v6468_v23, %v6476_v2 }
 0x5f5   : > { %14959 = vst [vmem:[#allocation32_spill] sm:$0xff] %v13801_v40  ;;  %8621 = vrot.lane.b32.xlu1 %v9173_v62, %s9396_s13  ;;  %v7047_v40 = vcombine.low %v14963_v47, %v14962_v1  ;;  %v8550_v62 = vpack.i.b16 %v8549_v4, %v8548_v35  ;;  %v13830_v50 = vrot.slane %v7055_v8, %v14819_v54 }
 0x5f6   : > { %8135 = vrot.lane.b32.xlu0 %v9145_v30, %s9398_s15  ;;  %v9142_v30 = vcombine.low %v8076_v26, %v8076_v26  ;;  %v7098_v1 = vcombine.high %v13820_v5, %v13806_v28  ;;  %v13844_v4 = vrot.slane %v7013_v14, %v14819_v54  ;;  %v13847_v8 = vrot.slane %v7021_v7, %v14819_v54 }
 0x5f7   : > { %v13827_v61 = vpop.permute.xlu1 %6067  ;;  %v13850_v26 = vrot.slane %v7047_v40, %v14819_v54  ;;  %v13855_v32 = vrot.slane %v7132_v22, %v14832_v25  ;;  %v9152_v47 = vcombine.low %v8109_v9, %v8109_v9  ;;  %v6601_v14 = vpack.i.b16 %v13823_v45, %v13838_v17 }
 0x5f8   : > { %v13832_v63 = vpop.permute.xlu0 %6039  ;;  %v13862_v7 = vrot.slane %v6478_v18, %v14832_v25  ;;  %v13867_v42 = vrot.slane %v7098_v1, %v14832_v25  ;;  %v6443_v9 = vcombine.low %v13727_v12, %v13736_v60  ;;  %v13873_v22 = vrot.slane %v6444_v24, %v14832_v25 }
 0x5f9   : > { %8159 = vrot.lane.b32.xlu1 %v9151_v55, %s9401_s23  ;;  %v9167_v55 = vcombine.low %v8550_v62, %v8550_v62  ;;  %v7064_v54 = vcombine.high %v13850_v26, %v13830_v50  ;;  %v7030_v2 = vcombine.high %v13844_v4, %v13847_v8  ;;  %v9083_v62 = vcombine.low %v6601_v14, %v6601_v14 }
 0x5fa   : > { %8123 = vrot.lane.b32.xlu0 %v9142_v30, %s9400_s17  ;;  %v8088_v30 = vpack.i.b16 %v8087_v19, %v8086_v58  ;;  %v7187_v18 = vpack.i.b16 %v13855_v32, %v13867_v42  ;;  %v8099_v19 = vshrl.u32 %v13663_v46, 16  ;;  %v13884_v1 = vrot.slane %v6477_v43, %v14832_v25 }
 0x5fb   : > { %v13857_v35 = vpop.permute.xlu1 %7677  ;;  %v13887_v12 = vrot.slane %v7064_v54, %v14832_v25  ;;  %v6577_v58 = vpack.i.b16 %v13862_v7, %v13873_v22  ;;  %v13897_v46 = vrot.slane %v7030_v2, %v14832_v25  ;;  %v6545_v43 = vcombine.low %v13772_v57, %v13754_v20 }
 0x5fc   : > { %14964 = vst [vmem:[#allocation44_spill] sm:$0xff] %v13857_v35  ;;  %v6028_v40 = vpop.permute.xlu0 %6027  ;;  %v9146_v24 = vcombine.low %v8088_v30, %v8088_v30  ;;  %v9100_v54 = vcombine.low %v7187_v18, %v7187_v18  ;;  %v6511_v2 = vcombine.low %v13715_v51, %v13706_v29  ;;  %v8110_v29 = vshrl.u32 %v13782_v10, 16 }
 0x5fd   : > { %8163 = vrot.lane.b32.xlu1 %v9152_v47, %s9398_s15  ;;  %v8098_v47 = vshrl.u32 %v13679_v27, 16  ;;  %v7163_v27 = vpack.i.b16 %v13887_v12, %v13897_v46  ;;  %v13914_v57 = vrot.slane %v6545_v43, %v14832_v25  ;;  %v13919_v51 = vcombine.high %v13884_v1, %v14829_v52 }
 0x5fe   : > { %8597 = vrot.lane.b32.xlu0 %v9167_v55, %s9400_s17  ;;  %v13894_v55 = vrot.slane %v6443_v9, %v14832_v25  ;;  %v6567_v9 = vshrl.u32 %v13884_v1, 16 }
 0x5ff   : > { %v13878_v23 = vpop.permute.xlu1 %7693  ;;  %v8100_v30 = vpack.i.b16 %v8099_v19, %v8098_v47  ;;  %v9093_v39 = vcombine.low %v7163_v27, %v7163_v27 }
 0x600   : > { %14965 = vst [vmem:[#allocation54_spill] sm:$0xff] %v13878_v23  ;;  %v6032_v60 = vpop.permute.xlu0 %6031  ;;  %v8573_v23 = vshrl.u32 %v13712_v48, 16  ;;  %v6566_v20 = vshrl.u32 %v13894_v55, 16  ;;  %v8111_v48 = vshrl.u32 %v13786_v11, 16  ;;  %v14967_v11 = vld [vmem:[#allocation67_spill] sm:$0xff]  ;;  %v13930_v43 = vcombine.high %v13894_v55, %v14829_v52 }
 0x601   : > { %6653 = vrot.lane.b32.xlu1 %v9083_v62, %s9397_s14  ;;  %v9076_v62 = vcombine.low %v6577_v58, %v6577_v58  ;;  %v9149_v19 = vcombine.low %v8100_v30, %v8100_v30 }
 0x602   : > { %8139 = vrot.lane.b32.xlu0 %v9146_v24, %s9402_s25  ;;  %v8572_v24 = vshrl.u32 %v13724_v53, 16  ;;  %v6568_v35 = vpack.i.b16 %v6567_v9, %v6566_v20  ;;  %v13922_v53 = vrot.slane %v6511_v2, %v14832_v25  ;;  %v6591_v9 = vshrl.u32 %v13914_v57, 16 }
 0x603   : > { %v6056_v14 = vpop.permute.xlu1 %6055  ;;  %v6579_v2 = vshrl.u32 %v13862_v7, 16 }
 0x604   : > { %v6044_v59 = vpop.permute.xlu0 %6043  ;;  %v8574_v58 = vpack.i.b16 %v8573_v23, %v8572_v24  ;;  %v8112_v23 = vpack.i.b16 %v8111_v48, %v8110_v29  ;;  %v7063_v24 = vcombine.low %v13850_v26, %v13830_v50  ;;  %v6571_v48 = vpack.i.b16 %v13919_v51, %v13930_v43 }
 0x605   : > { %7239 = vrot.lane.b32.xlu1 %v9100_v54, %s9397_s14  ;;  %v14966_v54 = vld [vmem:[#allocation70_spill] sm:$0xff]  ;;  %v7029_v29 = vcombine.low %v13844_v4, %v13847_v8  ;;  %v6578_v26 = vshrl.u32 %v13873_v22, 16 }
 0x606   : > { %6625 = vrot.lane.b32.xlu0 %v9076_v62, %s9397_s14  ;;  %v5979_v62 = vpack.i.b16 %v14967_v11, %v14966_v54  ;;  %v9174_v27 = vcombine.low %v8574_v58, %v8574_v58  ;;  %v6590_v58 = vshrl.u32 %v13922_v53, 16  ;;  %v14968_v54 = vld [vmem:[#allocation12_spill] sm:$0xff]  ;;  %v14969_v11 = vld [vmem:[#allocation71_spill] sm:$0xff]  ;;  %v9153_v8 = vcombine.low %v8112_v23, %v8112_v23 }
 0x607   : > { %v6060_v18 = vpop.permute.xlu1 %6059 }
 0x608   : > { %v6048_v47 = vpop.permute.xlu0 %6047  ;;  %v6083_v10 = vsel %vm786_vm15, %v5979_v62, %v6028_v40  ;;  %v6003_v62 = vpack.i.b16 %v14969_v11, %v14968_v54  ;;  %v13968_v54 = vrot.slane %v7029_v29, %v14832_v25 }
 0x609   : > { %8151 = vrot.lane.b32.xlu1 %v9149_v19, %s9400_s17  ;;  %v6085_v20 = vsel %vm790_vm0, %v6083_v10, %v6032_v60  ;;  %v6592_v60 = vpack.i.b16 %v6591_v9, %v6590_v58  ;;  %v13957_v10 = vcombine.high %v13922_v53, %v14829_v52  ;;  %v13977_v9 = vcombine.high %v13873_v22, %v14829_v52 }
 0x60a   : > { %7211 = vrot.lane.b32.xlu0 %v9093_v39, %s9397_s14  ;;  %v9073_v39 = vcombine.low %v6568_v35, %v6568_v35  ;;  %v13953_v35 = vcombine.high %v13914_v57, %v14829_v52  ;;  %v6098_v23 = vsel %vm786_vm15, %v6003_v62, %v6056_v14  ;;  %s215_s14 = sand.u32 1, %s9380_s19  }
 0x60b   : > { %v6072_v30 = vpop.permute.xlu1 %6071  ;;  %v9080_v14 = vcombine.low %v6592_v60, %v6592_v60  ;;  %v14002_v60 = vcombine.high %v13823_v45, %v14829_v52  ;;  %s8738_s8 = scalar_lea.sflag [#allocation5], %s215_s14 }
 0x60c   : > { %v6036_v19 = vpop.permute.xlu0 %6035 }
 0x60d   : > { %v6087_v40 = vsel %vm793_vm3, %v6085_v20, %v6036_v19  ;;  %8625 = vrot.lane.b32.xlu1 %v9174_v27, %s9400_s17  ;;  %v13961_v27 = vcombine.high %v13862_v7, %v14829_v52  ;;  %v6595_v7 = vpack.i.b16 %v13953_v35, %v13957_v10 }
 0x60e   : > { %v6089_v50 = vsel %vm14970_vm9, %v6087_v40, %v13832_v63  ;;  %6613 = vrot.lane.b32.xlu0 %v9073_v39, %s9399_s16  ;;  %v13964_v63 = vrot.slane %v7063_v24, %v14832_v25  ;;  %v9074_v39 = vcombine.low %v6571_v48, %v6571_v48  ;;  %v6580_v40 = vpack.i.b16 %v6579_v2, %v6578_v26  ;;  %vm14986_vm9 = vmmov %vm14975_vm4 }
 0x60f   : > { %v6076_v4 = vpop.permute.xlu1 %6075  ;;  %v6091_v20 = vsel %vm14971_vm12, %v6089_v50, %v6044_v59  ;;  %v6603_v59 = vshrl.u32 %v13823_v45, 16  ;;  %v7131_v2 = vcombine.low %v13809_v31, %v13793_v3  ;;  %v6100_v24 = vsel %vm790_vm0, %v6098_v23, %v6060_v18  ;;  %vm14987_vm12 = vmmov %vm14974_vm2 }
 0x610   : > { %v6052_v19 = vpop.permute.xlu0 %6051  ;;  %v6093_v48 = vsel %vm14972_vm14, %v6091_v20, %v6048_v47  ;;  %v9077_v62 = vcombine.low %v6580_v40, %v6580_v40  ;;  %v6583_v22 = vpack.i.b16 %v13961_v27, %v13977_v9  ;;  %v7153_v50 = vshrl.u32 %v13964_v63, 16  ;;  %vm14988_vm14 = vmmov %vm14930_vm6 }
 0x611   : > { %8167 = vrot.lane.b32.xlu1 %v9153_v8, %s9402_s25  ;;  %v7097_v26 = vcombine.low %v13820_v5, %v13806_v28  ;;  %v6602_v31 = vshrl.u32 %v13838_v17, 16  ;;  %v6095_v18 = vsel %vm14973_vm13, %v6093_v48, %v6052_v19  ;;  %v7152_v8 = vshrl.u32 %v13968_v54, 16  ;;  %vm14990_vm13 = vmmov %vm14930_vm6 }
 0x612   : > { %6617 = vrot.lane.b32.xlu0 %v9074_v39, %s9396_s13  ;;  %v14005_v28 = vrot.slane %v7131_v2, %v14832_v25  ;;  %v9081_v20 = vcombine.low %v6595_v7, %v6595_v7  ;;  %v9078_v23 = vcombine.low %v6583_v22, %v6583_v22  ;;  %v6116_v2 = vsel %vm5113_vm5, %v6095_v18, 0 }
 0x613   : > { %v6064_v29 = vpop.permute.xlu1 %6063  ;;  %v6604_v39 = vpack.i.b16 %v6603_v59, %v6602_v31  ;;  %v14016_v45 = vrot.slane %v7097_v26, %v14832_v25  ;;  %v14028_v7 = vcombine.high %v13968_v54, %v14829_v52 }
 0x614   : > { %v6102_v58 = vsel %vm793_vm3, %v6100_v24, %v6064_v29  ;;  %v13985_v11 = vpop.permute.xlu0 %5035  ;;  %v14013_v24 = vcombine.high %v13964_v63, %v14829_v52  ;;  %v7177_v29 = vshrl.u32 %v14005_v28, 16  ;;  %v14048_v18 = vcombine.high %v14005_v28, %v14829_v52 }
 0x615   : > { %v6104_v3 = vsel %vm14926_vm1, %v6102_v58, %v13827_v61  ;;  %6641 = vrot.lane.b32.xlu1 %v9080_v14, %s9399_s16  ;;  %v9084_v25 = vcombine.low %v6604_v39, %v6604_v39  ;;  %v7176_v22 = vshrl.u32 %v14016_v45, 16  ;;  %v7046_v39 = vcombine.high %v13897_v46, %v14829_v52  ;;  %vm14989_vm1 = vmmov %vm14975_vm4 }
 0x616   : > { %6629 = vrot.lane.b32.xlu0 %v9077_v62, %s9401_s23  ;;  %v6106_v47 = vsel %vm14974_vm2, %v6104_v3, %v6072_v30  ;;  %v7154_v30 = vpack.i.b16 %v7153_v50, %v7152_v8  ;;  %v7165_v62 = vshrl.u32 %v13887_v12, 16  ;;  %v7164_v50 = vshrl.u32 %v13897_v46, 16  ;;  %vm14997_vm2 = vmmov %vm14983_vm8 }
 0x617   : > { %v6108_v5 = vsel %vm14975_vm4, %v6106_v47, %v6076_v4  ;;  %v6080_v61 = vpop.permute.xlu1 %6079  ;;  %v14023_v4 = vcombine.high %v13838_v17, %v14829_v52  ;;  %v7157_v17 = vpack.i.b16 %v14013_v24, %v14028_v7  ;;  %v7178_v31 = vpack.i.b16 %v7177_v29, %v7176_v22  ;;  %vm14998_vm4 = vmmov %vm14997_vm2 }
 0x618   : > { %v6110_v19 = vsel %vm14930_vm6, %v6108_v5, %v6080_v61  ;;  %v14009_v40 = vpop.permute.xlu0 %5485  ;;  %v9090_v58 = vcombine.low %v7154_v30, %v7154_v30  ;;  %v7166_v5 = vpack.i.b16 %v7165_v62, %v7164_v50  ;;  %v14054_v61 = vcombine.high %v13887_v12, %v14829_v52  ;;  %vm14999_vm6 = vmmov %vm14985_vm11 }
 0x619   : > { %6645 = vrot.lane.b32.xlu1 %v9081_v20, %s9396_s13  ;;  %9071 = vmatprep.subr.msk.bf16.mxu0 %vm5113_vm5, %v6110_v19  ;;  %v6607_v48 = vpack.i.b16 %v14002_v60, %v14023_v4  ;;  %v9091_v8 = vcombine.low %v7157_v17, %v7157_v17  ;;  %v14059_v20 = vcombine.high %v14016_v45, %v14829_v52  ;;  %v7189_v12 = vshrl.u32 %v13855_v32, 16 }
 0x61a   : > { %6633 = vrot.lane.b32.xlu0 %v9078_v23, %s9398_s15  ;;  %6121 = vmatpush1.bf16.msra.mxu0 %v6116_v2  ;;  %v9097_v23 = vcombine.low %v7178_v31, %v7178_v31  ;;  %v6573_v29 = vshrl.u32 %v13919_v51, 16  ;;  %v6572_v46 = vshrl.u32 %v13930_v43, 16  ;;  %v14081_v50 = vcombine.high %v13855_v32, %v14829_v52 }
 0x61b   : > { %v14030_v59 = vpop.permute.xlu1 %5063  ;;  %v9085_v3 = vcombine.low %v6607_v48, %v6607_v48  ;;  %v7181_v30 = vpack.i.b16 %v14048_v18, %v14059_v20  ;;  %v7169_v48 = vpack.i.b16 %v14054_v61, %v7046_v39  ;;  %v6584_v43 = vshrl.u32 %v13977_v9, 16 }
 0x61c   : > { %v14035_v14 = vpop.permute.xlu0 %5023  ;;  %v6574_v51 = vpack.i.b16 %v6573_v29, %v6572_v46  ;;  %v7159_v29 = vshrl.u32 %v14013_v24, 16  ;;  %v7158_v9 = vshrl.u32 %v14028_v7, 16  ;;  %v6608_v7 = vshrl.u32 %v14023_v4, 16  ;;  %v14977_v4 = vld [vmem:[#allocation56_spill] sm:$0xff] }
 0x61d   : > { %6657 = vrot.lane.b32.xlu1 %v9084_v25, %s9401_s23  ;;  %v9094_v25 = vcombine.low %v7166_v5, %v7166_v5  ;;  %v9098_v62 = vcombine.low %v7181_v30, %v7181_v30  ;;  %v9095_v31 = vcombine.low %v7169_v48, %v7169_v48  ;;  %v7114_v5 = vcombine.high %v13867_v42, %v14829_v52 }
 0x61e   : > { %7199 = vrot.lane.b32.xlu0 %v9090_v58, %s9399_s16  ;;  %v7188_v58 = vshrl.u32 %v13867_v42, 16  ;;  %v9075_v48 = vcombine.low %v6574_v51, %v6574_v51  ;;  %v6596_v42 = vshrl.u32 %v13957_v10, 16  ;;  %v7160_v10 = vpack.i.b16 %v7159_v29, %v7158_v9 }
 0x61f   : > { %v14044_v26 = vpop.permute.xlu1 %5513  ;;  %v7193_v32 = vpack.i.b16 %v14081_v50, %v7114_v5  ;;  %v7171_v51 = vshrl.u32 %v14054_v61, 16  ;;  %v14976_v61 = vld [vmem:[#allocation49_spill] sm:$0xff] }
 0x620   : > { %v14050_v47 = vpop.permute.xlu0 %5051  ;;  %v7190_v22 = vpack.i.b16 %v7189_v12, %v7188_v58  ;;  %v6597_v12 = vshrl.u32 %v13953_v35, 16  ;;  %v9070_v58 = vld [vmem:[%s14442_s3 + $0xc] sm:$0xf]  ;;  %v8555_v29 = vshrl.u32 %v14976_v61, 16 }
 0x621   : > { %6661 = vrot.lane.b32.xlu1 %v9085_v3, %s9398_s15  ;;  %v9102_v35 = vcombine.low %v7193_v32, %v7193_v32  ;;  %9072 = vmatmul.mubr.msk.bf16.vlgmr.msra.gmra.mrb[24].mxu0 %vm5109_vm7, %v9070_v58  ;;  %v7183_v32 = vshrl.u32 %v14048_v18, 16  ;;  %v7195_v18 = vshrl.u32 %v14081_v50, 16  ;;  %v8579_v50 = vshrl.u32 %v13601_v33, 16 }
 0x622   : > { %7203 = vrot.lane.b32.xlu0 %v9091_v8, %s9396_s13  ;;  %v6585_v8 = vshrl.u32 %v13961_v27, 16  ;;  %v9101_v30 = vcombine.low %v7190_v22, %v7190_v22  ;;  %v6609_v22 = vshrl.u32 %v14002_v60, 16  ;;  %7324 = vmatprep.mubr.bf16.mxu0 %v14829_v52 }
 0x623   : > { %v14064_v19 = vpop.permute.xlu1 %5027 }
 0x624   : > { %v14069_v2 = vpop.permute.xlu0 %5039  ;;  %v6586_v27 = vpack.i.b16 %v6585_v8, %v6584_v43  ;;  %v7170_v8 = vshrl.u32 %v7046_v39, 16  ;;  %v8554_v39 = vshrl.u32 %v14977_v4, 16 }
 0x625   : > { %7227 = vrot.lane.b32.xlu1 %v9097_v23, %s9399_s16  ;;  %s8815_s16 = sshll.u32 %s215_s14, 4 }
 0x626   : > { %7215 = vrot.lane.b32.xlu0 %v9094_v25, %s9401_s23 }
 0x627   : > { %v14077_v17 = vpop.permute.xlu1 %5055 }
 0x628   : > { %v14083_v3 = vpop.permute.xlu0 %5043 }
 0x629   : > { %7231 = vrot.lane.b32.xlu1 %v9098_v62, %s9396_s13  ;;  %v6598_v62 = vpack.i.b16 %v6597_v12, %v6596_v42  ;;  %v7182_v42 = vshrl.u32 %v14059_v20, 16  ;;  %v7194_v20 = vshrl.u32 %v7114_v5, 16  ;;  %v8578_v5 = vshrl.u32 %v13622_v0, 16 }
 0x62a   : > { %7219 = vrot.lane.b32.xlu0 %v9095_v31, %s9398_s15  ;;  %v9079_v31 = vcombine.low %v6586_v27, %v6586_v27  ;;  %v7172_v27 = vpack.i.b16 %v7171_v51, %v7170_v8  ;;  %v8436_v51 = vcombine.high %v14977_v4, %v14829_v52 }
 0x62b   : > { %v14091_v23 = vpop.permute.xlu1 %5067  ;;  %v9082_v60 = vcombine.low %v6598_v62, %v6598_v62 }
 0x62c   : > { %v14095_v25 = vpop.permute.xlu0 %5473 }
 0x62d   : > { %7243 = vrot.lane.b32.xlu1 %v9101_v30, %s9401_s23  ;;  %v6610_v30 = vpack.i.b16 %v6609_v22, %v6608_v7  ;;  %v9096_v22 = vcombine.low %v7172_v27, %v7172_v27 }
 0x62e   : > { %6621 = vrot.lane.b32.xlu0 %v9075_v48, %s9400_s17  ;;  %v9092_v48 = vcombine.low %v7160_v10, %v7160_v10  ;;  %v8470_v10 = vcombine.high %v14976_v61, %v14829_v52  ;;  %v8560_v61 = vshrl.u32 %v8436_v51, 16 }
 0x62f   : > { %v14105_v46 = vpop.permute.xlu1 %5071  ;;  %v9086_v58 = vcombine.low %v6610_v30, %v6610_v30 }
 0x630   : > { %v14109_v24 = vpop.permute.xlu0 %5477  ;;  %v8561_v27 = vshrl.u32 %v8470_v10, 16 }
 0x631   : > { %7247 = vrot.lane.b32.xlu1 %v9102_v35, %s9398_s15  ;;  %v7184_v35 = vpack.i.b16 %v7183_v32, %v7182_v42 }
 0x632   : > { %6637 = vrot.lane.b32.xlu0 %v9079_v31, %s9402_s25  ;;  %v8556_v31 = vpack.i.b16 %v8555_v29, %v8554_v39  ;;  %v8538_v29 = vcombine.high %v13601_v33, %v14829_v52  ;;  %v8580_v39 = vpack.i.b16 %v8579_v50, %v8578_v5 }
 0x633   : > { %v14116_v43 = vpop.permute.xlu1 %5501  ;;  %v9099_v8 = vcombine.low %v7184_v35, %v7184_v35 }
 0x634   : > { %v14119_v12 = vpop.permute.xlu0 %5489  ;;  %v9169_v32 = vcombine.low %v8556_v31, %v8556_v31  ;;  %v14978_v31 = vld [vmem:[#allocation11_spill] sm:$0xff]  ;;  %v8585_v5 = vshrl.u32 %v8538_v29, 16 }
 0x635   : > { %6649 = vrot.lane.b32.xlu1 %v9082_v60, %s9400_s17  ;;  %v7196_v60 = vpack.i.b16 %v7195_v18, %v7194_v20  ;;  %v8562_v18 = vpack.i.b16 %v8561_v27, %v8560_v61  ;;  %v9176_v27 = vcombine.low %v8580_v39, %v8580_v39 }
 0x636   : > { %7207 = vrot.lane.b32.xlu0 %v9092_v48, %s9400_s17  ;;  %v8559_v48 = vpack.i.b16 %v8470_v10, %v8436_v51  ;;  %v14979_v10 = vld [vmem:[#allocation42_spill] sm:$0xff]  ;;  %v14980_v51 = vld [vmem:[#allocation27_spill] sm:$0xff] }
 0x637   : > { %v14126_v9 = vpop.permute.xlu1 %5505  ;;  %v9103_v4 = vcombine.low %v7196_v60, %v7196_v60  ;;  %v4975_v20 = vpack.i.b16 %v14979_v10, %v14978_v31  ;;  %v9171_v10 = vcombine.low %v8562_v18, %v8562_v18 }
 0x638   : > { %v14129_v62 = vpop.permute.xlu0 %5493  ;;  %v9170_v35 = vcombine.low %v8559_v48, %v8559_v48 }
 0x639   : > { %6665 = vrot.lane.b32.xlu1 %v9086_v58, %s9402_s25  ;;  %v5079_v50 = vsel %vm786_vm15, %v4975_v20, %v14035_v14 }
 0x63a   : > { %7223 = vrot.lane.b32.xlu0 %v9096_v22, %s9402_s25  ;;  %v8504_v22 = vcombine.high %v13622_v0, %v14829_v52  ;;  %v5081_v61 = vsel %vm790_vm0, %v5079_v50, %v14064_v19  ;;  %v14994_v50 = vld [vmem:[#allocation43_spill] sm:$0xff] }
 0x63b   : > { %v14137_v7 = vpop.permute.xlu1 %5517 }
 0x63c   : > { %v14140_v30 = vpop.permute.xlu0 %8127  ;;  %v8583_v60 = vpack.i.b16 %v8538_v29, %v8504_v22  ;;  %v8584_v14 = vshrl.u32 %v8504_v22, 16  ;;  %v8725_v22 = vld [vmem:[%s14443_s4] sm:$0xff] }
 0x63d   : > { %7235 = vrot.lane.b32.xlu1 %v9099_v8, %s9400_s17  ;;  %v14981_v8 = vld [vmem:[#allocation13_spill] sm:$0xff]  ;;  %s217_s17 = scalar_lea.vmem [#allocation4], %s8815_s16 }
 0x63e   : > { %8605 = vrot.lane.b32.xlu0 %v9169_v32, %s9401_s23  ;;  %v14982_v32 = vpack.i.b16 %v14980_v51, %v14981_v8  ;;  %v9177_v18 = vcombine.low %v8583_v60, %v8583_v60  ;;  %v8586_v20 = vpack.i.b16 %v8585_v5, %v8584_v14 }
 0x63f   : > { %v5522_v42 = vpop.permute.xlu1 %5521 }
 0x640   : > { %v14147_v58 = vpop.permute.xlu0 %8601  ;;  %v5094_v33 = vsel %vm786_vm15, %v14982_v32, %v14050_v47 }
 0x641   : > { %7251 = vrot.lane.b32.xlu1 %v9103_v4, %s9402_s25  ;;  %v5096_v0 = vsel %vm790_vm0, %v5094_v33, %v14077_v17 }
 0x642   : > { %8609 = vrot.lane.b32.xlu0 %v9170_v35, %s9398_s15 }
 0x643   : > { %v5060_v48 = vpop.permute.xlu1 %5059 }
 0x644   : > { %v5098_v4 = vsel %vm793_vm3, %v5096_v0, %v5060_v48  ;;  %v5032_v31 = vpop.permute.xlu0 %5031  ;;  %v14995_v0 = vld [vmem:[#allocation39_spill] sm:$0xff] }
 0x645   : > { %v5100_v47 = vsel %vm14983_vm8, %v5098_v4, %v14030_v59  ;;  %v5083_v35 = vsel %vm793_vm3, %v5081_v61, %v5032_v31  ;;  %8633 = vrot.lane.b32.xlu1 %v9176_v27, %s9401_s23  ;;  %v9178_v61 = vcombine.low %v8586_v20, %v8586_v20  ;;  %v9034_v4 = vld [vmem:[%s14442_s3 + $0x4] sm:$0xf]  ;;  %vm15000_vm8 = vmmov %vm14989_vm1  ;;  %s8752_s23 = sshll.u32 %s217_s17, 4  ;;  %s14399_s23 = int_to_ptr.vmem [resolvable:$true] %s8752_s23 }
 0x646   : > { %v5085_v17 = vsel %vm14984_vm10, %v5083_v35, %v13985_v11  ;;  %8613 = vrot.lane.b32.xlu0 %v9171_v10, %s9402_s25  ;;  %v5102_v19 = vsel %vm14985_vm11, %v5100_v47, %v14091_v23  ;;  %vm15001_vm10 = vmmov %vm14999_vm6  ;;  %s9326_s9 = scalar_lea.vmem %s14399_s23, 256 }
 0x647   : > { %v5076_v29 = vpop.permute.xlu1 %5075  ;;  %v5104_v39 = vsel %vm14986_vm9, %v5102_v19, %v14105_v46  ;;  %v5087_v59 = vsel %vm14987_vm12, %v5085_v17, %v14069_v2  ;;  %v14991_v2 = vld [vmem:[#allocation37_spill] sm:$0xff]  ;;  %v14992_v46 = vld [vmem:[#allocation16_spill] sm:$0xff]  ;;  %vm15002_vm11 = vmmov %vm14990_vm13  ;;  %p9327_p11 = scmp.ne.s32.totalorder %s14399_s23, %s9326_s9 }
 0x648   : > { %v5106_v11 = vsel %vm14988_vm14, %v5104_v39, %v5076_v29  ;;  %v5089_v51 = vsel %vm14989_vm1, %v5087_v59, %v14083_v3  ;;  %v5048_v8 = vpop.permute.xlu0 %5047  ;;  %v14993_v32 = vpack.i.b16 %v14991_v2, %v14992_v46  ;;  %v14996_v3 = vpack.i.b16 %v14994_v50, %v14995_v0  ;;  %vm15003_vm9 = vmmov %vm14989_vm1 }
 0x649   : > { %v5091_v23 = vsel %vm14990_vm13, %v5089_v51, %v5048_v8  ;;  %8637 = vrot.lane.b32.xlu1 %v9177_v18, %s9398_s15  ;;  %9035 = vmatprep.subr.msk.bf16.mxu1 %vm5113_vm5, %v5106_v11  ;;  %vm15004_vm12 = vmmov %vm15002_vm11  ;;  %v8067_v59 = vpack.i.b16 %v13559_v44, %v13500_v13  ;;  %v8091_v8 = vpack.i.b16 %v13592_v41, %v13510_v56  ;;  %s9268_s15 = sshll.u32 %s9455_s22, 8  ;;  %p9328_p12 = pnand %p9327_p11, %p9472_p5 }
 0x64a   : > { %v5544_v33 = vsel %vm786_vm15, %v14993_v32, %v14116_v43  ;;  %v5114_v60 = vsel %vm5113_vm5, %v5091_v23, 0  ;;  %8728 = vperm.xlu0 %9321, %v8725_v22   ;;  %v5529_v48 = vsel %vm786_vm15, %v14996_v3, %v14095_v25  ;;  %v8541_v23 = vpack.i.b16 %v13598_v21, %v13548_v34  ;;  %vm15005_vm14 = vmmov %vm14997_vm2  ;;  %s14397_s7 = scalar_lea.hbm %s14444_s5, %s9268_s15  ;;  %s9403_s22 = smov [#allocation4]  }
 0x64b   : > { %v5546_v27 = vsel %vm790_vm0, %v5544_v33, %v14126_v9  ;;  %v5510_v5 = vpop.permute.xlu1 %5509  ;;  %5119 = vmatpush1.bf16.msra.mxu1 %v5114_v60  ;;  %v5531_v43 = vsel %vm790_vm0, %v5529_v48, %v14109_v24  ;;  %v8565_v0 = vpack.i.b16 %v13652_v36, %v13666_v16  ;;  %vm15006_vm1 = vmmov %vm14999_vm6  ;;  %p9329_p13 = pneg %p9328_p12  ;;  %s9330_s26 = sshll.u32 %s9403_s22, 4  ;;  %s9331_s26 = int_to_ptr.vmem [resolvable:$false] %s9330_s26 }
 0x64c   : > { %v5548_v31 = vsel %vm793_vm3, %v5546_v27, %v5510_v5  ;;  %v5482_v10 = vpop.permute.xlu0 %5481  ;;  %vm15007_vm13 = vmmov %vm15000_vm8  ;;  %s9332_s30 = scalar_lea.vmem %s9331_s26, 512  ;;  %p9333_p0 = scmp.lt.s32.totalorder %s14399_s23, %s9331_s26 }
 0x64d   : > { %v5550_v47 = vsel %vm14997_vm2, %v5548_v31, %v14044_v26  ;;  %v5533_v25 = vsel %vm793_vm3, %v5531_v43, %v5482_v10  ;;  %8641 = vrot.lane.b32.xlu1 %v9178_v61, %s9402_s25  ;;  %p9334_p1 = scmp.lt.s32.totalorder %s9332_s30, %s9326_s9 }
 0x64e   : > { %v5535_v9 = vsel %vm14998_vm4, %v5533_v25, %v14009_v40  ;;  %v5552_v35 = vsel %vm14999_vm6, %v5550_v47, %v14137_v7  ;;  %9036 = vmatmul.mubr.msk.bf16.vlgmr.msra.gmra.mrb[16].mxu1 %vm5109_vm7, %v9034_v4  ;;  %vm15008_vm4 = vmmov %vm14997_vm2 }
 0x64f   : > { %v5554_v24 = vsel %vm15000_vm8, %v5552_v35, %v5522_v42  ;;  %v5526_v14 = vpop.permute.xlu1 %5525  ;;  %v5537_v17 = vsel %vm15001_vm10, %v5535_v9, %v14119_v12  ;;  %5598 = vmatprep.mubr.bf16.mxu1 %v14829_v52  ;;  %v9053_v12 = vld [vmem:[%s14442_s3 + $0x8] sm:$0xf]  ;;  %vm15009_vm6 = vmmov %vm15006_vm1  ;;  %p9335_p2 = por %p9334_p1, %p9333_p0 }
 0x650   : > { %v5556_v26 = vsel %vm15002_vm11, %v5554_v24, %v5526_v14  ;;  %v5539_v19 = vsel %vm15003_vm9, %v5537_v17, %v14129_v62  ;;  %v5498_v29 = vpop.permute.xlu0 %5497  ;;  %vm15010_vm10 = vmmov %vm14997_vm2 }
 0x651   : > { %v5541_v40 = vsel %vm15004_vm12, %v5539_v19, %v5498_v29  ;;  %9054 = vmatprep.subr.msk.bf16.mxu1 %vm5113_vm5, %v5556_v26  ;;  %vm15016_vm11 = vmmov %vm14997_vm2  ;;  %p9336_p3 = pnand %p9335_p2, %p9329_p13 }
 0x652   : > { %v5562_v7 = vsel %vm5113_vm5, %v5541_v40, 0  ;;  %vm15017_vm9 = vmmov %vm15006_vm1 }
 0x653   : > { %v8156_v39 = vpop.permute.xlu1 %8155  ;;  %5567 = vmatpush1.bf16.msra.mxu1 %v5562_v7  ;;  %vm15019_vm12 = vmmov %vm14997_vm2 }
 0x654   : > { %v8116_v42 = vpop.permute.xlu0 %8115 }
 0x655   : > { %v8171_v18 = vsel %vm786_vm15, %v8067_v59, %v8116_v42 }
 0x656   : > { %9055 = vmatmul.mubr.msk.bf16.vlgmr.msra.gmra.mrb[20].mxu1 %vm5109_vm7, %v9053_v12 }
 0x657   : > { %v8630_v62 = vpop.permute.xlu1 %8629  ;;  %6738 = vmatprep.mubr.bf16.mxu1 %v14829_v52 }
 0x658   : > { %v8120_v22 = vpop.permute.xlu0 %8119 }
 0x659   : > { %v8173_v20 = vsel %vm790_vm0, %v8171_v18, %v8120_v22 }
 0x65b   : > { %v8144_v11 = vpop.permute.xlu1 %8143 }
 0x65c   : > { %v8590_v51 = vpop.permute.xlu0 %8589  ;;  %v8186_v13 = vsel %vm786_vm15, %v8091_v8, %v8144_v11 }
 0x65d   : > { %v8645_v2 = vsel %vm786_vm15, %v8541_v23, %v8590_v51 }
 0x65f   : > { %v8148_v44 = vpop.permute.xlu1 %8147 }
 0x660   : > { %v8188_v46 = vsel %vm790_vm0, %v8186_v13, %v8148_v44  ;;  %v8594_v32 = vpop.permute.xlu0 %8593 }
 0x661   : > { %v8647_v33 = vsel %vm790_vm0, %v8645_v2, %v8594_v32  ;;  %v6565_v2 = vpack.i.b16 %v13884_v1, %v13894_v55 }
 0x663   : > { %v8618_v60 = vpop.permute.xlu1 %8617 }
 0x664   : > { %v8132_v50 = vpop.permute.xlu0 %8131  ;;  %v8660_v56 = vsel %vm786_vm15, %v8565_v0, %v8618_v60  ;;  %v15014_v60 = vld [vmem:[#allocation9_spill] sm:$0xff] }
 0x667   : > { %v8622_v41 = vpop.permute.xlu1 %8621 }
 0x668   : > { %v8662_v34 = vsel %vm790_vm0, %v8660_v56, %v8622_v41  ;;  %v8136_v21 = vpop.permute.xlu0 %8135 }
 0x66b   : > { %v8160_v3 = vpop.permute.xlu1 %8159 }
 0x66c   : > { %v8124_v48 = vpop.permute.xlu0 %8123 }
 0x66d   : > { %v8175_v27 = vsel %vm793_vm3, %v8173_v20, %v8124_v48 }
 0x66e   : > { %v8177_v5 = vsel %vm15005_vm14, %v8175_v27, %v14140_v30  ;;  %vm15021_vm14 = vmmov %vm14997_vm2 }
 0x66f   : > { %v8164_v61 = vpop.permute.xlu1 %8163  ;;  %v8179_v4 = vsel %vm15006_vm1, %v8177_v5, %v8132_v50  ;;  %v15015_v5 = vld [vmem:[#allocation44_spill] sm:$0xff]  ;;  %vm15022_vm1 = vmmov %vm15000_vm8 }
 0x670   : > { %v8598_v43 = vpop.permute.xlu0 %8597  ;;  %v14253_v31 = vsel %vm15007_vm13, %v8179_v4, %v8136_v21  ;;  %v6589_v4 = vpack.i.b16 %v13914_v57, %v13922_v53  ;;  %vm15024_vm13 = vmmov %vm15009_vm6 }
 0x671   : > { %v8649_v36 = vsel %vm793_vm3, %v8647_v33, %v8598_v43  ;;  %v15013_v33 = vld [vmem:[#allocation61_spill] sm:$0xff] }
 0x672   : > { %v14258_v16 = vsel %vm14997_vm2, %v8649_v36, %v14147_v58  ;;  %v7617_v50 = vpack.i.b16 %v15014_v60, %v15013_v33  ;;  %v15018_v36 = vld [vmem:[#allocation17_spill] sm:$0xff]  ;;  %vm15026_vm2 = vmmov %vm15009_vm6 }
 0x673   : > { %v6654_v10 = vpop.permute.xlu1 %6653 }
 0x674   : > { %v14260_v47 = vpop.permute.xlu0 %8139 }
 0x677   : > { %v14262_v25 = vpop.permute.xlu1 %7239 }
 0x678   : > { %v6626_v9 = vpop.permute.xlu0 %6625 }
 0x67b   : > { %v8152_v30 = vpop.permute.xlu1 %8151 }
 0x67c   : > { %v8190_v35 = vsel %vm793_vm3, %v8188_v46, %v8152_v30  ;;  %v7212_v24 = vpop.permute.xlu0 %7211  ;;  %v15012_v46 = vld [vmem:[#allocation53_spill] sm:$0xff]  ;;  %v15020_v30 = vld [vmem:[#allocation38_spill] sm:$0xff] }
 0x67d   : > { %v8192_v14 = vsel %vm15008_vm4, %v8190_v35, %v8156_v39 }
 0x67e   : > { %v8194_v17 = vsel %vm15009_vm6, %v8192_v14, %v8160_v3  ;;  %vm15027_vm6 = vcmask 916480  }
 0x67f   : > { %v8626_v26 = vpop.permute.xlu1 %8625  ;;  %v14268_v19 = vsel %vm15000_vm8, %v8194_v17, %v8164_v61  ;;  %vm15028_vm8 = vmmov %vm15008_vm4 }
 0x680   : > { %v8664_v58 = vsel %vm793_vm3, %v8662_v34, %v8626_v26  ;;  %v6614_v29 = vpop.permute.xlu0 %6613  ;;  %v7712_v34 = vsel %vm786_vm15, %v7617_v50, %v13691_v49  ;;  %v15023_v26 = vld [vmem:[#allocation34_spill] sm:$0xff] }
 0x681   : > { %v14272_v40 = vsel %vm15010_vm10, %v8664_v58, %v8630_v62  ;;  %v15011_v62 = vld [vmem:[#allocation55_spill] sm:$0xff]  ;;  %v6669_v0 = vsel %vm786_vm15, %v6565_v2, %v6614_v29  ;;  %v7714_v55 = vsel %vm790_vm0, %v7712_v34, %v13720_v6  ;;  %v15025_v29 = vld [vmem:[#allocation21_spill] sm:$0xff]  ;;  %vm15029_vm10 = vmmov %vm15026_vm2 }
 0x682   : > { %v7593_v32 = vpack.i.b16 %v15012_v46, %v15011_v62  ;;  %v15030_v62 = vld [vmem:[#allocation18_spill] sm:$0xff] }
 0x683   : > { %v14274_v7 = vpop.permute.xlu1 %8167 }
 0x684   : > { %v6618_v12 = vpop.permute.xlu0 %6617  ;;  %v7697_v41 = vsel %vm786_vm15, %v7593_v32, %v13642_v38  ;;  %v7716_v38 = vsel %vm793_vm3, %v7714_v55, %v15015_v5  ;;  %v15032_v32 = vld [vmem:[#allocation36_spill] sm:$0xff] }
 0x685   : > { %v6671_v21 = vsel %vm790_vm0, %v6669_v0, %v6618_v12  ;;  %v7699_v1 = vsel %vm790_vm0, %v7697_v41, %v13668_v15  ;;  %v7718_v35 = vsel %vm15021_vm14, %v7716_v38, %v15020_v30  ;;  %vm15035_vm14 = vmmov %vm15027_vm6 }
 0x686   : > { %v7701_v27 = vsel %vm793_vm3, %v7699_v1, %v13763_v37  ;;  %v7151_v37 = vpack.i.b16 %v13964_v63, %v13968_v54  ;;  %v7720_v12 = vsel %vm15026_vm2, %v7718_v35, %v15025_v29 }
 0x687   : > { %v6642_v42 = vpop.permute.xlu1 %6641  ;;  %v7703_v6 = vsel %vm15019_vm12, %v7701_v27, %v15018_v36  ;;  %vm15034_vm12 = vmmov %vm15022_vm1 }
 0x688   : > { %v6630_v59 = vpop.permute.xlu0 %6629  ;;  %v6684_v14 = vsel %vm786_vm15, %v6589_v4, %v6642_v42  ;;  %v7705_v58 = vsel %vm15024_vm13, %v7703_v6, %v15023_v26  ;;  %vm15038_vm13 = vmmov %vm15027_vm6 }
 0x68b   : > { %v6646_v18 = vpop.permute.xlu1 %6645 }
 0x68c   : > { %v6634_v22 = vpop.permute.xlu0 %6633 }
 0x68f   : > { %v6658_v39 = vpop.permute.xlu1 %6657 }
 0x690   : > { %v7200_v20 = vpop.permute.xlu0 %7199 }
 0x691   : > { %v7255_v17 = vsel %vm786_vm15, %v7151_v37, %v7200_v20 }
 0x693   : > { %v6662_v11 = vpop.permute.xlu1 %6661 }
 0x694   : > { %v7204_v51 = vpop.permute.xlu0 %7203 }
 0x697   : > { %v7228_v8 = vpop.permute.xlu1 %7227 }
 0x698   : > { %v7216_v23 = vpop.permute.xlu0 %7215 }
 0x69b   : > { %v7232_v13 = vpop.permute.xlu1 %7231 }
 0x69c   : > { %v7220_v44 = vpop.permute.xlu0 %7219 }
 0x69f   : > { %v7244_v56 = vpop.permute.xlu1 %7243 }
 0x6a0   : > { %v6622_v3 = vpop.permute.xlu0 %6621 }
 0x6a1   : > { %v6673_v48 = vsel %vm793_vm3, %v6671_v21, %v6622_v3  ;;  %v15039_v21 = vld [vmem:[#allocation54_spill] sm:$0xff] }
 0x6a2   : > { %v6675_v61 = vsel %vm15016_vm11, %v6673_v48, %v6626_v9  ;;  %v6686_v9 = vsel %vm790_vm0, %v6684_v14, %v6646_v18  ;;  %vm15031_vm11 = vmmov %vm15022_vm1 }
 0x6a3   : > { %v7248_v49 = vpop.permute.xlu1 %7247  ;;  %v6677_v43 = vsel %vm15017_vm9, %v6675_v61, %v6630_v59  ;;  %v7257_v59 = vsel %vm790_vm0, %v7255_v17, %v7204_v51  ;;  %v7707_v46 = vsel %vm15031_vm11, %v7705_v58, %v15030_v62  ;;  %vm15033_vm9 = vmmov %vm15022_vm1 }
 0x6a4   : > { %v6638_v15 = vpop.permute.xlu0 %6637  ;;  %v6679_v57 = vsel %vm15022_vm1, %v6677_v43, %v6634_v22  ;;  %v7722_v33 = vsel %vm15033_vm9, %v7720_v12, %v15032_v32  ;;  %vm15036_vm1 = vmmov %vm15026_vm2 }
 0x6a5   : > { %v6681_v18 = vsel %vm15027_vm6, %v6679_v57, %v6638_v15  ;;  %vm15040_vm2 = vmmov %vm15027_vm6  ;;  %v9129_v15 = vld [vmem:[%s14442_s3 + $0x18] sm:$0xf]  ;;  %v9154_v57 = vld [vmem:[%s14442_s3 + $0x1c] sm:$0xf] }
 0x6a6   : > { %v7724_v3 = vsel %vm15040_vm2, %v7722_v33, %v15039_v21  ;;  %vm15042_vm6 = vmmov %vm15028_vm8 }
 0x6a7   : > { %v6650_v53 = vpop.permute.xlu1 %6649  ;;  %vm15048_vm11 = vmmov %vm15040_vm2 }
 0x6a8   : > { %v6688_v2 = vsel %vm793_vm3, %v6686_v9, %v6650_v53  ;;  %v7208_v63 = vpop.permute.xlu0 %7207 }
 0x6a9   : > { %v6690_v54 = vsel %vm15008_vm4, %v6688_v2, %v6654_v10  ;;  %v7259_v42 = vsel %vm793_vm3, %v7257_v59, %v7208_v63  ;;  %v7175_v10 = vpack.i.b16 %v14005_v28, %v14016_v45  ;;  %v9087_v28 = vld [vmem:[%s14442_s3 + $0x10] sm:$0xf]  ;;  %vm15041_vm4 = vmmov %vm15033_vm9 }
 0x6aa   : > { %v7261_v22 = vsel %vm15028_vm8, %v7259_v42, %v7212_v24  ;;  %v6692_v20 = vsel %vm15029_vm10, %v6690_v54, %v6658_v39  ;;  %v6702_v24 = vsel %vm5113_vm5, %v6681_v18, 0  ;;  %v15037_v39 = vld [vmem:[#allocation32_spill] sm:$0xff]  ;;  %vm15044_vm8 = vmmov %vm15036_vm1 }
 0x6ab   : > { %v6694_v51 = vsel %vm15034_vm12, %v6692_v20, %v6662_v11  ;;  %v6666_v60 = vpop.permute.xlu1 %6665  ;;  %v7263_v0 = vsel %vm15036_vm1, %v7261_v22, %v7216_v23  ;;  %v7709_v34 = vsel %vm15038_vm13, %v7707_v46, %v15037_v39  ;;  %v7270_v11 = vsel %vm786_vm15, %v7175_v10, %v7228_v8  ;;  %vm15043_vm15 = vmmov %vm15040_vm2 }
 0x6ac   : > { %v6696_v50 = vsel %vm15035_vm14, %v6694_v51, %v6666_v60  ;;  %v7224_v41 = vpop.permute.xlu0 %7223  ;;  %v7272_v45 = vsel %vm790_vm0, %v7270_v11, %v7232_v13  ;;  %v7265_v23 = vsel %vm15041_vm4, %v7263_v0, %v7220_v44  ;;  %v7730_v27 = vsel %vm5113_vm5, %v7709_v34, 0  ;;  %vm15045_vm0 = vmmov %vm15041_vm4 }
 0x6ad   : > { %9088 = vmatprep.subr.msk.bf16.mxu1 %vm5113_vm5, %v6696_v50  ;;  %v7267_v5 = vsel %vm15043_vm15, %v7265_v23, %v7224_v41  ;;  %vm15046_vm10 = vmmov %vm15040_vm2 }
 0x6ae   : > { %6707 = vmatpush1.bf16.msra.mxu1 %v6702_v24  ;;  %v7288_v43 = vsel %vm5113_vm5, %v7267_v5, 0  ;;  %vm15049_vm9 = vmmov %vm15036_vm1 }
 0x6af   : > { %v7236_v1 = vpop.permute.xlu1 %7235  ;;  %9130 = vmatprep.subr.msk.bf16.mxu1 %vm5113_vm5, %v7724_v3  ;;  %vm15050_vm12 = vmmov %vm15045_vm0 }
 0x6b0   : > { %v7274_v55 = vsel %vm793_vm3, %v7272_v45, %v7236_v1  ;;  %v8606_v48 = vpop.permute.xlu0 %8605  ;;  %vm15047_vm3 = vmmov %vm15040_vm2 }
 0x6b1   : > { %v7276_v8 = vsel %vm15042_vm6, %v7274_v55, %v14262_v25  ;;  %9089 = vmatmul.mubr.msk.bf16.vlgmr.msra.gmra.mrb[24].mxu1 %vm5109_vm7, %v9087_v28  ;;  %v8183_v25 = vsel %vm15047_vm3, %v14253_v31, %v14260_v47  ;;  %v8653_v37 = vsel %vm15049_vm9, %v14258_v16, %v8606_v48  ;;  %vm15051_vm14 = vmmov %vm15036_vm1  ;;  %v9179_v16 = vld [vmem:[%s14442_s3 + $0x20] sm:$0xf] }
 0x6b2   : > { %7735 = vmatpush1.bf16.msra.mxu1 %v7730_v27  ;;  %v7278_v13 = vsel %vm15044_vm8, %v7276_v8, %v7244_v56  ;;  %7766 = vmatprep.mubr.bf16.mxu1 %v14829_v52  ;;  %v8198_v56 = vsel %vm15048_vm11, %v14268_v19, %v14274_v7  ;;  %v8204_v30 = vsel %vm5113_vm5, %v8183_v25, 0  ;;  %vm15052_vm1 = vmmov %vm15040_vm2 }
 0x6b3   : > { %v7280_v44 = vsel %vm15045_vm0, %v7278_v13, %v7248_v49  ;;  %v7252_v38 = vpop.permute.xlu1 %7251  ;;  %v9104_v49 = vld [vmem:[%s14442_s3 + $0x14] sm:$0xf]  ;;  %vm15053_vm13 = vmmov %vm15045_vm0 }
 0x6b4   : > { %v7282_v61 = vsel %vm15046_vm10, %v7280_v44, %v7252_v38  ;;  %v8610_v4 = vpop.permute.xlu0 %8609  ;;  %vm15054_vm2 = vmmov %vm15052_vm1 }
 0x6b5   : > { %9105 = vmatprep.subr.msk.bf16.mxu0 %vm5113_vm5, %v7282_v61  ;;  %v8655_v14 = vsel %vm15050_vm12, %v8653_v37, %v8610_v4 }
 0x6b6   : > { %7293 = vmatpush1.bf16.msra.mxu0 %v7288_v43 }
 0x6b7   : > { %v8634_v36 = vpop.permute.xlu1 %8633  ;;  %9155 = vmatprep.subr.msk.bf16.mxu0 %vm5113_vm5, %v8198_v56  ;;  %v5200_v6 = vpop.f32.mrb[20].mxu0 }
 0x6b8   : > { %v5202_v31 = vpop.f32.mrb[21].mxu0  ;;  %v8614_v47 = vpop.permute.xlu0 %8613  ;;  %v8668_v9 = vsel %vm15051_vm14, %v14272_v40, %v8634_v36 }
 0x6b9   : > { %9106 = vmatmul.mubr.msk.bf16.vlgmr.msra.gmra.mrb[28].mxu0 %vm5109_vm7, %v9104_v49  ;;  %9131 = vmatmul.mubr.msk.bf16.vlgmr.msra.gmra.mrb[28].mxu1 %vm5109_vm7, %v9129_v15  ;;  %v5204_v19 = vpop.f32.mrb[22].mxu0  ;;  %v8657_v17 = vsel %vm15052_vm1, %v8655_v14, %v8614_v47 }
 0x6ba   : > { %8209 = vmatpush1.bf16.msra.mxu0 %v8204_v30  ;;  %8240 = vmatprep.mubr.bf16.mxu0 %v14829_v52  ;;  %v5205_v35 = vpop.f32.mrb[23].mxu0  ;;  %v8678_v58 = vsel %vm5113_vm5, %v8657_v17, 0 }
 0x6bb   : > { %v8638_v7 = vpop.permute.xlu1 %8637  ;;  %8714 = vmatprep.mubr.bf16.mxu1 %v14829_v52 }
 0x6bc   : > { %v8670_v53 = vsel %vm15053_vm13, %v8668_v9, %v8638_v7 }
 0x6bf   : > { %v8642_v26 = vpop.permute.xlu1 %8641 }
 0x6c0   : > { %v8672_v52 = vsel %vm15054_vm2, %v8670_v53, %v8642_v26 }
 0x6c1   : > { %9156 = vmatmul.mubr.msk.bf16.vlgmr.msra.gmra.mrb[32].mxu0 %vm5109_vm7, %v9154_v57  ;;  %9180 = vmatprep.subr.msk.bf16.mxu1 %vm5113_vm5, %v8672_v52 }
 0x6c2   : > { %8683 = vmatpush1.bf16.msra.mxu1 %v8678_v58 }
 0x6c5   : > { %9181 = vmatmul.mubr.msk.bf16.vlgmr.msra.gmra.mrb[32].mxu1 %vm5109_vm7, %v9179_v16 }
 0x6c9   : > { %v8729_v15 = vpop.permute.xlu0 %8728 }
 0x6f4   : > { %v6154_v40 = vpop.f32.mrb[24].mxu0 }
 0x6f5   : > { %v6156_v29 = vpop.f32.mrb[25].mxu0 }
 0x6f6   : > { %v6158_v12 = vpop.f32.mrb[26].mxu0 }
 0x6f7   : > { %v6159_v59 = vpop.f32.mrb[27].mxu0 }
 0x721   : > { %v5152_v2 = vpop.f32.mrb[16].mxu1 }
 0x722   : > { %v5154_v63 = vpop.f32.mrb[17].mxu1  ;;  %v5201_v54 = vadd.f32 %v5200_v6, %v5152_v2 }
 0x723   : > { %v5156_v42 = vpop.f32.mrb[18].mxu1  ;;  %v5203_v18 = vadd.f32 %v5202_v31, %v5154_v63 }
 0x724   : > { %v5157_v22 = vpop.f32.mrb[19].mxu1 }
 0x729   : > { %v5600_v20 = vpop.f32.mrb[20].mxu1 }
 0x72a   : > { %v5607_v62 = vadd.f32 %v5600_v20, %v5201_v54  ;;  %v5602_v46 = vpop.f32.mrb[21].mxu1 }
 0x72b   : > { %v5608_v32 = vadd.f32 %v5602_v46, %v5203_v18  ;;  %v5604_v33 = vpop.f32.mrb[22].mxu1 }
 0x72c   : > { %v6161_v51 = vadd.f32 %v6154_v40, %v5607_v62  ;;  %v5605_v60 = vpop.f32.mrb[23].mxu1 }
 0x72d   : > { %v6162_v10 = vadd.f32 %v6156_v29, %v5608_v32 }
 0x784   : > { %v6740_v50 = vpop.f32.mrb[24].mxu1 }
 0x785   : > { %v6747_v0 = vadd.f32 %v6740_v50, %v6161_v51  ;;  %v6742_v41 = vpop.f32.mrb[25].mxu1 }
 0x786   : > { %v6748_v24 = vadd.f32 %v6742_v41, %v6162_v10  ;;  %v6744_v39 = vpop.f32.mrb[26].mxu1 }
 0x787   : > { %v6745_v34 = vpop.f32.mrb[27].mxu1 }
 0x78c   : > { %v7326_v21 = vpop.f32.mrb[28].mxu0  ;;  %v7768_v3 = vpop.f32.mrb[28].mxu1 }
 0x78d   : > { %v7333_v11 = vadd.f32 %v7326_v21, %v6747_v0  ;;  %v7328_v28 = vpop.f32.mrb[29].mxu0  ;;  %v7770_v45 = vpop.f32.mrb[29].mxu1 }
 0x78e   : > { %v7334_v23 = vadd.f32 %v7328_v28, %v6748_v24  ;;  %v7330_v1 = vpop.f32.mrb[30].mxu0  ;;  %v7772_v55 = vpop.f32.mrb[30].mxu1 }
 0x78f   : > { %v7775_v48 = vadd.f32 %v7768_v3, %v7333_v11  ;;  %v7331_v27 = vpop.f32.mrb[31].mxu0  ;;  %v7773_v8 = vpop.f32.mrb[31].mxu1 }
 0x790   : > { %v7776_v5 = vadd.f32 %v7770_v45, %v7334_v23 }
 0x794   : > { %v8242_v13 = vpop.f32.mrb[32].mxu0 }
 0x795   : > { %v8249_v44 = vadd.f32 %v8242_v13, %v7775_v48  ;;  %v8244_v38 = vpop.f32.mrb[33].mxu0 }
 0x796   : > { %v8250_v61 = vadd.f32 %v8244_v38, %v7776_v5  ;;  %v8246_v4 = vpop.f32.mrb[34].mxu0 }
 0x797   : > { %v8247_v43 = vpop.f32.mrb[35].mxu0 }
 0x798   : > { %v8716_v25 = vpop.f32.mrb[32].mxu1 }
 0x799   : > { %v8723_v56 = vadd.f32 %v8716_v25, %v8249_v44  ;;  %v8718_v49 = vpop.f32.mrb[33].mxu1 }
 0x79a   : > { %v8724_v36 = vadd.f32 %v8718_v49, %v8250_v61  ;;  %v8720_v6 = vpop.f32.mrb[34].mxu1 }
 0x79b   : > { %v8731_v30 = vadd.f32 %v8729_v15, %v8723_v56  ;;  %v8721_v31 = vpop.f32.mrb[35].mxu1 }
 0x79c   : > { %v8732_v47 = vadd.f32 %v8729_v15, %v8724_v36 }
 0x79d   : > { %v8733_v19 = vmax.f32 %v8731_v30, 0.0 }
 0x79e   : > { %v8734_v7 = vmax.f32 %v8732_v47, 0.0 }
 0x79f   : > { %8735 = vst [vmem:[%s217_s17] sm:$0xff] %v8733_v19 }
 0x7a0   : > { %8736 = vst [vmem:[%s217_s17 + $0x8] sm:$0xff] %v8734_v7 }
 0x7a1   : > { %9339 = shalt.err (!%p9336_p3)
}
 0x7a2   : > { %s9340_s10 = scalar_lea.hbm %s14397_s7, 256  ;;  %s9344_s13 = scalar_lea.hbm %s14444_s5, 512 }
 0x7a3   : > { %p9341_p4 = scmp.ne.s32.totalorder %s14397_s7, %s9340_s10  ;;  %p9345_p9 = scmp.lt.u32.totalorder %s14397_s7, %s14444_s5 }
 0x7a4   : > { %p9346_p10 = scmp.lt.u32.totalorder %s9344_s13, %s9340_s10  ;;  %p9348_p12 = scmp.lt.u32.totalorder %s9340_s10, %s14397_s7 }
 0x7a5   : > { %p9342_p7 = pnand %p9341_p4, %p9472_p5 }
 0x7a6   : > { %p9347_p11 = por %p9346_p10, %p9345_p9 }
 0x7a7   : > { %p9343_p8 = pneg %p9342_p7 }
 0x7a8   : > { %p9349_p13 = por %p9348_p12, %p9347_p11 }
 0x7aa   : > { %p9350_p0 = pnand %p9349_p13, %p9343_p8 }
 0x7ac   : > { %9353 = shalt.err (!%p9350_p0)
}
 0x7ad   : > { %9269 = dma.vmem_to_hbm [thread:$0]  (%p9472_p5), %s14399_s23, 256, %s14397_s7, %s8738_s8  }
 0x7ae PF: > { %p9275_p1 = scmp.ge.s32.totalorder %s9388_s21, 2  ;;  %s8764_s15 = sand.u32 1, %s9376_s18  }
 0x7af   : > { %s8765_s17 = scalar_lea.sflag [#allocation5], %s8764_s15 }
 0x7b0   : > { %p9272_p2 = pnand %p9275_p1, %p9476_p6 }
 0x7b2   : > { %9371 = dma.done.wait (!%p9272_p2), %s8765_s17, 256  }
 0x7b3   : > { %9373 = vsyncadd (!%p9272_p2), %s8765_s17, 4294967040  ;;  %p15_p3 = scmp.ge.s32.totalorder %s9459_s24, 4   ;;  %s15055_s18 = smov %s9380_s19 }
 0x7b4   : > { %s15056_s19 = smov %s9384_s20  ;;  %s15057_s20 = smov %s9470_s27 }
 0x7b5   : > { %s15058_s21 = smov %s9459_s24  ;;  %17 = sbr.rel (!%p15_p3) target bundleno = 3 (0x3), region = 91 }
 0x7bc   :  { %8770 = vsyncpa [#allocation5], 1 }
 0x7bd   :  { %8772 = vsyncpa [#allocation5 + $0x1], 1 }

</bundles_post_ra>
